<compile_context>
chip_gen: v7x
topology: tpu7x:2x2x1
jax: 0.10.0
libtpu: 0.0.40
codegen_flags: <defaults>
</compile_context>

<pallas_src>
import math
from functools import partial

import jax
import jax.numpy as jnp
from jax import lax
from jax.experimental import pallas as pl
from jax.experimental.pallas import tpu as pltpu

# ----- module-consistent configuration --------------------------------------
FEATURE_NUM = 8       # F
SEQUENCE_LEN = 16     # L  (= d_model of the transformer encoder)
NHEAD = 4             # transformer_encoder_head_num (must divide L)
HIDDEN_DIM = 32       # H  (LSTM hidden size)
LSTM_LAYERS = 2       # lstm_num_layers (lstm_dropout identity in eval mode)
FC_DIM = 32           # fc_layer_dim
DIM_FF = 2048         # nn.TransformerEncoderLayer default dim_feedforward
BATCH = 8             # B
LN_EPS = 1e-5         # nn.LayerNorm default eps
FF_CHUNKS = 4         # DIM_FF processed in FF_CHUNKS chunks inside the kernel

# ----- coalesced small-parameter pack layout ---------------------------------
# Every small parameter lives at lane offset 0 inside a (rows, 128) f32 block, so in-kernel
# extraction is a static sublane slice + an offset-0 lane slice (no relayout).
_PACK_WIDTH = 128
_PACK_LAYOUT = (
    ('w_in',  SEQUENCE_LEN,              3 * SEQUENCE_LEN),   # (16, 48)  QKV proj (fused)
    ('b_in',  1,                         3 * SEQUENCE_LEN),
    ('w_o',   SEQUENCE_LEN,              SEQUENCE_LEN),       # (16, 16)  attn out proj
    ('b_o',   1,                         SEQUENCE_LEN),
    ('ln1_g', 1,                         SEQUENCE_LEN),
    ('ln1_b', 1,                         SEQUENCE_LEN),
    ('ln2_g', 1,                         SEQUENCE_LEN),
    ('ln2_b', 1,                         SEQUENCE_LEN),
    ('b_ff2', 1,                         SEQUENCE_LEN),
    ('wih0',  FEATURE_NUM,               4 * HIDDEN_DIM),     # (8, 128)  LSTM layer 0
    ('whh0',  HIDDEN_DIM,                4 * HIDDEN_DIM),     # (32, 128)
    ('b0',    1,                         4 * HIDDEN_DIM),
    ('w1',    2 * HIDDEN_DIM,            4 * HIDDEN_DIM),     # (64, 128) [wih1; whh1] stacked
    ('b1',    1,                         4 * HIDDEN_DIM),
    ('fc1_w', SEQUENCE_LEN + HIDDEN_DIM, FC_DIM),             # (48, 32)
    ('fc1_b', 1,                         FC_DIM),
    ('fc2_w', FC_DIM,                    1),
    ('fc2_b', 1,                         1),
)


def _build_pack_offsets():
    offs, row = {}, 0
    for name, nr, nc in _PACK_LAYOUT:
        offs[name] = (row, nr, nc)
        row += nr
    return offs, row


_PACK_OFFSETS, _PACK_ROWS = _build_pack_offsets()


def _vmem_specs(n):
    return [pl.BlockSpec(memory_space=pltpu.MemorySpace.VMEM) for _ in range(n)]


# ============================ fused kernel ===================================
def _fused_kernel(xt_ref, xf_ref, pk_ref, wff1b_ref, wff2_ref, out_ref,
                  *, F, B, L, H, nhead):
    hd = L // nhead
    scale = 1.0 / math.sqrt(hd)

    def getp(name):
        r0, nr, nc = _PACK_OFFSETS[name]
        return pk_ref[r0:r0 + nr, 0:nc]

    def layernorm(z, g, b):
        mu = jnp.mean(z, axis=-1, keepdims=True)
        var = jnp.mean((z - mu) ** 2, axis=-1, keepdims=True)
        return (z - mu) * lax.rsqrt(var + LN_EPS) * g + b

    # -------- transformer encoder layer (post-norm) + GAP --------------------
    x2d = xt_ref[...]                                        # (F*B, L), rows grouped by MHA-batch F

    # fused QKV projection: one (F*B, L) @ (L, 3L) matmul (tiny -> kept f32)
    qkv = jnp.dot(x2d, getp('w_in'), preferred_element_type=jnp.float32) + getp('b_in')
    q = qkv[:, 0:L] * scale
    k = qkv[:, L:2 * L]
    v = qkv[:, 2 * L:3 * L]

    ctx_heads = []
    for h in range(nhead):
        q3 = q[:, h * hd:(h + 1) * hd].reshape(F, B, hd)
        k3 = k[:, h * hd:(h + 1) * hd].reshape(F, B, hd)
        v3 = v[:, h * hd:(h + 1) * hd].reshape(F, B, hd)
        s = jnp.einsum('fbd,fcd->fbc', q3, k3, preferred_element_type=jnp.float32)
        s = s - jnp.max(s, axis=-1, keepdims=True)
        e = jnp.exp(s)
        pmat = e * pl.reciprocal(jnp.sum(e, axis=-1, keepdims=True), approx=True)
        o3 = jnp.einsum('fbc,fcd->fbd', pmat, v3, preferred_element_type=jnp.float32)
        ctx_heads.append(o3.reshape(F * B, hd))
    ctx = jnp.concatenate(ctx_heads, axis=1)                 # (F*B, L), head-major

    # fused output projection: one (F*B, L) @ (L, L) matmul
    attn = jnp.dot(ctx, getp('w_o'), preferred_element_type=jnp.float32) + getp('b_o')
    z = layernorm(x2d + attn, getp('ln1_g'), getp('ln1_b'))  # (F*B, L) f32

    # FFN: bf16 operands, f32 accumulation, DIM_FF processed in FF_CHUNKS chunks so the live
    # hdn intermediate stays small and FF1/FF2 MXU pushes interleave with the LSTM chain.
    ch = DIM_FF // FF_CHUNKS
    z_bf = z.astype(jnp.bfloat16)
    ff = jnp.zeros((F * B, L), jnp.float32)
    for c in range(FF_CHUNKS):
        lo = c * ch
        w1c = wff1b_ref[0:L, lo:lo + ch]                     # (L, ch)   bf16
        b1c = wff1b_ref[L:L + 1, lo:lo + ch]                 # (1, ch)   bf16
        hc = jnp.maximum(
            jnp.dot(z_bf, w1c, preferred_element_type=jnp.float32) + b1c.astype(jnp.float32),
            0.0)
        w2c = wff2_ref[lo:lo + ch, :]                        # (ch, L)   bf16
        ff = ff + jnp.dot(hc.astype(jnp.bfloat16), w2c, preferred_element_type=jnp.float32)
    ff = ff + getp('b_ff2')
    y = layernorm(z + ff, getp('ln2_g'), getp('ln2_b'))      # (F*B, L) f32

    # AdaptiveAvgPool1d(1) on (B, L, F) == mean over the F axis of y:(F, B, L)
    gap = jnp.mean(y.reshape(F, B, L), axis=0)               # (B, L)

    # -------- 2-layer LSTM, wavefronted, lstm-batch row L-1 only ---------------
    # time axis = B (dim 0 of x), lstm-batch = L, input size = F.  Only output[:, L-1, :]
    # is consumed downstream and LSTM cells are independent across the lstm-batch dim,
    # so only that row is computed.  PyTorch gate order (i, f, g, o); bias = b_ih + b_hh.
    x_rows = [xf_ref[(t + 1) * L - 1:(t + 1) * L, :] for t in range(B)]   # x[t, L-1, :]
    x_last = jnp.concatenate(x_rows, axis=0)                              # (B, F)

    wih0 = getp('wih0').astype(jnp.bfloat16)                 # (F, 4H)
    whh0 = getp('whh0').astype(jnp.bfloat16)                 # (H, 4H)
    b0 = getp('b0')                                          # (1, 4H) f32
    w1 = getp('w1').astype(jnp.bfloat16)                     # (2H, 4H) = [wih1; whh1]
    b1 = getp('b1')                                          # (1, 4H) f32

    # layer-0 input projection hoisted out of the recurrence: one (B, F) @ (F, 4H) matmul
    proj0 = jnp.dot(x_last.astype(jnp.bfloat16), wih0,
                    preferred_element_type=jnp.float32) + b0              # (B, 4H) f32

    def lstm_cell(pre, c_prev):
        # full-width activations (2 EUP pushes), then gate column slices
        sg = jax.nn.sigmoid(pre)
        th = jnp.tanh(pre)
        i_g = sg[:, 0:H]
        f_g = sg[:, H:2 * H]
        o_g = sg[:, 3 * H:4 * H]
        g_g = th[:, 2 * H:3 * H]
        c_new = f_g * c_prev + i_g * g_g
        return o_g * jnp.tanh(c_new), c_new

    h0 = jnp.zeros((1, H), jnp.float32)
    c0 = jnp.zeros((1, H), jnp.float32)
    h1 = jnp.zeros((1, H), jnp.float32)
    c1 = jnp.zeros((1, H), jnp.float32)
    outs = []
    # Wavefront: iteration s runs layer-0 at time s and layer-1 at time s-1.  The two cell
    # updates are independent (layer-1 uses the *previous* h0), so they co-issue; the serial
    # depth is B+1 cell updates instead of 2*B.
    for s in range(B + 1):
        nh0, nc0 = h0, c0
        if s < B:
            pre0 = proj0[s:s + 1, :]
            if s > 0:   # initial hidden state is zero -> skip the first recurrent matmul
                pre0 = pre0 + jnp.dot(h0.astype(jnp.bfloat16), whh0,
                                      preferred_element_type=jnp.float32)
            nh0, nc0 = lstm_cell(pre0, c0)
        if s >= 1:
            # layer-1 time step s-1: input = layer-0 output at time s-1 (current h0);
            # single fused (1, 2H) @ (2H, 4H) matmul for wih1 and whh1.
            inp1 = jnp.concatenate([h0, h1], axis=1).astype(jnp.bfloat16)
            pre1 = jnp.dot(inp1, w1, preferred_element_type=jnp.float32) + b1
            h1, c1 = lstm_cell(pre1, c1)
            outs.append(h1)
        h0, c0 = nh0, nc0
        # NOTE: inter-layer dropout (lstm_dropout) is identity in eval mode.
    x2 = jnp.concatenate(outs, axis=0)                       # (B, H)

    # -------- head: Linear -> ReLU -> [Dropout=id] -> Linear -> ReLU ----------
    zcat = jnp.concatenate([gap, x2], axis=1)                # (B, L+H)
    h1o = jnp.maximum(jnp.dot(zcat, getp('fc1_w'), preferred_element_type=jnp.float32)
                      + getp('fc1_b'), 0.0)
    o = jnp.dot(h1o, getp('fc2_w'), preferred_element_type=jnp.float32) + getp('fc2_b')
    out_ref[...] = jnp.maximum(o, 0.0)


# ============================ wrapper ========================================
def transformer_lstm_forward(x, p):
    B, L, F = x.shape
    # only remaining XLA glue: one tiny (4 KB) transpose for the encoder layout; the flat
    # reshape for the LSTM branch is metadata-only.
    xt2d = jnp.transpose(x, (2, 0, 1)).reshape(F * B, L)     # (F*B, L)
    xf = x.reshape(B * L, F)                                 # (B*L, F)

    args = [xt2d, xf, p['pack'], p['wff1b'], p['wff2']]
    out = pl.pallas_call(
        partial(_fused_kernel, F=F, B=B, L=L, H=HIDDEN_DIM, nhead=NHEAD),
        out_shape=jax.ShapeDtypeStruct((B, 1), jnp.float32),
        in_specs=_vmem_specs(len(args)),
        out_specs=pl.BlockSpec(memory_space=pltpu.MemorySpace.VMEM),
    )(*args)
    return out


# ----- deterministic synthetic parameters (PyTorch layouts) ------------------
def init_raw_params(key):
    F, L, H = FEATURE_NUM, SEQUENCE_LEN, HIDDEN_DIM
    keys = iter(jax.random.split(key, 64))

    def u(shape, scale=0.1):
        return jax.random.uniform(next(keys), shape, jnp.float32, -scale, scale)

    raw = {}
    # MultiheadAttention: in_proj_weight (3L, L), in_proj_bias (3L,), out_proj (L,L)+(L,)
    raw['in_proj_w'] = u((3 * L, L))
    raw['in_proj_b'] = u((3 * L,))
    raw['out_proj_w'] = u((L, L))
    raw['out_proj_b'] = u((L,))
    raw['ln1_w'] = 1.0 + u((L,), 0.05)
    raw['ln1_b'] = u((L,))
    raw['ln2_w'] = 1.0 + u((L,), 0.05)
    raw['ln2_b'] = u((L,))
    raw['lin1_w'] = u((DIM_FF, L), 0.05)
    raw['lin1_b'] = u((DIM_FF,), 0.05)
    raw['lin2_w'] = u((L, DIM_FF), 0.05)
    raw['lin2_b'] = u((L,), 0.05)
    for l in range(LSTM_LAYERS):
        in_size = F if l == 0 else H
        raw[f'w_ih_l{l}'] = u((4 * H, in_size))
        raw[f'w_hh_l{l}'] = u((4 * H, H))
        raw[f'b_ih_l{l}'] = u((4 * H,))
        raw[f'b_hh_l{l}'] = u((4 * H,))
    raw['fc1_w'] = u((FC_DIM, L + H))
    raw['fc1_b'] = u((FC_DIM,))
    raw['fc2_w'] = u((1, FC_DIM))
    raw['fc2_b'] = u((1,))
    return raw


def pack_params(raw):
    """Pre-transpose / fuse weights (row-major (in, out) per matmul) and coalesce all small
    parameters into one (rows, 128) f32 block + two bf16 FFN weight arrays."""
    mats = {
        'w_in':  raw['in_proj_w'].T,                               # (L, 3L) cols [q|k|v], head-major
        'b_in':  raw['in_proj_b'][None, :],
        'w_o':   raw['out_proj_w'].T,                              # (L, L)
        'b_o':   raw['out_proj_b'][None, :],
        'ln1_g': raw['ln1_w'][None, :],
        'ln1_b': raw['ln1_b'][None, :],
        'ln2_g': raw['ln2_w'][None, :],
        'ln2_b': raw['ln2_b'][None, :],
        'b_ff2': raw['lin2_b'][None, :],
        'wih0':  raw['w_ih_l0'].T,                                 # (F, 4H), gate order i,f,g,o
        'whh0':  raw['w_hh_l0'].T,                                 # (H, 4H)
        'b0':    (raw['b_ih_l0'] + raw['b_hh_l0'])[None, :],
        'w1':    jnp.concatenate([raw['w_ih_l1'].T, raw['w_hh_l1'].T], axis=0),   # (2H, 4H)
        'b1':    (raw['b_ih_l1'] + raw['b_hh_l1'])[None, :],
        'fc1_w': raw['fc1_w'].T,                                   # (L+H, FC)
        'fc1_b': raw['fc1_b'][None, :],
        'fc2_w': raw['fc2_w'].T,                                   # (FC, 1)
        'fc2_b': raw['fc2_b'][None, :],
    }
    pack = jnp.zeros((_PACK_ROWS, _PACK_WIDTH), jnp.float32)
    for name, (r0, nr, nc) in _PACK_OFFSETS.items():
        pack = pack.at[r0:r0 + nr, 0:nc].set(mats[name].astype(jnp.float32))
    # FF1 weight with its bias stacked as an extra row; FF2 weight — both pre-cast to bf16.
    wff1b = jnp.concatenate([raw['lin1_w'].T, raw['lin1_b'][None, :]], axis=0).astype(jnp.bfloat16)
    wff2 = raw['lin2_w'].T.astype(jnp.bfloat16)
    return {'pack': pack, 'wff1b': wff1b, 'wff2': wff2}


# ----- pure-JAX reference (independent math, raw PyTorch layouts, all f32) ----
def _ln(z, g, b):
    mu = jnp.mean(z, axis=-1, keepdims=True)
    var = jnp.mean((z - mu) ** 2, axis=-1, keepdims=True)
    return (z - mu) / jnp.sqrt(var + LN_EPS) * g + b


def reference_forward(x, raw):
    B, L, F = x.shape
    H, NH = HIDDEN_DIM, NHEAD
    hd = L // NH

    # encoder branch, (S=B, N=F, E=L)
    xp = jnp.transpose(x, (0, 2, 1))               # (B, F, L)
    wq, wk, wv = raw['in_proj_w'][:L], raw['in_proj_w'][L:2 * L], raw['in_proj_w'][2 * L:]
    bq, bk, bv = raw['in_proj_b'][:L], raw['in_proj_b'][L:2 * L], raw['in_proj_b'][2 * L:]
    q = (xp @ wq.T + bq).reshape(B, F, NH, hd)
    k = (xp @ wk.T + bk).reshape(B, F, NH, hd)
    v = (xp @ wv.T + bv).reshape(B, F, NH, hd)
    s = jnp.einsum('infd,jnfd->nfij', q, k) / math.sqrt(hd)
    a = jax.nn.softmax(s, axis=-1)
    o = jnp.einsum('nfij,jnfd->infd', a, v).reshape(B, F, L)
    attn = o @ raw['out_proj_w'].T + raw['out_proj_b']
    z = _ln(xp + attn, raw['ln1_w'], raw['ln1_b'])
    ff = jnp.maximum(z @ raw['lin1_w'].T + raw['lin1_b'], 0.0) @ raw['lin2_w'].T + raw['lin2_b']
    y = _ln(z + ff, raw['ln2_w'], raw['ln2_b'])    # (B, F, L)
    gap = jnp.mean(y, axis=1)                      # (B, L)

    # LSTM branch: time = B, lstm-batch = L
    inp = x
    for l in range(LSTM_LAYERS):
        wih, whh = raw[f'w_ih_l{l}'], raw[f'w_hh_l{l}']
        bih, bhh = raw[f'b_ih_l{l}'], raw[f'b_hh_l{l}']
        h_t = jnp.zeros((L, H), jnp.float32)
        c_t = jnp.zeros((L, H), jnp.float32)
        outs = []
        for t in range(B):
            g = inp[t] @ wih.T + bih + h_t @ whh.T + bhh
            ig = jax.nn.sigmoid(g[:, 0:H])
            fg = jax.nn.sigmoid(g[:, H:2 * H])
            gg = jnp.tanh(g[:, 2 * H:3 * H])
            og = jax.nn.sigmoid(g[:, 3 * H:4 * H])
            c_t = fg * c_t + ig * gg
            h_t = og * jnp.tanh(c_t)
            outs.append(h_t)
        inp = jnp.stack(outs, axis=0)
    x2 = inp[:, L - 1, :]

    zc = jnp.concatenate([gap, x2], axis=1)
    h1 = jnp.maximum(zc @ raw['fc1_w'].T + raw['fc1_b'], 0.0)
    return jnp.maximum(h1 @ raw['fc2_w'].T + raw['fc2_b'], 0.0)


if __name__ == "__main__":
    key = jax.random.PRNGKey(0)
    kx, kp = jax.random.split(key)
    x = jax.random.normal(kx, (BATCH, SEQUENCE_LEN, FEATURE_NUM), jnp.float32)
    raw_params = init_raw_params(kp)
    params = pack_params(raw_params)

    out = jax.jit(transformer_lstm_forward)(x, params)
    out = jax.block_until_ready(out)
    assert out.shape == (BATCH, 1), out.shape

    ref = reference_forward(x, raw_params)
    # bf16 matmul operands (f32 accumulation) + approx reciprocal in softmax -> slightly
    # looser tolerance than pure-f32; still catches any semantic mismatch.
    if not jnp.allclose(out, ref, atol=2e-2, rtol=2e-2):
        raise AssertionError(f"kernel/reference mismatch:\n{out}\nvs\n{ref}")

    print("KERNEL_OK")
</pallas_src>

<mosaic_0001>
module attributes {stable_mosaic.version = 11 : i64} {
  func.func @_fused_kernel(%arg0: memref<64x16xf32, #tpu.memory_space<vmem>>, %arg1: memref<128x8xf32, #tpu.memory_space<vmem>>, %arg2: memref<227x128xf32, #tpu.memory_space<vmem>>, %arg3: memref<17x2048xbf16, #tpu.memory_space<vmem>>, %arg4: memref<2048x16xbf16, #tpu.memory_space<vmem>>, %arg5: memref<8x1xf32, #tpu.memory_space<vmem>>) attributes {dimension_semantics = [], scalar_prefetch = 0 : i64, scratch_operands = 0 : i64, tpu.core_type = #tpu.core_type<tc>} {
    %c0 = arith.constant 0 : index
    %c0_0 = arith.constant 0 : index
    %0 = vector.load %arg0[%c0, %c0_0] : memref<64x16xf32, #tpu.memory_space<vmem>>, vector<64x16xf32>
    %c0_1 = arith.constant 0 : index
    %c0_2 = arith.constant 0 : index
    %1 = vector.load %arg2[%c0_1, %c0_2] : memref<227x128xf32, #tpu.memory_space<vmem>>, vector<16x48xf32>
    %cst = arith.constant dense<0.000000e+00> : vector<64x48xf32>
    %2 = tpu.matmul %0, %1, %cst {dimension_numbers = #tpu.dot_dimension_numbers<[1], [0], [0], [1], [0, 0, 1, 1], [], []>} : vector<64x16xf32>, vector<16x48xf32>, vector<64x48xf32> -> vector<64x48xf32>
    %c16 = arith.constant 16 : index
    %c0_3 = arith.constant 0 : index
    %3 = vector.load %arg2[%c16, %c0_3] : memref<227x128xf32, #tpu.memory_space<vmem>>, vector<1x48xf32>
    %4 = vector.broadcast %3 : vector<1x48xf32> to vector<64x48xf32>
    %5 = arith.addf %2, %4 : vector<64x48xf32>
    %6 = vector.extract_strided_slice %5 {offsets = [0, 0], sizes = [64, 16], strides = [1, 1]} : vector<64x48xf32> to vector<64x16xf32>
    %cst_4 = arith.constant 5.000000e-01 : f32
    %7 = vector.broadcast %cst_4 : f32 to vector<64x16xf32>
    %8 = arith.mulf %6, %7 : vector<64x16xf32>
    %9 = vector.extract_strided_slice %5 {offsets = [0, 16], sizes = [64, 16], strides = [1, 1]} : vector<64x48xf32> to vector<64x16xf32>
    %10 = vector.extract_strided_slice %5 {offsets = [0, 32], sizes = [64, 16], strides = [1, 1]} : vector<64x48xf32> to vector<64x16xf32>
    %11 = vector.extract_strided_slice %8 {offsets = [0, 0], sizes = [64, 4], strides = [1, 1]} : vector<64x16xf32> to vector<64x4xf32>
    %12 = vector.shape_cast %11 : vector<64x4xf32> to vector<8x8x4xf32>
    %13 = vector.extract_strided_slice %9 {offsets = [0, 0], sizes = [64, 4], strides = [1, 1]} : vector<64x16xf32> to vector<64x4xf32>
    %14 = vector.shape_cast %13 : vector<64x4xf32> to vector<8x8x4xf32>
    %15 = vector.extract_strided_slice %10 {offsets = [0, 0], sizes = [64, 4], strides = [1, 1]} : vector<64x16xf32> to vector<64x4xf32>
    %16 = vector.shape_cast %15 : vector<64x4xf32> to vector<8x8x4xf32>
    "tpu.trace_start"() <{level = 10 : i32, message = "fbd,fcd->fbc"}> : () -> ()
    %cst_5 = arith.constant dense<0.000000e+00> : vector<8x8x8xf32>
    %17 = tpu.matmul %12, %14, %cst_5 {dimension_numbers = #tpu.dot_dimension_numbers<[2], [2], [1], [1], [0, 0, 0, 1, 1, 1], [0], [0]>} : vector<8x8x4xf32>, vector<8x8x4xf32>, vector<8x8x8xf32> -> vector<8x8x8xf32>
    "tpu.trace_stop"() : () -> ()
    %cst_6 = arith.constant dense<0xFF800000> : vector<8x8xf32>
    %18 = vector.multi_reduction <maximumf>, %17, %cst_6 [2] : vector<8x8x8xf32> to vector<8x8xf32>
    %19 = vector.shape_cast %18 : vector<8x8xf32> to vector<8x8x1xf32>
    %20 = vector.broadcast %19 : vector<8x8x1xf32> to vector<8x8x8xf32>
    %21 = arith.subf %17, %20 : vector<8x8x8xf32>
    %22 = math.exp %21 : vector<8x8x8xf32>
    %cst_7 = arith.constant dense<0.000000e+00> : vector<8x8xf32>
    %23 = vector.multi_reduction <add>, %22, %cst_7 [2] : vector<8x8x8xf32> to vector<8x8xf32>
    %24 = vector.shape_cast %23 : vector<8x8xf32> to vector<8x8x1xf32>
    %25 = tpu.reciprocal %24 {approx = true} : vector<8x8x1xf32> -> vector<8x8x1xf32>
    %26 = vector.broadcast %25 : vector<8x8x1xf32> to vector<8x8x8xf32>
    %27 = arith.mulf %22, %26 : vector<8x8x8xf32>
    "tpu.trace_start"() <{level = 10 : i32, message = "fbc,fcd->fbd"}> : () -> ()
    %cst_8 = arith.constant dense<0.000000e+00> : vector<8x8x4xf32>
    %28 = tpu.matmul %27, %16, %cst_8 {dimension_numbers = #tpu.dot_dimension_numbers<[2], [1], [1], [2], [0, 0, 0, 1, 1, 2], [0], [0]>} : vector<8x8x8xf32>, vector<8x8x4xf32>, vector<8x8x4xf32> -> vector<8x8x4xf32>
    "tpu.trace_stop"() : () -> ()
    %29 = vector.shape_cast %28 : vector<8x8x4xf32> to vector<64x4xf32>
    %30 = vector.extract_strided_slice %8 {offsets = [0, 4], sizes = [64, 4], strides = [1, 1]} : vector<64x16xf32> to vector<64x4xf32>
    %31 = vector.shape_cast %30 : vector<64x4xf32> to vector<8x8x4xf32>
    %32 = vector.extract_strided_slice %9 {offsets = [0, 4], sizes = [64, 4], strides = [1, 1]} : vector<64x16xf32> to vector<64x4xf32>
    %33 = vector.shape_cast %32 : vector<64x4xf32> to vector<8x8x4xf32>
    %34 = vector.extract_strided_slice %10 {offsets = [0, 4], sizes = [64, 4], strides = [1, 1]} : vector<64x16xf32> to vector<64x4xf32>
    %35 = vector.shape_cast %34 : vector<64x4xf32> to vector<8x8x4xf32>
    "tpu.trace_start"() <{level = 10 : i32, message = "fbd,fcd->fbc"}> : () -> ()
    %cst_9 = arith.constant dense<0.000000e+00> : vector<8x8x8xf32>
    %36 = tpu.matmul %31, %33, %cst_9 {dimension_numbers = #tpu.dot_dimension_numbers<[2], [2], [1], [1], [0, 0, 0, 1, 1, 1], [0], [0]>} : vector<8x8x4xf32>, vector<8x8x4xf32>, vector<8x8x8xf32> -> vector<8x8x8xf32>
    "tpu.trace_stop"() : () -> ()
    %cst_10 = arith.constant dense<0xFF800000> : vector<8x8xf32>
    %37 = vector.multi_reduction <maximumf>, %36, %cst_10 [2] : vector<8x8x8xf32> to vector<8x8xf32>
    %38 = vector.shape_cast %37 : vector<8x8xf32> to vector<8x8x1xf32>
    %39 = vector.broadcast %38 : vector<8x8x1xf32> to vector<8x8x8xf32>
    %40 = arith.subf %36, %39 : vector<8x8x8xf32>
    %41 = math.exp %40 : vector<8x8x8xf32>
    %cst_11 = arith.constant dense<0.000000e+00> : vector<8x8xf32>
    %42 = vector.multi_reduction <add>, %41, %cst_11 [2] : vector<8x8x8xf32> to vector<8x8xf32>
    %43 = vector.shape_cast %42 : vector<8x8xf32> to vector<8x8x1xf32>
    %44 = tpu.reciprocal %43 {approx = true} : vector<8x8x1xf32> -> vector<8x8x1xf32>
    %45 = vector.broadcast %44 : vector<8x8x1xf32> to vector<8x8x8xf32>
    %46 = arith.mulf %41, %45 : vector<8x8x8xf32>
    "tpu.trace_start"() <{level = 10 : i32, message = "fbc,fcd->fbd"}> : () -> ()
    %cst_12 = arith.constant dense<0.000000e+00> : vector<8x8x4xf32>
    %47 = tpu.matmul %46, %35, %cst_12 {dimension_numbers = #tpu.dot_dimension_numbers<[2], [1], [1], [2], [0, 0, 0, 1, 1, 2], [0], [0]>} : vector<8x8x8xf32>, vector<8x8x4xf32>, vector<8x8x4xf32> -> vector<8x8x4xf32>
    "tpu.trace_stop"() : () -> ()
    %48 = vector.shape_cast %47 : vector<8x8x4xf32> to vector<64x4xf32>
    %49 = vector.extract_strided_slice %8 {offsets = [0, 8], sizes = [64, 4], strides = [1, 1]} : vector<64x16xf32> to vector<64x4xf32>
    %50 = vector.shape_cast %49 : vector<64x4xf32> to vector<8x8x4xf32>
    %51 = vector.extract_strided_slice %9 {offsets = [0, 8], sizes = [64, 4], strides = [1, 1]} : vector<64x16xf32> to vector<64x4xf32>
    %52 = vector.shape_cast %51 : vector<64x4xf32> to vector<8x8x4xf32>
    %53 = vector.extract_strided_slice %10 {offsets = [0, 8], sizes = [64, 4], strides = [1, 1]} : vector<64x16xf32> to vector<64x4xf32>
    %54 = vector.shape_cast %53 : vector<64x4xf32> to vector<8x8x4xf32>
    "tpu.trace_start"() <{level = 10 : i32, message = "fbd,fcd->fbc"}> : () -> ()
    %cst_13 = arith.constant dense<0.000000e+00> : vector<8x8x8xf32>
    %55 = tpu.matmul %50, %52, %cst_13 {dimension_numbers = #tpu.dot_dimension_numbers<[2], [2], [1], [1], [0, 0, 0, 1, 1, 1], [0], [0]>} : vector<8x8x4xf32>, vector<8x8x4xf32>, vector<8x8x8xf32> -> vector<8x8x8xf32>
    "tpu.trace_stop"() : () -> ()
    %cst_14 = arith.constant dense<0xFF800000> : vector<8x8xf32>
    %56 = vector.multi_reduction <maximumf>, %55, %cst_14 [2] : vector<8x8x8xf32> to vector<8x8xf32>
    %57 = vector.shape_cast %56 : vector<8x8xf32> to vector<8x8x1xf32>
    %58 = vector.broadcast %57 : vector<8x8x1xf32> to vector<8x8x8xf32>
    %59 = arith.subf %55, %58 : vector<8x8x8xf32>
    %60 = math.exp %59 : vector<8x8x8xf32>
    %cst_15 = arith.constant dense<0.000000e+00> : vector<8x8xf32>
    %61 = vector.multi_reduction <add>, %60, %cst_15 [2] : vector<8x8x8xf32> to vector<8x8xf32>
    %62 = vector.shape_cast %61 : vector<8x8xf32> to vector<8x8x1xf32>
    %63 = tpu.reciprocal %62 {approx = true} : vector<8x8x1xf32> -> vector<8x8x1xf32>
    %64 = vector.broadcast %63 : vector<8x8x1xf32> to vector<8x8x8xf32>
    %65 = arith.mulf %60, %64 : vector<8x8x8xf32>
    "tpu.trace_start"() <{level = 10 : i32, message = "fbc,fcd->fbd"}> : () -> ()
    %cst_16 = arith.constant dense<0.000000e+00> : vector<8x8x4xf32>
    %66 = tpu.matmul %65, %54, %cst_16 {dimension_numbers = #tpu.dot_dimension_numbers<[2], [1], [1], [2], [0, 0, 0, 1, 1, 2], [0], [0]>} : vector<8x8x8xf32>, vector<8x8x4xf32>, vector<8x8x4xf32> -> vector<8x8x4xf32>
    "tpu.trace_stop"() : () -> ()
    %67 = vector.shape_cast %66 : vector<8x8x4xf32> to vector<64x4xf32>
    %68 = vector.extract_strided_slice %8 {offsets = [0, 12], sizes = [64, 4], strides = [1, 1]} : vector<64x16xf32> to vector<64x4xf32>
    %69 = vector.shape_cast %68 : vector<64x4xf32> to vector<8x8x4xf32>
    %70 = vector.extract_strided_slice %9 {offsets = [0, 12], sizes = [64, 4], strides = [1, 1]} : vector<64x16xf32> to vector<64x4xf32>
    %71 = vector.shape_cast %70 : vector<64x4xf32> to vector<8x8x4xf32>
    %72 = vector.extract_strided_slice %10 {offsets = [0, 12], sizes = [64, 4], strides = [1, 1]} : vector<64x16xf32> to vector<64x4xf32>
    %73 = vector.shape_cast %72 : vector<64x4xf32> to vector<8x8x4xf32>
    "tpu.trace_start"() <{level = 10 : i32, message = "fbd,fcd->fbc"}> : () -> ()
    %cst_17 = arith.constant dense<0.000000e+00> : vector<8x8x8xf32>
    %74 = tpu.matmul %69, %71, %cst_17 {dimension_numbers = #tpu.dot_dimension_numbers<[2], [2], [1], [1], [0, 0, 0, 1, 1, 1], [0], [0]>} : vector<8x8x4xf32>, vector<8x8x4xf32>, vector<8x8x8xf32> -> vector<8x8x8xf32>
    "tpu.trace_stop"() : () -> ()
    %cst_18 = arith.constant dense<0xFF800000> : vector<8x8xf32>
    %75 = vector.multi_reduction <maximumf>, %74, %cst_18 [2] : vector<8x8x8xf32> to vector<8x8xf32>
    %76 = vector.shape_cast %75 : vector<8x8xf32> to vector<8x8x1xf32>
    %77 = vector.broadcast %76 : vector<8x8x1xf32> to vector<8x8x8xf32>
    %78 = arith.subf %74, %77 : vector<8x8x8xf32>
    %79 = math.exp %78 : vector<8x8x8xf32>
    %cst_19 = arith.constant dense<0.000000e+00> : vector<8x8xf32>
    %80 = vector.multi_reduction <add>, %79, %cst_19 [2] : vector<8x8x8xf32> to vector<8x8xf32>
    %81 = vector.shape_cast %80 : vector<8x8xf32> to vector<8x8x1xf32>
    %82 = tpu.reciprocal %81 {approx = true} : vector<8x8x1xf32> -> vector<8x8x1xf32>
    %83 = vector.broadcast %82 : vector<8x8x1xf32> to vector<8x8x8xf32>
    %84 = arith.mulf %79, %83 : vector<8x8x8xf32>
    "tpu.trace_start"() <{level = 10 : i32, message = "fbc,fcd->fbd"}> : () -> ()
    %cst_20 = arith.constant dense<0.000000e+00> : vector<8x8x4xf32>
    %85 = tpu.matmul %84, %73, %cst_20 {dimension_numbers = #tpu.dot_dimension_numbers<[2], [1], [1], [2], [0, 0, 0, 1, 1, 2], [0], [0]>} : vector<8x8x8xf32>, vector<8x8x4xf32>, vector<8x8x4xf32> -> vector<8x8x4xf32>
    "tpu.trace_stop"() : () -> ()
    %86 = vector.shape_cast %85 : vector<8x8x4xf32> to vector<64x4xf32>
    %87 = tpu.concatenate %29, %48, %67, %86 in 1 : vector<64x4xf32>, vector<64x4xf32>, vector<64x4xf32>, vector<64x4xf32> -> vector<64x16xf32>
    %c17 = arith.constant 17 : index
    %c0_21 = arith.constant 0 : index
    %88 = vector.load %arg2[%c17, %c0_21] : memref<227x128xf32, #tpu.memory_space<vmem>>, vector<16x16xf32>
    %cst_22 = arith.constant dense<0.000000e+00> : vector<64x16xf32>
    %89 = tpu.matmul %87, %88, %cst_22 {dimension_numbers = #tpu.dot_dimension_numbers<[1], [0], [0], [1], [0, 0, 1, 1], [], []>} : vector<64x16xf32>, vector<16x16xf32>, vector<64x16xf32> -> vector<64x16xf32>
    %c33 = arith.constant 33 : index
    %c0_23 = arith.constant 0 : index
    %90 = vector.load %arg2[%c33, %c0_23] : memref<227x128xf32, #tpu.memory_space<vmem>>, vector<1x16xf32>
    %91 = vector.broadcast %90 : vector<1x16xf32> to vector<64x16xf32>
    %92 = arith.addf %89, %91 : vector<64x16xf32>
    %93 = arith.addf %0, %92 : vector<64x16xf32>
    %c34 = arith.constant 34 : index
    %c0_24 = arith.constant 0 : index
    %94 = vector.load %arg2[%c34, %c0_24] : memref<227x128xf32, #tpu.memory_space<vmem>>, vector<1x16xf32>
    %c35 = arith.constant 35 : index
    %c0_25 = arith.constant 0 : index
    %95 = vector.load %arg2[%c35, %c0_25] : memref<227x128xf32, #tpu.memory_space<vmem>>, vector<1x16xf32>
    %cst_26 = arith.constant dense<0.000000e+00> : vector<64xf32>
    %96 = vector.multi_reduction <add>, %93, %cst_26 [1] : vector<64x16xf32> to vector<64xf32>
    %97 = vector.shape_cast %96 : vector<64xf32> to vector<64x1xf32>
    %cst_27 = arith.constant 1.600000e+01 : f32
    %98 = vector.broadcast %cst_27 : f32 to vector<64x1xf32>
    %99 = arith.divf %97, %98 : vector<64x1xf32>
    %100 = vector.broadcast %99 : vector<64x1xf32> to vector<64x16xf32>
    %101 = arith.subf %93, %100 : vector<64x16xf32>
    %102 = arith.mulf %101, %101 : vector<64x16xf32>
    %cst_28 = arith.constant dense<0.000000e+00> : vector<64xf32>
    %103 = vector.multi_reduction <add>, %102, %cst_28 [1] : vector<64x16xf32> to vector<64xf32>
    %104 = vector.shape_cast %103 : vector<64xf32> to vector<64x1xf32>
    %cst_29 = arith.constant 1.600000e+01 : f32
    %105 = vector.broadcast %cst_29 : f32 to vector<64x1xf32>
    %106 = arith.divf %104, %105 : vector<64x1xf32>
    %107 = vector.broadcast %99 : vector<64x1xf32> to vector<64x16xf32>
    %108 = arith.subf %93, %107 : vector<64x16xf32>
    %cst_30 = arith.constant 9.99999974E-6 : f32
    %109 = vector.broadcast %cst_30 : f32 to vector<64x1xf32>
    %110 = arith.addf %106, %109 : vector<64x1xf32>
    %111 = math.rsqrt %110 : vector<64x1xf32>
    %112 = vector.broadcast %111 : vector<64x1xf32> to vector<64x16xf32>
    %113 = arith.mulf %108, %112 : vector<64x16xf32>
    %114 = vector.broadcast %94 : vector<1x16xf32> to vector<64x16xf32>
    %115 = arith.mulf %113, %114 : vector<64x16xf32>
    %116 = vector.broadcast %95 : vector<1x16xf32> to vector<64x16xf32>
    %117 = arith.addf %115, %116 : vector<64x16xf32>
    %118 = arith.truncf %117 : vector<64x16xf32> to vector<64x16xbf16>
    %cst_31 = arith.constant 0.000000e+00 : f32
    %119 = vector.broadcast %cst_31 : f32 to vector<64x16xf32>
    %c0_32 = arith.constant 0 : index
    %c0_33 = arith.constant 0 : index
    %120 = vector.load %arg3[%c0_32, %c0_33] : memref<17x2048xbf16, #tpu.memory_space<vmem>>, vector<16x512xbf16>
    %c16_34 = arith.constant 16 : index
    %c0_35 = arith.constant 0 : index
    %121 = vector.load %arg3[%c16_34, %c0_35] : memref<17x2048xbf16, #tpu.memory_space<vmem>>, vector<1x512xbf16>
    %cst_36 = arith.constant dense<0.000000e+00> : vector<64x512xf32>
    %122 = tpu.matmul %118, %120, %cst_36 {dimension_numbers = #tpu.dot_dimension_numbers<[1], [0], [0], [1], [0, 0, 1, 1], [], []>} : vector<64x16xbf16>, vector<16x512xbf16>, vector<64x512xf32> -> vector<64x512xf32>
    %123 = arith.extf %121 : vector<1x512xbf16> to vector<1x512xf32>
    %124 = vector.broadcast %123 : vector<1x512xf32> to vector<64x512xf32>
    %125 = arith.addf %122, %124 : vector<64x512xf32>
    %cst_37 = arith.constant 0.000000e+00 : f32
    %126 = vector.broadcast %cst_37 : f32 to vector<64x512xf32>
    %127 = arith.maximumf %125, %126 : vector<64x512xf32>
    %c0_38 = arith.constant 0 : index
    %c0_39 = arith.constant 0 : index
    %128 = vector.load %arg4[%c0_38, %c0_39] : memref<2048x16xbf16, #tpu.memory_space<vmem>>, vector<512x16xbf16>
    %129 = arith.truncf %127 : vector<64x512xf32> to vector<64x512xbf16>
    %cst_40 = arith.constant dense<0.000000e+00> : vector<64x16xf32>
    %130 = tpu.matmul %129, %128, %cst_40 {dimension_numbers = #tpu.dot_dimension_numbers<[1], [0], [0], [1], [0, 0, 1, 1], [], []>} : vector<64x512xbf16>, vector<512x16xbf16>, vector<64x16xf32> -> vector<64x16xf32>
    %131 = arith.addf %119, %130 : vector<64x16xf32>
    %c0_41 = arith.constant 0 : index
    %c512 = arith.constant 512 : index
    %132 = vector.load %arg3[%c0_41, %c512] : memref<17x2048xbf16, #tpu.memory_space<vmem>>, vector<16x512xbf16>
    %c16_42 = arith.constant 16 : index
    %c512_43 = arith.constant 512 : index
    %133 = vector.load %arg3[%c16_42, %c512_43] : memref<17x2048xbf16, #tpu.memory_space<vmem>>, vector<1x512xbf16>
    %cst_44 = arith.constant dense<0.000000e+00> : vector<64x512xf32>
    %134 = tpu.matmul %118, %132, %cst_44 {dimension_numbers = #tpu.dot_dimension_numbers<[1], [0], [0], [1], [0, 0, 1, 1], [], []>} : vector<64x16xbf16>, vector<16x512xbf16>, vector<64x512xf32> -> vector<64x512xf32>
    %135 = arith.extf %133 : vector<1x512xbf16> to vector<1x512xf32>
    %136 = vector.broadcast %135 : vector<1x512xf32> to vector<64x512xf32>
    %137 = arith.addf %134, %136 : vector<64x512xf32>
    %cst_45 = arith.constant 0.000000e+00 : f32
    %138 = vector.broadcast %cst_45 : f32 to vector<64x512xf32>
    %139 = arith.maximumf %137, %138 : vector<64x512xf32>
    %c512_46 = arith.constant 512 : index
    %c0_47 = arith.constant 0 : index
    %140 = vector.load %arg4[%c512_46, %c0_47] : memref<2048x16xbf16, #tpu.memory_space<vmem>>, vector<512x16xbf16>
    %141 = arith.truncf %139 : vector<64x512xf32> to vector<64x512xbf16>
    %cst_48 = arith.constant dense<0.000000e+00> : vector<64x16xf32>
    %142 = tpu.matmul %141, %140, %cst_48 {dimension_numbers = #tpu.dot_dimension_numbers<[1], [0], [0], [1], [0, 0, 1, 1], [], []>} : vector<64x512xbf16>, vector<512x16xbf16>, vector<64x16xf32> -> vector<64x16xf32>
    %143 = arith.addf %131, %142 : vector<64x16xf32>
    %c0_49 = arith.constant 0 : index
    %c1024 = arith.constant 1024 : index
    %144 = vector.load %arg3[%c0_49, %c1024] : memref<17x2048xbf16, #tpu.memory_space<vmem>>, vector<16x512xbf16>
    %c16_50 = arith.constant 16 : index
    %c1024_51 = arith.constant 1024 : index
    %145 = vector.load %arg3[%c16_50, %c1024_51] : memref<17x2048xbf16, #tpu.memory_space<vmem>>, vector<1x512xbf16>
    %cst_52 = arith.constant dense<0.000000e+00> : vector<64x512xf32>
    %146 = tpu.matmul %118, %144, %cst_52 {dimension_numbers = #tpu.dot_dimension_numbers<[1], [0], [0], [1], [0, 0, 1, 1], [], []>} : vector<64x16xbf16>, vector<16x512xbf16>, vector<64x512xf32> -> vector<64x512xf32>
    %147 = arith.extf %145 : vector<1x512xbf16> to vector<1x512xf32>
    %148 = vector.broadcast %147 : vector<1x512xf32> to vector<64x512xf32>
    %149 = arith.addf %146, %148 : vector<64x512xf32>
    %cst_53 = arith.constant 0.000000e+00 : f32
    %150 = vector.broadcast %cst_53 : f32 to vector<64x512xf32>
    %151 = arith.maximumf %149, %150 : vector<64x512xf32>
    %c1024_54 = arith.constant 1024 : index
    %c0_55 = arith.constant 0 : index
    %152 = vector.load %arg4[%c1024_54, %c0_55] : memref<2048x16xbf16, #tpu.memory_space<vmem>>, vector<512x16xbf16>
    %153 = arith.truncf %151 : vector<64x512xf32> to vector<64x512xbf16>
    %cst_56 = arith.constant dense<0.000000e+00> : vector<64x16xf32>
    %154 = tpu.matmul %153, %152, %cst_56 {dimension_numbers = #tpu.dot_dimension_numbers<[1], [0], [0], [1], [0, 0, 1, 1], [], []>} : vector<64x512xbf16>, vector<512x16xbf16>, vector<64x16xf32> -> vector<64x16xf32>
    %155 = arith.addf %143, %154 : vector<64x16xf32>
    %c0_57 = arith.constant 0 : index
    %c1536 = arith.constant 1536 : index
    %156 = vector.load %arg3[%c0_57, %c1536] : memref<17x2048xbf16, #tpu.memory_space<vmem>>, vector<16x512xbf16>
    %c16_58 = arith.constant 16 : index
    %c1536_59 = arith.constant 1536 : index
    %157 = vector.load %arg3[%c16_58, %c1536_59] : memref<17x2048xbf16, #tpu.memory_space<vmem>>, vector<1x512xbf16>
    %cst_60 = arith.constant dense<0.000000e+00> : vector<64x512xf32>
    %158 = tpu.matmul %118, %156, %cst_60 {dimension_numbers = #tpu.dot_dimension_numbers<[1], [0], [0], [1], [0, 0, 1, 1], [], []>} : vector<64x16xbf16>, vector<16x512xbf16>, vector<64x512xf32> -> vector<64x512xf32>
    %159 = arith.extf %157 : vector<1x512xbf16> to vector<1x512xf32>
    %160 = vector.broadcast %159 : vector<1x512xf32> to vector<64x512xf32>
    %161 = arith.addf %158, %160 : vector<64x512xf32>
    %cst_61 = arith.constant 0.000000e+00 : f32
    %162 = vector.broadcast %cst_61 : f32 to vector<64x512xf32>
    %163 = arith.maximumf %161, %162 : vector<64x512xf32>
    %c1536_62 = arith.constant 1536 : index
    %c0_63 = arith.constant 0 : index
    %164 = vector.load %arg4[%c1536_62, %c0_63] : memref<2048x16xbf16, #tpu.memory_space<vmem>>, vector<512x16xbf16>
    %165 = arith.truncf %163 : vector<64x512xf32> to vector<64x512xbf16>
    %cst_64 = arith.constant dense<0.000000e+00> : vector<64x16xf32>
    %166 = tpu.matmul %165, %164, %cst_64 {dimension_numbers = #tpu.dot_dimension_numbers<[1], [0], [0], [1], [0, 0, 1, 1], [], []>} : vector<64x512xbf16>, vector<512x16xbf16>, vector<64x16xf32> -> vector<64x16xf32>
    %167 = arith.addf %155, %166 : vector<64x16xf32>
    %c38 = arith.constant 38 : index
    %c0_65 = arith.constant 0 : index
    %168 = vector.load %arg2[%c38, %c0_65] : memref<227x128xf32, #tpu.memory_space<vmem>>, vector<1x16xf32>
    %169 = vector.broadcast %168 : vector<1x16xf32> to vector<64x16xf32>
    %170 = arith.addf %167, %169 : vector<64x16xf32>
    %171 = arith.addf %117, %170 : vector<64x16xf32>
    %c36 = arith.constant 36 : index
    %c0_66 = arith.constant 0 : index
    %172 = vector.load %arg2[%c36, %c0_66] : memref<227x128xf32, #tpu.memory_space<vmem>>, vector<1x16xf32>
    %c37 = arith.constant 37 : index
    %c0_67 = arith.constant 0 : index
    %173 = vector.load %arg2[%c37, %c0_67] : memref<227x128xf32, #tpu.memory_space<vmem>>, vector<1x16xf32>
    %cst_68 = arith.constant dense<0.000000e+00> : vector<64xf32>
    %174 = vector.multi_reduction <add>, %171, %cst_68 [1] : vector<64x16xf32> to vector<64xf32>
    %175 = vector.shape_cast %174 : vector<64xf32> to vector<64x1xf32>
    %cst_69 = arith.constant 1.600000e+01 : f32
    %176 = vector.broadcast %cst_69 : f32 to vector<64x1xf32>
    %177 = arith.divf %175, %176 : vector<64x1xf32>
    %178 = vector.broadcast %177 : vector<64x1xf32> to vector<64x16xf32>
    %179 = arith.subf %171, %178 : vector<64x16xf32>
    %180 = arith.mulf %179, %179 : vector<64x16xf32>
    %cst_70 = arith.constant dense<0.000000e+00> : vector<64xf32>
    %181 = vector.multi_reduction <add>, %180, %cst_70 [1] : vector<64x16xf32> to vector<64xf32>
    %182 = vector.shape_cast %181 : vector<64xf32> to vector<64x1xf32>
    %cst_71 = arith.constant 1.600000e+01 : f32
    %183 = vector.broadcast %cst_71 : f32 to vector<64x1xf32>
    %184 = arith.divf %182, %183 : vector<64x1xf32>
    %185 = vector.broadcast %177 : vector<64x1xf32> to vector<64x16xf32>
    %186 = arith.subf %171, %185 : vector<64x16xf32>
    %cst_72 = arith.constant 9.99999974E-6 : f32
    %187 = vector.broadcast %cst_72 : f32 to vector<64x1xf32>
    %188 = arith.addf %184, %187 : vector<64x1xf32>
    %189 = math.rsqrt %188 : vector<64x1xf32>
    %190 = vector.broadcast %189 : vector<64x1xf32> to vector<64x16xf32>
    %191 = arith.mulf %186, %190 : vector<64x16xf32>
    %192 = vector.broadcast %172 : vector<1x16xf32> to vector<64x16xf32>
    %193 = arith.mulf %191, %192 : vector<64x16xf32>
    %194 = vector.broadcast %173 : vector<1x16xf32> to vector<64x16xf32>
    %195 = arith.addf %193, %194 : vector<64x16xf32>
    %196 = vector.shape_cast %195 : vector<64x16xf32> to vector<8x8x16xf32>
    %cst_73 = arith.constant dense<0.000000e+00> : vector<8x16xf32>
    %197 = vector.multi_reduction <add>, %196, %cst_73 [0] : vector<8x8x16xf32> to vector<8x16xf32>
    %cst_74 = arith.constant 8.000000e+00 : f32
    %198 = vector.broadcast %cst_74 : f32 to vector<8x16xf32>
    %199 = arith.divf %197, %198 : vector<8x16xf32>
    %c15 = arith.constant 15 : index
    %c0_75 = arith.constant 0 : index
    %200 = vector.load %arg1[%c15, %c0_75] : memref<128x8xf32, #tpu.memory_space<vmem>>, vector<1x8xf32>
    %c31 = arith.constant 31 : index
    %c0_76 = arith.constant 0 : index
    %201 = vector.load %arg1[%c31, %c0_76] : memref<128x8xf32, #tpu.memory_space<vmem>>, vector<1x8xf32>
    %c47 = arith.constant 47 : index
    %c0_77 = arith.constant 0 : index
    %202 = vector.load %arg1[%c47, %c0_77] : memref<128x8xf32, #tpu.memory_space<vmem>>, vector<1x8xf32>
    %c63 = arith.constant 63 : index
    %c0_78 = arith.constant 0 : index
    %203 = vector.load %arg1[%c63, %c0_78] : memref<128x8xf32, #tpu.memory_space<vmem>>, vector<1x8xf32>
    %c79 = arith.constant 79 : index
    %c0_79 = arith.constant 0 : index
    %204 = vector.load %arg1[%c79, %c0_79] : memref<128x8xf32, #tpu.memory_space<vmem>>, vector<1x8xf32>
    %c95 = arith.constant 95 : index
    %c0_80 = arith.constant 0 : index
    %205 = vector.load %arg1[%c95, %c0_80] : memref<128x8xf32, #tpu.memory_space<vmem>>, vector<1x8xf32>
    %c111 = arith.constant 111 : index
    %c0_81 = arith.constant 0 : index
    %206 = vector.load %arg1[%c111, %c0_81] : memref<128x8xf32, #tpu.memory_space<vmem>>, vector<1x8xf32>
    %c127 = arith.constant 127 : index
    %c0_82 = arith.constant 0 : index
    %207 = vector.load %arg1[%c127, %c0_82] : memref<128x8xf32, #tpu.memory_space<vmem>>, vector<1x8xf32>
    %208 = tpu.concatenate %200, %201, %202, %203, %204, %205, %206, %207 in 0 : vector<1x8xf32>, vector<1x8xf32>, vector<1x8xf32>, vector<1x8xf32>, vector<1x8xf32>, vector<1x8xf32>, vector<1x8xf32>, vector<1x8xf32> -> vector<8x8xf32>
    %c39 = arith.constant 39 : index
    %c0_83 = arith.constant 0 : index
    %209 = vector.load %arg2[%c39, %c0_83] : memref<227x128xf32, #tpu.memory_space<vmem>>, vector<8x128xf32>
    %210 = arith.truncf %209 : vector<8x128xf32> to vector<8x128xbf16>
    %c47_84 = arith.constant 47 : index
    %c0_85 = arith.constant 0 : index
    %211 = vector.load %arg2[%c47_84, %c0_85] : memref<227x128xf32, #tpu.memory_space<vmem>>, vector<32x128xf32>
    %212 = arith.truncf %211 : vector<32x128xf32> to vector<32x128xbf16>
    %c79_86 = arith.constant 79 : index
    %c0_87 = arith.constant 0 : index
    %213 = vector.load %arg2[%c79_86, %c0_87] : memref<227x128xf32, #tpu.memory_space<vmem>>, vector<1x128xf32>
    %c80 = arith.constant 80 : index
    %c0_88 = arith.constant 0 : index
    %214 = vector.load %arg2[%c80, %c0_88] : memref<227x128xf32, #tpu.memory_space<vmem>>, vector<64x128xf32>
    %215 = arith.truncf %214 : vector<64x128xf32> to vector<64x128xbf16>
    %c144 = arith.constant 144 : index
    %c0_89 = arith.constant 0 : index
    %216 = vector.load %arg2[%c144, %c0_89] : memref<227x128xf32, #tpu.memory_space<vmem>>, vector<1x128xf32>
    %217 = arith.truncf %208 : vector<8x8xf32> to vector<8x8xbf16>
    %cst_90 = arith.constant dense<0.000000e+00> : vector<8x128xf32>
    %218 = tpu.matmul %217, %210, %cst_90 {dimension_numbers = #tpu.dot_dimension_numbers<[1], [0], [0], [1], [0, 0, 1, 1], [], []>} : vector<8x8xbf16>, vector<8x128xbf16>, vector<8x128xf32> -> vector<8x128xf32>
    %219 = vector.broadcast %213 : vector<1x128xf32> to vector<8x128xf32>
    %220 = arith.addf %218, %219 : vector<8x128xf32>
    %cst_91 = arith.constant 0.000000e+00 : f32
    %221 = vector.broadcast %cst_91 : f32 to vector<1x32xf32>
    %cst_92 = arith.constant 0.000000e+00 : f32
    %222 = vector.broadcast %cst_92 : f32 to vector<1x32xf32>
    %cst_93 = arith.constant 0.000000e+00 : f32
    %223 = vector.broadcast %cst_93 : f32 to vector<1x32xf32>
    %224 = vector.extract_strided_slice %220 {offsets = [0, 0], sizes = [1, 128], strides = [1, 1]} : vector<8x128xf32> to vector<1x128xf32>
    %225 = arith.negf %224 : vector<1x128xf32>
    %226 = math.exp %225 : vector<1x128xf32>
    %cst_94 = arith.constant 1.000000e+00 : f32
    %227 = vector.broadcast %cst_94 : f32 to vector<1x128xf32>
    %228 = arith.addf %227, %226 : vector<1x128xf32>
    %229 = arith.divf %227, %228 : vector<1x128xf32>
    %230 = math.tanh %224 : vector<1x128xf32>
    %231 = vector.extract_strided_slice %229 {offsets = [0, 0], sizes = [1, 32], strides = [1, 1]} : vector<1x128xf32> to vector<1x32xf32>
    %232 = vector.extract_strided_slice %229 {offsets = [0, 32], sizes = [1, 32], strides = [1, 1]} : vector<1x128xf32> to vector<1x32xf32>
    %233 = vector.extract_strided_slice %229 {offsets = [0, 96], sizes = [1, 32], strides = [1, 1]} : vector<1x128xf32> to vector<1x32xf32>
    %234 = vector.extract_strided_slice %230 {offsets = [0, 64], sizes = [1, 32], strides = [1, 1]} : vector<1x128xf32> to vector<1x32xf32>
    %235 = arith.mulf %232, %221 : vector<1x32xf32>
    %236 = arith.mulf %231, %234 : vector<1x32xf32>
    %237 = arith.addf %235, %236 : vector<1x32xf32>
    %238 = math.tanh %237 : vector<1x32xf32>
    %239 = arith.mulf %233, %238 : vector<1x32xf32>
    %240 = vector.extract_strided_slice %220 {offsets = [1, 0], sizes = [1, 128], strides = [1, 1]} : vector<8x128xf32> to vector<1x128xf32>
    %241 = arith.truncf %239 : vector<1x32xf32> to vector<1x32xbf16>
    %cst_95 = arith.constant dense<0.000000e+00> : vector<1x128xf32>
    %242 = tpu.matmul %241, %212, %cst_95 {dimension_numbers = #tpu.dot_dimension_numbers<[1], [0], [0], [1], [0, 0, 1, 1], [], []>} : vector<1x32xbf16>, vector<32x128xbf16>, vector<1x128xf32> -> vector<1x128xf32>
    %243 = arith.addf %240, %242 : vector<1x128xf32>
    %244 = arith.negf %243 : vector<1x128xf32>
    %245 = math.exp %244 : vector<1x128xf32>
    %cst_96 = arith.constant 1.000000e+00 : f32
    %246 = vector.broadcast %cst_96 : f32 to vector<1x128xf32>
    %247 = arith.addf %246, %245 : vector<1x128xf32>
    %248 = arith.divf %246, %247 : vector<1x128xf32>
    %249 = math.tanh %243 : vector<1x128xf32>
    %250 = vector.extract_strided_slice %248 {offsets = [0, 0], sizes = [1, 32], strides = [1, 1]} : vector<1x128xf32> to vector<1x32xf32>
    %251 = vector.extract_strided_slice %248 {offsets = [0, 32], sizes = [1, 32], strides = [1, 1]} : vector<1x128xf32> to vector<1x32xf32>
    %252 = vector.extract_strided_slice %248 {offsets = [0, 96], sizes = [1, 32], strides = [1, 1]} : vector<1x128xf32> to vector<1x32xf32>
    %253 = vector.extract_strided_slice %249 {offsets = [0, 64], sizes = [1, 32], strides = [1, 1]} : vector<1x128xf32> to vector<1x32xf32>
    %254 = arith.mulf %251, %237 : vector<1x32xf32>
    %255 = arith.mulf %250, %253 : vector<1x32xf32>
    %256 = arith.addf %254, %255 : vector<1x32xf32>
    %257 = math.tanh %256 : vector<1x32xf32>
    %258 = arith.mulf %252, %257 : vector<1x32xf32>
    %259 = tpu.concatenate %239, %222 in 1 : vector<1x32xf32>, vector<1x32xf32> -> vector<1x64xf32>
    %260 = arith.truncf %259 : vector<1x64xf32> to vector<1x64xbf16>
    %cst_97 = arith.constant dense<0.000000e+00> : vector<1x128xf32>
    %261 = tpu.matmul %260, %215, %cst_97 {dimension_numbers = #tpu.dot_dimension_numbers<[1], [0], [0], [1], [0, 0, 1, 1], [], []>} : vector<1x64xbf16>, vector<64x128xbf16>, vector<1x128xf32> -> vector<1x128xf32>
    %262 = arith.addf %261, %216 : vector<1x128xf32>
    %263 = arith.negf %262 : vector<1x128xf32>
    %264 = math.exp %263 : vector<1x128xf32>
    %cst_98 = arith.constant 1.000000e+00 : f32
    %265 = vector.broadcast %cst_98 : f32 to vector<1x128xf32>
    %266 = arith.addf %265, %264 : vector<1x128xf32>
    %267 = arith.divf %265, %266 : vector<1x128xf32>
    %268 = math.tanh %262 : vector<1x128xf32>
    %269 = vector.extract_strided_slice %267 {offsets = [0, 0], sizes = [1, 32], strides = [1, 1]} : vector<1x128xf32> to vector<1x32xf32>
    %270 = vector.extract_strided_slice %267 {offsets = [0, 32], sizes = [1, 32], strides = [1, 1]} : vector<1x128xf32> to vector<1x32xf32>
    %271 = vector.extract_strided_slice %267 {offsets = [0, 96], sizes = [1, 32], strides = [1, 1]} : vector<1x128xf32> to vector<1x32xf32>
    %272 = vector.extract_strided_slice %268 {offsets = [0, 64], sizes = [1, 32], strides = [1, 1]} : vector<1x128xf32> to vector<1x32xf32>
    %273 = arith.mulf %270, %223 : vector<1x32xf32>
    %274 = arith.mulf %269, %272 : vector<1x32xf32>
    %275 = arith.addf %273, %274 : vector<1x32xf32>
    %276 = math.tanh %275 : vector<1x32xf32>
    %277 = arith.mulf %271, %276 : vector<1x32xf32>
    %278 = vector.extract_strided_slice %220 {offsets = [2, 0], sizes = [1, 128], strides = [1, 1]} : vector<8x128xf32> to vector<1x128xf32>
    %279 = arith.truncf %258 : vector<1x32xf32> to vector<1x32xbf16>
    %cst_99 = arith.constant dense<0.000000e+00> : vector<1x128xf32>
    %280 = tpu.matmul %279, %212, %cst_99 {dimension_numbers = #tpu.dot_dimension_numbers<[1], [0], [0], [1], [0, 0, 1, 1], [], []>} : vector<1x32xbf16>, vector<32x128xbf16>, vector<1x128xf32> -> vector<1x128xf32>
    %281 = arith.addf %278, %280 : vector<1x128xf32>
    %282 = arith.negf %281 : vector<1x128xf32>
    %283 = math.exp %282 : vector<1x128xf32>
    %cst_100 = arith.constant 1.000000e+00 : f32
    %284 = vector.broadcast %cst_100 : f32 to vector<1x128xf32>
    %285 = arith.addf %284, %283 : vector<1x128xf32>
    %286 = arith.divf %284, %285 : vector<1x128xf32>
    %287 = math.tanh %281 : vector<1x128xf32>
    %288 = vector.extract_strided_slice %286 {offsets = [0, 0], sizes = [1, 32], strides = [1, 1]} : vector<1x128xf32> to vector<1x32xf32>
    %289 = vector.extract_strided_slice %286 {offsets = [0, 32], sizes = [1, 32], strides = [1, 1]} : vector<1x128xf32> to vector<1x32xf32>
    %290 = vector.extract_strided_slice %286 {offsets = [0, 96], sizes = [1, 32], strides = [1, 1]} : vector<1x128xf32> to vector<1x32xf32>
    %291 = vector.extract_strided_slice %287 {offsets = [0, 64], sizes = [1, 32], strides = [1, 1]} : vector<1x128xf32> to vector<1x32xf32>
    %292 = arith.mulf %289, %256 : vector<1x32xf32>
    %293 = arith.mulf %288, %291 : vector<1x32xf32>
    %294 = arith.addf %292, %293 : vector<1x32xf32>
    %295 = math.tanh %294 : vector<1x32xf32>
    %296 = arith.mulf %290, %295 : vector<1x32xf32>
    %297 = tpu.concatenate %258, %277 in 1 : vector<1x32xf32>, vector<1x32xf32> -> vector<1x64xf32>
    %298 = arith.truncf %297 : vector<1x64xf32> to vector<1x64xbf16>
    %cst_101 = arith.constant dense<0.000000e+00> : vector<1x128xf32>
    %299 = tpu.matmul %298, %215, %cst_101 {dimension_numbers = #tpu.dot_dimension_numbers<[1], [0], [0], [1], [0, 0, 1, 1], [], []>} : vector<1x64xbf16>, vector<64x128xbf16>, vector<1x128xf32> -> vector<1x128xf32>
    %300 = arith.addf %299, %216 : vector<1x128xf32>
    %301 = arith.negf %300 : vector<1x128xf32>
    %302 = math.exp %301 : vector<1x128xf32>
    %cst_102 = arith.constant 1.000000e+00 : f32
    %303 = vector.broadcast %cst_102 : f32 to vector<1x128xf32>
    %304 = arith.addf %303, %302 : vector<1x128xf32>
    %305 = arith.divf %303, %304 : vector<1x128xf32>
    %306 = math.tanh %300 : vector<1x128xf32>
    %307 = vector.extract_strided_slice %305 {offsets = [0, 0], sizes = [1, 32], strides = [1, 1]} : vector<1x128xf32> to vector<1x32xf32>
    %308 = vector.extract_strided_slice %305 {offsets = [0, 32], sizes = [1, 32], strides = [1, 1]} : vector<1x128xf32> to vector<1x32xf32>
    %309 = vector.extract_strided_slice %305 {offsets = [0, 96], sizes = [1, 32], strides = [1, 1]} : vector<1x128xf32> to vector<1x32xf32>
    %310 = vector.extract_strided_slice %306 {offsets = [0, 64], sizes = [1, 32], strides = [1, 1]} : vector<1x128xf32> to vector<1x32xf32>
    %311 = arith.mulf %308, %275 : vector<1x32xf32>
    %312 = arith.mulf %307, %310 : vector<1x32xf32>
    %313 = arith.addf %311, %312 : vector<1x32xf32>
    %314 = math.tanh %313 : vector<1x32xf32>
    %315 = arith.mulf %309, %314 : vector<1x32xf32>
    %316 = vector.extract_strided_slice %220 {offsets = [3, 0], sizes = [1, 128], strides = [1, 1]} : vector<8x128xf32> to vector<1x128xf32>
    %317 = arith.truncf %296 : vector<1x32xf32> to vector<1x32xbf16>
    %cst_103 = arith.constant dense<0.000000e+00> : vector<1x128xf32>
    %318 = tpu.matmul %317, %212, %cst_103 {dimension_numbers = #tpu.dot_dimension_numbers<[1], [0], [0], [1], [0, 0, 1, 1], [], []>} : vector<1x32xbf16>, vector<32x128xbf16>, vector<1x128xf32> -> vector<1x128xf32>
    %319 = arith.addf %316, %318 : vector<1x128xf32>
    %320 = arith.negf %319 : vector<1x128xf32>
    %321 = math.exp %320 : vector<1x128xf32>
    %cst_104 = arith.constant 1.000000e+00 : f32
    %322 = vector.broadcast %cst_104 : f32 to vector<1x128xf32>
    %323 = arith.addf %322, %321 : vector<1x128xf32>
    %324 = arith.divf %322, %323 : vector<1x128xf32>
    %325 = math.tanh %319 : vector<1x128xf32>
    %326 = vector.extract_strided_slice %324 {offsets = [0, 0], sizes = [1, 32], strides = [1, 1]} : vector<1x128xf32> to vector<1x32xf32>
    %327 = vector.extract_strided_slice %324 {offsets = [0, 32], sizes = [1, 32], strides = [1, 1]} : vector<1x128xf32> to vector<1x32xf32>
    %328 = vector.extract_strided_slice %324 {offsets = [0, 96], sizes = [1, 32], strides = [1, 1]} : vector<1x128xf32> to vector<1x32xf32>
    %329 = vector.extract_strided_slice %325 {offsets = [0, 64], sizes = [1, 32], strides = [1, 1]} : vector<1x128xf32> to vector<1x32xf32>
    %330 = arith.mulf %327, %294 : vector<1x32xf32>
    %331 = arith.mulf %326, %329 : vector<1x32xf32>
    %332 = arith.addf %330, %331 : vector<1x32xf32>
    %333 = math.tanh %332 : vector<1x32xf32>
    %334 = arith.mulf %328, %333 : vector<1x32xf32>
    %335 = tpu.concatenate %296, %315 in 1 : vector<1x32xf32>, vector<1x32xf32> -> vector<1x64xf32>
    %336 = arith.truncf %335 : vector<1x64xf32> to vector<1x64xbf16>
    %cst_105 = arith.constant dense<0.000000e+00> : vector<1x128xf32>
    %337 = tpu.matmul %336, %215, %cst_105 {dimension_numbers = #tpu.dot_dimension_numbers<[1], [0], [0], [1], [0, 0, 1, 1], [], []>} : vector<1x64xbf16>, vector<64x128xbf16>, vector<1x128xf32> -> vector<1x128xf32>
    %338 = arith.addf %337, %216 : vector<1x128xf32>
    %339 = arith.negf %338 : vector<1x128xf32>
    %340 = math.exp %339 : vector<1x128xf32>
    %cst_106 = arith.constant 1.000000e+00 : f32
    %341 = vector.broadcast %cst_106 : f32 to vector<1x128xf32>
    %342 = arith.addf %341, %340 : vector<1x128xf32>
    %343 = arith.divf %341, %342 : vector<1x128xf32>
    %344 = math.tanh %338 : vector<1x128xf32>
    %345 = vector.extract_strided_slice %343 {offsets = [0, 0], sizes = [1, 32], strides = [1, 1]} : vector<1x128xf32> to vector<1x32xf32>
    %346 = vector.extract_strided_slice %343 {offsets = [0, 32], sizes = [1, 32], strides = [1, 1]} : vector<1x128xf32> to vector<1x32xf32>
    %347 = vector.extract_strided_slice %343 {offsets = [0, 96], sizes = [1, 32], strides = [1, 1]} : vector<1x128xf32> to vector<1x32xf32>
    %348 = vector.extract_strided_slice %344 {offsets = [0, 64], sizes = [1, 32], strides = [1, 1]} : vector<1x128xf32> to vector<1x32xf32>
    %349 = arith.mulf %346, %313 : vector<1x32xf32>
    %350 = arith.mulf %345, %348 : vector<1x32xf32>
    %351 = arith.addf %349, %350 : vector<1x32xf32>
    %352 = math.tanh %351 : vector<1x32xf32>
    %353 = arith.mulf %347, %352 : vector<1x32xf32>
    %354 = vector.extract_strided_slice %220 {offsets = [4, 0], sizes = [1, 128], strides = [1, 1]} : vector<8x128xf32> to vector<1x128xf32>
    %355 = arith.truncf %334 : vector<1x32xf32> to vector<1x32xbf16>
    %cst_107 = arith.constant dense<0.000000e+00> : vector<1x128xf32>
    %356 = tpu.matmul %355, %212, %cst_107 {dimension_numbers = #tpu.dot_dimension_numbers<[1], [0], [0], [1], [0, 0, 1, 1], [], []>} : vector<1x32xbf16>, vector<32x128xbf16>, vector<1x128xf32> -> vector<1x128xf32>
    %357 = arith.addf %354, %356 : vector<1x128xf32>
    %358 = arith.negf %357 : vector<1x128xf32>
    %359 = math.exp %358 : vector<1x128xf32>
    %cst_108 = arith.constant 1.000000e+00 : f32
    %360 = vector.broadcast %cst_108 : f32 to vector<1x128xf32>
    %361 = arith.addf %360, %359 : vector<1x128xf32>
    %362 = arith.divf %360, %361 : vector<1x128xf32>
    %363 = math.tanh %357 : vector<1x128xf32>
    %364 = vector.extract_strided_slice %362 {offsets = [0, 0], sizes = [1, 32], strides = [1, 1]} : vector<1x128xf32> to vector<1x32xf32>
    %365 = vector.extract_strided_slice %362 {offsets = [0, 32], sizes = [1, 32], strides = [1, 1]} : vector<1x128xf32> to vector<1x32xf32>
    %366 = vector.extract_strided_slice %362 {offsets = [0, 96], sizes = [1, 32], strides = [1, 1]} : vector<1x128xf32> to vector<1x32xf32>
    %367 = vector.extract_strided_slice %363 {offsets = [0, 64], sizes = [1, 32], strides = [1, 1]} : vector<1x128xf32> to vector<1x32xf32>
    %368 = arith.mulf %365, %332 : vector<1x32xf32>
    %369 = arith.mulf %364, %367 : vector<1x32xf32>
    %370 = arith.addf %368, %369 : vector<1x32xf32>
    %371 = math.tanh %370 : vector<1x32xf32>
    %372 = arith.mulf %366, %371 : vector<1x32xf32>
    %373 = tpu.concatenate %334, %353 in 1 : vector<1x32xf32>, vector<1x32xf32> -> vector<1x64xf32>
    %374 = arith.truncf %373 : vector<1x64xf32> to vector<1x64xbf16>
    %cst_109 = arith.constant dense<0.000000e+00> : vector<1x128xf32>
    %375 = tpu.matmul %374, %215, %cst_109 {dimension_numbers = #tpu.dot_dimension_numbers<[1], [0], [0], [1], [0, 0, 1, 1], [], []>} : vector<1x64xbf16>, vector<64x128xbf16>, vector<1x128xf32> -> vector<1x128xf32>
    %376 = arith.addf %375, %216 : vector<1x128xf32>
    %377 = arith.negf %376 : vector<1x128xf32>
    %378 = math.exp %377 : vector<1x128xf32>
    %cst_110 = arith.constant 1.000000e+00 : f32
    %379 = vector.broadcast %cst_110 : f32 to vector<1x128xf32>
    %380 = arith.addf %379, %378 : vector<1x128xf32>
    %381 = arith.divf %379, %380 : vector<1x128xf32>
    %382 = math.tanh %376 : vector<1x128xf32>
    %383 = vector.extract_strided_slice %381 {offsets = [0, 0], sizes = [1, 32], strides = [1, 1]} : vector<1x128xf32> to vector<1x32xf32>
    %384 = vector.extract_strided_slice %381 {offsets = [0, 32], sizes = [1, 32], strides = [1, 1]} : vector<1x128xf32> to vector<1x32xf32>
    %385 = vector.extract_strided_slice %381 {offsets = [0, 96], sizes = [1, 32], strides = [1, 1]} : vector<1x128xf32> to vector<1x32xf32>
    %386 = vector.extract_strided_slice %382 {offsets = [0, 64], sizes = [1, 32], strides = [1, 1]} : vector<1x128xf32> to vector<1x32xf32>
    %387 = arith.mulf %384, %351 : vector<1x32xf32>
    %388 = arith.mulf %383, %386 : vector<1x32xf32>
    %389 = arith.addf %387, %388 : vector<1x32xf32>
    %390 = math.tanh %389 : vector<1x32xf32>
    %391 = arith.mulf %385, %390 : vector<1x32xf32>
    %392 = vector.extract_strided_slice %220 {offsets = [5, 0], sizes = [1, 128], strides = [1, 1]} : vector<8x128xf32> to vector<1x128xf32>
    %393 = arith.truncf %372 : vector<1x32xf32> to vector<1x32xbf16>
    %cst_111 = arith.constant dense<0.000000e+00> : vector<1x128xf32>
    %394 = tpu.matmul %393, %212, %cst_111 {dimension_numbers = #tpu.dot_dimension_numbers<[1], [0], [0], [1], [0, 0, 1, 1], [], []>} : vector<1x32xbf16>, vector<32x128xbf16>, vector<1x128xf32> -> vector<1x128xf32>
    %395 = arith.addf %392, %394 : vector<1x128xf32>
    %396 = arith.negf %395 : vector<1x128xf32>
    %397 = math.exp %396 : vector<1x128xf32>
    %cst_112 = arith.constant 1.000000e+00 : f32
    %398 = vector.broadcast %cst_112 : f32 to vector<1x128xf32>
    %399 = arith.addf %398, %397 : vector<1x128xf32>
    %400 = arith.divf %398, %399 : vector<1x128xf32>
    %401 = math.tanh %395 : vector<1x128xf32>
    %402 = vector.extract_strided_slice %400 {offsets = [0, 0], sizes = [1, 32], strides = [1, 1]} : vector<1x128xf32> to vector<1x32xf32>
    %403 = vector.extract_strided_slice %400 {offsets = [0, 32], sizes = [1, 32], strides = [1, 1]} : vector<1x128xf32> to vector<1x32xf32>
    %404 = vector.extract_strided_slice %400 {offsets = [0, 96], sizes = [1, 32], strides = [1, 1]} : vector<1x128xf32> to vector<1x32xf32>
    %405 = vector.extract_strided_slice %401 {offsets = [0, 64], sizes = [1, 32], strides = [1, 1]} : vector<1x128xf32> to vector<1x32xf32>
    %406 = arith.mulf %403, %370 : vector<1x32xf32>
    %407 = arith.mulf %402, %405 : vector<1x32xf32>
    %408 = arith.addf %406, %407 : vector<1x32xf32>
    %409 = math.tanh %408 : vector<1x32xf32>
    %410 = arith.mulf %404, %409 : vector<1x32xf32>
    %411 = tpu.concatenate %372, %391 in 1 : vector<1x32xf32>, vector<1x32xf32> -> vector<1x64xf32>
    %412 = arith.truncf %411 : vector<1x64xf32> to vector<1x64xbf16>
    %cst_113 = arith.constant dense<0.000000e+00> : vector<1x128xf32>
    %413 = tpu.matmul %412, %215, %cst_113 {dimension_numbers = #tpu.dot_dimension_numbers<[1], [0], [0], [1], [0, 0, 1, 1], [], []>} : vector<1x64xbf16>, vector<64x128xbf16>, vector<1x128xf32> -> vector<1x128xf32>
    %414 = arith.addf %413, %216 : vector<1x128xf32>
    %415 = arith.negf %414 : vector<1x128xf32>
    %416 = math.exp %415 : vector<1x128xf32>
    %cst_114 = arith.constant 1.000000e+00 : f32
    %417 = vector.broadcast %cst_114 : f32 to vector<1x128xf32>
    %418 = arith.addf %417, %416 : vector<1x128xf32>
    %419 = arith.divf %417, %418 : vector<1x128xf32>
    %420 = math.tanh %414 : vector<1x128xf32>
    %421 = vector.extract_strided_slice %419 {offsets = [0, 0], sizes = [1, 32], strides = [1, 1]} : vector<1x128xf32> to vector<1x32xf32>
    %422 = vector.extract_strided_slice %419 {offsets = [0, 32], sizes = [1, 32], strides = [1, 1]} : vector<1x128xf32> to vector<1x32xf32>
    %423 = vector.extract_strided_slice %419 {offsets = [0, 96], sizes = [1, 32], strides = [1, 1]} : vector<1x128xf32> to vector<1x32xf32>
    %424 = vector.extract_strided_slice %420 {offsets = [0, 64], sizes = [1, 32], strides = [1, 1]} : vector<1x128xf32> to vector<1x32xf32>
    %425 = arith.mulf %422, %389 : vector<1x32xf32>
    %426 = arith.mulf %421, %424 : vector<1x32xf32>
    %427 = arith.addf %425, %426 : vector<1x32xf32>
    %428 = math.tanh %427 : vector<1x32xf32>
    %429 = arith.mulf %423, %428 : vector<1x32xf32>
    %430 = vector.extract_strided_slice %220 {offsets = [6, 0], sizes = [1, 128], strides = [1, 1]} : vector<8x128xf32> to vector<1x128xf32>
    %431 = arith.truncf %410 : vector<1x32xf32> to vector<1x32xbf16>
    %cst_115 = arith.constant dense<0.000000e+00> : vector<1x128xf32>
    %432 = tpu.matmul %431, %212, %cst_115 {dimension_numbers = #tpu.dot_dimension_numbers<[1], [0], [0], [1], [0, 0, 1, 1], [], []>} : vector<1x32xbf16>, vector<32x128xbf16>, vector<1x128xf32> -> vector<1x128xf32>
    %433 = arith.addf %430, %432 : vector<1x128xf32>
    %434 = arith.negf %433 : vector<1x128xf32>
    %435 = math.exp %434 : vector<1x128xf32>
    %cst_116 = arith.constant 1.000000e+00 : f32
    %436 = vector.broadcast %cst_116 : f32 to vector<1x128xf32>
    %437 = arith.addf %436, %435 : vector<1x128xf32>
    %438 = arith.divf %436, %437 : vector<1x128xf32>
    %439 = math.tanh %433 : vector<1x128xf32>
    %440 = vector.extract_strided_slice %438 {offsets = [0, 0], sizes = [1, 32], strides = [1, 1]} : vector<1x128xf32> to vector<1x32xf32>
    %441 = vector.extract_strided_slice %438 {offsets = [0, 32], sizes = [1, 32], strides = [1, 1]} : vector<1x128xf32> to vector<1x32xf32>
    %442 = vector.extract_strided_slice %438 {offsets = [0, 96], sizes = [1, 32], strides = [1, 1]} : vector<1x128xf32> to vector<1x32xf32>
    %443 = vector.extract_strided_slice %439 {offsets = [0, 64], sizes = [1, 32], strides = [1, 1]} : vector<1x128xf32> to vector<1x32xf32>
    %444 = arith.mulf %441, %408 : vector<1x32xf32>
    %445 = arith.mulf %440, %443 : vector<1x32xf32>
    %446 = arith.addf %444, %445 : vector<1x32xf32>
    %447 = math.tanh %446 : vector<1x32xf32>
    %448 = arith.mulf %442, %447 : vector<1x32xf32>
    %449 = tpu.concatenate %410, %429 in 1 : vector<1x32xf32>, vector<1x32xf32> -> vector<1x64xf32>
    %450 = arith.truncf %449 : vector<1x64xf32> to vector<1x64xbf16>
    %cst_117 = arith.constant dense<0.000000e+00> : vector<1x128xf32>
    %451 = tpu.matmul %450, %215, %cst_117 {dimension_numbers = #tpu.dot_dimension_numbers<[1], [0], [0], [1], [0, 0, 1, 1], [], []>} : vector<1x64xbf16>, vector<64x128xbf16>, vector<1x128xf32> -> vector<1x128xf32>
    %452 = arith.addf %451, %216 : vector<1x128xf32>
    %453 = arith.negf %452 : vector<1x128xf32>
    %454 = math.exp %453 : vector<1x128xf32>
    %cst_118 = arith.constant 1.000000e+00 : f32
    %455 = vector.broadcast %cst_118 : f32 to vector<1x128xf32>
    %456 = arith.addf %455, %454 : vector<1x128xf32>
    %457 = arith.divf %455, %456 : vector<1x128xf32>
    %458 = math.tanh %452 : vector<1x128xf32>
    %459 = vector.extract_strided_slice %457 {offsets = [0, 0], sizes = [1, 32], strides = [1, 1]} : vector<1x128xf32> to vector<1x32xf32>
    %460 = vector.extract_strided_slice %457 {offsets = [0, 32], sizes = [1, 32], strides = [1, 1]} : vector<1x128xf32> to vector<1x32xf32>
    %461 = vector.extract_strided_slice %457 {offsets = [0, 96], sizes = [1, 32], strides = [1, 1]} : vector<1x128xf32> to vector<1x32xf32>
    %462 = vector.extract_strided_slice %458 {offsets = [0, 64], sizes = [1, 32], strides = [1, 1]} : vector<1x128xf32> to vector<1x32xf32>
    %463 = arith.mulf %460, %427 : vector<1x32xf32>
    %464 = arith.mulf %459, %462 : vector<1x32xf32>
    %465 = arith.addf %463, %464 : vector<1x32xf32>
    %466 = math.tanh %465 : vector<1x32xf32>
    %467 = arith.mulf %461, %466 : vector<1x32xf32>
    %468 = vector.extract_strided_slice %220 {offsets = [7, 0], sizes = [1, 128], strides = [1, 1]} : vector<8x128xf32> to vector<1x128xf32>
    %469 = arith.truncf %448 : vector<1x32xf32> to vector<1x32xbf16>
    %cst_119 = arith.constant dense<0.000000e+00> : vector<1x128xf32>
    %470 = tpu.matmul %469, %212, %cst_119 {dimension_numbers = #tpu.dot_dimension_numbers<[1], [0], [0], [1], [0, 0, 1, 1], [], []>} : vector<1x32xbf16>, vector<32x128xbf16>, vector<1x128xf32> -> vector<1x128xf32>
    %471 = arith.addf %468, %470 : vector<1x128xf32>
    %472 = arith.negf %471 : vector<1x128xf32>
    %473 = math.exp %472 : vector<1x128xf32>
    %cst_120 = arith.constant 1.000000e+00 : f32
    %474 = vector.broadcast %cst_120 : f32 to vector<1x128xf32>
    %475 = arith.addf %474, %473 : vector<1x128xf32>
    %476 = arith.divf %474, %475 : vector<1x128xf32>
    %477 = math.tanh %471 : vector<1x128xf32>
    %478 = vector.extract_strided_slice %476 {offsets = [0, 0], sizes = [1, 32], strides = [1, 1]} : vector<1x128xf32> to vector<1x32xf32>
    %479 = vector.extract_strided_slice %476 {offsets = [0, 32], sizes = [1, 32], strides = [1, 1]} : vector<1x128xf32> to vector<1x32xf32>
    %480 = vector.extract_strided_slice %476 {offsets = [0, 96], sizes = [1, 32], strides = [1, 1]} : vector<1x128xf32> to vector<1x32xf32>
    %481 = vector.extract_strided_slice %477 {offsets = [0, 64], sizes = [1, 32], strides = [1, 1]} : vector<1x128xf32> to vector<1x32xf32>
    %482 = arith.mulf %479, %446 : vector<1x32xf32>
    %483 = arith.mulf %478, %481 : vector<1x32xf32>
    %484 = arith.addf %482, %483 : vector<1x32xf32>
    %485 = math.tanh %484 : vector<1x32xf32>
    %486 = arith.mulf %480, %485 : vector<1x32xf32>
    %487 = tpu.concatenate %448, %467 in 1 : vector<1x32xf32>, vector<1x32xf32> -> vector<1x64xf32>
    %488 = arith.truncf %487 : vector<1x64xf32> to vector<1x64xbf16>
    %cst_121 = arith.constant dense<0.000000e+00> : vector<1x128xf32>
    %489 = tpu.matmul %488, %215, %cst_121 {dimension_numbers = #tpu.dot_dimension_numbers<[1], [0], [0], [1], [0, 0, 1, 1], [], []>} : vector<1x64xbf16>, vector<64x128xbf16>, vector<1x128xf32> -> vector<1x128xf32>
    %490 = arith.addf %489, %216 : vector<1x128xf32>
    %491 = arith.negf %490 : vector<1x128xf32>
    %492 = math.exp %491 : vector<1x128xf32>
    %cst_122 = arith.constant 1.000000e+00 : f32
    %493 = vector.broadcast %cst_122 : f32 to vector<1x128xf32>
    %494 = arith.addf %493, %492 : vector<1x128xf32>
    %495 = arith.divf %493, %494 : vector<1x128xf32>
    %496 = math.tanh %490 : vector<1x128xf32>
    %497 = vector.extract_strided_slice %495 {offsets = [0, 0], sizes = [1, 32], strides = [1, 1]} : vector<1x128xf32> to vector<1x32xf32>
    %498 = vector.extract_strided_slice %495 {offsets = [0, 32], sizes = [1, 32], strides = [1, 1]} : vector<1x128xf32> to vector<1x32xf32>
    %499 = vector.extract_strided_slice %495 {offsets = [0, 96], sizes = [1, 32], strides = [1, 1]} : vector<1x128xf32> to vector<1x32xf32>
    %500 = vector.extract_strided_slice %496 {offsets = [0, 64], sizes = [1, 32], strides = [1, 1]} : vector<1x128xf32> to vector<1x32xf32>
    %501 = arith.mulf %498, %465 : vector<1x32xf32>
    %502 = arith.mulf %497, %500 : vector<1x32xf32>
    %503 = arith.addf %501, %502 : vector<1x32xf32>
    %504 = math.tanh %503 : vector<1x32xf32>
    %505 = arith.mulf %499, %504 : vector<1x32xf32>
    %506 = tpu.concatenate %486, %505 in 1 : vector<1x32xf32>, vector<1x32xf32> -> vector<1x64xf32>
    %507 = arith.truncf %506 : vector<1x64xf32> to vector<1x64xbf16>
    %cst_123 = arith.constant dense<0.000000e+00> : vector<1x128xf32>
    %508 = tpu.matmul %507, %215, %cst_123 {dimension_numbers = #tpu.dot_dimension_numbers<[1], [0], [0], [1], [0, 0, 1, 1], [], []>} : vector<1x64xbf16>, vector<64x128xbf16>, vector<1x128xf32> -> vector<1x128xf32>
    %509 = arith.addf %508, %216 : vector<1x128xf32>
    %510 = arith.negf %509 : vector<1x128xf32>
    %511 = math.exp %510 : vector<1x128xf32>
    %cst_124 = arith.constant 1.000000e+00 : f32
    %512 = vector.broadcast %cst_124 : f32 to vector<1x128xf32>
    %513 = arith.addf %512, %511 : vector<1x128xf32>
    %514 = arith.divf %512, %513 : vector<1x128xf32>
    %515 = math.tanh %509 : vector<1x128xf32>
    %516 = vector.extract_strided_slice %514 {offsets = [0, 0], sizes = [1, 32], strides = [1, 1]} : vector<1x128xf32> to vector<1x32xf32>
    %517 = vector.extract_strided_slice %514 {offsets = [0, 32], sizes = [1, 32], strides = [1, 1]} : vector<1x128xf32> to vector<1x32xf32>
    %518 = vector.extract_strided_slice %514 {offsets = [0, 96], sizes = [1, 32], strides = [1, 1]} : vector<1x128xf32> to vector<1x32xf32>
    %519 = vector.extract_strided_slice %515 {offsets = [0, 64], sizes = [1, 32], strides = [1, 1]} : vector<1x128xf32> to vector<1x32xf32>
    %520 = arith.mulf %517, %503 : vector<1x32xf32>
    %521 = arith.mulf %516, %519 : vector<1x32xf32>
    %522 = arith.addf %520, %521 : vector<1x32xf32>
    %523 = math.tanh %522 : vector<1x32xf32>
    %524 = arith.mulf %518, %523 : vector<1x32xf32>
    %525 = tpu.concatenate %277, %315, %353, %391, %429, %467, %505, %524 in 0 : vector<1x32xf32>, vector<1x32xf32>, vector<1x32xf32>, vector<1x32xf32>, vector<1x32xf32>, vector<1x32xf32>, vector<1x32xf32>, vector<1x32xf32> -> vector<8x32xf32>
    %526 = tpu.concatenate %199, %525 in 1 : vector<8x16xf32>, vector<8x32xf32> -> vector<8x48xf32>
    %c145 = arith.constant 145 : index
    %c0_125 = arith.constant 0 : index
    %527 = vector.load %arg2[%c145, %c0_125] : memref<227x128xf32, #tpu.memory_space<vmem>>, vector<48x32xf32>
    %cst_126 = arith.constant dense<0.000000e+00> : vector<8x32xf32>
    %528 = tpu.matmul %526, %527, %cst_126 {dimension_numbers = #tpu.dot_dimension_numbers<[1], [0], [0], [1], [0, 0, 1, 1], [], []>} : vector<8x48xf32>, vector<48x32xf32>, vector<8x32xf32> -> vector<8x32xf32>
    %c193 = arith.constant 193 : index
    %c0_127 = arith.constant 0 : index
    %529 = vector.load %arg2[%c193, %c0_127] : memref<227x128xf32, #tpu.memory_space<vmem>>, vector<1x32xf32>
    %530 = vector.broadcast %529 : vector<1x32xf32> to vector<8x32xf32>
    %531 = arith.addf %528, %530 : vector<8x32xf32>
    %cst_128 = arith.constant 0.000000e+00 : f32
    %532 = vector.broadcast %cst_128 : f32 to vector<8x32xf32>
    %533 = arith.maximumf %531, %532 : vector<8x32xf32>
    %c194 = arith.constant 194 : index
    %c0_129 = arith.constant 0 : index
    %534 = vector.load %arg2[%c194, %c0_129] : memref<227x128xf32, #tpu.memory_space<vmem>>, vector<32x1xf32>
    %cst_130 = arith.constant dense<0.000000e+00> : vector<8x1xf32>
    %535 = tpu.matmul %533, %534, %cst_130 {dimension_numbers = #tpu.dot_dimension_numbers<[1], [0], [0], [1], [0, 0, 1, 1], [], []>} : vector<8x32xf32>, vector<32x1xf32>, vector<8x1xf32> -> vector<8x1xf32>
    %c226 = arith.constant 226 : index
    %c0_131 = arith.constant 0 : index
    %536 = vector.load %arg2[%c226, %c0_131] : memref<227x128xf32, #tpu.memory_space<vmem>>, vector<1x1xf32>
    %537 = vector.broadcast %536 : vector<1x1xf32> to vector<8x1xf32>
    %538 = arith.addf %535, %537 : vector<8x1xf32>
    %cst_132 = arith.constant 0.000000e+00 : f32
    %539 = vector.broadcast %cst_132 : f32 to vector<8x1xf32>
    %540 = arith.maximumf %538, %539 : vector<8x1xf32>
    %c0_133 = arith.constant 0 : index
    %c0_134 = arith.constant 0 : index
    %541 = vector.load %arg5[%c0_133, %c0_134] : memref<8x1xf32, #tpu.memory_space<vmem>>, vector<8x1xf32>
    tpu.vector_store %arg5[%c0_133, %c0_134], %540 {strides = array<i32>} : memref<8x1xf32, #tpu.memory_space<vmem>>, vector<8x1xf32>,
    return
  }
}

</mosaic_0001>

<bundles_post_ra>
// kernel: transformer_lstm_forward.1
= control target key start
LH: loop header
LB: loop body
LE: loop exit
PB: predicated region body
PF: predicated region fallthrough
CT: control target
= control target key end

     0   :  { %vm36_vm0 = vcmask 130048   ;;  %v11978_v11 = vmov 0.0   ;;  %vm11979_vm1 = vmmov 0   ;;  %s11980_s15 = smov 112   ;;  %vm177_vm2 = vcmask 31744   ;;  %s11981_s16 = smov 96   ;;  %s14507_s2 = inlined_call_operand.vmem [shape: f32[227,128], index: 2, kind: input, shape index: {}]   ;;  %s14508_s0 = inlined_call_operand.vmem [shape: f32[64,16], index: 0, kind: input, shape index: {}]   ;;  %s14509_s3 = inlined_call_operand.vmem [shape: bf16[17,2048], index: 3, kind: input, shape index: {}]   ;;  %s14510_s4 = inlined_call_operand.vmem [shape: bf16[2048,16], index: 4, kind: input, shape index: {}]   ;;  %s14511_s1 = inlined_call_operand.vmem [shape: f32[128,8], index: 1, kind: input, shape index: {}]   ;;  %s14512_s5 = inlined_call_operand.vmem [shape: f32[8,1], index: 5, kind: output, shape index: {}]  }
   0x1   :  { %v29_v0 = vld [vmem:[%s14507_s2] sm:$0xff]  ;;  %v30_v1 = vld [vmem:[%s14507_s2 + $0x8] sm:$0xff]  ;;  %v23_v5 = vld [vmem:[%s14508_s0 + $0x10] sm:$0xff]  ;;  %10988 = vmatprep.subr.mxu1 %v11978_v11  ;;  %10990 = vmatprep.mubr.msk.f32.mxu1 %vm11979_vm1, %v11978_v11  ;;  %vm799_vm3 = vcmask 64512   ;;  %s11982_s17 = smov 108   ;;  %s11983_s18 = smov 124  }
   0x2   :  { %v21_v2 = vld [vmem:[%s14508_s0] sm:$0xff]  ;;  %v11508_v3 = vpack.c.bf16 %v30_v1, %v29_v0  ;;  %v22_v4 = vld [vmem:[%s14508_s0 + $0x8] sm:$0xff]  ;;  %v24_v6 = vld [vmem:[%s14508_s0 + $0x18] sm:$0xff]  ;;  %s11984_s19 = smov 92   ;;  %s11985_s20 = smov 104   ;;  %vm5568_vm4 = vcmask 97280  }
   0x3   :  { %10976 = vmatprep.mubr.msk.f32.mxu0 %vm36_vm0, %v21_v2  ;;  %v25_v7 = vld [vmem:[%s14508_s0 + $0x20] sm:$0xff]  ;;  %v26_v8 = vld [vmem:[%s14508_s0 + $0x28] sm:$0xff]  ;;  %v27_v9 = vld [vmem:[%s14508_s0 + $0x30] sm:$0xff]  ;;  %s11986_s21 = smov 120   ;;  %s11987_s22 = smov 88   ;;  %vm8591_vm5 = vcmask 1043456  }
   0x4   :  { %11509 = vmatprep.subr.bf16.mxu0 %v11508_v3  ;;  %v28_v10 = vld [vmem:[%s14508_s0 + $0x38] sm:$0xff]  ;;  %v10097_v12 = vld [vmem:[%s14507_s2 + $0x10] ss:$0 sm:$0xff]  ;;  %s11988_s23 = smov 100   ;;  %s11989_s24 = smov 116   ;;  %vm8585_vm6 = vcmask 1040384  }
   0x5   :  { %11511 = vmatpush3.bf16.msra.mxu0 %v11508_v3  ;;  %s11990_s25 = smov 84   ;;  %s11991_s26 = smov 4   ;;  %vm8587_vm7 = vcmask 1041408   ;;  %vm8589_vm8 = vcmask 1042432   ;;  %vm8593_vm9 = vcmask 1044480   ;;  %vm8595_vm10 = vcmask 1045504  }
   0x6   :  { %11008 = vmatprep.subr.mxu0 %v11978_v11  ;;  %s11992_s27 = smov 8   ;;  %s11993_s7 = smov 12   ;;  %vm8597_vm11 = vcmask 1046528   ;;  %vm8700_vm12 = vcmask 261120   ;;  %vm8781_vm13 = vcmask 523264   ;;  %vm9933_vm14 = vcmask 392192  }
   0x7   :  { %s11998_s6 = smov 48   ;;  %vm10091_vm15 = vcmask 7168  }
   0x8   :  { %10977 = vmatmul.mubr.msk.f32.vlgmr.msra.gmra.mrb[0].mxu0 %vm36_vm0, %v22_v4 }
   0x9   :  { %10979 = vmatprep.mubr.msk.f32.mxu0 %vm36_vm0, %v23_v5 }
   0xc   :  { %10980 = vmatmul.mubr.msk.f32.gmra.mrb[2].mxu0 %vm36_vm0, %v24_v6 }
   0xd   :  { %10982 = vmatprep.mubr.msk.f32.mxu0 %vm36_vm0, %v25_v7 }
  0x10   :  { %10983 = vmatmul.mubr.msk.f32.gmra.mrb[4].mxu0 %vm36_vm0, %v26_v8 }
  0x11   :  { %10985 = vmatprep.mubr.msk.f32.mxu0 %vm36_vm0, %v27_v9 }
  0x14   :  { %10986 = vmatmul.mubr.msk.f32.gmra.mrb[6].mxu0 %vm36_vm0, %v28_v10 }
  0x15   :  { %11010 = vmatprep.mubr.msk.f32.mxu0 %vm11979_vm1, %v11978_v11 }
  0xdb   :  { %v10978_v13 = vpop.f32.mrb[0].mxu0 }
  0xdc   :  { %v127_v14 = vpop.f32.mrb[1].mxu0  ;;  %v12079_v18 = vadd.f32 %v10978_v13, %v10097_v12 }
  0xdd   :  { %v12076_v15 = vadd.f32 %v10097_v12, %v127_v14 }
  0xde   :  { %v12111_v33 = vmul.f32 0.5, %v12079_v18 }
  0xdf   :  { %v10981_v16 = vpop.f32.mrb[2].mxu0  ;;  %175 = vrot.lane.b32.xlu0 %v12076_v15, %s11980_s15  ;;  %v12103_v30 = vmul.f32 0.5, %v12076_v15 }
  0xe0   :  { %v137_v17 = vpop.f32.mrb[3].mxu0  ;;  %v12083_v20 = vadd.f32 %v10981_v16, %v10097_v12 }
  0xe1   :  { %v12081_v19 = vadd.f32 %v10097_v12, %v137_v17 }
  0xe2   :  { %v12139_v40 = vmul.f32 0.5, %v12083_v20 }
  0xe3   :  { %v10984_v21 = vpop.f32.mrb[4].mxu0  ;;  %332 = vrot.lane.b32.xlu1 %v12081_v19, %s11980_s15  ;;  %254 = vrot.lane.b32.xlu0 %v12079_v18, %s11980_s15  ;;  %v12125_v37 = vmul.f32 0.5, %v12081_v19 }
  0xe4   :  { %v147_v22 = vpop.f32.mrb[5].mxu0  ;;  %v12089_v24 = vadd.f32 %v10984_v21, %v10097_v12 }
  0xe5   :  { %v12087_v23 = vadd.f32 %v10097_v12, %v147_v22 }
  0xe6   :  { %v12154_v42 = vmul.f32 0.5, %v12089_v24 }
  0xe7   :  { %v10987_v25 = vpop.f32.mrb[6].mxu0  ;;  %410 = vrot.lane.b32.xlu1 %v12083_v20, %s11980_s15  ;;  %488 = vrot.lane.b32.xlu0 %v12087_v23, %s11980_s15  ;;  %v12121_v36 = vmul.f32 0.5, %v12087_v23 }
  0xe8   :  { %v157_v26 = vpop.f32.mrb[7].mxu0  ;;  %v12095_v28 = vadd.f32 %v10987_v25, %v10097_v12 }
  0xe9   :  { %v12093_v27 = vadd.f32 %v10097_v12, %v157_v26 }
  0xea   :  { %v12165_v44 = vmul.f32 0.5, %v12095_v28 }
  0xeb   :  { %566 = vrot.lane.b32.xlu1 %v12089_v24, %s11980_s15  ;;  %644 = vrot.lane.b32.xlu0 %v12093_v27, %s11980_s15  ;;  %v12142_v41 = vmul.f32 0.5, %v12093_v27 }
  0xef   :  { %722 = vrot.lane.b32.xlu1 %v12095_v28, %s11980_s15  ;;  %s11995_s15 = smov 64  }
 0x151   :  { %v176_v29 = vpop.permute.xlu0 %175 }
 0x152   :  { %10989 = vmatpush3.xpose.msk.msra.mxu1 %vm177_vm2, %v176_v29 }
 0x153   :  { %10993 = vmatprep.subr.mxu1 %v11978_v11 }
 0x155   :  { %v333_v31 = vpop.permute.xlu1 %332  ;;  %v255_v32 = vpop.permute.xlu0 %254  ;;  %10991 = vmatmul.mubr.msk.f32.vlgmr.msra.gmra.mrb[0].mxu1 %vm177_vm2, %v12103_v30 }
 0x156   :  { %10994 = vmatpush3.xpose.msk.msra.mxu1 %vm177_vm2, %v255_v32  ;;  %10995 = vmatprep.mubr.msk.f32.mxu1 %vm11979_vm1, %v11978_v11 }
 0x157   :  { %10998 = vmatprep.subr.mxu1 %v11978_v11 }
 0x159   :  { %v411_v34 = vpop.permute.xlu1 %410  ;;  %v489_v35 = vpop.permute.xlu0 %488  ;;  %10996 = vmatmul.mubr.msk.f32.vlgmr.msra.gmra.mrb[2].mxu1 %vm177_vm2, %v12111_v33 }
 0x15a   :  { %10999 = vmatpush3.xpose.msk.msra.mxu1 %vm177_vm2, %v333_v31  ;;  %11009 = vmatpush3.xpose.msk.msra.mxu0 %vm177_vm2, %v489_v35 }
 0x15b   :  { %11000 = vmatprep.mubr.msk.f32.mxu1 %vm11979_vm1, %v11978_v11  ;;  %11018 = vmatprep.subr.mxu0 %v11978_v11 }
 0x15c   :  { %11003 = vmatprep.subr.mxu1 %v11978_v11 }
 0x15d   :  { %11011 = vmatmul.mubr.msk.f32.vlgmr.msra.gmra.mrb[8].mxu0 %vm177_vm2, %v12121_v36  ;;  %v645_v38 = vpop.permute.xlu0 %644  ;;  %11001 = vmatmul.mubr.msk.f32.vlgmr.msra.gmra.mrb[4].mxu1 %vm177_vm2, %v12125_v37  ;;  %v567_v39 = vpop.permute.xlu1 %566 }
 0x15e   :  { %11004 = vmatpush3.xpose.msk.msra.mxu1 %vm177_vm2, %v411_v34  ;;  %11019 = vmatpush3.xpose.msk.msra.mxu0 %vm177_vm2, %v645_v38 }
 0x15f   :  { %11005 = vmatprep.mubr.msk.f32.mxu1 %vm11979_vm1, %v11978_v11  ;;  %11020 = vmatprep.mubr.msk.f32.mxu0 %vm11979_vm1, %v11978_v11 }
 0x160   :  { %11013 = vmatprep.subr.mxu1 %v11978_v11  ;;  %11028 = vmatprep.subr.mxu0 %v11978_v11 }
 0x161   :  { %11006 = vmatmul.mubr.msk.f32.vlgmr.msra.gmra.mrb[6].mxu1 %vm177_vm2, %v12139_v40  ;;  %11021 = vmatmul.mubr.msk.f32.vlgmr.msra.gmra.mrb[10].mxu0 %vm177_vm2, %v12142_v41  ;;  %v723_v43 = vpop.permute.xlu1 %722 }
 0x162   :  { %11014 = vmatpush3.xpose.msk.msra.mxu1 %vm177_vm2, %v567_v39  ;;  %11015 = vmatprep.mubr.msk.f32.mxu1 %vm11979_vm1, %v11978_v11 }
 0x163   :  { %11023 = vmatprep.subr.mxu1 %v11978_v11  ;;  %11030 = vmatprep.mubr.msk.f32.mxu0 %vm11979_vm1, %v11978_v11 }
 0x165   :  { %11016 = vmatmul.mubr.msk.f32.vlgmr.msra.gmra.mrb[8].mxu1 %vm177_vm2, %v12154_v42 }
 0x166   :  { %11024 = vmatpush3.xpose.msk.msra.mxu1 %vm177_vm2, %v723_v43  ;;  %11025 = vmatprep.mubr.msk.f32.mxu1 %vm11979_vm1, %v11978_v11 }
 0x167   :  { %11033 = vmatprep.subr.mxu1 %v11978_v11 }
 0x169   :  { %11026 = vmatmul.mubr.msk.f32.vlgmr.msra.gmra.mrb[10].mxu1 %vm177_vm2, %v12165_v44 }
 0x16a   :  { %11035 = vmatprep.mubr.msk.f32.mxu1 %vm11979_vm1, %v11978_v11 }
 0x228   :  { %v249_v45 = vpop.f32.mrb[0].mxu1 }
 0x229   :  { %v10992_v46 = vpop.f32.mrb[1].mxu1  ;;  %v800_v47 = vsel %vm799_vm3, %v249_v45, -inf }
 0x22a   :  { %801 = vmax.xlane.f32.xlu0 %v800_v47 }
 0x22c   :  { %v327_v48 = vpop.f32.mrb[2].mxu1 }
 0x22d   :  { %v10997_v49 = vpop.f32.mrb[3].mxu1  ;;  %v803_v50 = vsel %vm799_vm3, %v327_v48, -inf }
 0x22e   :  { %804 = vmax.xlane.f32.xlu1 %v803_v50 }
 0x230   :  { %v405_v51 = vpop.f32.mrb[4].mxu1  ;;  %v561_v52 = vpop.f32.mrb[8].mxu0 }
 0x231   :  { %v11002_v53 = vpop.f32.mrb[5].mxu1  ;;  %v11012_v54 = vpop.f32.mrb[9].mxu0  ;;  %v812_v55 = vsel %vm799_vm3, %v561_v52, -inf  ;;  %v806_v56 = vsel %vm799_vm3, %v405_v51, -inf }
 0x232   :  { %813 = vmax.xlane.f32.xlu1 %v812_v55  ;;  %807 = vmax.xlane.f32.xlu0 %v806_v56 }
 0x234   :  { %v483_v57 = vpop.f32.mrb[6].mxu1  ;;  %v717_v58 = vpop.f32.mrb[10].mxu0 }
 0x235   :  { %v11007_v59 = vpop.f32.mrb[7].mxu1  ;;  %v11022_v60 = vpop.f32.mrb[11].mxu0  ;;  %v818_v61 = vsel %vm799_vm3, %v717_v58, -inf  ;;  %v809_v62 = vsel %vm799_vm3, %v483_v57, -inf }
 0x236   :  { %819 = vmax.xlane.f32.xlu1 %v818_v61  ;;  %810 = vmax.xlane.f32.xlu0 %v809_v62 }
 0x238   :  { %v639_v63 = vpop.f32.mrb[8].mxu1 }
 0x239   :  { %v11017_v0 = vpop.f32.mrb[9].mxu1  ;;  %v815_v1 = vsel %vm799_vm3, %v639_v63, -inf }
 0x23a   :  { %816 = vmax.xlane.f32.xlu0 %v815_v1 }
 0x23c   :  { %v795_v2 = vpop.f32.mrb[10].mxu1 }
 0x23d   :  { %v11027_v3 = vpop.f32.mrb[11].mxu1  ;;  %v821_v4 = vsel %vm799_vm3, %v795_v2, -inf }
 0x23e   :  { %822 = vmax.xlane.f32.xlu0 %v821_v4 }
 0x247   :  { %888 = vrot.lane.b32.xlu1 %v12076_v15, %s11981_s16 }
 0x24b   :  { %1040 = vrot.lane.b32.xlu1 %v12081_v19, %s11981_s16 }
 0x24f   :  { %1116 = vrot.lane.b32.xlu1 %v12083_v20, %s11981_s16 }
 0x253   :  { %1268 = vrot.lane.b32.xlu1 %v12089_v24, %s11981_s16 }
 0x254   :  { %964 = vrot.lane.b32.xlu0 %v12079_v18, %s11981_s16 }
 0x257   :  { %1420 = vrot.lane.b32.xlu1 %v12095_v28, %s11981_s16 }
 0x258   :  { %1192 = vrot.lane.b32.xlu0 %v12087_v23, %s11981_s16 }
 0x25b   :  { %1576 = vrot.lane.b32.xlu1 %v12079_v18, %s11982_s17 }
 0x25c   :  { %1344 = vrot.lane.b32.xlu0 %v12093_v27, %s11981_s16  ;;  %s11996_s16 = smov 32  }
 0x25f   :  { %1574 = vrot.lane.b32.xlu1 %v12111_v33, %s11983_s18 }
 0x260   :  { %1498 = vrot.lane.b32.xlu0 %v12076_v15, %s11982_s17 }
 0x263   :  { %1732 = vrot.lane.b32.xlu1 %v12083_v20, %s11982_s17 }
 0x264   :  { %1496 = vrot.lane.b32.xlu0 %v12103_v30, %s11983_s18 }
 0x268   :  { %1654 = vrot.lane.b32.xlu0 %v12081_v19, %s11982_s17 }
 0x2b7   :  { %v802_v5 = vpop.xlane.xlu0 %801 }
 0x2b8   :  { %v824_v6 = vsub.f32 %v249_v45, %v802_v5 }
 0x2ba   :  { %v832_v7 = vmul.f32 1.442695, %v824_v6 }
 0x2bb   :  { %v805_v8 = vpop.xlane.xlu1 %804 }
 0x2bc   :  { %11680 = vpow2.f32 %v832_v7  ;;  %v825_v9 = vsub.f32 %v327_v48, %v805_v8 }
 0x2be   :  { %v834_v10 = vmul.f32 1.442695, %v825_v9 }
 0x2bf   :  { %v814_v12 = vpop.xlane.xlu1 %813  ;;  %v808_v13 = vpop.xlane.xlu0 %807 }
 0x2c0   :  { %11682 = vpow2.f32 %v834_v10  ;;  %v828_v14 = vsub.f32 %v561_v52, %v814_v12  ;;  %v826_v16 = vsub.f32 %v405_v51, %v808_v13 }
 0x2c2   :  { %v836_v17 = vmul.f32 1.442695, %v826_v16  ;;  %v840_v21 = vmul.f32 1.442695, %v828_v14 }
 0x2c3   :  { %v820_v22 = vpop.xlane.xlu1 %819  ;;  %v811_v25 = vpop.xlane.xlu0 %810 }
 0x2c4   :  { %v830_v26 = vsub.f32 %v717_v58, %v820_v22  ;;  %v827_v29 = vsub.f32 %v483_v57, %v811_v25  ;;  %11684 = vpow2.f32 %v836_v17 }
 0x2c5   :  { %11686 = vpow2.f32 %v840_v21 }
 0x2c6   :  { %v12200_v31 = vpop.eup %11680  ;;  %v838_v32 = vmul.f32 1.442695, %v827_v29  ;;  %v844_v34 = vmul.f32 1.442695, %v830_v26 }
 0x2c7   :  { %v889_v35 = vpop.permute.xlu1 %888  ;;  %v817_v38 = vpop.xlane.xlu0 %816  ;;  %v848_v39 = vsel %vm799_vm3, %v12200_v31, 0.0 }
 0x2c8   :  { %v829_v43 = vsub.f32 %v639_v63, %v817_v38  ;;  %849 = vadd.xlane.f32.xlu1 %v848_v39  ;;  %11029 = vmatpush3.msra.mxu0 %v889_v35  ;;  %11688 = vpow2.f32 %v838_v32 }
 0x2c9   :  { %11038 = vmatprep.subr.mxu0 %v11978_v11  ;;  %11690 = vpow2.f32 %v844_v34 }
 0x2ca   :  { %v12205_v45 = vpop.eup %11682  ;;  %v842_v46 = vmul.f32 1.442695, %v829_v43 }
 0x2cb   :  { %v823_v47 = vpop.xlane.xlu0 %822  ;;  %v851_v48 = vsel %vm799_vm3, %v12205_v45, 0.0  ;;  %v1041_v0 = vpop.permute.xlu1 %1040 }
 0x2cc   :  { %11692 = vpow2.f32 %v842_v46  ;;  %v831_v49 = vsub.f32 %v795_v2, %v823_v47  ;;  %852 = vadd.xlane.f32.xlu0 %v851_v48 }
 0x2ce   :  { %v846_v50 = vmul.f32 1.442695, %v831_v49  ;;  %v12209_v51 = vpop.eup %11684 }
 0x2cf   :  { %v965_v52 = vpop.permute.xlu0 %964  ;;  %v854_v53 = vsel %vm799_vm3, %v12209_v51, 0.0  ;;  %v12213_v54 = vpop.eup %11686 }
 0x2d0   :  { %11694 = vpow2.f32 %v846_v50  ;;  %11034 = vmatpush3.msra.mxu1 %v965_v52  ;;  %855 = vadd.xlane.f32.xlu1 %v854_v53  ;;  %v860_v56 = vsel %vm799_vm3, %v12213_v54, 0.0  ;;  %v1117_v1 = vpop.permute.xlu1 %1116 }
 0x2d1   :  { %11043 = vmatprep.subr.mxu1 %v11978_v11 }
 0x2d2   :  { %v12216_v55 = vpop.eup %11688 }
 0x2d3   :  { %v857_v57 = vsel %vm799_vm3, %v12216_v55, 0.0  ;;  %v12222_v58 = vpop.eup %11690  ;;  %v1193_v3 = vpop.permute.xlu0 %1192 }
 0x2d4   :  { %861 = vadd.xlane.f32.xlu1 %v860_v56  ;;  %858 = vadd.xlane.f32.xlu0 %v857_v57  ;;  %v866_v61 = vsel %vm799_vm3, %v12222_v58, 0.0  ;;  %v1269_v2 = vpop.permute.xlu1 %1268 }
 0x2d6   :  { %v12224_v59 = vpop.eup %11692 }
 0x2d7   :  { %v863_v60 = vsel %vm799_vm3, %v12224_v59, 0.0  ;;  %v1345_v5 = vpop.permute.xlu0 %1344 }
 0x2d8   :  { %867 = vadd.xlane.f32.xlu1 %v866_v61  ;;  %864 = vadd.xlane.f32.xlu0 %v863_v60  ;;  %v12254_v4 = vpop.permute.xlu1 %1420 }
 0x2da   :  { %v12230_v62 = vpop.eup %11694 }
 0x2db   :  { %v869_v63 = vsel %vm799_vm3, %v12230_v62, 0.0  ;;  %v12258_v7 = vpop.permute.xlu0 %1498 }
 0x2dc   :  { %870 = vadd.xlane.f32.xlu0 %v869_v63  ;;  %v12256_v6 = vpop.permute.xlu1 %1576 }
 0x2df   :  { %v12262_v9 = vpop.permute.xlu0 %1496 }
 0x2e0   :  { %v12260_v8 = vpop.permute.xlu1 %1574 }
 0x2e3   :  { %v12266_v12 = vpop.permute.xlu0 %1654 }
 0x2e4   :  { %v12264_v10 = vpop.permute.xlu1 %1732 }
 0x2e9   :  { %1730 = vrot.lane.b32.xlu1 %v12139_v40, %s11983_s18 }
 0x2ed   :  { %1888 = vrot.lane.b32.xlu1 %v12089_v24, %s11982_s17 }
 0x2f1   :  { %1886 = vrot.lane.b32.xlu1 %v12154_v42, %s11983_s18 }
 0x2f2   :  { %1652 = vrot.lane.b32.xlu0 %v12125_v37, %s11983_s18 }
 0x2f5   :  { %2044 = vrot.lane.b32.xlu1 %v12095_v28, %s11982_s17 }
 0x2f6   :  { %1810 = vrot.lane.b32.xlu0 %v12087_v23, %s11982_s17 }
 0x2f9   :  { %2042 = vrot.lane.b32.xlu1 %v12165_v44, %s11983_s18 }
 0x2fa   :  { %1808 = vrot.lane.b32.xlu0 %v12121_v36, %s11983_s18 }
 0x2fe   :  { %1966 = vrot.lane.b32.xlu0 %v12093_v27, %s11982_s17 }
 0x302   :  { %1964 = vrot.lane.b32.xlu0 %v12142_v41, %s11983_s18 }
 0x355   :  { %v850_v13 = vpop.xlane.xlu1 %849 }
 0x356   :  { %11696 = vrcp.f32 %v850_v13 }
 0x359   :  { %v853_v14 = vpop.xlane.xlu0 %852 }
 0x35a   :  { %11698 = vrcp.f32 %v853_v14 }
 0x35d   :  { %v856_v16 = vpop.xlane.xlu1 %855 }
 0x35e   :  { %11700 = vrcp.f32 %v856_v16 }
 0x360   :  { %v11697_v17 = vpop.eup %11696 }
 0x361   :  { %v880_v21 = vmul.f32 %v11697_v17, %v12200_v31  ;;  %v862_v22 = vpop.xlane.xlu1 %861  ;;  %v859_v25 = vpop.xlane.xlu0 %858 }
 0x362   :  { %11702 = vrcp.f32 %v862_v22 }
 0x363   :  { %11031 = vmatmul.mubr.msk.f32.vlgmr.msra.gmra.mrb[12].mxu0 %vm799_vm3, %v880_v21  ;;  %11704 = vrcp.f32 %v859_v25 }
 0x364   :  { %v11699_v26 = vpop.eup %11698  ;;  %11039 = vmatpush3.msra.mxu0 %v1041_v0  ;;  %11040 = vmatprep.mubr.msk.f32.mxu0 %vm11979_vm1, %v11978_v11 }
 0x365   :  { %v881_v29 = vmul.f32 %v11699_v26, %v12205_v45  ;;  %11048 = vmatprep.subr.mxu0 %v11978_v11  ;;  %v868_v32 = vpop.xlane.xlu1 %867  ;;  %v865_v34 = vpop.xlane.xlu0 %864 }
 0x366   :  { %11706 = vrcp.f32 %v868_v32 }
 0x367   :  { %11036 = vmatmul.mubr.msk.f32.vlgmr.msra.gmra.mrb[12].mxu1 %vm799_vm3, %v881_v29  ;;  %11708 = vrcp.f32 %v865_v34 }
 0x368   :  { %11044 = vmatpush3.msra.mxu1 %v1117_v1  ;;  %11045 = vmatprep.mubr.msk.f32.mxu1 %vm11979_vm1, %v11978_v11  ;;  %v11701_v31 = vpop.eup %11700 }
 0x369   :  { %11053 = vmatprep.subr.mxu1 %v11978_v11  ;;  %v871_v35 = vpop.xlane.xlu0 %870  ;;  %v882_v38 = vmul.f32 %v11701_v31, %v12209_v51  ;;  %v1731_v51 = vpop.permute.xlu1 %1730 }
 0x36a   :  { %11710 = vrcp.f32 %v871_v35 }
 0x36b   :  { %11041 = vmatmul.mubr.msk.f32.vlgmr.msra.gmra.mrb[14].mxu0 %vm799_vm3, %v882_v38 }
 0x36c   :  { %v11703_v39 = vpop.eup %11702  ;;  %11049 = vmatpush3.msra.mxu0 %v1193_v3  ;;  %11050 = vmatprep.mubr.msk.f32.mxu0 %vm11979_vm1, %v11978_v11 }
 0x36d   :  { %v11705_v43 = vpop.eup %11704  ;;  %v1653_v45 = vpop.permute.xlu0 %1652  ;;  %11058 = vmatprep.subr.mxu0 %v11978_v11  ;;  %v884_v46 = vmul.f32 %v11703_v39, %v12213_v54 }
 0x36e   :  { %v883_v47 = vmul.f32 %v11705_v43, %v12216_v55  ;;  %v1889_v56 = vpop.permute.xlu1 %1888 }
 0x36f   :  { %11051 = vmatmul.mubr.msk.f32.vlgmr.msra.gmra.mrb[16].mxu0 %vm799_vm3, %v884_v46 }
 0x370   :  { %v11707_v48 = vpop.eup %11706  ;;  %11046 = vmatmul.mubr.msk.f32.vlgmr.msra.gmra.mrb[14].mxu1 %vm799_vm3, %v883_v47  ;;  %11059 = vmatpush3.msra.mxu0 %v1345_v5 }
 0x371   :  { %v11709_v49 = vpop.eup %11708  ;;  %11054 = vmatpush3.msra.mxu1 %v1269_v2  ;;  %11055 = vmatprep.mubr.msk.f32.mxu1 %vm11979_vm1, %v11978_v11  ;;  %v886_v50 = vmul.f32 %v11707_v48, %v12222_v58  ;;  %v1811_v53 = vpop.permute.xlu0 %1810 }
 0x372   :  { %11060 = vmatprep.mubr.msk.f32.mxu0 %vm11979_vm1, %v11978_v11  ;;  %11063 = vmatprep.subr.mxu1 %v11978_v11  ;;  %v885_v52 = vmul.f32 %v11709_v49, %v12224_v59  ;;  %v1887_v58 = vpop.permute.xlu1 %1886 }
 0x373   :  { %11061 = vmatmul.mubr.msk.f32.vlgmr.msra.gmra.mrb[18].mxu0 %vm799_vm3, %v886_v50  ;;  %11068 = vmatprep.subr.mxu0 %v11978_v11 }
 0x374   :  { %v11711_v54 = vpop.eup %11710  ;;  %11056 = vmatmul.mubr.msk.f32.vlgmr.msra.gmra.mrb[16].mxu1 %vm799_vm3, %v885_v52  ;;  %11070 = vmatprep.mubr.msk.f32.mxu0 %vm11979_vm1, %v11978_v11 }
 0x375   :  { %11064 = vmatpush3.msra.mxu1 %v12254_v4  ;;  %11065 = vmatprep.mubr.msk.f32.mxu1 %vm11979_vm1, %v11978_v11  ;;  %v887_v55 = vmul.f32 %v11711_v54, %v12230_v62  ;;  %v1809_v57 = vpop.permute.xlu0 %1808 }
 0x376   :  { %11073 = vmatprep.subr.mxu1 %v11978_v11  ;;  %v2045_v60 = vpop.permute.xlu1 %2044 }
 0x377   :  { %11069 = vmatpush3.xpose.msk.msra.mxu0 %vm177_vm2, %v12258_v7 }
 0x378   :  { %11066 = vmatmul.mubr.msk.f32.vlgmr.msra.gmra.mrb[18].mxu1 %vm799_vm3, %v887_v55  ;;  %11078 = vmatprep.subr.mxu0 %v11978_v11 }
 0x379   :  { %11075 = vmatprep.mubr.msk.f32.mxu1 %vm11979_vm1, %v11978_v11  ;;  %v1967_v59 = vpop.permute.xlu0 %1966 }
 0x37a   :  { %11071 = vmatmul.mubr.msk.f32.vlgmr.msra.gmra.mrb[20].mxu0 %vm177_vm2, %v12262_v9  ;;  %v2043_v62 = vpop.permute.xlu1 %2042 }
 0x37b   :  { %11079 = vmatpush3.xpose.msk.msra.mxu0 %vm177_vm2, %v12266_v12  ;;  %11080 = vmatprep.mubr.msk.f32.mxu0 %vm11979_vm1, %v11978_v11 }
 0x37c   :  { %11074 = vmatpush3.xpose.msk.msra.mxu1 %vm177_vm2, %v12256_v6  ;;  %11088 = vmatprep.subr.mxu0 %v11978_v11 }
 0x37d   :  { %11083 = vmatprep.subr.mxu1 %v11978_v11  ;;  %v1965_v61 = vpop.permute.xlu0 %1964 }
 0x37e   :  { %11081 = vmatmul.mubr.msk.f32.vlgmr.msra.gmra.mrb[22].mxu0 %vm177_vm2, %v1653_v45 }
 0x37f   :  { %11076 = vmatmul.mubr.msk.f32.vlgmr.msra.gmra.mrb[20].mxu1 %vm177_vm2, %v12260_v8  ;;  %11089 = vmatpush3.xpose.msk.msra.mxu0 %vm177_vm2, %v1811_v53 }
 0x380   :  { %11084 = vmatpush3.xpose.msk.msra.mxu1 %vm177_vm2, %v12264_v10  ;;  %11085 = vmatprep.mubr.msk.f32.mxu1 %vm11979_vm1, %v11978_v11 }
 0x381   :  { %11090 = vmatprep.mubr.msk.f32.mxu0 %vm11979_vm1, %v11978_v11  ;;  %11093 = vmatprep.subr.mxu1 %v11978_v11 }
 0x382   :  { %11091 = vmatmul.mubr.msk.f32.vlgmr.msra.gmra.mrb[24].mxu0 %vm177_vm2, %v1809_v57  ;;  %11098 = vmatprep.subr.mxu0 %v11978_v11 }
 0x383   :  { %11086 = vmatmul.mubr.msk.f32.vlgmr.msra.gmra.mrb[22].mxu1 %vm177_vm2, %v1731_v51  ;;  %11099 = vmatpush3.xpose.msk.msra.mxu0 %vm177_vm2, %v1967_v59 }
 0x384   :  { %11094 = vmatpush3.xpose.msk.msra.mxu1 %vm177_vm2, %v1889_v56  ;;  %11095 = vmatprep.mubr.msk.f32.mxu1 %vm11979_vm1, %v11978_v11 }
 0x385   :  { %11100 = vmatprep.mubr.msk.f32.mxu0 %vm11979_vm1, %v11978_v11  ;;  %11103 = vmatprep.subr.mxu1 %v11978_v11 }
 0x386   :  { %11101 = vmatmul.mubr.msk.f32.vlgmr.msra.gmra.mrb[26].mxu0 %vm177_vm2, %v1965_v61  ;;  %11108 = vmatprep.subr.mxu0 %v11978_v11 }
 0x387   :  { %11096 = vmatmul.mubr.msk.f32.vlgmr.msra.gmra.mrb[24].mxu1 %vm177_vm2, %v1887_v58  ;;  %11110 = vmatprep.mubr.msk.f32.mxu0 %vm11979_vm1, %v11978_v11 }
 0x388   :  { %11104 = vmatpush3.xpose.msk.msra.mxu1 %vm177_vm2, %v2045_v60  ;;  %11105 = vmatprep.mubr.msk.f32.mxu1 %vm11979_vm1, %v11978_v11 }
 0x389   :  { %11113 = vmatprep.subr.mxu1 %v11978_v11 }
 0x38b   :  { %11106 = vmatmul.mubr.msk.f32.vlgmr.msra.gmra.mrb[26].mxu1 %vm177_vm2, %v2043_v62 }
 0x38c   :  { %11115 = vmatprep.mubr.msk.f32.mxu1 %vm11979_vm1, %v11978_v11 }
 0x436   :  { %v12353_v63 = vpop.f32.mrb[12].mxu0 }
 0x437   :  { %v11032_v0 = vpop.f32.mrb[13].mxu0 }
 0x43a   :  { %v12355_v1 = vpop.f32.mrb[12].mxu1 }
 0x43b   :  { %v11037_v2 = vpop.f32.mrb[13].mxu1 }
 0x43e   :  { %v12357_v3 = vpop.f32.mrb[14].mxu0 }
 0x43f   :  { %v11042_v4 = vpop.f32.mrb[15].mxu0 }
 0x442   :  { %v12359_v5 = vpop.f32.mrb[16].mxu0 }
 0x443   :  { %v12361_v6 = vpop.f32.mrb[14].mxu1  ;;  %v11052_v7 = vpop.f32.mrb[17].mxu0 }
 0x444   :  { %v11047_v8 = vpop.f32.mrb[15].mxu1 }
 0x446   :  { %v12363_v9 = vpop.f32.mrb[18].mxu0 }
 0x447   :  { %v12365_v10 = vpop.f32.mrb[16].mxu1  ;;  %v11062_v12 = vpop.f32.mrb[19].mxu0 }
 0x448   :  { %v11057_v13 = vpop.f32.mrb[17].mxu1 }
 0x44b   :  { %v12367_v14 = vpop.f32.mrb[18].mxu1 }
 0x44c   :  { %v11067_v16 = vpop.f32.mrb[19].mxu1 }
 0x44d   :  { %v1570_v17 = vpop.f32.mrb[20].mxu0 }
 0x44e   :  { %v11072_v21 = vpop.f32.mrb[21].mxu0  ;;  %v2120_v22 = vsel %vm799_vm3, %v1570_v17, -inf }
 0x44f   :  { %2121 = vmax.xlane.f32.xlu0 %v2120_v22 }
 0x451   :  { %v1726_v25 = vpop.f32.mrb[22].mxu0 }
 0x452   :  { %v1648_v26 = vpop.f32.mrb[20].mxu1  ;;  %v11082_v29 = vpop.f32.mrb[23].mxu0  ;;  %v2126_v32 = vsel %vm799_vm3, %v1726_v25, -inf }
 0x453   :  { %v11077_v34 = vpop.f32.mrb[21].mxu1  ;;  %2127 = vmax.xlane.f32.xlu0 %v2126_v32  ;;  %v2123_v31 = vsel %vm799_vm3, %v1648_v26, -inf }
 0x454   :  { %2124 = vmax.xlane.f32.xlu1 %v2123_v31 }
 0x455   :  { %v1882_v35 = vpop.f32.mrb[24].mxu0 }
 0x456   :  { %v1804_v38 = vpop.f32.mrb[22].mxu1  ;;  %v11092_v39 = vpop.f32.mrb[25].mxu0  ;;  %v2132_v43 = vsel %vm799_vm3, %v1882_v35, -inf }
 0x457   :  { %v11087_v45 = vpop.f32.mrb[23].mxu1  ;;  %v2129_v46 = vsel %vm799_vm3, %v1804_v38, -inf }
 0x458   :  { %2133 = vmax.xlane.f32.xlu1 %v2132_v43  ;;  %2130 = vmax.xlane.f32.xlu0 %v2129_v46 }
 0x459   :  { %v12374_v47 = vpop.f32.mrb[26].mxu0 }
 0x45a   :  { %v1960_v48 = vpop.f32.mrb[24].mxu1  ;;  %v11102_v49 = vpop.f32.mrb[27].mxu0  ;;  %v2138_v55 = vsel %vm799_vm3, %v12374_v47, -inf }
 0x45b   :  { %v11097_v50 = vpop.f32.mrb[25].mxu1  ;;  %v2135_v51 = vsel %vm799_vm3, %v1960_v48, -inf }
 0x45c   :  { %2136 = vmax.xlane.f32.xlu0 %v2135_v51 }
 0x45e   :  { %v2116_v52 = vpop.f32.mrb[26].mxu1 }
 0x45f   :  { %v11107_v53 = vpop.f32.mrb[27].mxu1  ;;  %v2141_v54 = vsel %vm799_vm3, %v2116_v52, -inf }
 0x460   :  { %2142 = vmax.xlane.f32.xlu0 %v2141_v54 }
 0x469   :  { %2208 = vrot.lane.b32.xlu1 %v12076_v15, %s11984_s19 }
 0x476   :  { %2284 = vrot.lane.b32.xlu0 %v12079_v18, %s11984_s19 }
 0x47a   :  { %2512 = vrot.lane.b32.xlu0 %v12087_v23, %s11984_s19 }
 0x47e   :  { %2664 = vrot.lane.b32.xlu0 %v12093_v27, %s11984_s19 }
 0x482   :  { %2818 = vrot.lane.b32.xlu0 %v12076_v15, %s11985_s20 }
 0x486   :  { %2816 = vrot.lane.b32.xlu0 %v12103_v30, %s11986_s21 }
 0x48a   :  { %2974 = vrot.lane.b32.xlu0 %v12081_v19, %s11985_s20 }
 0x48d   :  { %2139 = vmax.xlane.f32.xlu1 %v2138_v55 }
 0x49e   :  { %2360 = vrot.lane.b32.xlu1 %v12081_v19, %s11984_s19 }
 0x4a2   :  { %2436 = vrot.lane.b32.xlu1 %v12083_v20, %s11984_s19 }
 0x4a6   :  { %2588 = vrot.lane.b32.xlu1 %v12089_v24, %s11984_s19 }
 0x4aa   :  { %2740 = vrot.lane.b32.xlu1 %v12095_v28, %s11984_s19 }
 0x4ae   :  { %2896 = vrot.lane.b32.xlu1 %v12079_v18, %s11985_s20 }
 0x4b2   :  { %2894 = vrot.lane.b32.xlu1 %v12111_v33, %s11986_s21 }
 0x4b6   :  { %3052 = vrot.lane.b32.xlu1 %v12083_v20, %s11985_s20 }
 0x4dc   :  { %v2122_v56 = vpop.xlane.xlu0 %2121 }
 0x4dd   :  { %v2144_v57 = vsub.f32 %v1570_v17, %v2122_v56 }
 0x4df   :  { %v2152_v58 = vmul.f32 1.442695, %v2144_v57 }
 0x4e0   :  { %v2128_v59 = vpop.xlane.xlu0 %2127 }
 0x4e1   :  { %11712 = vpow2.f32 %v2152_v58  ;;  %v2146_v60 = vsub.f32 %v1726_v25, %v2128_v59  ;;  %v2125_v61 = vpop.xlane.xlu1 %2124 }
 0x4e2   :  { %v2145_v62 = vsub.f32 %v1648_v26, %v2125_v61 }
 0x4e3   :  { %v2156_v0 = vmul.f32 1.442695, %v2146_v60 }
 0x4e4   :  { %v2154_v2 = vmul.f32 1.442695, %v2145_v62 }
 0x4e5   :  { %11714 = vpow2.f32 %v2156_v0  ;;  %v2134_v4 = vpop.xlane.xlu1 %2133  ;;  %v2131_v7 = vpop.xlane.xlu0 %2130 }
 0x4e6   :  { %11716 = vpow2.f32 %v2154_v2  ;;  %v2148_v8 = vsub.f32 %v1882_v35, %v2134_v4  ;;  %v2147_v12 = vsub.f32 %v1804_v38, %v2131_v7 }
 0x4e8   :  { %v2160_v13 = vmul.f32 1.442695, %v2148_v8  ;;  %v2158_v16 = vmul.f32 1.442695, %v2147_v12 }
 0x4e9   :  { %v2209_v21 = vpop.permute.xlu1 %2208  ;;  %v2137_v22 = vpop.xlane.xlu0 %2136 }
 0x4ea   :  { %11718 = vpow2.f32 %v2160_v13  ;;  %v2149_v17 = vsub.f32 %v1960_v48, %v2137_v22  ;;  %11109 = vmatpush3.msra.mxu0 %v2209_v21 }
 0x4eb   :  { %v12400_v29 = vpop.eup %11712  ;;  %11720 = vpow2.f32 %v2158_v16  ;;  %11118 = vmatprep.subr.mxu0 %v11978_v11 }
 0x4ec   :  { %v2162_v25 = vmul.f32 1.442695, %v2149_v17  ;;  %v2168_v26 = vsel %vm799_vm3, %v12400_v29, 0.0 }
 0x4ed   :  { %v2143_v32 = vpop.xlane.xlu0 %2142  ;;  %2169 = vadd.xlane.f32.xlu1 %v2168_v26 }
 0x4ee   :  { %11722 = vpow2.f32 %v2162_v25  ;;  %v2151_v34 = vsub.f32 %v2116_v52, %v2143_v32 }
 0x4ef   :  { %v12405_v31 = vpop.eup %11714 }
 0x4f0   :  { %v12407_v35 = vpop.eup %11716  ;;  %v2166_v38 = vmul.f32 1.442695, %v2151_v34  ;;  %v2174_v39 = vsel %vm799_vm3, %v12405_v31, 0.0 }
 0x4f1   :  { %v2285_v43 = vpop.permute.xlu0 %2284  ;;  %2175 = vadd.xlane.f32.xlu1 %v2174_v39  ;;  %v2171_v45 = vsel %vm799_vm3, %v12407_v35, 0.0 }
 0x4f2   :  { %11724 = vpow2.f32 %v2166_v38  ;;  %2172 = vadd.xlane.f32.xlu0 %v2171_v45  ;;  %11114 = vmatpush3.msra.mxu1 %v2285_v43 }
 0x4f3   :  { %11123 = vmatprep.subr.mxu1 %v11978_v11 }
 0x4f4   :  { %v12414_v46 = vpop.eup %11718 }
 0x4f5   :  { %v12416_v48 = vpop.eup %11720  ;;  %v2180_v49 = vsel %vm799_vm3, %v12414_v46, 0.0  ;;  %v2513_v62 = vpop.permute.xlu0 %2512 }
 0x4f6   :  { %2181 = vadd.xlane.f32.xlu1 %v2180_v49  ;;  %v2177_v50 = vsel %vm799_vm3, %v12416_v48, 0.0 }
 0x4f7   :  { %2178 = vadd.xlane.f32.xlu0 %v2177_v50 }
 0x4f8   :  { %v12422_v51 = vpop.eup %11722 }
 0x4f9   :  { %v2183_v52 = vsel %vm799_vm3, %v12422_v51, 0.0  ;;  %v2665_v2 = vpop.permute.xlu0 %2664 }
 0x4fb   :  { %2184 = vadd.xlane.f32.xlu0 %v2183_v52 }
 0x4fc   :  { %v12426_v53 = vpop.eup %11724 }
 0x4fd   :  { %v2189_v54 = vsel %vm799_vm3, %v12426_v53, 0.0  ;;  %v12467_v7 = vpop.permute.xlu0 %2818 }
 0x4ff   :  { %2190 = vadd.xlane.f32.xlu0 %v2189_v54 }
 0x501   :  { %v12469_v12 = vpop.permute.xlu0 %2816 }
 0x505   :  { %v12471_v21 = vpop.permute.xlu0 %2974 }
 0x515   :  { %2972 = vrot.lane.b32.xlu0 %v12125_v37, %s11986_s21 }
 0x519   :  { %3130 = vrot.lane.b32.xlu0 %v12087_v23, %s11985_s20 }
 0x51a   :  { %v2140_v55 = vpop.xlane.xlu1 %2139 }
 0x51b   :  { %v2150_v56 = vsub.f32 %v12374_v47, %v2140_v55 }
 0x51d   :  { %v2164_v57 = vmul.f32 1.442695, %v2150_v56  ;;  %3128 = vrot.lane.b32.xlu0 %v12121_v36, %s11986_s21 }
 0x51e   :  { %v2361_v59 = vpop.permute.xlu1 %2360 }
 0x51f   :  { %11726 = vpow2.f32 %v2164_v57 }
 0x521   :  { %3286 = vrot.lane.b32.xlu0 %v12093_v27, %s11985_s20 }
 0x522   :  { %v2437_v60 = vpop.permute.xlu1 %2436 }
 0x525   :  { %3284 = vrot.lane.b32.xlu0 %v12142_v41, %s11986_s21 }
 0x526   :  { %v2589_v61 = vpop.permute.xlu1 %2588 }
 0x529   :  { %v12441_v58 = vpop.eup %11726  ;;  %3604 = vrot.lane.b32.xlu0 %v12079_v18, %s11987_s22 }
 0x52a   :  { %v2186_v47 = vsel %vm799_vm3, %v12441_v58, 0.0  ;;  %v2741_v0 = vpop.permute.xlu1 %2740 }
 0x52b   :  { %2187 = vadd.xlane.f32.xlu1 %v2186_v47 }
 0x52d   :  { %3832 = vrot.lane.b32.xlu0 %v12087_v23, %s11987_s22 }
 0x52e   :  { %v2897_v4 = vpop.permute.xlu1 %2896 }
 0x532   :  { %v2895_v8 = vpop.permute.xlu1 %2894 }
 0x536   :  { %v3053_v13 = vpop.permute.xlu1 %3052 }
 0x53c   :  { %3050 = vrot.lane.b32.xlu1 %v12139_v40, %s11986_s21 }
 0x540   :  { %3208 = vrot.lane.b32.xlu1 %v12089_v24, %s11985_s20 }
 0x544   :  { %3206 = vrot.lane.b32.xlu1 %v12154_v42, %s11986_s21 }
 0x548   :  { %3364 = vrot.lane.b32.xlu1 %v12095_v28, %s11985_s20 }
 0x54c   :  { %3362 = vrot.lane.b32.xlu1 %v12165_v44, %s11986_s21 }
 0x550   :  { %3528 = vrot.lane.b32.xlu1 %v12076_v15, %s11987_s22 }
 0x554   :  { %3680 = vrot.lane.b32.xlu1 %v12081_v19, %s11987_s22 }
 0x558   :  { %3756 = vrot.lane.b32.xlu1 %v12083_v20, %s11987_s22 }
 0x55c   :  { %3908 = vrot.lane.b32.xlu1 %v12089_v24, %s11987_s22 }
 0x57a   :  { %v2170_v16 = vpop.xlane.xlu1 %2169 }
 0x57b   :  { %11728 = vrcp.f32 %v2170_v16 }
 0x57e   :  { %v2176_v22 = vpop.xlane.xlu1 %2175 }
 0x57f   :  { %11730 = vrcp.f32 %v2176_v22  ;;  %v2173_v17 = vpop.xlane.xlu0 %2172 }
 0x580   :  { %11732 = vrcp.f32 %v2173_v17 }
 0x583   :  { %v2182_v25 = vpop.xlane.xlu1 %2181 }
 0x584   :  { %11734 = vrcp.f32 %v2182_v25  ;;  %v2179_v26 = vpop.xlane.xlu0 %2178 }
 0x585   :  { %v11729_v32 = vpop.eup %11728  ;;  %11736 = vrcp.f32 %v2179_v26 }
 0x586   :  { %v2200_v34 = vmul.f32 %v11729_v32, %v12400_v29 }
 0x588   :  { %v2185_v38 = vpop.xlane.xlu0 %2184  ;;  %11111 = vmatmul.mubr.msk.f32.vlgmr.msra.gmra.mrb[28].mxu0 %vm799_vm3, %v2200_v34 }
 0x589   :  { %v11731_v39 = vpop.eup %11730  ;;  %11738 = vrcp.f32 %v2185_v38  ;;  %11119 = vmatpush3.msra.mxu0 %v2361_v59  ;;  %11120 = vmatprep.mubr.msk.f32.mxu0 %vm11979_vm1, %v11978_v11 }
 0x58a   :  { %v11733_v43 = vpop.eup %11732  ;;  %11128 = vmatprep.subr.mxu0 %v11978_v11  ;;  %v2202_v45 = vmul.f32 %v11731_v39, %v12405_v31 }
 0x58b   :  { %v2201_v49 = vmul.f32 %v11733_v43, %v12407_v35 }
 0x58c   :  { %v2191_v50 = vpop.xlane.xlu0 %2190  ;;  %11121 = vmatmul.mubr.msk.f32.vlgmr.msra.gmra.mrb[30].mxu0 %vm799_vm3, %v2202_v45 }
 0x58d   :  { %11740 = vrcp.f32 %v2191_v50  ;;  %11116 = vmatmul.mubr.msk.f32.vlgmr.msra.gmra.mrb[28].mxu1 %vm799_vm3, %v2201_v49  ;;  %11129 = vmatpush3.msra.mxu0 %v2513_v62 }
 0x58e   :  { %v11735_v29 = vpop.eup %11734  ;;  %11124 = vmatpush3.msra.mxu1 %v2437_v60  ;;  %11125 = vmatprep.mubr.msk.f32.mxu1 %vm11979_vm1, %v11978_v11 }
 0x58f   :  { %v11737_v52 = vpop.eup %11736  ;;  %11130 = vmatprep.mubr.msk.f32.mxu0 %vm11979_vm1, %v11978_v11  ;;  %11133 = vmatprep.subr.mxu1 %v11978_v11  ;;  %v2204_v31 = vmul.f32 %v11735_v29, %v12414_v46 }
 0x590   :  { %11138 = vmatprep.subr.mxu0 %v11978_v11  ;;  %v2203_v35 = vmul.f32 %v11737_v52, %v12416_v48 }
 0x591   :  { %11131 = vmatmul.mubr.msk.f32.vlgmr.msra.gmra.mrb[32].mxu0 %vm799_vm3, %v2204_v31 }
 0x592   :  { %11126 = vmatmul.mubr.msk.f32.vlgmr.msra.gmra.mrb[30].mxu1 %vm799_vm3, %v2203_v35  ;;  %11139 = vmatpush3.msra.mxu0 %v2665_v2 }
 0x593   :  { %v11739_v54 = vpop.eup %11738  ;;  %11134 = vmatpush3.msra.mxu1 %v2589_v61  ;;  %11135 = vmatprep.mubr.msk.f32.mxu1 %vm11979_vm1, %v11978_v11 }
 0x594   :  { %11143 = vmatprep.subr.mxu1 %v11978_v11  ;;  %v2205_v55 = vmul.f32 %v11739_v54, %v12422_v51  ;;  %11140 = vmatprep.mubr.msk.f32.mxu0 %vm11979_vm1, %v11978_v11  ;;  %v2973_v51 = vpop.permute.xlu0 %2972 }
 0x595   :  { %11148 = vmatprep.subr.mxu0 %v11978_v11 }
 0x596   :  { %11136 = vmatmul.mubr.msk.f32.vlgmr.msra.gmra.mrb[32].mxu1 %vm799_vm3, %v2205_v55 }
 0x597   :  { %v11741_v46 = vpop.eup %11740  ;;  %11144 = vmatpush3.msra.mxu1 %v2741_v0  ;;  %11145 = vmatprep.mubr.msk.f32.mxu1 %vm11979_vm1, %v11978_v11 }
 0x598   :  { %v2207_v48 = vmul.f32 %v11741_v46, %v12426_v53  ;;  %11153 = vmatprep.subr.mxu1 %v11978_v11  ;;  %v3131_v53 = vpop.permute.xlu0 %3130 }
 0x59a   :  { %11146 = vmatmul.mubr.msk.f32.vlgmr.msra.gmra.mrb[34].mxu1 %vm799_vm3, %v2207_v48 }
 0x59b   :  { %11155 = vmatprep.mubr.msk.f32.mxu1 %vm11979_vm1, %v11978_v11 }
 0x59c   :  { %v3129_v57 = vpop.permute.xlu0 %3128 }
 0x59e   :  { %11154 = vmatpush3.xpose.msk.msra.mxu1 %vm177_vm2, %v2897_v4 }
 0x59f   :  { %11163 = vmatprep.subr.mxu1 %v11978_v11 }
 0x5a0   :  { %v3287_v60 = vpop.permute.xlu0 %3286 }
 0x5a1   :  { %11156 = vmatmul.mubr.msk.f32.vlgmr.msra.gmra.mrb[36].mxu1 %vm177_vm2, %v2895_v8 }
 0x5a2   :  { %11164 = vmatpush3.xpose.msk.msra.mxu1 %vm177_vm2, %v3053_v13  ;;  %11165 = vmatprep.mubr.msk.f32.mxu1 %vm11979_vm1, %v11978_v11 }
 0x5a3   :  { %11173 = vmatprep.subr.mxu1 %v11978_v11 }
 0x5a4   :  { %v3285_v2 = vpop.permute.xlu0 %3284 }
 0x5b8   :  { %v2188_v56 = vpop.xlane.xlu1 %2187 }
 0x5b9   :  { %11742 = vrcp.f32 %v2188_v56 }
 0x5bc   :  { %v3051_v47 = vpop.permute.xlu1 %3050 }
 0x5bd   :  { %11166 = vmatmul.mubr.msk.f32.vlgmr.msra.gmra.mrb[38].mxu1 %vm177_vm2, %v3051_v47 }
 0x5be   :  { %11175 = vmatprep.mubr.msk.f32.mxu1 %vm11979_vm1, %v11978_v11 }
 0x5c0   :  { %v3209_v59 = vpop.permute.xlu1 %3208 }
 0x5c1   :  { %11174 = vmatpush3.xpose.msk.msra.mxu1 %vm177_vm2, %v3209_v59 }
 0x5c2   :  { %11183 = vmatprep.subr.mxu1 %v11978_v11 }
 0x5c3   :  { %v11743_v61 = vpop.eup %11742 }
 0x5c4   :  { %v3207_v62 = vpop.permute.xlu1 %3206  ;;  %v2206_v0 = vmul.f32 %v11743_v61, %v12441_v58 }
 0x5c5   :  { %11176 = vmatmul.mubr.msk.f32.vlgmr.msra.gmra.mrb[40].mxu1 %vm177_vm2, %v3207_v62 }
 0x5c6   :  { %11141 = vmatmul.mubr.msk.f32.vlgmr.msra.gmra.mrb[34].mxu0 %vm799_vm3, %v2206_v0  ;;  %11185 = vmatprep.mubr.msk.f32.mxu1 %vm11979_vm1, %v11978_v11 }
 0x5c7   :  { %11149 = vmatpush3.xpose.msk.msra.mxu0 %vm177_vm2, %v12467_v7  ;;  %11150 = vmatprep.mubr.msk.f32.mxu0 %vm11979_vm1, %v11978_v11  ;;  %v3605_v7 = vpop.permute.xlu0 %3604 }
 0x5c8   :  { %v3365_v4 = vpop.permute.xlu1 %3364  ;;  %11158 = vmatprep.subr.mxu0 %v11978_v11 }
 0x5c9   :  { %11184 = vmatpush3.xpose.msk.msra.mxu1 %vm177_vm2, %v3365_v4 }
 0x5ca   :  { %11151 = vmatmul.mubr.msk.f32.vlgmr.msra.gmra.mrb[36].mxu0 %vm177_vm2, %v12469_v12  ;;  %11193 = vmatprep.subr.mxu1 %v11978_v11 }
 0x5cb   :  { %11159 = vmatpush3.xpose.msk.msra.mxu0 %vm177_vm2, %v12471_v21  ;;  %11160 = vmatprep.mubr.msk.f32.mxu0 %vm11979_vm1, %v11978_v11 }
 0x5cc   :  { %v3363_v58 = vpop.permute.xlu1 %3362  ;;  %11168 = vmatprep.subr.mxu0 %v11978_v11 }
 0x5cd   :  { %11186 = vmatmul.mubr.msk.f32.vlgmr.msra.gmra.mrb[42].mxu1 %vm177_vm2, %v3363_v58 }
 0x5ce   :  { %11194 = vmatpush3.msra.mxu1 %v3605_v7  ;;  %11161 = vmatmul.mubr.msk.f32.vlgmr.msra.gmra.mrb[38].mxu0 %vm177_vm2, %v2973_v51 }
 0x5cf   :  { %11169 = vmatpush3.xpose.msk.msra.mxu0 %vm177_vm2, %v3131_v53  ;;  %11170 = vmatprep.mubr.msk.f32.mxu0 %vm11979_vm1, %v11978_v11 }
 0x5d0   :  { %11178 = vmatprep.subr.mxu0 %v11978_v11  ;;  %11195 = vmatprep.mubr.msk.f32.mxu1 %vm11979_vm1, %v11978_v11  ;;  %v3529_v8 = vpop.permute.xlu1 %3528 }
 0x5d1   :  { %11203 = vmatprep.subr.mxu1 %v11978_v11 }
 0x5d2   :  { %11171 = vmatmul.mubr.msk.f32.vlgmr.msra.gmra.mrb[40].mxu0 %vm177_vm2, %v3129_v57 }
 0x5d3   :  { %11179 = vmatpush3.xpose.msk.msra.mxu0 %vm177_vm2, %v3287_v60  ;;  %11180 = vmatprep.mubr.msk.f32.mxu0 %vm11979_vm1, %v11978_v11 }
 0x5d4   :  { %11188 = vmatprep.subr.mxu0 %v11978_v11 }
 0x5d6   :  { %11181 = vmatmul.mubr.msk.f32.vlgmr.msra.gmra.mrb[42].mxu0 %vm177_vm2, %v3285_v2 }
 0x5d7   :  { %11189 = vmatpush3.msra.mxu0 %v3529_v8  ;;  %11190 = vmatprep.mubr.msk.f32.mxu0 %vm11979_vm1, %v11978_v11 }
 0x5d8   :  { %11198 = vmatprep.subr.mxu0 %v11978_v11 }
 0x65b   :  { %v12556_v12 = vpop.f32.mrb[28].mxu0 }
 0x65c   :  { %v11112_v13 = vpop.f32.mrb[29].mxu0 }
 0x65f   :  { %v12558_v16 = vpop.f32.mrb[30].mxu0 }
 0x660   :  { %v12560_v21 = vpop.f32.mrb[28].mxu1  ;;  %v11122_v22 = vpop.f32.mrb[31].mxu0 }
 0x661   :  { %v11117_v17 = vpop.f32.mrb[29].mxu1  ;;  %v12587_v22 = vpop.permute.xlu1 %3680 }
 0x664   :  { %v12562_v25 = vpop.f32.mrb[32].mxu0 }
 0x665   :  { %v12564_v26 = vpop.f32.mrb[30].mxu1  ;;  %v11132_v32 = vpop.f32.mrb[33].mxu0 }
 0x666   :  { %v11127_v34 = vpop.f32.mrb[31].mxu1  ;;  %v12589_v17 = vpop.permute.xlu1 %3756 }
 0x669   :  { %v12566_v38 = vpop.f32.mrb[32].mxu1 }
 0x66a   :  { %v11137_v39 = vpop.f32.mrb[33].mxu1  ;;  %v12591_v32 = vpop.permute.xlu1 %3908 }
 0x66d   :  { %v12568_v43 = vpop.f32.mrb[34].mxu1 }
 0x66e   :  { %v11147_v45 = vpop.f32.mrb[35].mxu1 }
 0x674   :  { %v2968_v49 = vpop.f32.mrb[36].mxu1 }
 0x675   :  { %v11157_v50 = vpop.f32.mrb[37].mxu1  ;;  %v3443_v29 = vsel %vm799_vm3, %v2968_v49, -inf }
 0x676   :  { %3444 = vmax.xlane.f32.xlu1 %v3443_v29 }
 0x690   :  { %v3124_v52 = vpop.f32.mrb[38].mxu1 }
 0x691   :  { %v11167_v31 = vpop.f32.mrb[39].mxu1  ;;  %v3449_v2 = vsel %vm799_vm3, %v3124_v52, -inf }
 0x692   :  { %v12597_v31 = vpop.permute.xlu0 %3832 }
 0x698   :  { %v3280_v35 = vpop.f32.mrb[40].mxu1 }
 0x699   :  { %v12571_v54 = vpop.f32.mrb[34].mxu0  ;;  %v11177_v55 = vpop.f32.mrb[41].mxu1  ;;  %v3455_v8 = vsel %vm799_vm3, %v3280_v35, -inf }
 0x69a   :  { %v11142_v46 = vpop.f32.mrb[35].mxu0 }
 0x69d   :  { %v2890_v48 = vpop.f32.mrb[36].mxu0 }
 0x69e   :  { %v11152_v51 = vpop.f32.mrb[37].mxu0  ;;  %v3440_v53 = vsel %vm799_vm3, %v2890_v48, -inf }
 0x69f   :  { %3441 = vmax.xlane.f32.xlu0 %v3440_v53 }
 0x6a0   :  { %v12574_v56 = vpop.f32.mrb[42].mxu1 }
 0x6a1   :  { %v3046_v57 = vpop.f32.mrb[38].mxu0  ;;  %v11187_v47 = vpop.f32.mrb[43].mxu1  ;;  %v3461_v13 = vsel %vm799_vm3, %v12574_v56, -inf }
 0x6a2   :  { %v11162_v59 = vpop.f32.mrb[39].mxu0  ;;  %v3446_v60 = vsel %vm799_vm3, %v3046_v57, -inf }
 0x6a3   :  { %3447 = vmax.xlane.f32.xlu0 %v3446_v60 }
 0x6a5   :  { %v3202_v61 = vpop.f32.mrb[40].mxu0 }
 0x6a6   :  { %v11172_v62 = vpop.f32.mrb[41].mxu0  ;;  %v3452_v0 = vsel %vm799_vm3, %v3202_v61, -inf }
 0x6a7   :  { %3453 = vmax.xlane.f32.xlu1 %v3452_v0  ;;  %3450 = vmax.xlane.f32.xlu0 %v3449_v2 }
 0x6a9   :  { %v3358_v4 = vpop.f32.mrb[42].mxu0 }
 0x6aa   :  { %v11182_v58 = vpop.f32.mrb[43].mxu0  ;;  %v3458_v7 = vsel %vm799_vm3, %v3358_v4, -inf }
 0x6ab   :  { %3459 = vmax.xlane.f32.xlu1 %v3458_v7  ;;  %3456 = vmax.xlane.f32.xlu0 %v3455_v8 }
 0x6af   :  { %3462 = vmax.xlane.f32.xlu0 %v3461_v13 }
 0x6bc   :  { %4060 = vrot.lane.b32.xlu1 %v12095_v28, %s11987_s22 }
 0x6c5   :  { %3984 = vrot.lane.b32.xlu0 %v12093_v27, %s11987_s22 }
 0x703   :  { %v3445_v34 = vpop.xlane.xlu1 %3444 }
 0x704   :  { %v3465_v39 = vsub.f32 %v2968_v49, %v3445_v34 }
 0x706   :  { %v3474_v45 = vmul.f32 1.442695, %v3465_v39 }
 0x708   :  { %11744 = vpow2.f32 %v3474_v45 }
 0x712   :  { %v12593_v50 = vpop.eup %11744 }
 0x713   :  { %v3491_v29 = vsel %vm799_vm3, %v12593_v50, 0.0 }
 0x714   :  { %3492 = vadd.xlane.f32.xlu0 %v3491_v29 }
 0x72c   :  { %v3442_v55 = vpop.xlane.xlu0 %3441 }
 0x72d   :  { %v3464_v46 = vsub.f32 %v2890_v48, %v3442_v55 }
 0x72f   :  { %v3472_v51 = vmul.f32 1.442695, %v3464_v46 }
 0x730   :  { %v3448_v53 = vpop.xlane.xlu0 %3447 }
 0x731   :  { %11746 = vpow2.f32 %v3472_v51  ;;  %v3466_v47 = vsub.f32 %v3046_v57, %v3448_v53 }
 0x733   :  { %v3476_v59 = vmul.f32 1.442695, %v3466_v47 }
 0x734   :  { %v3454_v60 = vpop.xlane.xlu1 %3453  ;;  %v3451_v62 = vpop.xlane.xlu0 %3450 }
 0x735   :  { %11748 = vpow2.f32 %v3476_v59  ;;  %v3468_v49 = vsub.f32 %v3202_v61, %v3454_v60  ;;  %v3467_v0 = vsub.f32 %v3124_v52, %v3451_v62 }
 0x737   :  { %v3480_v2 = vmul.f32 1.442695, %v3468_v49  ;;  %v3478_v58 = vmul.f32 1.442695, %v3467_v0 }
 0x738   :  { %v3457_v7 = vpop.xlane.xlu0 %3456  ;;  %v3460_v46 = vpop.xlane.xlu1 %3459 }
 0x739   :  { %11750 = vpow2.f32 %v3480_v2  ;;  %v3469_v8 = vsub.f32 %v3280_v35, %v3457_v7  ;;  %v3470_v51 = vsub.f32 %v3358_v4, %v3460_v46 }
 0x73a   :  { %11752 = vpow2.f32 %v3478_v58 }
 0x73b   :  { %v12599_v13 = vpop.eup %11746  ;;  %v3482_v34 = vmul.f32 1.442695, %v3469_v8  ;;  %v3484_v47 = vmul.f32 1.442695, %v3470_v51 }
 0x73c   :  { %v3488_v48 = vsel %vm799_vm3, %v12599_v13, 0.0  ;;  %v3463_v53 = vpop.xlane.xlu0 %3462 }
 0x73d   :  { %3489 = vadd.xlane.f32.xlu1 %v3488_v48  ;;  %11754 = vpow2.f32 %v3482_v34  ;;  %v3471_v59 = vsub.f32 %v12574_v56, %v3463_v53 }
 0x73e   :  { %11756 = vpow2.f32 %v3484_v47 }
 0x73f   :  { %v12603_v57 = vpop.eup %11748  ;;  %v3486_v60 = vmul.f32 1.442695, %v3471_v59 }
 0x740   :  { %v3494_v61 = vsel %vm799_vm3, %v12603_v57, 0.0  ;;  %v3985_v56 = vpop.permute.xlu0 %3984 }
 0x741   :  { %3495 = vadd.xlane.f32.xlu1 %v3494_v61  ;;  %11758 = vpow2.f32 %v3486_v60 }
 0x743   :  { %v12607_v52 = vpop.eup %11750 }
 0x744   :  { %v12609_v39 = vpop.eup %11752  ;;  %v3500_v35 = vsel %vm799_vm3, %v12607_v52, 0.0 }
 0x745   :  { %3501 = vadd.xlane.f32.xlu1 %v3500_v35  ;;  %v3497_v45 = vsel %vm799_vm3, %v12609_v39, 0.0 }
 0x746   :  { %3498 = vadd.xlane.f32.xlu0 %v3497_v45 }
 0x747   :  { %v12615_v29 = vpop.eup %11754 }
 0x748   :  { %v3503_v55 = vsel %vm799_vm3, %v12615_v29, 0.0  ;;  %v12624_v62 = vpop.eup %11756 }
 0x749   :  { %v3506_v49 = vsel %vm799_vm3, %v12624_v62, 0.0 }
 0x74a   :  { %3504 = vadd.xlane.f32.xlu0 %v3503_v55 }
 0x74b   :  { %v12628_v0 = vpop.eup %11758 }
 0x74c   :  { %v3509_v2 = vsel %vm799_vm3, %v12628_v0, 0.0 }
 0x756   :  { %4216 = vrot.lane.b32.xlu1 %v12079_v18, %s11988_s23 }
 0x760   :  { %4138 = vrot.lane.b32.xlu0 %v12076_v15, %s11988_s23 }
 0x77a   :  { %3507 = vadd.xlane.f32.xlu1 %v3506_v49 }
 0x77f   :  { %3510 = vadd.xlane.f32.xlu0 %v3509_v2 }
 0x78b   :  { %4214 = vrot.lane.b32.xlu1 %v12111_v33, %s11989_s24 }
 0x78f   :  { %4372 = vrot.lane.b32.xlu1 %v12083_v20, %s11988_s23 }
 0x793   :  { %4370 = vrot.lane.b32.xlu1 %v12139_v40, %s11989_s24 }
 0x795   :  { %4136 = vrot.lane.b32.xlu0 %v12103_v30, %s11989_s24 }
 0x797   :  { %4528 = vrot.lane.b32.xlu1 %v12089_v24, %s11988_s23 }
 0x799   :  { %4294 = vrot.lane.b32.xlu0 %v12081_v19, %s11988_s23 }
 0x79b   :  { %4526 = vrot.lane.b32.xlu1 %v12154_v42, %s11989_s24 }
 0x79d   :  { %4292 = vrot.lane.b32.xlu0 %v12125_v37, %s11989_s24 }
 0x79f   :  { %4684 = vrot.lane.b32.xlu1 %v12095_v28, %s11988_s23 }
 0x7a1   :  { %v3493_v33 = vpop.xlane.xlu0 %3492  ;;  %4450 = vrot.lane.b32.xlu0 %v12087_v23, %s11988_s23 }
 0x7a2   :  { %11760 = vrcp.f32 %v3493_v33 }
 0x7a3   :  { %4682 = vrot.lane.b32.xlu1 %v12165_v44, %s11989_s24 }
 0x7a5   :  { %4448 = vrot.lane.b32.xlu0 %v12121_v36, %s11989_s24  ;;  %v4061_v36 = vpop.permute.xlu1 %4060 }
 0x7a7   :  { %4848 = vrot.lane.b32.xlu1 %v12076_v15, %s11990_s25 }
 0x7a9   :  { %4606 = vrot.lane.b32.xlu0 %v12093_v27, %s11988_s23 }
 0x7ac   :  { %v11761_v30 = vpop.eup %11760 }
 0x7ad   :  { %4604 = vrot.lane.b32.xlu0 %v12142_v41, %s11989_s24  ;;  %v3521_v37 = vmul.f32 %v11761_v30, %v12593_v50 }
 0x7af   :  { %11196 = vmatmul.mubr.msk.f32.vlgmr.msra.gmra.mrb[44].mxu1 %vm799_vm3, %v3521_v37 }
 0x7b0   :  { %11204 = vmatpush3.msra.mxu1 %v12589_v17  ;;  %11205 = vmatprep.mubr.msk.f32.mxu1 %vm11979_vm1, %v11978_v11 }
 0x7b1   :  { %11213 = vmatprep.subr.mxu1 %v11978_v11 }
 0x7ca   :  { %v3490_v40 = vpop.xlane.xlu1 %3489 }
 0x7cb   :  { %11762 = vrcp.f32 %v3490_v40 }
 0x7ce   :  { %v3496_v15 = vpop.xlane.xlu1 %3495 }
 0x7cf   :  { %11764 = vrcp.f32 %v3496_v15 }
 0x7d2   :  { %v3502_v42 = vpop.xlane.xlu1 %3501 }
 0x7d3   :  { %11766 = vrcp.f32 %v3502_v42  ;;  %v3499_v44 = vpop.xlane.xlu0 %3498 }
 0x7d4   :  { %11768 = vrcp.f32 %v3499_v44 }
 0x7d5   :  { %v11763_v41 = vpop.eup %11762 }
 0x7d6   :  { %v3520_v4 = vmul.f32 %v11763_v41, %v12599_v13 }
 0x7d7   :  { %v3505_v50 = vpop.xlane.xlu0 %3504 }
 0x7d8   :  { %11770 = vrcp.f32 %v3505_v50  ;;  %11191 = vmatmul.mubr.msk.f32.vlgmr.msra.gmra.mrb[44].mxu0 %vm799_vm3, %v3520_v4 }
 0x7d9   :  { %v11765_v17 = vpop.eup %11764  ;;  %11199 = vmatpush3.msra.mxu0 %v12587_v22  ;;  %11200 = vmatprep.mubr.msk.f32.mxu0 %vm11979_vm1, %v11978_v11 }
 0x7da   :  { %11208 = vmatprep.subr.mxu0 %v11978_v11  ;;  %v3522_v58 = vmul.f32 %v11765_v17, %v12603_v57 }
 0x7db   :  { %v4139_v57 = vpop.permute.xlu0 %4138 }
 0x7dc   :  { %11201 = vmatmul.mubr.msk.f32.vlgmr.msra.gmra.mrb[46].mxu0 %vm799_vm3, %v3522_v58 }
 0x7dd   :  { %v11767_v7 = vpop.eup %11766  ;;  %11209 = vmatpush3.msra.mxu0 %v12597_v31  ;;  %11210 = vmatprep.mubr.msk.f32.mxu0 %vm11979_vm1, %v11978_v11 }
 0x7de   :  { %v11769_v8 = vpop.eup %11768  ;;  %11218 = vmatprep.subr.mxu0 %v11978_v11  ;;  %v3524_v22 = vmul.f32 %v11767_v7, %v12607_v52 }
 0x7df   :  { %v3523_v13 = vmul.f32 %v11769_v8, %v12609_v39 }
 0x7e0   :  { %11211 = vmatmul.mubr.msk.f32.vlgmr.msra.gmra.mrb[48].mxu0 %vm799_vm3, %v3524_v22 }
 0x7e1   :  { %11206 = vmatmul.mubr.msk.f32.vlgmr.msra.gmra.mrb[46].mxu1 %vm799_vm3, %v3523_v13  ;;  %11219 = vmatpush3.msra.mxu0 %v3985_v56 }
 0x7e2   :  { %v11771_v34 = vpop.eup %11770  ;;  %11214 = vmatpush3.msra.mxu1 %v12591_v32  ;;  %11215 = vmatprep.mubr.msk.f32.mxu1 %vm11979_vm1, %v11978_v11  ;;  %v4217_v32 = vpop.permute.xlu1 %4216 }
 0x7e3   :  { %11223 = vmatprep.subr.mxu1 %v11978_v11  ;;  %v3525_v31 = vmul.f32 %v11771_v34, %v12615_v29  ;;  %11220 = vmatprep.mubr.msk.f32.mxu0 %vm11979_vm1, %v11978_v11 }
 0x7e4   :  { %11228 = vmatprep.subr.mxu0 %v11978_v11 }
 0x7e5   :  { %11216 = vmatmul.mubr.msk.f32.vlgmr.msra.gmra.mrb[48].mxu1 %vm799_vm3, %v3525_v31 }
 0x7e6   :  { %11224 = vmatpush3.msra.mxu1 %v4061_v36  ;;  %11225 = vmatprep.mubr.msk.f32.mxu1 %vm11979_vm1, %v11978_v11 }
 0x7e7   :  { %11233 = vmatprep.subr.mxu1 %v11978_v11 }
 0x807   :  { %v3508_v48 = vpop.xlane.xlu1 %3507 }
 0x808   :  { %11772 = vrcp.f32 %v3508_v48 }
 0x80b   :  { %v4215_v61 = vpop.permute.xlu1 %4214 }
 0x80c   :  { %v3511_v52 = vpop.xlane.xlu0 %3510 }
 0x80d   :  { %11774 = vrcp.f32 %v3511_v52 }
 0x80f   :  { %v4373_v39 = vpop.permute.xlu1 %4372 }
 0x810   :  { %v4137_v35 = vpop.permute.xlu0 %4136 }
 0x812   :  { %v11773_v45 = vpop.eup %11772 }
 0x813   :  { %v4371_v29 = vpop.permute.xlu1 %4370  ;;  %v3526_v55 = vmul.f32 %v11773_v45, %v12624_v62 }
 0x814   :  { %v4295_v46 = vpop.permute.xlu0 %4294 }
 0x815   :  { %11221 = vmatmul.mubr.msk.f32.vlgmr.msra.gmra.mrb[50].mxu0 %vm799_vm3, %v3526_v55 }
 0x816   :  { %11229 = vmatpush3.xpose.msk.msra.mxu0 %vm177_vm2, %v4139_v57  ;;  %11230 = vmatprep.mubr.msk.f32.mxu0 %vm11979_vm1, %v11978_v11 }
 0x817   :  { %v11775_v51 = vpop.eup %11774  ;;  %v4529_v53 = vpop.permute.xlu1 %4528  ;;  %11238 = vmatprep.subr.mxu0 %v11978_v11 }
 0x818   :  { %v4293_v47 = vpop.permute.xlu0 %4292  ;;  %v3527_v59 = vmul.f32 %v11775_v51, %v12628_v0 }
 0x819   :  { %11231 = vmatmul.mubr.msk.f32.vlgmr.msra.gmra.mrb[52].mxu0 %vm177_vm2, %v4137_v35 }
 0x81a   :  { %11226 = vmatmul.mubr.msk.f32.vlgmr.msra.gmra.mrb[50].mxu1 %vm799_vm3, %v3527_v59  ;;  %11239 = vmatpush3.xpose.msk.msra.mxu0 %vm177_vm2, %v4295_v46 }
 0x81b   :  { %11234 = vmatpush3.xpose.msk.msra.mxu1 %vm177_vm2, %v4217_v32  ;;  %v4527_v60 = vpop.permute.xlu1 %4526  ;;  %11235 = vmatprep.mubr.msk.f32.mxu1 %vm11979_vm1, %v11978_v11 }
 0x81c   :  { %v4451_v62 = vpop.permute.xlu0 %4450  ;;  %11240 = vmatprep.mubr.msk.f32.mxu0 %vm11979_vm1, %v11978_v11  ;;  %11243 = vmatprep.subr.mxu1 %v11978_v11 }
 0x81d   :  { %11248 = vmatprep.subr.mxu0 %v11978_v11  ;;  %11241 = vmatmul.mubr.msk.f32.vlgmr.msra.gmra.mrb[54].mxu0 %vm177_vm2, %v4293_v47 }
 0x81e   :  { %11236 = vmatmul.mubr.msk.f32.vlgmr.msra.gmra.mrb[52].mxu1 %vm177_vm2, %v4215_v61  ;;  %11249 = vmatpush3.xpose.msk.msra.mxu0 %vm177_vm2, %v4451_v62 }
 0x81f   :  { %11244 = vmatpush3.xpose.msk.msra.mxu1 %vm177_vm2, %v4373_v39  ;;  %v4685_v49 = vpop.permute.xlu1 %4684  ;;  %11245 = vmatprep.mubr.msk.f32.mxu1 %vm11979_vm1, %v11978_v11 }
 0x820   :  { %v4449_v0 = vpop.permute.xlu0 %4448  ;;  %11250 = vmatprep.mubr.msk.f32.mxu0 %vm11979_vm1, %v11978_v11  ;;  %11253 = vmatprep.subr.mxu1 %v11978_v11 }
 0x821   :  { %11251 = vmatmul.mubr.msk.f32.vlgmr.msra.gmra.mrb[56].mxu0 %vm177_vm2, %v4449_v0  ;;  %11258 = vmatprep.subr.mxu0 %v11978_v11 }
 0x822   :  { %11246 = vmatmul.mubr.msk.f32.vlgmr.msra.gmra.mrb[54].mxu1 %vm177_vm2, %v4371_v29  ;;  %11260 = vmatprep.mubr.msk.f32.mxu0 %vm11979_vm1, %v11978_v11 }
 0x823   :  { %11254 = vmatpush3.xpose.msk.msra.mxu1 %vm177_vm2, %v4529_v53  ;;  %v4683_v2 = vpop.permute.xlu1 %4682  ;;  %11255 = vmatprep.mubr.msk.f32.mxu1 %vm11979_vm1, %v11978_v11 }
 0x824   :  { %v4607_v56 = vpop.permute.xlu0 %4606  ;;  %11263 = vmatprep.subr.mxu1 %v11978_v11 }
 0x825   :  { %11259 = vmatpush3.xpose.msk.msra.mxu0 %vm177_vm2, %v4607_v56 }
 0x826   :  { %11256 = vmatmul.mubr.msk.f32.vlgmr.msra.gmra.mrb[56].mxu1 %vm177_vm2, %v4527_v60  ;;  %11268 = vmatprep.subr.mxu0 %v11978_v11 }
 0x827   :  { %11264 = vmatpush3.xpose.msk.msra.mxu1 %vm177_vm2, %v4685_v49  ;;  %v4849_v33 = vpop.permute.xlu1 %4848  ;;  %11265 = vmatprep.mubr.msk.f32.mxu1 %vm11979_vm1, %v11978_v11 }
 0x828   :  { %v4605_v30 = vpop.permute.xlu0 %4604  ;;  %11273 = vmatprep.subr.mxu1 %v11978_v11 }
 0x829   :  { %11261 = vmatmul.mubr.msk.f32.vlgmr.msra.gmra.mrb[58].mxu0 %vm177_vm2, %v4605_v30 }
 0x82a   :  { %11269 = vmatpush3.msra.mxu0 %v4849_v33  ;;  %11266 = vmatmul.mubr.msk.f32.vlgmr.msra.gmra.mrb[58].mxu1 %vm177_vm2, %v4683_v2 }
 0x82b   :  { %11270 = vmatprep.mubr.msk.f32.mxu0 %vm11979_vm1, %v11978_v11  ;;  %11278 = vmatprep.subr.mxu0 %v11978_v11 }
 0x82c   :  { %11275 = vmatprep.mubr.msk.f32.mxu1 %vm11979_vm1, %v11978_v11 }
 0x882   :  { %v12737_v37 = vpop.f32.mrb[44].mxu1 }
 0x883   :  { %v11197_v36 = vpop.f32.mrb[45].mxu1 }
 0x8ab   :  { %v12739_v40 = vpop.f32.mrb[44].mxu0 }
 0x8ac   :  { %v11192_v15 = vpop.f32.mrb[45].mxu0 }
 0x8af   :  { %v12741_v42 = vpop.f32.mrb[46].mxu0 }
 0x8b0   :  { %v11202_v44 = vpop.f32.mrb[47].mxu0 }
 0x8b3   :  { %v12743_v41 = vpop.f32.mrb[48].mxu0 }
 0x8b4   :  { %v12745_v4 = vpop.f32.mrb[46].mxu1  ;;  %v11212_v50 = vpop.f32.mrb[49].mxu0 }
 0x8b5   :  { %v11207_v17 = vpop.f32.mrb[47].mxu1 }
 0x8b8   :  { %v12747_v58 = vpop.f32.mrb[48].mxu1 }
 0x8b9   :  { %v11217_v7 = vpop.f32.mrb[49].mxu1 }
 0x8e8   :  { %v12749_v8 = vpop.f32.mrb[50].mxu0 }
 0x8e9   :  { %v11222_v22 = vpop.f32.mrb[51].mxu0 }
 0x8ec   :  { %v4210_v13 = vpop.f32.mrb[52].mxu0 }
 0x8ed   :  { %v12751_v34 = vpop.f32.mrb[50].mxu1  ;;  %v11232_v31 = vpop.f32.mrb[53].mxu0  ;;  %v4760_v32 = vsel %vm799_vm3, %v4210_v13, -inf }
 0x8ee   :  { %v11227_v48 = vpop.f32.mrb[51].mxu1  ;;  %4761 = vmax.xlane.f32.xlu0 %v4760_v32 }
 0x8f0   :  { %v4366_v57 = vpop.f32.mrb[54].mxu0 }
 0x8f1   :  { %v4288_v61 = vpop.f32.mrb[52].mxu1  ;;  %v11242_v52 = vpop.f32.mrb[55].mxu0  ;;  %v4766_v39 = vsel %vm799_vm3, %v4366_v57, -inf }
 0x8f2   :  { %v11237_v35 = vpop.f32.mrb[53].mxu1  ;;  %4767 = vmax.xlane.f32.xlu0 %v4766_v39  ;;  %v4763_v45 = vsel %vm799_vm3, %v4288_v61, -inf }
 0x8f3   :  { %4764 = vmax.xlane.f32.xlu1 %v4763_v45 }
 0x8f4   :  { %v4522_v29 = vpop.f32.mrb[56].mxu0 }
 0x8f5   :  { %v4444_v55 = vpop.f32.mrb[54].mxu1  ;;  %v11252_v46 = vpop.f32.mrb[57].mxu0  ;;  %v4772_v51 = vsel %vm799_vm3, %v4522_v29, -inf }
 0x8f6   :  { %v11247_v53 = vpop.f32.mrb[55].mxu1  ;;  %v4769_v47 = vsel %vm799_vm3, %v4444_v55, -inf }
 0x8f7   :  { %4773 = vmax.xlane.f32.xlu1 %v4772_v51  ;;  %4770 = vmax.xlane.f32.xlu0 %v4769_v47 }
 0x8f9   :  { %v4600_v59 = vpop.f32.mrb[56].mxu1 }
 0x8fa   :  { %v11257_v60 = vpop.f32.mrb[57].mxu1  ;;  %v4775_v62 = vsel %vm799_vm3, %v4600_v59, -inf }
 0x8fb   :  { %4776 = vmax.xlane.f32.xlu0 %v4775_v62 }
 0x8fc   :  { %v4678_v49 = vpop.f32.mrb[58].mxu0 }
 0x8fd   :  { %v11262_v0 = vpop.f32.mrb[59].mxu0  ;;  %v4756_v2 = vpop.f32.mrb[58].mxu1  ;;  %v4778_v56 = vsel %vm799_vm3, %v4678_v49, -inf }
 0x8fe   :  { %4779 = vmax.xlane.f32.xlu1 %v4778_v56  ;;  %v11267_v33 = vpop.f32.mrb[59].mxu1  ;;  %v4781_v30 = vsel %vm799_vm3, %v4756_v2, -inf }
 0x8ff   :  { %4782 = vmax.xlane.f32.xlu0 %v4781_v30 }
 0x90f   :  { %5000 = vrot.lane.b32.xlu1 %v12081_v19, %s11990_s25 }
 0x913   :  { %5076 = vrot.lane.b32.xlu1 %v12083_v20, %s11990_s25 }
 0x915   :  { %4924 = vrot.lane.b32.xlu0 %v12079_v18, %s11990_s25 }
 0x97b   :  { %v4762_v36 = vpop.xlane.xlu0 %4761 }
 0x97c   :  { %v4784_v15 = vsub.f32 %v4210_v13, %v4762_v36 }
 0x97e   :  { %v4792_v44 = vmul.f32 1.442695, %v4784_v15 }
 0x97f   :  { %v4768_v50 = vpop.xlane.xlu0 %4767 }
 0x980   :  { %11776 = vpow2.f32 %v4792_v44  ;;  %v4786_v17 = vsub.f32 %v4366_v57, %v4768_v50  ;;  %v4765_v7 = vpop.xlane.xlu1 %4764 }
 0x981   :  { %v4785_v22 = vsub.f32 %v4288_v61, %v4765_v7 }
 0x982   :  { %v4796_v31 = vmul.f32 1.442695, %v4786_v17 }
 0x983   :  { %v4794_v32 = vmul.f32 1.442695, %v4785_v22 }
 0x984   :  { %11778 = vpow2.f32 %v4796_v31  ;;  %v4771_v48 = vpop.xlane.xlu0 %4770  ;;  %v4774_v53 = vpop.xlane.xlu1 %4773 }
 0x985   :  { %11780 = vpow2.f32 %v4794_v32  ;;  %v4787_v19 = vsub.f32 %v4444_v55, %v4771_v48  ;;  %v4788_v47 = vsub.f32 %v4522_v29, %v4774_v53  ;;  %v5578_v53 = vld [vmem:[%s14507_s2 + $0x19] sm:$0xff] }
 0x987   :  { %v4798_v52 = vmul.f32 1.442695, %v4787_v19  ;;  %v4800_v62 = vmul.f32 1.442695, %v4788_v47 }
 0x988   :  { %v4777_v39 = vpop.xlane.xlu0 %4776 }
 0x989   :  { %11782 = vpow2.f32 %v4798_v52  ;;  %v4789_v56 = vsub.f32 %v4600_v59, %v4777_v39 }
 0x98a   :  { %v12767_v20 = vpop.eup %11776  ;;  %11784 = vpow2.f32 %v4800_v62 }
 0x98b   :  { %v4808_v18 = vsel %vm799_vm3, %v12767_v20, 0.0  ;;  %v4780_v60 = vpop.xlane.xlu1 %4779  ;;  %v4802_v30 = vmul.f32 1.442695, %v4789_v56 }
 0x98c   :  { %v4783_v13 = vpop.xlane.xlu0 %4782  ;;  %4809 = vadd.xlane.f32.xlu1 %v4808_v18  ;;  %v4790_v0 = vsub.f32 %v4678_v49, %v4780_v60 }
 0x98d   :  { %v4791_v36 = vsub.f32 %v4756_v2, %v4783_v13 }
 0x98e   :  { %v12771_v35 = vpop.eup %11778  ;;  %v4804_v33 = vmul.f32 1.442695, %v4790_v0 }
 0x98f   :  { %v12773_v57 = vpop.eup %11780  ;;  %v4814_v61 = vsel %vm799_vm3, %v12771_v35, 0.0  ;;  %v4806_v15 = vmul.f32 1.442695, %v4791_v36 }
 0x990   :  { %v4925_v45 = vpop.permute.xlu0 %4924  ;;  %4815 = vadd.xlane.f32.xlu1 %v4814_v61  ;;  %v4811_v55 = vsel %vm799_vm3, %v12773_v57, 0.0  ;;  %11786 = vpow2.f32 %v4804_v33 }
 0x991   :  { %4812 = vadd.xlane.f32.xlu0 %v4811_v55  ;;  %11274 = vmatpush3.msra.mxu1 %v4925_v45  ;;  %11788 = vpow2.f32 %v4802_v30 }
 0x992   :  { %11283 = vmatprep.subr.mxu1 %v11978_v11  ;;  %11790 = vpow2.f32 %v4806_v15 }
 0x993   :  { %v12780_v46 = vpop.eup %11782 }
 0x994   :  { %v4817_v51 = vsel %vm799_vm3, %v12780_v46, 0.0  ;;  %v12788_v44 = vpop.eup %11784 }
 0x995   :  { %4818 = vadd.xlane.f32.xlu0 %v4817_v51  ;;  %v5577_v51 = vld [vmem:[%s14507_s2 + $0x11] sm:$0xff] }
 0x996   :  { %v11512_v47 = vpack.c.bf16 %v5578_v53, %v5577_v51 }
 0x99a   :  { %v12792_v50 = vpop.eup %11786 }
 0x99b   :  { %v4826_v29 = vsel %vm799_vm3, %v12792_v50, 0.0 }
 0x9a1   :  { %5228 = vrot.lane.b32.xlu1 %v12089_v24, %s11990_s25  ;;  %v4820_v24 = vsel %vm799_vm3, %v12788_v44, 0.0 }
 0x9ab   :  { %5152 = vrot.lane.b32.xlu0 %v12087_v23, %s11990_s25  ;;  %v12794_v23 = vpop.eup %11788 }
 0x9ac   :  { %v4823_v59 = vsel %vm799_vm3, %v12794_v23, 0.0  ;;  %v12800_v49 = vpop.eup %11790 }
 0x9ad   :  { %v4829_v2 = vsel %vm799_vm3, %v12800_v49, 0.0 }
 0x9c5   :  { %4821 = vadd.xlane.f32.xlu1 %v4820_v24 }
 0x9c9   :  { %4827 = vadd.xlane.f32.xlu1 %v4826_v29 }
 0x9ca   :  { %4824 = vadd.xlane.f32.xlu0 %v4823_v59 }
 0x9ce   :  { %4830 = vadd.xlane.f32.xlu0 %v4829_v2 }
 0x9da   :  { %5380 = vrot.lane.b32.xlu1 %v12095_v28, %s11990_s25 }
 0x9de   :  { %5466 = vrot.lane.b32.xlu1 %v12560_v21, %s11991_s26 }
 0x9e2   :  { %5498 = vrot.lane.b32.xlu1 %v12737_v37, %s11992_s27 }
 0x9e4   :  { %5304 = vrot.lane.b32.xlu0 %v12093_v27, %s11990_s25  ;;  %v5001_v27 = vpop.permute.xlu1 %5000 }
 0x9e6   :  { %5470 = vrot.lane.b32.xlu1 %v12564_v26, %s11991_s26 }
 0x9e8   :  { %5464 = vrot.lane.b32.xlu0 %v12556_v12, %s11991_s26  ;;  %v5077_v28 = vpop.permute.xlu1 %5076 }
 0x9ea   :  { %5502 = vrot.lane.b32.xlu1 %v12745_v4, %s11992_s27 }
 0x9ec   :  { %5496 = vrot.lane.b32.xlu0 %v12739_v40, %s11992_s27 }
 0x9ee   :  { %5474 = vrot.lane.b32.xlu1 %v12566_v38, %s11991_s26 }
 0x9f0   :  { %5468 = vrot.lane.b32.xlu0 %v12558_v16, %s11991_s26 }
 0x9f4   :  { %5500 = vrot.lane.b32.xlu0 %v12741_v42, %s11992_s27 }
 0x9f8   :  { %5472 = vrot.lane.b32.xlu0 %v12562_v25, %s11991_s26 }
 0xa19   :  { %v4810_v12 = vpop.xlane.xlu1 %4809 }
 0xa1a   :  { %11792 = vrcp.f32 %v4810_v12 }
 0xa1d   :  { %v4816_v21 = vpop.xlane.xlu1 %4815 }
 0xa1e   :  { %11794 = vrcp.f32 %v4816_v21  ;;  %v4813_v26 = vpop.xlane.xlu0 %4812 }
 0xa1f   :  { %11796 = vrcp.f32 %v4813_v26 }
 0xa21   :  { %v5229_v31 = vpop.permute.xlu1 %5228 }
 0xa22   :  { %v4819_v37 = vpop.xlane.xlu0 %4818 }
 0xa23   :  { %11798 = vrcp.f32 %v4819_v37 }
 0xa24   :  { %v11793_v40 = vpop.eup %11792 }
 0xa25   :  { %v4840_v38 = vmul.f32 %v11793_v40, %v12767_v20 }
 0xa26   :  { %v5153_v17 = vpop.permute.xlu0 %5152 }
 0xa27   :  { %11271 = vmatmul.mubr.msk.f32.vlgmr.msra.gmra.mrb[60].mxu0 %vm799_vm3, %v4840_v38 }
 0xa28   :  { %v11795_v16 = vpop.eup %11794  ;;  %11279 = vmatpush3.msra.mxu0 %v5001_v27  ;;  %11280 = vmatprep.mubr.msk.f32.mxu0 %vm11979_vm1, %v11978_v11 }
 0xa29   :  { %v11797_v25 = vpop.eup %11796  ;;  %11288 = vmatprep.subr.mxu0 %v11978_v11  ;;  %v4842_v42 = vmul.f32 %v11795_v16, %v12771_v35 }
 0xa2a   :  { %v4841_v4 = vmul.f32 %v11797_v25, %v12773_v57 }
 0xa2b   :  { %11281 = vmatmul.mubr.msk.f32.vlgmr.msra.gmra.mrb[62].mxu0 %vm799_vm3, %v4842_v42 }
 0xa2c   :  { %11276 = vmatmul.mubr.msk.f32.vlgmr.msra.gmra.mrb[60].mxu1 %vm799_vm3, %v4841_v4  ;;  %11289 = vmatpush3.msra.mxu0 %v5153_v17 }
 0xa2d   :  { %11284 = vmatpush3.msra.mxu1 %v5077_v28  ;;  %11285 = vmatprep.mubr.msk.f32.mxu1 %vm11979_vm1, %v11978_v11  ;;  %v11799_v7 = vpop.eup %11798 }
 0xa2e   :  { %11293 = vmatprep.subr.mxu1 %v11978_v11  ;;  %11290 = vmatprep.mubr.msk.f32.mxu0 %vm11979_vm1, %v11978_v11  ;;  %v4843_v22 = vmul.f32 %v11799_v7, %v12780_v46 }
 0xa2f   :  { %11298 = vmatprep.subr.mxu0 %v11978_v11 }
 0xa30   :  { %11286 = vmatmul.mubr.msk.f32.vlgmr.msra.gmra.mrb[62].mxu1 %vm799_vm3, %v4843_v22 }
 0xa31   :  { %11294 = vmatpush3.msra.mxu1 %v5229_v31  ;;  %11295 = vmatprep.mubr.msk.f32.mxu1 %vm11979_vm1, %v11978_v11 }
 0xa32   :  { %11303 = vmatprep.subr.mxu1 %v11978_v11 }
 0xa52   :  { %v4822_v32 = vpop.xlane.xlu1 %4821 }
 0xa53   :  { %11800 = vrcp.f32 %v4822_v32 }
 0xa56   :  { %v4828_v48 = vpop.xlane.xlu1 %4827 }
 0xa57   :  { %11802 = vrcp.f32 %v4828_v48  ;;  %v4825_v19 = vpop.xlane.xlu0 %4824 }
 0xa58   :  { %11804 = vrcp.f32 %v4825_v19 }
 0xa5a   :  { %v5381_v45 = vpop.permute.xlu1 %5380 }
 0xa5b   :  { %v4831_v52 = vpop.xlane.xlu0 %4830 }
 0xa5c   :  { %11806 = vrcp.f32 %v4831_v52 }
 0xa5d   :  { %v11801_v39 = vpop.eup %11800 }
 0xa5e   :  { %v4844_v20 = vmul.f32 %v11801_v39, %v12788_v44 }
 0xa5f   :  { %v5305_v18 = vpop.permute.xlu0 %5304 }
 0xa60   :  { %11291 = vmatmul.mubr.msk.f32.vlgmr.msra.gmra.mrb[64].mxu0 %vm799_vm3, %v4844_v20 }
 0xa61   :  { %v11803_v13 = vpop.eup %11802  ;;  %11299 = vmatpush3.msra.mxu0 %v5305_v18  ;;  %11300 = vmatprep.mubr.msk.f32.mxu0 %vm11979_vm1, %v11978_v11 }
 0xa62   :  { %v4846_v35 = vmul.f32 %v11803_v13, %v12792_v50  ;;  %v11805_v57 = vpop.eup %11804  ;;  %11513 = vmatprep.subr.bf16.mxu0 %v11512_v47 }
 0xa63   :  { %v4845_v61 = vmul.f32 %v11805_v57, %v12794_v23  ;;  %v5465_v59 = vpop.permute.xlu0 %5464 }
 0xa64   :  { %11301 = vmatmul.mubr.msk.f32.vlgmr.msra.gmra.mrb[66].mxu0 %vm799_vm3, %v4846_v35  ;;  %v5552_v26 = vsel %vm177_vm2, %v12353_v63, %v5465_v59  ;;  %v11970_v59 = vld [vmem:[%s14508_s0 + $0x10] sm:$0xff] }
 0xa65   :  { %11296 = vmatmul.mubr.msk.f32.vlgmr.msra.gmra.mrb[64].mxu1 %vm799_vm3, %v4845_v61  ;;  %11515 = vmatpush3.bf16.msra.mxu0 %v11512_v47 }
 0xa66   :  { %v11807_v55 = vpop.eup %11806  ;;  %11304 = vmatpush3.msra.mxu1 %v5381_v45  ;;  %11305 = vmatprep.mubr.msk.f32.mxu1 %vm11979_vm1, %v11978_v11 }
 0xa67   :  { %v4847_v46 = vmul.f32 %v11807_v55, %v12800_v49  ;;  %v5497_v49 = vpop.permute.xlu0 %5496 }
 0xa68   :  { %v5560_v37 = vsel %vm799_vm3, %v5552_v26, %v5497_v49  ;;  %v11971_v49 = vld [vmem:[%s14508_s0 + $0x18] sm:$0xff] }
 0xa69   :  { %11306 = vmatmul.mubr.msk.f32.vlgmr.msra.gmra.mrb[66].mxu1 %vm799_vm3, %v4847_v46 }
 0xa6b   :  { %v5469_v27 = vpop.permute.xlu0 %5468 }
 0xa6c   :  { %v5554_v63 = vsel %vm177_vm2, %v12357_v3, %v5469_v27 }
 0xa6f   :  { %v5501_v12 = vpop.permute.xlu0 %5500 }
 0xa70   :  { %v5562_v7 = vsel %vm799_vm3, %v5554_v63, %v5501_v12 }
 0xafa   :  { %v4920_v60 = vpop.f32.mrb[60].mxu0 }
 0xafb   :  { %v11272_v62 = vpop.f32.mrb[61].mxu0  ;;  %5528 = vrot.lane.b32.xlu0 %v4920_v60, %s11993_s7 }
 0xafe   :  { %v5072_v0 = vpop.f32.mrb[62].mxu0 }
 0xaff   :  { %v4996_v56 = vpop.f32.mrb[60].mxu1  ;;  %v11282_v33 = vpop.f32.mrb[63].mxu0  ;;  %5504 = vrot.lane.b32.xlu0 %v12743_v41, %s11992_s27 }
 0xb00   :  { %5530 = vrot.lane.b32.xlu1 %v4996_v56, %s11993_s7  ;;  %v11277_v30 = vpop.f32.mrb[61].mxu1 }
 0xb03   :  { %5532 = vrot.lane.b32.xlu0 %v5072_v0, %s11993_s7  ;;  %v5148_v36 = vpop.f32.mrb[62].mxu1  ;;  %v10202_v0 = vld [vmem:[%s14507_s2 + $0x21] ss:$0 sm:$0xff] }
 0xb04   :  { %5506 = vrot.lane.b32.xlu1 %v12747_v58, %s11992_s27  ;;  %v11287_v15 = vpop.f32.mrb[63].mxu1 }
 0xb05   :  { %v11968_v15 = vld [vmem:[%s14508_s0 + $0x8] sm:$0xff] }
 0xb07   :  { %5476 = vrot.lane.b32.xlu0 %v12571_v54, %s11991_s26 }
 0xb08   :  { %5534 = vrot.lane.b32.xlu1 %v5148_v36, %s11993_s7 }
 0xb0c   :  { %5478 = vrot.lane.b32.xlu1 %v12568_v43, %s11991_s26  ;;  %v5467_v43 = vpop.permute.xlu1 %5466 }
 0xb0d   :  { %v5553_v16 = vsel %vm177_vm2, %v12355_v1, %v5467_v43 }
 0xb10   :  { %v5499_v2 = vpop.permute.xlu1 %5498 }
 0xb11   :  { %v5561_v42 = vsel %vm799_vm3, %v5553_v16, %v5499_v2 }
 0xb14   :  { %v5471_v28 = vpop.permute.xlu1 %5470 }
 0xb15   :  { %v5555_v1 = vsel %vm177_vm2, %v12361_v6, %v5471_v28 }
 0xb18   :  { %v5503_v21 = vpop.permute.xlu1 %5502 }
 0xb19   :  { %v5563_v48 = vsel %vm799_vm3, %v5555_v1, %v5503_v21 }
 0xb1c   :  { %v5475_v38 = vpop.permute.xlu1 %5474 }
 0xb1d   :  { %v5557_v57 = vsel %vm177_vm2, %v12365_v10, %v5475_v38  ;;  %v11973_v38 = vld [vmem:[%s14508_s0 + $0x20] sm:$0xff] }
 0xb33   :  { %v5224_v44 = vpop.f32.mrb[64].mxu0 }
 0xb34   :  { %5536 = vrot.lane.b32.xlu0 %v5224_v44, %s11993_s7  ;;  %v11292_v24 = vpop.f32.mrb[65].mxu0  ;;  %v11969_v44 = vld [vmem:[%s14508_s0] sm:$0xff] }
 0xb37   :  { %v5376_v50 = vpop.f32.mrb[66].mxu0 }
 0xb38   :  { %5508 = vrot.lane.b32.xlu0 %v12749_v8, %s11992_s27  ;;  %v11302_v41 = vpop.f32.mrb[67].mxu0  ;;  %v5300_v23 = vpop.f32.mrb[64].mxu1 }
 0xb39   :  { %5538 = vrot.lane.b32.xlu1 %v5300_v23, %s11993_s7  ;;  %v11297_v29 = vpop.f32.mrb[65].mxu1  ;;  %v5473_v8 = vpop.permute.xlu0 %5472 }
 0xb3a   :  { %v5556_v39 = vsel %vm177_vm2, %v12359_v5, %v5473_v8 }
 0xb3c   :  { %5540 = vrot.lane.b32.xlu0 %v5376_v50, %s11993_s7  ;;  %v5452_v58 = vpop.f32.mrb[66].mxu1 }
 0xb3d   :  { %5510 = vrot.lane.b32.xlu1 %v12751_v34, %s11992_s27  ;;  %v11307_v54 = vpop.f32.mrb[67].mxu1 }
 0xb41   :  { %5542 = vrot.lane.b32.xlu1 %v5452_v58, %s11993_s7 }
 0xb6d   :  { %v5529_v40 = vpop.permute.xlu0 %5528 }
 0xb6e   :  { %v5569_v34 = vsel %vm5568_vm4, %v5560_v37, %v5529_v40  ;;  %v11972_v37 = vld [vmem:[%s14508_s0 + $0x28] sm:$0xff] }
 0xb6f   :  { %11312 = vmatprep.mubr.msk.f32.mxu0 %vm36_vm0, %v5569_v34 }
 0xb71   :  { %v5505_v25 = vpop.permute.xlu0 %5504 }
 0xb72   :  { %v5531_v4 = vpop.permute.xlu1 %5530  ;;  %v5564_v20 = vsel %vm799_vm3, %v5556_v39, %v5505_v25 }
 0xb73   :  { %v5570_v17 = vsel %vm5568_vm4, %v5561_v42, %v5531_v4 }
 0xb74   :  { %11313 = vmatmul.mubr.msk.f32.vlgmr.msra.gmra.mrb[68].mxu0 %vm36_vm0, %v5570_v17 }
 0xb75   :  { %v5533_v22 = vpop.permute.xlu0 %5532 }
 0xb76   :  { %v5571_v31 = vsel %vm5568_vm4, %v5562_v7, %v5533_v22  ;;  %v5507_v32 = vpop.permute.xlu1 %5506  ;;  %v11974_v7 = vld [vmem:[%s14508_s0 + $0x38] sm:$0xff] }
 0xb77   :  { %11315 = vmatprep.mubr.msk.f32.mxu0 %vm36_vm0, %v5571_v31  ;;  %v5565_v61 = vsel %vm799_vm3, %v5557_v57, %v5507_v32  ;;  %v11975_v31 = vld [vmem:[%s14508_s0 + $0x30] sm:$0xff] }
 0xb79   :  { %v5477_v3 = vpop.permute.xlu0 %5476 }
 0xb7a   :  { %v5535_v19 = vpop.permute.xlu1 %5534  ;;  %v5558_v55 = vsel %vm177_vm2, %v12363_v9, %v5477_v3 }
 0xb7b   :  { %v5572_v52 = vsel %vm5568_vm4, %v5563_v48, %v5535_v19 }
 0xb7c   :  { %11316 = vmatmul.mubr.msk.f32.gmra.mrb[70].mxu0 %vm36_vm0, %v5572_v52 }
 0xb7e   :  { %v5479_v35 = vpop.permute.xlu1 %5478 }
 0xb7f   :  { %v5559_v10 = vsel %vm177_vm2, %v12367_v14, %v5479_v35 }
 0xba6   :  { %v5537_v18 = vpop.permute.xlu0 %5536 }
 0xba7   :  { %v5573_v13 = vsel %vm5568_vm4, %v5564_v20, %v5537_v18 }
 0xba8   :  { %11318 = vmatprep.mubr.msk.f32.mxu0 %vm36_vm0, %v5573_v13 }
 0xbaa   :  { %v5509_v6 = vpop.permute.xlu0 %5508 }
 0xbab   :  { %v5539_v45 = vpop.permute.xlu1 %5538  ;;  %v5566_v46 = vsel %vm799_vm3, %v5558_v55, %v5509_v6 }
 0xbac   :  { %v5574_v5 = vsel %vm5568_vm4, %v5565_v61, %v5539_v45 }
 0xbad   :  { %11319 = vmatmul.mubr.msk.f32.gmra.mrb[72].mxu0 %vm36_vm0, %v5574_v5 }
 0xbae   :  { %v5541_v51 = vpop.permute.xlu0 %5540 }
 0xbaf   :  { %v5575_v53 = vsel %vm5568_vm4, %v5566_v46, %v5541_v51  ;;  %v5511_v47 = vpop.permute.xlu1 %5510 }
 0xbb0   :  { %11321 = vmatprep.mubr.msk.f32.mxu0 %vm36_vm0, %v5575_v53  ;;  %v5567_v60 = vsel %vm799_vm3, %v5559_v10, %v5511_v47 }
 0xbb3   :  { %v5543_v62 = vpop.permute.xlu1 %5542 }
 0xbb4   :  { %v5576_v9 = vsel %vm5568_vm4, %v5567_v60, %v5543_v62  ;;  %v5856_v62 = vld [vmem:[%s14509_s3] sm:$0xff] }
 0xbb5   :  { %11322 = vmatmul.mubr.msk.f32.gmra.mrb[74].mxu0 %vm36_vm0, %v5576_v9  ;;  %v5858_v9 = vld [vmem:[%s14509_s3 + $0x40] sm:$0xff] }
 0xc47   :  { %v11314_v56 = vpop.f32.mrb[68].mxu0 }
 0xc48   :  { %v5680_v33 = vadd.f32 %v11314_v56, %v10202_v0  ;;  %v5674_v30 = vpop.f32.mrb[69].mxu0  ;;  %v10214_v56 = vcombine.high %v5856_v62, %v5858_v9 }
 0xc49   :  { %v5675_v36 = vadd.f32 %v10202_v0, %v5674_v30  ;;  %v10213_v30 = vcombine.low %v5856_v62, %v5858_v9 }
 0xc4a   :  { %v5714_v14 = vadd.f32 %v11968_v15, %v5680_v33  ;;  %v5859_v33 = vld [vmem:[%s14509_s3 + $0x48] sm:$0xff]  ;;  %5914 = vmatprep.subr.bf16.mxu1 %v10214_v56 }
 0xc4b   :  { %v5713_v24 = vadd.f32 %v11969_v44, %v5675_v36  ;;  %5915 = vmatpush1.bf16.msra.mxu1 %v10213_v30 }
 0xc4c   :  { %v5726_v50 = vsel %vm36_vm0, %v5714_v14, 0.0 }
 0xc4d   :  { %5727 = vadd.xlane.f32.xlu1 %v5726_v50  ;;  %v5723_v41 = vsel %vm36_vm0, %v5713_v24, 0.0 }
 0xc4e   :  { %5724 = vadd.xlane.f32.xlu0 %v5723_v41 }
 0xc4f   :  { %v11317_v23 = vpop.f32.mrb[70].mxu0 }
 0xc50   :  { %v5684_v29 = vpop.f32.mrb[71].mxu0  ;;  %v5690_v58 = vadd.f32 %v11317_v23, %v10202_v0 }
 0xc51   :  { %v5685_v54 = vadd.f32 %v10202_v0, %v5684_v29 }
 0xc52   :  { %v5716_v2 = vadd.f32 %v11971_v49, %v5690_v58 }
 0xc53   :  { %v5715_v43 = vadd.f32 %v11970_v59, %v5685_v54 }
 0xc54   :  { %v5732_v28 = vsel %vm36_vm0, %v5716_v2, 0.0 }
 0xc55   :  { %v5729_v27 = vsel %vm36_vm0, %v5715_v43, 0.0 }
 0xc56   :  { %5730 = vadd.xlane.f32.xlu0 %v5729_v27 }
 0xc5a   :  { %5733 = vadd.xlane.f32.xlu0 %v5732_v28 }
 0xc80   :  { %v11320_v12 = vpop.f32.mrb[72].mxu0 }
 0xc81   :  { %v5700_v21 = vadd.f32 %v11320_v12, %v10202_v0  ;;  %v5694_v8 = vpop.f32.mrb[73].mxu0 }
 0xc82   :  { %v5695_v26 = vadd.f32 %v10202_v0, %v5694_v8 }
 0xc83   :  { %v12940_v40 = vadd.f32 %v11972_v37, %v5700_v21 }
 0xc84   :  { %v5717_v34 = vadd.f32 %v11973_v38, %v5695_v26  ;;  %v6172_v38 = vld [vmem:[%s14509_s3 + $0x10] sm:$0xff] }
 0xc85   :  { %v5738_v16 = vsel %vm36_vm0, %v12940_v40, 0.0 }
 0xc86   :  { %5739 = vadd.xlane.f32.xlu0 %v5738_v16  ;;  %v5735_v25 = vsel %vm36_vm0, %v5717_v34, 0.0 }
 0xc87   :  { %5736 = vadd.xlane.f32.xlu1 %v5735_v25  ;;  %v6173_v25 = vld [vmem:[%s14509_s3 + $0x18] sm:$0xff] }
 0xc88   :  { %v11323_v42 = vpop.f32.mrb[74].mxu0 }
 0xc89   :  { %v5710_v4 = vadd.f32 %v11323_v42, %v10202_v0  ;;  %v5704_v17 = vpop.f32.mrb[75].mxu0  ;;  %v6175_v42 = vld [vmem:[%s14509_s3 + $0x58] sm:$0xff] }
 0xc8a   :  { %v5705_v63 = vadd.f32 %v10202_v0, %v5704_v17  ;;  %v5857_v0 = vld [vmem:[%s14509_s3 + $0x8] sm:$0xff] }
 0xc8b   :  { %v12951_v22 = vadd.f32 %v11974_v7, %v5710_v4  ;;  %v10215_v36 = vcombine.low %v5857_v0, %v5859_v33  ;;  %v10216_v15 = vcombine.high %v5857_v0, %v5859_v33  ;;  %v10228_v4 = vcombine.high %v6173_v25, %v6175_v42 }
 0xc8c   :  { %v5719_v32 = vadd.f32 %v11975_v31, %v5705_v63 }
 0xc8d   :  { %v5744_v1 = vsel %vm36_vm0, %v12951_v22, 0.0  ;;  %5987 = vmatprep.subr.bf16.mxu0 %v10216_v15 }
 0xc8e   :  { %5745 = vadd.xlane.f32.xlu0 %v5744_v1  ;;  %v5741_v48 = vsel %vm36_vm0, %v5719_v32, 0.0  ;;  %5988 = vmatpush1.bf16.msra.mxu0 %v10215_v36 }
 0xc8f   :  { %5742 = vadd.xlane.f32.xlu1 %v5741_v48  ;;  %6291 = vmatprep.subr.bf16.mxu0 %v10228_v4 }
 0xcda   :  { %v5728_v19 = vpop.xlane.xlu1 %5727 }
 0xcdb   :  { %v5749_v52 = vmul.f32 0.0625, %v5728_v19  ;;  %v5725_v3 = vpop.xlane.xlu0 %5724 }
 0xcdc   :  { %v5748_v39 = vmul.f32 0.0625, %v5725_v3 }
 0xcdd   :  { %v12959_v20 = vsub.f32 %v5714_v14, %v5749_v52  ;;  %v11994_v14 = vmov 0  }
 0xcde   :  { %v12961_v18 = vsub.f32 %v5713_v24, %v5748_v39  ;;  %5946 = vmatprep.mubr.bf16.mxu1 %v11994_v14  ;;  %6019 = vmatprep.mubr.bf16.mxu0 %v11994_v14 }
 0xcdf   :  { %v5765_v13 = vmul.f32 %v12959_v20, %v12959_v20 }
 0xce0   :  { %v5764_v35 = vmul.f32 %v12961_v18, %v12961_v18 }
 0xce1   :  { %v5775_v6 = vsel %vm36_vm0, %v5765_v13, 0.0  ;;  %v13030_v13 = vld [vmem:[%s14507_s2 + $0x22] ss:$0 sm:$0xff] }
 0xce2   :  { %5776 = vadd.xlane.f32.xlu0 %v5775_v6  ;;  %v5772_v57 = vsel %vm36_vm0, %v5764_v35, 0.0 }
 0xce3   :  { %v5731_v61 = vpop.xlane.xlu0 %5730  ;;  %5773 = vadd.xlane.f32.xlu1 %v5772_v57 }
 0xce4   :  { %v5750_v45 = vmul.f32 0.0625, %v5731_v61  ;;  %v13036_v61 = vld [vmem:[%s14507_s2 + $0x23] ss:$0 sm:$0xff] }
 0xce6   :  { %v12969_v55 = vsub.f32 %v5715_v43, %v5750_v45 }
 0xce7   :  { %v5734_v5 = vpop.xlane.xlu0 %5733 }
 0xce8   :  { %v5751_v46 = vmul.f32 0.0625, %v5734_v5  ;;  %v5766_v51 = vmul.f32 %v12969_v55, %v12969_v55 }
 0xcea   :  { %v12973_v53 = vsub.f32 %v5716_v2, %v5751_v46  ;;  %v5778_v47 = vsel %vm36_vm0, %v5766_v51, 0.0 }
 0xceb   :  { %5779 = vadd.xlane.f32.xlu1 %v5778_v47 }
 0xcec   :  { %v5767_v10 = vmul.f32 %v12973_v53, %v12973_v53 }
 0xcee   :  { %v5781_v60 = vsel %vm36_vm0, %v5767_v10, 0.0 }
 0xcef   :  { %5782 = vadd.xlane.f32.xlu0 %v5781_v60  ;;  %v10227_v60 = vcombine.low %v6173_v25, %v6175_v42 }
 0xd13   :  { %v5740_v44 = vpop.xlane.xlu0 %5739 }
 0xd14   :  { %v5753_v24 = vmul.f32 0.0625, %v5740_v44  ;;  %v5737_v50 = vpop.xlane.xlu1 %5736 }
 0xd15   :  { %v5752_v41 = vmul.f32 0.0625, %v5737_v50 }
 0xd16   :  { %v12994_v23 = vsub.f32 %v12940_v40, %v5753_v24 }
 0xd17   :  { %v12996_v29 = vsub.f32 %v5717_v34, %v5752_v41  ;;  %v6174_v34 = vld [vmem:[%s14509_s3 + $0x50] sm:$0xff] }
 0xd18   :  { %v5769_v58 = vmul.f32 %v12994_v23, %v12994_v23  ;;  %v10226_v16 = vcombine.high %v6172_v38, %v6174_v34  ;;  %v10225_v10 = vcombine.low %v6172_v38, %v6174_v34 }
 0xd19   :  { %v5768_v54 = vmul.f32 %v12996_v29, %v12996_v29 }
 0xd1a   :  { %v5787_v59 = vsel %vm36_vm0, %v5769_v58, 0.0  ;;  %6218 = vmatprep.subr.bf16.mxu1 %v10226_v16 }
 0xd1b   :  { %v5746_v43 = vpop.xlane.xlu0 %5745  ;;  %5788 = vadd.xlane.f32.xlu0 %v5787_v59  ;;  %v5784_v49 = vsel %vm36_vm0, %v5768_v54, 0.0 }
 0xd1c   :  { %v5755_v2 = vmul.f32 0.0625, %v5746_v43  ;;  %5785 = vadd.xlane.f32.xlu1 %v5784_v49  ;;  %v5743_v27 = vpop.xlane.xlu1 %5742 }
 0xd1d   :  { %v5754_v28 = vmul.f32 0.0625, %v5743_v27 }
 0xd1e   :  { %v13005_v12 = vsub.f32 %v12951_v22, %v5755_v2 }
 0xd1f   :  { %v13007_v21 = vsub.f32 %v5719_v32, %v5754_v28 }
 0xd20   :  { %v5771_v8 = vmul.f32 %v13005_v12, %v13005_v12 }
 0xd21   :  { %v5770_v26 = vmul.f32 %v13007_v21, %v13007_v21 }
 0xd22   :  { %v5793_v37 = vsel %vm36_vm0, %v5771_v8, 0.0 }
 0xd23   :  { %5794 = vadd.xlane.f32.xlu0 %v5793_v37  ;;  %v5790_v40 = vsel %vm36_vm0, %v5770_v26, 0.0 }
 0xd24   :  { %5791 = vadd.xlane.f32.xlu1 %v5790_v40 }
 0xd6f   :  { %v5777_v17 = vpop.xlane.xlu0 %5776 }
 0xd70   :  { %v5797_v63 = vmul.f32 0.0625, %v5777_v17  ;;  %v5774_v7 = vpop.xlane.xlu1 %5773 }
 0xd71   :  { %v5796_v22 = vmul.f32 0.0625, %v5774_v7  ;;  %v11552_v7 = vld [vmem:[%s14510_s4 + $0x140] sm:$0xff]  }
 0xd72   :  { %v5805_v31 = vadd.f32 1e-05, %v5797_v63 }
 0xd73   :  { %v5804_v32 = vadd.f32 1e-05, %v5796_v22  ;;  %v11553_v22 = vld [vmem:[%s14510_s4 + $0x1c0] sm:$0xff]  }
 0xd74   :  { %11808 = vrsqrt.f32 %v5805_v31  ;;  %v11554_v31 = vld [vmem:[%s14510_s4 + $0x100] sm:$0xff]  }
 0xd75   :  { %11810 = vrsqrt.f32 %v5804_v32  ;;  %v11555_v32 = vld [vmem:[%s14510_s4 + $0x180] sm:$0xff]  }
 0xd78   :  { %v5780_v1 = vpop.xlane.xlu1 %5779 }
 0xd79   :  { %v5798_v48 = vmul.f32 0.0625, %v5780_v1  ;;  %v11556_v1 = vld [vmem:[%s14510_s4 + $0x148] sm:$0xff]  }
 0xd7b   :  { %v5806_v19 = vadd.f32 1e-05, %v5798_v48  ;;  %v11557_v48 = vld [vmem:[%s14510_s4 + $0x1c8] sm:$0xff]  }
 0xd7c   :  { %v5783_v52 = vpop.xlane.xlu0 %5782 }
 0xd7d   :  { %11812 = vrsqrt.f32 %v5806_v19  ;;  %v5799_v3 = vmul.f32 0.0625, %v5783_v52  ;;  %v11558_v19 = vld [vmem:[%s14510_s4 + $0x108] sm:$0xff]  }
 0xd7e   :  { %v11809_v39 = vpop.eup %11808  ;;  %v11559_v52 = vld [vmem:[%s14510_s4 + $0x188] sm:$0xff]  }
 0xd7f   :  { %v11811_v35 = vpop.eup %11810  ;;  %v5821_v6 = vmul.f32 %v11809_v39, %v12959_v20  ;;  %v5807_v57 = vadd.f32 1e-05, %v5799_v3  ;;  %v11560_v3 = vld [vmem:[%s14510_s4 + $0x150] sm:$0xff]  }
 0xd80   :  { %v5820_v45 = vmul.f32 %v11811_v35, %v12961_v18  ;;  %v11561_v39 = vld [vmem:[%s14510_s4 + $0x1d0] sm:$0xff]  }
 0xd81   :  { %v5833_v5 = vmul.f32 %v13030_v13, %v5821_v6  ;;  %11814 = vrsqrt.f32 %v5807_v57  ;;  %v11563_v35 = vld [vmem:[%s14510_s4 + $0x190] sm:$0xff]   ;;  %v11564_v6 = vld [vmem:[%s14510_s4 + $0x158] sm:$0xff]  }
 0xd82   :  { %v5832_v46 = vmul.f32 %v13030_v13, %v5820_v45  ;;  %v11565_v57 = vld [vmem:[%s14510_s4 + $0x1d8] sm:$0xff]  }
 0xd83   :  { %v13042_v51 = vadd.f32 %v13036_v61, %v5833_v5  ;;  %v11567_v45 = vld [vmem:[%s14510_s4 + $0x198] sm:$0xff]   ;;  %v11568_v5 = vld [vmem:[%s14510_s4 + $0x160] sm:$0xff]  }
 0xd84   :  { %v13045_v47 = vadd.f32 %v13036_v61, %v5832_v46  ;;  %v11569_v46 = vld [vmem:[%s14510_s4 + $0x1e0] sm:$0xff]  }
 0xd86   :  { %v13049_v20 = vpack.c.bf16 %v13042_v51, %v13045_v47 }
 0xd87   :  { %v11813_v62 = vpop.eup %11812 }
 0xd88   :  { %v5822_v18 = vmul.f32 %v11813_v62, %v12969_v55  ;;  %10217 = vmatmul.mubr.msk.bf16.vlgmr.msra.gmra.mrb[68].mxu1 %vm36_vm0, %v13049_v20  ;;  %10221 = vmatmul.mubr.msk.bf16.vlgmr.msra.gmra.mrb[76].mxu0 %vm36_vm0, %v13049_v20  ;;  %v11572_v62 = vld [vmem:[%s14510_s4 + $0x168] sm:$0xff]  }
 0xd89   :  { %5956 = vmatprep.mubr.bf16.mxu1 %v11994_v14  ;;  %6029 = vmatprep.mubr.bf16.mxu0 %v11994_v14 }
 0xd8a   :  { %6219 = vmatpush1.bf16.msra.mxu1 %v10225_v10  ;;  %6292 = vmatpush1.bf16.msra.mxu0 %v10227_v60  ;;  %v5834_v0 = vmul.f32 %v13030_v13, %v5822_v18  ;;  %v11570_v10 = vld [vmem:[%s14510_s4 + $0x120] sm:$0xff]   ;;  %v11573_v18 = vld [vmem:[%s14510_s4 + $0x1e8] sm:$0xff]  }
 0xd8b   :  { %v11815_v9 = vpop.eup %11814  ;;  %10577 = vmatprep.subr.bf16.mxu1 %v11552_v7  ;;  %10617 = vmatprep.subr.bf16.mxu0 %v11553_v22  ;;  %v11571_v60 = vld [vmem:[%s14510_s4 + $0x1a0] sm:$0xff]  }
 0xd8c   :  { %v5823_v56 = vmul.f32 %v11815_v9, %v12973_v53  ;;  %v13062_v55 = vadd.f32 %v13036_v61, %v5834_v0  ;;  %v11574_v9 = vld [vmem:[%s14510_s4 + $0x128] sm:$0xff]  }
 0xd8d   :  { %v11575_v0 = vld [vmem:[%s14510_s4 + $0x1a8] sm:$0xff]  }
 0xd8e   :  { %v5835_v33 = vmul.f32 %v13030_v13, %v5823_v56  ;;  %v11576_v56 = vld [vmem:[%s14510_s4 + $0x170] sm:$0xff]  }
 0xd90   :  { %v13065_v30 = vadd.f32 %v13036_v61, %v5835_v33  ;;  %v11577_v33 = vld [vmem:[%s14510_s4 + $0x1f0] sm:$0xff]  }
 0xd92   :  { %v13069_v36 = vpack.c.bf16 %v13065_v30, %v13062_v55 }
 0xd94   :  { %10218 = vmatmul.mubr.msk.bf16.gmra.mrb[72].mxu1 %vm36_vm0, %v13069_v36  ;;  %10222 = vmatmul.mubr.msk.bf16.gmra.mrb[80].mxu0 %vm36_vm0, %v13069_v36 }
 0xd95   :  { %5966 = vmatprep.mubr.bf16.mxu1 %v11994_v14  ;;  %6039 = vmatprep.mubr.bf16.mxu0 %v11994_v14 }
 0xda8   :  { %v5789_v53 = vpop.xlane.xlu0 %5788 }
 0xda9   :  { %v5801_v15 = vmul.f32 0.0625, %v5789_v53  ;;  %v5786_v44 = vpop.xlane.xlu1 %5785  ;;  %v11578_v53 = vld [vmem:[%s14510_s4 + $0x130] sm:$0xff]  }
 0xdaa   :  { %v5800_v24 = vmul.f32 0.0625, %v5786_v44  ;;  %v11580_v44 = vld [vmem:[%s14510_s4 + $0x178] sm:$0xff]  }
 0xdab   :  { %v5809_v50 = vadd.f32 1e-05, %v5801_v15  ;;  %v11579_v15 = vld [vmem:[%s14510_s4 + $0x1b0] sm:$0xff]  }
 0xdac   :  { %v5808_v41 = vadd.f32 1e-05, %v5800_v24  ;;  %v11581_v24 = vld [vmem:[%s14510_s4 + $0x1f8] sm:$0xff]  }
 0xdad   :  { %11816 = vrsqrt.f32 %v5809_v50  ;;  %v11582_v50 = vld [vmem:[%s14510_s4 + $0x138] sm:$0xff]  }
 0xdae   :  { %11818 = vrsqrt.f32 %v5808_v41  ;;  %v11583_v41 = vld [vmem:[%s14510_s4 + $0x1b8] sm:$0xff]  }
 0xdb0   :  { %v5795_v58 = vpop.xlane.xlu0 %5794 }
 0xdb1   :  { %v5803_v54 = vmul.f32 0.0625, %v5795_v58  ;;  %v5792_v59 = vpop.xlane.xlu1 %5791  ;;  %v11584_v58 = vld [vmem:[%s14510_s4 + $0x40] sm:$0xff]  }
 0xdb2   :  { %v5802_v43 = vmul.f32 0.0625, %v5792_v59  ;;  %v5866_v59 = vlaneseq }
 0xdb3   :  { %v5811_v49 = vadd.f32 1e-05, %v5803_v54  ;;  %v11585_v54 = vld [vmem:[%s14510_s4 + $0xc0] sm:$0xff]  }
 0xdb4   :  { %v5810_v2 = vadd.f32 1e-05, %v5802_v43  ;;  %v5867_v43 = vshrl.u32 %v5866_v59, 7 }
 0xdb5   :  { %11820 = vrsqrt.f32 %v5811_v49 }
 0xdb6   :  { %11822 = vrsqrt.f32 %v5810_v2  ;;  %v13241_v49 = vsub.s32 0, %v5867_v43  ;;  %v5860_v2 = vld [vmem:[%s14509_s3 + $0x80] sm:$0x11] }
 0xdb7   :  { %v11817_v27 = vpop.eup %11816 }
 0xdb8   :  { %v11819_v28 = vpop.eup %11818  ;;  %v5825_v8 = vmul.f32 %v11817_v27, %v12994_v23  ;;  %v5861_v27 = vld [vmem:[%s14509_s3 + $0x88] sm:$0x11] }
 0xdb9   :  { %v5824_v26 = vmul.f32 %v11819_v28, %v12996_v29  ;;  %v5862_v28 = vunpack.c.l.bf16 %v5860_v2 }
 0xdba   :  { %v5837_v37 = vmul.f32 %v13030_v13, %v5825_v8  ;;  %v5864_v8 = vunpack.c.l.bf16 %v5861_v27 }
 0xdbb   :  { %v5836_v40 = vmul.f32 %v13030_v13, %v5824_v26  ;;  %v5863_v26 = vunpack.c.h.bf16 %v5860_v2 }
 0xdbc   :  { %v13082_v38 = vadd.f32 %v13036_v61, %v5837_v37  ;;  %v5865_v37 = vunpack.c.h.bf16 %v5861_v27 }
 0xdbd   :  { %v13085_v34 = vadd.f32 %v13036_v61, %v5836_v40  ;;  %v13250_v40 = vrot.slane %v5862_v28, %v13241_v49 }
 0xdbf   :  { %v11821_v16 = vpop.eup %11820  ;;  %v13089_v25 = vpack.c.bf16 %v13082_v38, %v13085_v34 }
 0xdc0   :  { %v11823_v42 = vpop.eup %11822  ;;  %v5827_v23 = vmul.f32 %v11821_v16, %v13005_v12  ;;  %v13253_v16 = vrot.slane %v5864_v8, %v13241_v49 }
 0xdc1   :  { %v5826_v29 = vmul.f32 %v11823_v42, %v13007_v21  ;;  %10219 = vmatmul.mubr.msk.bf16.gmra.mrb[76].mxu1 %vm36_vm0, %v13089_v25  ;;  %10223 = vmatmul.mubr.msk.bf16.gmra.mrb[84].mxu0 %vm36_vm0, %v13089_v25  ;;  %v13256_v42 = vrot.slane %v5863_v26, %v13241_v49 }
 0xdc2   :  { %v5839_v4 = vmul.f32 %v13030_v13, %v5827_v23  ;;  %5976 = vmatprep.mubr.bf16.mxu1 %v11994_v14  ;;  %6049 = vmatprep.mubr.bf16.mxu0 %v11994_v14  ;;  %v13259_v23 = vrot.slane %v5865_v37, %v13241_v49 }
 0xdc3   :  { %v5838_v17 = vmul.f32 %v13030_v13, %v5826_v29  ;;  %v11562_v13 = vld [vmem:[%s14510_s4 + $0x110] sm:$0xff]  }
 0xdc4   :  { %v13102_v63 = vadd.f32 %v13036_v61, %v5839_v4 }
 0xdc5   :  { %v13105_v12 = vadd.f32 %v13036_v61, %v5838_v17  ;;  %v11566_v61 = vld [vmem:[%s14510_s4 + $0x118] sm:$0xff]  }
 0xdc7   :  { %v13109_v21 = vpack.c.bf16 %v13102_v63, %v13105_v12 }
 0xdc9   :  { %10220 = vmatmul.mubr.msk.bf16.gmra.mrb[80].mxu1 %vm36_vm0, %v13109_v21  ;;  %10224 = vmatmul.mubr.msk.bf16.gmra.mrb[88].mxu0 %vm36_vm0, %v13109_v21 }
 0xdca   :  { %6250 = vmatprep.mubr.bf16.mxu1 %v11994_v14  ;;  %6323 = vmatprep.mubr.bf16.mxu0 %v11994_v14 }
 0xdd1   :  { %10229 = vmatmul.mubr.msk.bf16.vlgmr.msra.gmra.mrb[84].mxu1 %vm36_vm0, %v13049_v20  ;;  %10233 = vmatmul.mubr.msk.bf16.vlgmr.msra.gmra.mrb[92].mxu0 %vm36_vm0, %v13049_v20 }
 0xdd2   :  { %6260 = vmatprep.mubr.bf16.mxu1 %v11994_v14  ;;  %6333 = vmatprep.mubr.bf16.mxu0 %v11994_v14 }
 0xdd3   :  { %10578 = vmatpush3.bf16.msra.mxu1 %v11554_v31  ;;  %10618 = vmatpush3.bf16.msra.mxu0 %v11555_v32 }
 0xdd4   :  { %10579 = vmatprep.subr.bf16.mxu1 %v11556_v1  ;;  %10619 = vmatprep.subr.bf16.mxu0 %v11557_v48 }
 0xdd7   :  { %10580 = vmatpush3.bf16.msra.mxu1 %v11558_v19  ;;  %10620 = vmatpush3.bf16.msra.mxu0 %v11559_v52 }
 0xdd8   :  { %10581 = vmatprep.subr.bf16.mxu1 %v11560_v3  ;;  %10621 = vmatprep.subr.bf16.mxu0 %v11561_v39 }
 0xdd9   :  { %10230 = vmatmul.mubr.msk.bf16.gmra.mrb[88].mxu1 %vm36_vm0, %v13069_v36  ;;  %10234 = vmatmul.mubr.msk.bf16.gmra.mrb[96].mxu0 %vm36_vm0, %v13069_v36 }
 0xdda   :  { %6270 = vmatprep.mubr.bf16.mxu1 %v11994_v14  ;;  %6343 = vmatprep.mubr.bf16.mxu0 %v11994_v14 }
 0xddb   :  { %10582 = vmatpush3.bf16.msra.mxu1 %v11562_v13  ;;  %10622 = vmatpush3.bf16.msra.mxu0 %v11563_v35 }
 0xddc   :  { %10583 = vmatprep.subr.bf16.mxu1 %v11564_v6  ;;  %10623 = vmatprep.subr.bf16.mxu0 %v11565_v57 }
 0xddf   :  { %10584 = vmatpush3.bf16.msra.mxu1 %v11566_v61  ;;  %10624 = vmatpush3.bf16.msra.mxu0 %v11567_v45 }
 0xde0   :  { %10585 = vmatprep.subr.bf16.mxu1 %v11568_v5  ;;  %10625 = vmatprep.subr.bf16.mxu0 %v11569_v46 }
 0xde1   :  { %10231 = vmatmul.mubr.msk.bf16.gmra.mrb[92].mxu1 %vm36_vm0, %v13089_v25  ;;  %10235 = vmatmul.mubr.msk.bf16.gmra.mrb[100].mxu0 %vm36_vm0, %v13089_v25 }
 0xde2   :  { %6280 = vmatprep.mubr.bf16.mxu1 %v11994_v14  ;;  %6353 = vmatprep.mubr.bf16.mxu0 %v11994_v14 }
 0xde3   :  { %10586 = vmatpush3.bf16.msra.mxu1 %v11570_v10  ;;  %10626 = vmatpush3.bf16.msra.mxu0 %v11571_v60 }
 0xde4   :  { %10587 = vmatprep.subr.bf16.mxu1 %v11572_v62  ;;  %10627 = vmatprep.subr.bf16.mxu0 %v11573_v18 }
 0xde7   :  { %10588 = vmatpush3.bf16.msra.mxu1 %v11574_v9  ;;  %10628 = vmatpush3.bf16.msra.mxu0 %v11575_v0 }
 0xde8   :  { %10589 = vmatprep.subr.bf16.mxu1 %v11576_v56  ;;  %10629 = vmatprep.subr.bf16.mxu0 %v11577_v33 }
 0xde9   :  { %10232 = vmatmul.mubr.msk.bf16.gmra.mrb[96].mxu1 %vm36_vm0, %v13109_v21  ;;  %10236 = vmatmul.mubr.msk.bf16.gmra.mrb[104].mxu0 %vm36_vm0, %v13109_v21 }
 0xdeb   :  { %10590 = vmatpush3.bf16.msra.mxu1 %v11578_v53  ;;  %10630 = vmatpush3.bf16.msra.mxu0 %v11579_v15 }
 0xdec   :  { %10591 = vmatprep.subr.bf16.mxu1 %v11580_v44  ;;  %10631 = vmatprep.subr.bf16.mxu0 %v11581_v24 }
 0xdef   :  { %10592 = vmatpush3.bf16.msra.mxu1 %v11582_v50  ;;  %10632 = vmatpush3.bf16.msra.mxu0 %v11583_v41 }
 0xdf0   :  { %10657 = vmatprep.subr.bf16.mxu1 %v11584_v58  ;;  %10697 = vmatprep.subr.bf16.mxu0 %v11585_v54 }
 0xe5b   :  { %v5948_v29 = vpop.f32.mrb[68].mxu1  ;;  %v6021_v4 = vpop.f32.mrb[76].mxu0 }
 0xe5c   :  { %v5949_v17 = vadd.f32 %v5948_v29, %v13250_v40  ;;  %v6022_v7 = vadd.f32 %v6021_v4, %v13253_v16  ;;  %v5950_v22 = vpop.f32.mrb[69].mxu1  ;;  %v6023_v31 = vpop.f32.mrb[77].mxu0 }
 0xe5d   :  { %v5951_v32 = vadd.f32 %v5950_v22, %v13256_v42  ;;  %v6024_v1 = vadd.f32 %v6023_v31, %v13259_v23  ;;  %v5952_v48 = vpop.f32.mrb[70].mxu1  ;;  %v6025_v19 = vpop.f32.mrb[78].mxu0 }
 0xe5e   :  { %v5953_v52 = vadd.f32 %v5952_v48, %v13250_v40  ;;  %v6026_v3 = vadd.f32 %v6025_v19, %v13253_v16  ;;  %v5954_v39 = vpop.f32.mrb[71].mxu1  ;;  %v6027_v13 = vpop.f32.mrb[79].mxu0  ;;  %v6060_v57 = vmax.f32 %v5949_v17, 0.0  ;;  %v6062_v61 = vmax.f32 %v6022_v7, 0.0 }
 0xe5f   :  { %v5955_v35 = vadd.f32 %v5954_v39, %v13256_v42  ;;  %v6028_v6 = vadd.f32 %v6027_v13, %v13259_v23  ;;  %v6061_v46 = vmax.f32 %v5951_v32, 0.0  ;;  %v6063_v10 = vmax.f32 %v6024_v1, 0.0 }
 0xe60   :  { %v6064_v45 = vmax.f32 %v5953_v52, 0.0  ;;  %v6066_v5 = vmax.f32 %v6026_v3, 0.0 }
 0xe61   :  { %v6065_v60 = vmax.f32 %v5955_v35, 0.0  ;;  %v6067_v62 = vmax.f32 %v6028_v6, 0.0 }
 0xe62   :  { %v13269_v18 = vpack.c.bf16 %v6064_v45, %v6060_v57  ;;  %v13271_v9 = vpack.c.bf16 %v6066_v5, %v6062_v61 }
 0xe63   :  { %v13273_v0 = vpack.c.bf16 %v6065_v60, %v6061_v46  ;;  %v13275_v56 = vpack.c.bf16 %v6067_v62, %v6063_v10 }
 0xe67   :  { %v5958_v33 = vpop.f32.mrb[72].mxu1  ;;  %v6031_v53 = vpop.f32.mrb[80].mxu0 }
 0xe68   :  { %v5959_v15 = vadd.f32 %v5958_v33, %v13250_v40  ;;  %v6032_v44 = vadd.f32 %v6031_v53, %v13253_v16  ;;  %v5960_v24 = vpop.f32.mrb[73].mxu1  ;;  %v6033_v50 = vpop.f32.mrb[81].mxu0 }
 0xe69   :  { %v5961_v41 = vadd.f32 %v5960_v24, %v13256_v42  ;;  %v6034_v58 = vadd.f32 %v6033_v50, %v13259_v23  ;;  %v5962_v54 = vpop.f32.mrb[74].mxu1  ;;  %v6035_v59 = vpop.f32.mrb[82].mxu0  ;;  %v6177_v24 = vld [vmem:[%s14509_s3 + $0x98] sm:$0x11] }
 0xe6a   :  { %v5963_v43 = vadd.f32 %v5962_v54, %v13250_v40  ;;  %v6036_v2 = vadd.f32 %v6035_v59, %v13253_v16  ;;  %v5964_v27 = vpop.f32.mrb[75].mxu1  ;;  %v6037_v28 = vpop.f32.mrb[83].mxu0  ;;  %v6068_v37 = vmax.f32 %v5959_v15, 0.0  ;;  %v6070_v29 = vmax.f32 %v6032_v44, 0.0  ;;  %v6176_v44 = vld [vmem:[%s14509_s3 + $0x90] sm:$0x11] }
 0xe6b   :  { %v5965_v8 = vadd.f32 %v5964_v27, %v13256_v42  ;;  %v6038_v26 = vadd.f32 %v6037_v28, %v13259_v23  ;;  %v6069_v7 = vmax.f32 %v5961_v41, 0.0  ;;  %v6071_v22 = vmax.f32 %v6034_v58, 0.0 }
 0xe6c   :  { %v6072_v4 = vmax.f32 %v5963_v43, 0.0  ;;  %v6074_v17 = vmax.f32 %v6036_v2, 0.0 }
 0xe6d   :  { %v6073_v31 = vmax.f32 %v5965_v8, 0.0  ;;  %v6075_v32 = vmax.f32 %v6038_v26, 0.0  ;;  %v6178_v26 = vunpack.c.l.bf16 %v6176_v44 }
 0xe6e   :  { %v13285_v1 = vpack.c.bf16 %v6072_v4, %v6068_v37  ;;  %v13287_v48 = vpack.c.bf16 %v6074_v17, %v6070_v29  ;;  %v6180_v37 = vunpack.c.l.bf16 %v6177_v24 }
 0xe6f   :  { %v13289_v19 = vpack.c.bf16 %v6073_v31, %v6069_v7  ;;  %v13291_v52 = vpack.c.bf16 %v6075_v32, %v6071_v22  ;;  %v6179_v22 = vunpack.c.h.bf16 %v6176_v44  ;;  %v6181_v31 = vunpack.c.h.bf16 %v6177_v24 }
 0xe71   :  { %v13333_v44 = vrot.slane %v6181_v31, %v13241_v49 }
 0xe94   :  { %v5968_v3 = vpop.f32.mrb[76].mxu1  ;;  %v6041_v39 = vpop.f32.mrb[84].mxu0 }
 0xe95   :  { %v5969_v13 = vadd.f32 %v5968_v3, %v13250_v40  ;;  %v6042_v35 = vadd.f32 %v6041_v39, %v13253_v16  ;;  %v5970_v6 = vpop.f32.mrb[77].mxu1  ;;  %v6043_v57 = vpop.f32.mrb[85].mxu0 }
 0xe96   :  { %v5971_v61 = vadd.f32 %v5970_v6, %v13256_v42  ;;  %v6044_v45 = vadd.f32 %v6043_v57, %v13259_v23  ;;  %v5972_v5 = vpop.f32.mrb[78].mxu1  ;;  %v6045_v46 = vpop.f32.mrb[86].mxu0 }
 0xe97   :  { %v5973_v10 = vadd.f32 %v5972_v5, %v13250_v40  ;;  %v6046_v60 = vadd.f32 %v6045_v46, %v13253_v16  ;;  %v5974_v62 = vpop.f32.mrb[79].mxu1  ;;  %v6047_v33 = vpop.f32.mrb[87].mxu0  ;;  %v6076_v50 = vmax.f32 %v5969_v13, 0.0  ;;  %v6078_v41 = vmax.f32 %v6042_v35, 0.0 }
 0xe98   :  { %v5975_v53 = vadd.f32 %v5974_v62, %v13256_v42  ;;  %v6048_v15 = vadd.f32 %v6047_v33, %v13259_v23  ;;  %v6077_v59 = vmax.f32 %v5971_v61, 0.0  ;;  %v6079_v43 = vmax.f32 %v6044_v45, 0.0 }
 0xe99   :  { %v6080_v58 = vmax.f32 %v5973_v10, 0.0  ;;  %v6082_v54 = vmax.f32 %v6046_v60, 0.0  ;;  %v13322_v60 = vrot.slane %v6178_v26, %v13241_v49  ;;  %v13325_v62 = vrot.slane %v6180_v37, %v13241_v49 }
 0xe9a   :  { %v6081_v2 = vmax.f32 %v5975_v53, 0.0  ;;  %v6083_v27 = vmax.f32 %v6048_v15, 0.0  ;;  %v13330_v15 = vrot.slane %v6179_v22, %v13241_v49 }
 0xe9b   :  { %v13307_v28 = vpack.c.bf16 %v6080_v58, %v6076_v50  ;;  %v13309_v8 = vpack.c.bf16 %v6082_v54, %v6078_v41 }
 0xe9c   :  { %v13311_v29 = vpack.c.bf16 %v6081_v2, %v6077_v59  ;;  %v13313_v4 = vpack.c.bf16 %v6083_v27, %v6079_v43  ;;  %v5978_v17 = vpop.f32.mrb[80].mxu1  ;;  %v6051_v7 = vpop.f32.mrb[88].mxu0 }
 0xe9d   :  { %v5979_v32 = vadd.f32 %v5978_v17, %v13250_v40  ;;  %v6052_v3 = vadd.f32 %v6051_v7, %v13253_v16  ;;  %v5980_v39 = vpop.f32.mrb[81].mxu1  ;;  %v6053_v13 = vpop.f32.mrb[89].mxu0 }
 0xe9e   :  { %v5981_v35 = vadd.f32 %v5980_v39, %v13256_v42  ;;  %v6054_v6 = vadd.f32 %v6053_v13, %v13259_v23  ;;  %v5982_v57 = vpop.f32.mrb[82].mxu1  ;;  %v6055_v61 = vpop.f32.mrb[90].mxu0 }
 0xe9f   :  { %v5983_v45 = vadd.f32 %v5982_v57, %v13250_v40  ;;  %v6056_v5 = vadd.f32 %v6055_v61, %v13253_v16  ;;  %v5984_v46 = vpop.f32.mrb[83].mxu1  ;;  %v6057_v10 = vpop.f32.mrb[91].mxu0  ;;  %v6084_v40 = vmax.f32 %v5979_v32, 0.0  ;;  %v6086_v16 = vmax.f32 %v6052_v3, 0.0 }
 0xea0   :  { %v5985_v33 = vadd.f32 %v5984_v46, %v13256_v42  ;;  %v6058_v53 = vadd.f32 %v6057_v10, %v13259_v23  ;;  %v6085_v41 = vmax.f32 %v5981_v35, 0.0  ;;  %v6087_v58 = vmax.f32 %v6054_v6, 0.0 }
 0xea1   :  { %v6088_v24 = vmax.f32 %v5983_v45, 0.0  ;;  %v6090_v50 = vmax.f32 %v6056_v5, 0.0 }
 0xea2   :  { %v6089_v54 = vmax.f32 %v5985_v33, 0.0  ;;  %v6091_v59 = vmax.f32 %v6058_v53, 0.0 }
 0xea3   :  { %v13335_v43 = vpack.c.bf16 %v6088_v24, %v6084_v40  ;;  %v13337_v2 = vpack.c.bf16 %v6090_v50, %v6086_v16 }
 0xea4   :  { %v13339_v42 = vpack.c.bf16 %v6089_v54, %v6085_v41  ;;  %v13341_v23 = vpack.c.bf16 %v6091_v59, %v6087_v58  ;;  %v6252_v27 = vpop.f32.mrb[84].mxu1  ;;  %v6325_v26 = vpop.f32.mrb[92].mxu0 }
 0xea5   :  { %v6253_v37 = vadd.f32 %v6252_v27, %v13322_v60  ;;  %v6326_v17 = vadd.f32 %v6325_v26, %v13325_v62  ;;  %v6254_v7 = vpop.f32.mrb[85].mxu1  ;;  %v6327_v22 = vpop.f32.mrb[93].mxu0  ;;  %v11586_v26 = vld [vmem:[%s14510_s4] sm:$0xff]  }
 0xea6   :  { %v6255_v31 = vadd.f32 %v6254_v7, %v13330_v15  ;;  %v6328_v32 = vadd.f32 %v6327_v22, %v13333_v44  ;;  %v6256_v3 = vpop.f32.mrb[86].mxu1  ;;  %v6329_v39 = vpop.f32.mrb[94].mxu0 }
 0xea7   :  { %v6257_v13 = vadd.f32 %v6256_v3, %v13322_v60  ;;  %v6330_v35 = vadd.f32 %v6329_v39, %v13325_v62  ;;  %v6258_v6 = vpop.f32.mrb[87].mxu1  ;;  %v6331_v57 = vpop.f32.mrb[95].mxu0  ;;  %v6364_v5 = vmax.f32 %v6253_v37, 0.0  ;;  %v6366_v46 = vmax.f32 %v6326_v17, 0.0  ;;  %v11587_v37 = vld [vmem:[%s14510_s4 + $0x80] sm:$0xff]   ;;  %v11589_v3 = vld [vmem:[%s14510_s4 + $0xc8] sm:$0xff]  }
 0xea8   :  { %v6259_v61 = vadd.f32 %v6258_v6, %v13330_v15  ;;  %v6332_v45 = vadd.f32 %v6331_v57, %v13333_v44  ;;  %v6365_v53 = vmax.f32 %v6255_v31, 0.0  ;;  %v6367_v40 = vmax.f32 %v6328_v32, 0.0  ;;  %v11588_v32 = vld [vmem:[%s14510_s4 + $0x48] sm:$0xff]  }
 0xea9   :  { %v6368_v10 = vmax.f32 %v6257_v13, 0.0  ;;  %v6370_v33 = vmax.f32 %v6330_v35, 0.0 }
 0xeaa   :  { %v6369_v16 = vmax.f32 %v6259_v61, 0.0  ;;  %v6371_v24 = vmax.f32 %v6332_v45, 0.0 }
 0xeab   :  { %v6460_v50 = vpack.c.bf16 %v6368_v10, %v6364_v5  ;;  %v6462_v41 = vpack.c.bf16 %v6370_v33, %v6366_v46  ;;  %v11590_v33 = vld [vmem:[%s14510_s4 + $0x8] sm:$0xff]  }
 0xeac   :  { %v6461_v58 = vpack.c.bf16 %v6369_v16, %v6365_v53  ;;  %v6463_v54 = vpack.c.bf16 %v6371_v24, %v6367_v40  ;;  %v6262_v59 = vpop.f32.mrb[88].mxu1  ;;  %v6335_v27 = vpop.f32.mrb[96].mxu0  ;;  %v11591_v53 = vld [vmem:[%s14510_s4 + $0x88] sm:$0xff]  }
 0xead   :  { %v6263_v17 = vadd.f32 %v6262_v59, %v13322_v60  ;;  %v6336_v7 = vadd.f32 %v6335_v27, %v13325_v62  ;;  %v6264_v22 = vpop.f32.mrb[89].mxu1  ;;  %v6337_v31 = vpop.f32.mrb[97].mxu0 }
 0xeae   :  { %v6265_v39 = vadd.f32 %v6264_v22, %v13330_v15  ;;  %v6338_v13 = vadd.f32 %v6337_v31, %v13333_v44  ;;  %v6266_v35 = vpop.f32.mrb[90].mxu1  ;;  %v6339_v6 = vpop.f32.mrb[98].mxu0  ;;  %6700 = vmatprep.mubr.bf16.mxu1 %v6461_v58  ;;  %6765 = vmatprep.mubr.bf16.mxu0 %v6463_v54 }
 0xeaf   :  { %v6267_v57 = vadd.f32 %v6266_v35, %v13322_v60  ;;  %v6340_v61 = vadd.f32 %v6339_v6, %v13325_v62  ;;  %v6268_v45 = vpop.f32.mrb[91].mxu1  ;;  %v6341_v5 = vpop.f32.mrb[99].mxu0  ;;  %6701 = vmatmul.mubr.bf16.vlgmr.msra.gmra.mrb[100].mxu1 %v6460_v50  ;;  %6766 = vmatmul.mubr.bf16.vlgmr.msra.gmra.mrb[108].mxu0 %v6462_v41  ;;  %v6372_v40 = vmax.f32 %v6263_v17, 0.0  ;;  %v6374_v16 = vmax.f32 %v6336_v7, 0.0  ;;  %v11592_v50 = vld [vmem:[%s14510_s4 + $0x50] sm:$0xff]  }
 0xeb0   :  { %v6269_v46 = vadd.f32 %v6268_v45, %v13330_v15  ;;  %v6342_v10 = vadd.f32 %v6341_v5, %v13333_v44  ;;  %10658 = vmatpush3.bf16.msra.mxu1 %v11586_v26  ;;  %10698 = vmatpush3.bf16.msra.mxu0 %v11587_v37  ;;  %v11593_v41 = vld [vmem:[%s14510_s4 + $0xd0] sm:$0xff]   ;;  %v6373_v54 = vmax.f32 %v6265_v39, 0.0  ;;  %v6375_v59 = vmax.f32 %v6338_v13, 0.0  ;;  %v11597_v45 = vld [vmem:[%s14510_s4 + $0xd8] sm:$0xff]  }
 0xeb1   :  { %v6376_v24 = vmax.f32 %v6267_v57, 0.0  ;;  %v6378_v58 = vmax.f32 %v6340_v61, 0.0  ;;  %10659 = vmatprep.subr.bf16.mxu1 %v11588_v32  ;;  %10699 = vmatprep.subr.bf16.mxu0 %v11589_v3  ;;  %v11594_v32 = vld [vmem:[%s14510_s4 + $0x10] sm:$0xff]   ;;  %v11596_v61 = vld [vmem:[%s14510_s4 + $0x58] sm:$0xff]  }
 0xeb2   :  { %v6377_v27 = vmax.f32 %v6269_v46, 0.0  ;;  %v6379_v26 = vmax.f32 %v6342_v10, 0.0  ;;  %v11595_v3 = vld [vmem:[%s14510_s4 + $0x90] sm:$0xff]  }
 0xeb3   :  { %v6464_v37 = vpack.c.bf16 %v6376_v24, %v6372_v40  ;;  %v6466_v22 = vpack.c.bf16 %v6378_v58, %v6374_v16 }
 0xeb4   :  { %v6465_v17 = vpack.c.bf16 %v6377_v27, %v6373_v54  ;;  %v6467_v7 = vpack.c.bf16 %v6379_v26, %v6375_v59  ;;  %v6272_v31 = vpop.f32.mrb[92].mxu1  ;;  %v6345_v35 = vpop.f32.mrb[100].mxu0  ;;  %10660 = vmatpush3.bf16.msra.mxu1 %v11590_v33  ;;  %10700 = vmatpush3.bf16.msra.mxu0 %v11591_v53  ;;  %v11599_v54 = vld [vmem:[%s14510_s4 + $0x98] sm:$0xff]  }
 0xeb5   :  { %v6273_v39 = vadd.f32 %v6272_v31, %v13322_v60  ;;  %v6346_v13 = vadd.f32 %v6345_v35, %v13325_v62  ;;  %v6274_v6 = vpop.f32.mrb[93].mxu1  ;;  %v6347_v57 = vpop.f32.mrb[101].mxu0  ;;  %10661 = vmatprep.subr.bf16.mxu1 %v11592_v50  ;;  %10701 = vmatprep.subr.bf16.mxu0 %v11593_v41  ;;  %v11598_v41 = vld [vmem:[%s14510_s4 + $0x18] sm:$0xff]  }
 0xeb6   :  { %v6275_v5 = vadd.f32 %v6274_v6, %v13330_v15  ;;  %v6348_v46 = vadd.f32 %v6347_v57, %v13333_v44  ;;  %v6276_v10 = vpop.f32.mrb[94].mxu1  ;;  %v6349_v33 = vpop.f32.mrb[102].mxu0  ;;  %6708 = vmatprep.mubr.bf16.mxu1 %v6465_v17  ;;  %6773 = vmatprep.mubr.bf16.mxu0 %v6467_v7 }
 0xeb7   :  { %v6277_v53 = vadd.f32 %v6276_v10, %v13322_v60  ;;  %v6350_v40 = vadd.f32 %v6349_v33, %v13325_v62  ;;  %v6278_v16 = vpop.f32.mrb[95].mxu1  ;;  %v6351_v24 = vpop.f32.mrb[103].mxu0  ;;  %6709 = vmatmul.mubr.bf16.gmra.mrb[104].mxu1 %v6464_v37  ;;  %6774 = vmatmul.mubr.bf16.gmra.mrb[112].mxu0 %v6466_v22  ;;  %v6380_v59 = vmax.f32 %v6273_v39, 0.0  ;;  %v6382_v27 = vmax.f32 %v6346_v13, 0.0  ;;  %v11600_v37 = vld [vmem:[%s14510_s4 + $0x60] sm:$0xff]  }
 0xeb8   :  { %v6279_v58 = vadd.f32 %v6278_v16, %v13330_v15  ;;  %v6352_v50 = vadd.f32 %v6351_v24, %v13333_v44  ;;  %10662 = vmatpush3.bf16.msra.mxu1 %v11594_v32  ;;  %10702 = vmatpush3.bf16.msra.mxu0 %v11595_v3  ;;  %v11601_v22 = vld [vmem:[%s14510_s4 + $0xe0] sm:$0xff]   ;;  %v6381_v7 = vmax.f32 %v6275_v5, 0.0  ;;  %v6383_v31 = vmax.f32 %v6348_v46, 0.0  ;;  %v11605_v16 = vld [vmem:[%s14510_s4 + $0xe8] sm:$0xff]  }
 0xeb9   :  { %v6384_v26 = vmax.f32 %v6277_v53, 0.0  ;;  %v6386_v17 = vmax.f32 %v6350_v40, 0.0  ;;  %10663 = vmatprep.subr.bf16.mxu1 %v11596_v61  ;;  %10703 = vmatprep.subr.bf16.mxu0 %v11597_v45  ;;  %v11602_v61 = vld [vmem:[%s14510_s4 + $0x20] sm:$0xff]   ;;  %v11604_v40 = vld [vmem:[%s14510_s4 + $0x68] sm:$0xff]  }
 0xeba   :  { %v6385_v35 = vmax.f32 %v6279_v58, 0.0  ;;  %v6387_v32 = vmax.f32 %v6352_v50, 0.0  ;;  %v11603_v45 = vld [vmem:[%s14510_s4 + $0xa0] sm:$0xff]  }
 0xebb   :  { %v6468_v3 = vpack.c.bf16 %v6384_v26, %v6380_v59  ;;  %v6470_v6 = vpack.c.bf16 %v6386_v17, %v6382_v27 }
 0xebc   :  { %v6469_v39 = vpack.c.bf16 %v6385_v35, %v6381_v7  ;;  %v6471_v13 = vpack.c.bf16 %v6387_v32, %v6383_v31  ;;  %v6282_v57 = vpop.f32.mrb[96].mxu1  ;;  %v6355_v10 = vpop.f32.mrb[104].mxu0  ;;  %10664 = vmatpush3.bf16.msra.mxu1 %v11598_v41  ;;  %10704 = vmatpush3.bf16.msra.mxu0 %v11599_v54 }
 0xebd   :  { %v6283_v5 = vadd.f32 %v6282_v57, %v13322_v60  ;;  %v6356_v46 = vadd.f32 %v6355_v10, %v13325_v62  ;;  %v6284_v33 = vpop.f32.mrb[97].mxu1  ;;  %v6357_v53 = vpop.f32.mrb[105].mxu0  ;;  %10665 = vmatprep.subr.bf16.mxu1 %v11600_v37  ;;  %10705 = vmatprep.subr.bf16.mxu0 %v11601_v22  ;;  %v11606_v22 = vld [vmem:[%s14510_s4 + $0x28] sm:$0xff]  }
 0xebe   :  { %v6285_v24 = vadd.f32 %v6284_v33, %v13330_v15  ;;  %v6358_v58 = vadd.f32 %v6357_v53, %v13333_v44  ;;  %v6286_v50 = vpop.f32.mrb[98].mxu1  ;;  %v6359_v41 = vpop.f32.mrb[106].mxu0  ;;  %6716 = vmatprep.mubr.bf16.mxu1 %v6469_v39  ;;  %6781 = vmatprep.mubr.bf16.mxu0 %v6471_v13  ;;  %v11613_v33 = vld [vmem:[%s14510_s4 + $0xf8] sm:$0xff]   ;;  %v7120_v53 = vld [vmem:[%s14509_s3 + $0x20] sm:$0xff] }
 0xebf   :  { %v6287_v54 = vadd.f32 %v6286_v50, %v13322_v60  ;;  %v6360_v59 = vadd.f32 %v6359_v41, %v13325_v62  ;;  %v6288_v27 = vpop.f32.mrb[99].mxu1  ;;  %v6361_v26 = vpop.f32.mrb[107].mxu0  ;;  %6717 = vmatmul.mubr.bf16.gmra.mrb[108].mxu1 %v6468_v3  ;;  %6782 = vmatmul.mubr.bf16.gmra.mrb[116].mxu0 %v6470_v6  ;;  %v11607_v60 = vld [vmem:[%s14510_s4 + $0xa8] sm:$0xff]   ;;  %v6388_v7 = vmax.f32 %v6283_v5, 0.0  ;;  %v6390_v62 = vmax.f32 %v6356_v46, 0.0  ;;  %v11611_v5 = vld [vmem:[%s14510_s4 + $0xb0] sm:$0xff]  }
 0xec0   :  { %v6289_v17 = vadd.f32 %v6288_v27, %v13330_v15  ;;  %v6362_v37 = vadd.f32 %v6361_v26, %v13333_v44  ;;  %10666 = vmatpush3.bf16.msra.mxu1 %v11602_v61  ;;  %10706 = vmatpush3.bf16.msra.mxu0 %v11603_v45  ;;  %v11608_v15 = vld [vmem:[%s14510_s4 + $0x70] sm:$0xff]   ;;  %v6389_v32 = vmax.f32 %v6285_v24, 0.0  ;;  %v6391_v3 = vmax.f32 %v6358_v58, 0.0  ;;  %v11612_v46 = vld [vmem:[%s14510_s4 + $0x78] sm:$0xff]   ;;  %v7123_v24 = vld [vmem:[%s14509_s3 + $0x68] sm:$0xff] }
 0xec1   :  { %v6392_v31 = vmax.f32 %v6287_v54, 0.0  ;;  %v6394_v35 = vmax.f32 %v6360_v59, 0.0  ;;  %10667 = vmatprep.subr.bf16.mxu1 %v11604_v40  ;;  %10707 = vmatprep.subr.bf16.mxu0 %v11605_v16  ;;  %v11609_v44 = vld [vmem:[%s14510_s4 + $0xf0] sm:$0xff]   ;;  %v7122_v40 = vld [vmem:[%s14509_s3 + $0x60] sm:$0xff]  ;;  %v7121_v16 = vld [vmem:[%s14509_s3 + $0x28] sm:$0xff] }
 0xec2   :  { %v6393_v6 = vmax.f32 %v6289_v17, 0.0  ;;  %v6395_v39 = vmax.f32 %v6362_v37, 0.0  ;;  %v11610_v45 = vld [vmem:[%s14510_s4 + $0x30] sm:$0xff]   ;;  %v11614_v58 = vld [vmem:[%s14510_s4 + $0x38] sm:$0xff]   ;;  %v10302_v41 = vcombine.high %v7120_v53, %v7122_v40  ;;  %v10304_v54 = vcombine.high %v7121_v16, %v7123_v24  ;;  %v11632_v26 = vld [vmem:[%s14510_s4 + $0x260] sm:$0xff]  }
 0xec3   :  { %v6472_v13 = vpack.c.bf16 %v6392_v31, %v6388_v7  ;;  %v6474_v57 = vpack.c.bf16 %v6394_v35, %v6390_v62  ;;  %v11615_v50 = vld [vmem:[%s14510_s4 + $0xb8] sm:$0xff]   ;;  %v10301_v59 = vcombine.low %v7120_v53, %v7122_v40  ;;  %v11633_v17 = vld [vmem:[%s14510_s4 + $0x2e0] sm:$0xff]   ;;  %v11637_v7 = vld [vmem:[%s14510_s4 + $0x2e8] sm:$0xff]  }
 0xec4   :  { %v6473_v10 = vpack.c.bf16 %v6393_v6, %v6389_v32  ;;  %v6475_v61 = vpack.c.bf16 %v6395_v39, %v6391_v3  ;;  %10668 = vmatpush3.bf16.msra.mxu1 %v11606_v22  ;;  %10708 = vmatpush3.bf16.msra.mxu0 %v11607_v60  ;;  %v11631_v27 = vld [vmem:[%s14510_s4 + $0x298] sm:$0xff]   ;;  %v11634_v37 = vld [vmem:[%s14510_s4 + $0x220] sm:$0xff]   ;;  %v11636_v60 = vld [vmem:[%s14510_s4 + $0x268] sm:$0xff]  }
 0xec5   :  { %10669 = vmatprep.subr.bf16.mxu1 %v11608_v15  ;;  %10709 = vmatprep.subr.bf16.mxu0 %v11609_v44  ;;  %v11635_v22 = vld [vmem:[%s14510_s4 + $0x2a0] sm:$0xff]   ;;  %v11638_v62 = vld [vmem:[%s14510_s4 + $0x228] sm:$0xff]   ;;  %v11640_v35 = vld [vmem:[%s14510_s4 + $0x270] sm:$0xff]  }
 0xec6   :  { %6724 = vmatprep.mubr.bf16.mxu1 %v6473_v10  ;;  %6789 = vmatprep.mubr.bf16.mxu0 %v6475_v61  ;;  %v11639_v31 = vld [vmem:[%s14510_s4 + $0x2a8] sm:$0xff]   ;;  %v11641_v15 = vld [vmem:[%s14510_s4 + $0x2f0] sm:$0xff]   ;;  %v11644_v3 = vld [vmem:[%s14510_s4 + $0x278] sm:$0xff]  }
 0xec7   :  { %6725 = vmatmul.mubr.bf16.gmra.mrb[112].mxu1 %v6472_v13  ;;  %6790 = vmatmul.mubr.bf16.gmra.mrb[120].mxu0 %v6474_v57  ;;  %v11642_v44 = vld [vmem:[%s14510_s4 + $0x230] sm:$0xff]   ;;  %v11645_v6 = vld [vmem:[%s14510_s4 + $0x2f8] sm:$0xff]  }
 0xec8   :  { %10670 = vmatpush3.bf16.msra.mxu1 %v11610_v45  ;;  %7022 = vmatprep.mubr.bf16.mxu1 %v13273_v0  ;;  %v10303_v0 = vcombine.low %v7121_v16, %v7123_v24  ;;  %v11643_v32 = vld [vmem:[%s14510_s4 + $0x2b0] sm:$0xff]   ;;  %v11646_v39 = vld [vmem:[%s14510_s4 + $0x238] sm:$0xff]  }
 0xec9   :  { %10710 = vmatpush3.bf16.msra.mxu0 %v11611_v5  ;;  %7087 = vmatprep.mubr.bf16.mxu0 %v13275_v56  ;;  %v11618_v56 = vld [vmem:[%s14510_s4 + $0x200] sm:$0xff]   ;;  %v11647_v13 = vld [vmem:[%s14510_s4 + $0x2b8] sm:$0xff]   ;;  %v13616_v57 = vld [vmem:[%s14509_s3 + $0x30] sm:$0xff] }
 0xeca   :  { %10671 = vmatprep.subr.bf16.mxu1 %v11612_v46  ;;  %10711 = vmatprep.subr.bf16.mxu0 %v11613_v33  ;;  %v13621_v10 = vld [vmem:[%s14509_s3 + $0x70] sm:$0xff]  ;;  %v13630_v5 = vld [vmem:[%s14509_s3 + $0x38] sm:$0xff] }
 0xecb   :  { %v10345_v61 = vcombine.low %v13616_v57, %v13621_v10  ;;  %v10346_v45 = vcombine.high %v13616_v57, %v13621_v10  ;;  %v13635_v46 = vld [vmem:[%s14509_s3 + $0x78] sm:$0xff] }
 0xecc   :  { %10672 = vmatpush3.bf16.msra.mxu1 %v11614_v58  ;;  %v10347_v33 = vcombine.low %v13630_v5, %v13635_v46  ;;  %v10348_v53 = vcombine.high %v13630_v5, %v13635_v46 }
 0xecd   :  { %10712 = vmatpush3.bf16.msra.mxu0 %v11615_v50  ;;  %7166 = vmatprep.subr.bf16.mxu1 %v10302_v41 }
 0xece   :  { %7239 = vmatprep.subr.bf16.mxu0 %v10304_v54 }
 0xecf   :  { %7023 = vmatmul.mubr.bf16.vlgmr.msra.gmra.mrb[116].mxu1 %v13269_v18  ;;  %v11616_v18 = vld [vmem:[%s14510_s4 + $0x240] sm:$0xff]  }
 0xed0   :  { %7088 = vmatmul.mubr.bf16.vlgmr.msra.gmra.mrb[124].mxu0 %v13271_v9  ;;  %7030 = vmatprep.mubr.bf16.mxu1 %v13289_v19  ;;  %v11617_v9 = vld [vmem:[%s14510_s4 + $0x2c0] sm:$0xff]   ;;  %v11621_v19 = vld [vmem:[%s14510_s4 + $0x2c8] sm:$0xff]  }
 0xed1   :  { %7095 = vmatprep.mubr.bf16.mxu0 %v13291_v52  ;;  %7167 = vmatpush1.bf16.msra.mxu1 %v10301_v59  ;;  %v11622_v52 = vld [vmem:[%s14510_s4 + $0x208] sm:$0xff]  }
 0xed2   :  { %7240 = vmatpush1.bf16.msra.mxu0 %v10303_v0  ;;  %10737 = vmatprep.subr.bf16.mxu1 %v11616_v18 }
 0xed3   :  { %10777 = vmatprep.subr.bf16.mxu0 %v11617_v9 }
 0xed7   :  { %7031 = vmatmul.mubr.bf16.gmra.mrb[120].mxu1 %v13285_v1  ;;  %v11619_v1 = vld [vmem:[%s14510_s4 + $0x280] sm:$0xff]  }
 0xed8   :  { %7096 = vmatmul.mubr.bf16.gmra.mrb[128].mxu0 %v13287_v48  ;;  %7038 = vmatprep.mubr.bf16.mxu1 %v13311_v29  ;;  %v11620_v48 = vld [vmem:[%s14510_s4 + $0x248] sm:$0xff]   ;;  %v11625_v29 = vld [vmem:[%s14510_s4 + $0x2d0] sm:$0xff]  }
 0xed9   :  { %7103 = vmatprep.mubr.bf16.mxu0 %v13313_v4  ;;  %v11626_v4 = vld [vmem:[%s14510_s4 + $0x210] sm:$0xff]  }
 0xedf   :  { %7039 = vmatmul.mubr.bf16.gmra.mrb[124].mxu1 %v13307_v28  ;;  %v11623_v28 = vld [vmem:[%s14510_s4 + $0x288] sm:$0xff]  }
 0xee0   :  { %7104 = vmatmul.mubr.bf16.gmra.mrb[132].mxu0 %v13309_v8  ;;  %7046 = vmatprep.mubr.bf16.mxu1 %v13339_v42  ;;  %v11624_v8 = vld [vmem:[%s14510_s4 + $0x250] sm:$0xff]   ;;  %v11629_v42 = vld [vmem:[%s14510_s4 + $0x2d8] sm:$0xff]  }
 0xee1   :  { %7111 = vmatprep.mubr.bf16.mxu0 %v13341_v23  ;;  %v11630_v23 = vld [vmem:[%s14510_s4 + $0x218] sm:$0xff]  }
 0xee7   :  { %7047 = vmatmul.mubr.bf16.gmra.mrb[128].mxu1 %v13335_v43  ;;  %v11627_v43 = vld [vmem:[%s14510_s4 + $0x290] sm:$0xff]  }
 0xee8   :  { %7112 = vmatmul.mubr.bf16.gmra.mrb[136].mxu0 %v13337_v2  ;;  %7198 = vmatprep.mubr.bf16.mxu1 %v11994_v14  ;;  %v11628_v2 = vld [vmem:[%s14510_s4 + $0x258] sm:$0xff]  }
 0xee9   :  { %7271 = vmatprep.mubr.bf16.mxu0 %v11994_v14 }
 0xeef   :  { %10305 = vmatmul.mubr.msk.bf16.vlgmr.msra.gmra.mrb[132].mxu1 %vm36_vm0, %v13049_v20 }
 0xef0   :  { %10309 = vmatmul.mubr.msk.bf16.vlgmr.msra.gmra.mrb[140].mxu0 %vm36_vm0, %v13049_v20  ;;  %7208 = vmatprep.mubr.bf16.mxu1 %v11994_v14 }
 0xef1   :  { %7281 = vmatprep.mubr.bf16.mxu0 %v11994_v14  ;;  %10738 = vmatpush3.bf16.msra.mxu1 %v11618_v56 }
 0xef2   :  { %10778 = vmatpush3.bf16.msra.mxu0 %v11619_v1  ;;  %10739 = vmatprep.subr.bf16.mxu1 %v11620_v48 }
 0xef3   :  { %10779 = vmatprep.subr.bf16.mxu0 %v11621_v19 }
 0xef5   :  { %10740 = vmatpush3.bf16.msra.mxu1 %v11622_v52 }
 0xef6   :  { %10780 = vmatpush3.bf16.msra.mxu0 %v11623_v28  ;;  %10741 = vmatprep.subr.bf16.mxu1 %v11624_v8 }
 0xef7   :  { %10306 = vmatmul.mubr.msk.bf16.gmra.mrb[136].mxu1 %vm36_vm0, %v13069_v36  ;;  %10781 = vmatprep.subr.bf16.mxu0 %v11625_v29 }
 0xef8   :  { %10310 = vmatmul.mubr.msk.bf16.gmra.mrb[144].mxu0 %vm36_vm0, %v13069_v36  ;;  %7218 = vmatprep.mubr.bf16.mxu1 %v11994_v14 }
 0xef9   :  { %7291 = vmatprep.mubr.bf16.mxu0 %v11994_v14  ;;  %10742 = vmatpush3.bf16.msra.mxu1 %v11626_v4 }
 0xefa   :  { %10782 = vmatpush3.bf16.msra.mxu0 %v11627_v43  ;;  %10743 = vmatprep.subr.bf16.mxu1 %v11628_v2 }
 0xefb   :  { %10783 = vmatprep.subr.bf16.mxu0 %v11629_v42 }
 0xefd   :  { %10744 = vmatpush3.bf16.msra.mxu1 %v11630_v23 }
 0xefe   :  { %10784 = vmatpush3.bf16.msra.mxu0 %v11631_v27  ;;  %10745 = vmatprep.subr.bf16.mxu1 %v11632_v26 }
 0xeff   :  { %10307 = vmatmul.mubr.msk.bf16.gmra.mrb[140].mxu1 %vm36_vm0, %v13089_v25  ;;  %10785 = vmatprep.subr.bf16.mxu0 %v11633_v17 }
 0xf00   :  { %10311 = vmatmul.mubr.msk.bf16.gmra.mrb[148].mxu0 %vm36_vm0, %v13089_v25  ;;  %7228 = vmatprep.mubr.bf16.mxu1 %v11994_v14 }
 0xf01   :  { %7301 = vmatprep.mubr.bf16.mxu0 %v11994_v14  ;;  %10746 = vmatpush3.bf16.msra.mxu1 %v11634_v37 }
 0xf02   :  { %10786 = vmatpush3.bf16.msra.mxu0 %v11635_v22  ;;  %10747 = vmatprep.subr.bf16.mxu1 %v11636_v60 }
 0xf03   :  { %10787 = vmatprep.subr.bf16.mxu0 %v11637_v7 }
 0xf05   :  { %10748 = vmatpush3.bf16.msra.mxu1 %v11638_v62 }
 0xf06   :  { %10788 = vmatpush3.bf16.msra.mxu0 %v11639_v31  ;;  %10749 = vmatprep.subr.bf16.mxu1 %v11640_v35 }
 0xf07   :  { %10308 = vmatmul.mubr.msk.bf16.gmra.mrb[144].mxu1 %vm36_vm0, %v13109_v21  ;;  %10789 = vmatprep.subr.bf16.mxu0 %v11641_v15 }
 0xf08   :  { %10312 = vmatmul.mubr.msk.bf16.gmra.mrb[152].mxu0 %vm36_vm0, %v13109_v21 }
 0xf09   :  { %10750 = vmatpush3.bf16.msra.mxu1 %v11642_v44 }
 0xf0a   :  { %10790 = vmatpush3.bf16.msra.mxu0 %v11643_v32  ;;  %10751 = vmatprep.subr.bf16.mxu1 %v11644_v3 }
 0xf0b   :  { %10791 = vmatprep.subr.bf16.mxu0 %v11645_v6 }
 0xf0d   :  { %10752 = vmatpush3.bf16.msra.mxu1 %v11646_v39 }
 0xf0e   :  { %10792 = vmatpush3.bf16.msra.mxu0 %v11647_v13  ;;  %7800 = vmatprep.subr.bf16.mxu1 %v10346_v45 }
 0xf0f   :  { %7873 = vmatprep.subr.bf16.mxu0 %v10348_v53 }
 0xf82   :  { %v10593_v40 = vpop.f32.mrb[100].mxu1  ;;  %v10633_v16 = vpop.f32.mrb[108].mxu0 }
 0xf83   :  { %v10594_v24 = vpop.f32.mrb[101].mxu1  ;;  %v10634_v58 = vpop.f32.mrb[109].mxu0 }
 0xf84   :  { %v10595_v50 = vadd.f32 %v10594_v24, %v10593_v40  ;;  %v10635_v41 = vadd.f32 %v10634_v58, %v10633_v16  ;;  %v10596_v54 = vpop.f32.mrb[102].mxu1  ;;  %v10636_v59 = vpop.f32.mrb[110].mxu0 }
 0xf85   :  { %v10597_v0 = vpop.f32.mrb[103].mxu1  ;;  %v10637_v18 = vpop.f32.mrb[111].mxu0 }
 0xf86   :  { %v6768_v9 = vadd.f32 %v10635_v41, %v10595_v50  ;;  %v10598_v56 = vadd.f32 %v10597_v0, %v10596_v54  ;;  %v10638_v1 = vadd.f32 %v10637_v18, %v10636_v59 }
 0xf88   :  { %v6771_v48 = vadd.f32 %v10638_v1, %v10598_v56 }
 0xf8a   :  { %v10599_v19 = vpop.f32.mrb[104].mxu1  ;;  %v10639_v52 = vpop.f32.mrb[112].mxu0 }
 0xf8b   :  { %v10600_v28 = vpop.f32.mrb[105].mxu1  ;;  %v10640_v8 = vpop.f32.mrb[113].mxu0 }
 0xf8c   :  { %v10601_v29 = vadd.f32 %v10600_v28, %v10599_v19  ;;  %v10641_v4 = vadd.f32 %v10640_v8, %v10639_v52  ;;  %v10602_v43 = vpop.f32.mrb[106].mxu1  ;;  %v10642_v2 = vpop.f32.mrb[114].mxu0 }
 0xf8d   :  { %v10603_v42 = vpop.f32.mrb[107].mxu1  ;;  %v10643_v23 = vpop.f32.mrb[115].mxu0 }
 0xf8e   :  { %v6776_v27 = vadd.f32 %v10641_v4, %v10601_v29  ;;  %v10604_v26 = vadd.f32 %v10603_v42, %v10602_v43  ;;  %v10644_v17 = vadd.f32 %v10643_v23, %v10642_v2 }
 0xf90   :  { %v6779_v37 = vadd.f32 %v10644_v17, %v10604_v26 }
 0xf92   :  { %v10605_v22 = vpop.f32.mrb[108].mxu1  ;;  %v10645_v60 = vpop.f32.mrb[116].mxu0 }
 0xf93   :  { %v10606_v7 = vpop.f32.mrb[109].mxu1  ;;  %v10646_v62 = vpop.f32.mrb[117].mxu0 }
 0xf94   :  { %v10607_v31 = vadd.f32 %v10606_v7, %v10605_v22  ;;  %v10647_v35 = vadd.f32 %v10646_v62, %v10645_v60  ;;  %v10608_v15 = vpop.f32.mrb[110].mxu1  ;;  %v10648_v44 = vpop.f32.mrb[118].mxu0 }
 0xf95   :  { %v10609_v32 = vpop.f32.mrb[111].mxu1  ;;  %v10649_v3 = vpop.f32.mrb[119].mxu0 }
 0xf96   :  { %v6784_v6 = vadd.f32 %v10647_v35, %v10607_v31  ;;  %v10610_v39 = vadd.f32 %v10609_v32, %v10608_v15  ;;  %v10650_v13 = vadd.f32 %v10649_v3, %v10648_v44 }
 0xf98   :  { %v6787_v45 = vadd.f32 %v10650_v13, %v10610_v39 }
 0xf9a   :  { %v10611_v53 = vpop.f32.mrb[112].mxu1  ;;  %v10651_v40 = vpop.f32.mrb[120].mxu0 }
 0xf9b   :  { %v10612_v16 = vpop.f32.mrb[113].mxu1  ;;  %v10652_v24 = vpop.f32.mrb[121].mxu0 }
 0xf9c   :  { %v10613_v58 = vadd.f32 %v10612_v16, %v10611_v53  ;;  %v10653_v50 = vadd.f32 %v10652_v24, %v10651_v40  ;;  %v10614_v41 = vpop.f32.mrb[114].mxu1  ;;  %v10654_v54 = vpop.f32.mrb[122].mxu0 }
 0xf9d   :  { %v10615_v59 = vpop.f32.mrb[115].mxu1  ;;  %v10655_v0 = vpop.f32.mrb[123].mxu0 }
 0xf9e   :  { %v13641_v18 = vadd.f32 %v10653_v50, %v10613_v58  ;;  %v10616_v56 = vadd.f32 %v10615_v59, %v10614_v41  ;;  %v10656_v1 = vadd.f32 %v10655_v0, %v10654_v54 }
 0xfa0   :  { %v13643_v19 = vadd.f32 %v10656_v1, %v10616_v56 }
 0xfa2   :  { %v10673_v52 = vpop.f32.mrb[116].mxu1 }
 0xfa3   :  { %v10713_v28 = vpop.f32.mrb[124].mxu0  ;;  %v10674_v8 = vpop.f32.mrb[117].mxu1 }
 0xfa4   :  { %v10675_v29 = vadd.f32 %v10674_v8, %v10673_v52  ;;  %v10714_v4 = vpop.f32.mrb[125].mxu0  ;;  %v10676_v43 = vpop.f32.mrb[118].mxu1 }
 0xfa5   :  { %v10715_v2 = vadd.f32 %v10714_v4, %v10713_v28  ;;  %v10716_v42 = vpop.f32.mrb[126].mxu0  ;;  %v10677_v23 = vpop.f32.mrb[119].mxu1 }
 0xfa6   :  { %v7025_v26 = vadd.f32 %v10675_v29, %v6768_v9  ;;  %v10678_v17 = vadd.f32 %v10677_v23, %v10676_v43  ;;  %v10717_v22 = vpop.f32.mrb[127].mxu0 }
 0xfa7   :  { %v10718_v60 = vadd.f32 %v10717_v22, %v10716_v42 }
 0xfa8   :  { %v13645_v7 = vadd.f32 %v10715_v2, %v7025_v26  ;;  %v7028_v62 = vadd.f32 %v10678_v17, %v6771_v48  ;;  %v7125_v26 = vld [vmem:[%s14509_s3 + $0xa8] sm:$0x11] }
 0xfaa   :  { %v13647_v31 = vadd.f32 %v10718_v60, %v7028_v62  ;;  %v10679_v35 = vpop.f32.mrb[120].mxu1 }
 0xfab   :  { %v10719_v15 = vpop.f32.mrb[128].mxu0  ;;  %v10680_v44 = vpop.f32.mrb[121].mxu1 }
 0xfac   :  { %v10681_v32 = vadd.f32 %v10680_v44, %v10679_v35  ;;  %v10720_v3 = vpop.f32.mrb[129].mxu0  ;;  %v10682_v39 = vpop.f32.mrb[122].mxu1 }
 0xfad   :  { %v10721_v13 = vadd.f32 %v10720_v3, %v10719_v15  ;;  %v10722_v53 = vpop.f32.mrb[130].mxu0  ;;  %v10683_v40 = vpop.f32.mrb[123].mxu1 }
 0xfae   :  { %v7033_v16 = vadd.f32 %v10681_v32, %v6776_v27  ;;  %v10684_v24 = vadd.f32 %v10683_v40, %v10682_v39  ;;  %v10723_v9 = vpop.f32.mrb[131].mxu0  ;;  %v7128_v32 = vunpack.c.l.bf16 %v7125_v26 }
 0xfaf   :  { %v10724_v58 = vadd.f32 %v10723_v9, %v10722_v53  ;;  %v7129_v53 = vunpack.c.h.bf16 %v7125_v26 }
 0xfb0   :  { %v13649_v50 = vadd.f32 %v10721_v13, %v7033_v16  ;;  %v7036_v41 = vadd.f32 %v10684_v24, %v6779_v37  ;;  %v7124_v37 = vld [vmem:[%s14509_s3 + $0xa0] sm:$0x11] }
 0xfb1   :  { %v7127_v3 = vunpack.c.h.bf16 %v7124_v37 }
 0xfb2   :  { %v13651_v54 = vadd.f32 %v10724_v58, %v7036_v41  ;;  %v10685_v48 = vpop.f32.mrb[124].mxu1 }
 0xfb3   :  { %v10725_v59 = vpop.f32.mrb[132].mxu0  ;;  %v10686_v0 = vpop.f32.mrb[125].mxu1 }
 0xfb4   :  { %v10687_v56 = vadd.f32 %v10686_v0, %v10685_v48  ;;  %v10726_v1 = vpop.f32.mrb[133].mxu0  ;;  %v10688_v52 = vpop.f32.mrb[126].mxu1  ;;  %v13674_v0 = vrot.slane %v7127_v3, %v13241_v49 }
 0xfb5   :  { %v10727_v28 = vadd.f32 %v10726_v1, %v10725_v59  ;;  %v10728_v8 = vpop.f32.mrb[134].mxu0  ;;  %v10689_v29 = vpop.f32.mrb[127].mxu1  ;;  %v13671_v59 = vrot.slane %v7128_v32, %v13241_v49 }
 0xfb6   :  { %v7041_v4 = vadd.f32 %v10687_v56, %v6784_v6  ;;  %v10690_v43 = vadd.f32 %v10689_v29, %v10688_v52  ;;  %v10729_v27 = vpop.f32.mrb[135].mxu0  ;;  %v7126_v6 = vunpack.c.l.bf16 %v7124_v37  ;;  %v13677_v56 = vrot.slane %v7129_v53, %v13241_v49 }
 0xfb7   :  { %v10730_v2 = vadd.f32 %v10729_v27, %v10728_v8 }
 0xfb8   :  { %v13653_v42 = vadd.f32 %v10727_v28, %v7041_v4  ;;  %v7044_v23 = vadd.f32 %v10690_v43, %v6787_v45  ;;  %v13665_v58 = vrot.slane %v7126_v6, %v13241_v49 }
 0xfba   :  { %v13661_v17 = vadd.f32 %v10730_v2, %v7044_v23  ;;  %v10691_v22 = vpop.f32.mrb[128].mxu1 }
 0xfbb   :  { %v10731_v60 = vpop.f32.mrb[136].mxu0  ;;  %v10692_v62 = vpop.f32.mrb[129].mxu1 }
 0xfbc   :  { %v10693_v35 = vadd.f32 %v10692_v62, %v10691_v22  ;;  %v10732_v15 = vpop.f32.mrb[137].mxu0  ;;  %v10694_v44 = vpop.f32.mrb[130].mxu1 }
 0xfbd   :  { %v10733_v45 = vadd.f32 %v10732_v15, %v10731_v60  ;;  %v10734_v39 = vpop.f32.mrb[138].mxu0  ;;  %v10695_v13 = vpop.f32.mrb[131].mxu1 }
 0xfbe   :  { %v7049_v40 = vadd.f32 %v10693_v35, %v13641_v18  ;;  %v10696_v16 = vadd.f32 %v10695_v13, %v10694_v44  ;;  %v10735_v24 = vpop.f32.mrb[139].mxu0 }
 0xfbf   :  { %v10736_v9 = vadd.f32 %v10735_v24, %v10734_v39 }
 0xfc0   :  { %v13667_v41 = vadd.f32 %v10733_v45, %v7049_v40  ;;  %v7052_v48 = vadd.f32 %v10696_v16, %v13643_v19 }
 0xfc2   :  { %v13679_v18 = vadd.f32 %v10736_v9, %v7052_v48  ;;  %v7200_v1 = vpop.f32.mrb[132].mxu1 }
 0xfc3   :  { %v7201_v52 = vadd.f32 %v7200_v1, %v13665_v58  ;;  %v7273_v28 = vpop.f32.mrb[140].mxu0  ;;  %v7202_v8 = vpop.f32.mrb[133].mxu1 }
 0xfc4   :  { %v7274_v29 = vadd.f32 %v7273_v28, %v13671_v59  ;;  %v7203_v19 = vadd.f32 %v7202_v8, %v13674_v0  ;;  %v7275_v4 = vpop.f32.mrb[141].mxu0  ;;  %v7204_v43 = vpop.f32.mrb[134].mxu1 }
 0xfc5   :  { %v7276_v27 = vadd.f32 %v7275_v4, %v13677_v56  ;;  %v7205_v2 = vadd.f32 %v7204_v43, %v13665_v58  ;;  %v7277_v23 = vpop.f32.mrb[142].mxu0  ;;  %v7206_v37 = vpop.f32.mrb[135].mxu1  ;;  %v7312_v62 = vmax.f32 %v7201_v52, 0.0 }
 0xfc6   :  { %v7278_v26 = vadd.f32 %v7277_v23, %v13671_v59  ;;  %v7207_v22 = vadd.f32 %v7206_v37, %v13674_v0  ;;  %v7279_v60 = vpop.f32.mrb[143].mxu0  ;;  %v7314_v15 = vmax.f32 %v7274_v29, 0.0  ;;  %v7313_v44 = vmax.f32 %v7203_v19, 0.0 }
 0xfc7   :  { %v7316_v6 = vmax.f32 %v7205_v2, 0.0  ;;  %v7280_v35 = vadd.f32 %v7279_v60, %v13677_v56  ;;  %v7315_v45 = vmax.f32 %v7276_v27, 0.0 }
 0xfc8   :  { %v7318_v32 = vmax.f32 %v7278_v26, 0.0  ;;  %v7317_v3 = vmax.f32 %v7207_v22, 0.0 }
 0xfc9   :  { %v7408_v39 = vpack.c.bf16 %v7316_v6, %v7312_v62  ;;  %v7319_v13 = vmax.f32 %v7280_v35, 0.0 }
 0xfca   :  { %v7410_v53 = vpack.c.bf16 %v7318_v32, %v7314_v15  ;;  %v7409_v40 = vpack.c.bf16 %v7317_v3, %v7313_v44  ;;  %v7210_v16 = vpop.f32.mrb[136].mxu1 }
 0xfcb   :  { %v7411_v24 = vpack.c.bf16 %v7319_v13, %v7315_v45  ;;  %v7211_v9 = vadd.f32 %v7210_v16, %v13665_v58  ;;  %v7283_v48 = vpop.f32.mrb[144].mxu0  ;;  %v7212_v1 = vpop.f32.mrb[137].mxu1 }
 0xfcc   :  { %v7284_v52 = vadd.f32 %v7283_v48, %v13671_v59  ;;  %v7213_v28 = vadd.f32 %v7212_v1, %v13674_v0  ;;  %v7285_v8 = vpop.f32.mrb[145].mxu0  ;;  %v7214_v29 = vpop.f32.mrb[138].mxu1  ;;  %7648 = vmatprep.mubr.bf16.mxu1 %v7409_v40 }
 0xfcd   :  { %v7286_v19 = vadd.f32 %v7285_v8, %v13677_v56  ;;  %v7215_v4 = vadd.f32 %v7214_v29, %v13665_v58  ;;  %v7287_v43 = vpop.f32.mrb[146].mxu0  ;;  %7713 = vmatprep.mubr.bf16.mxu0 %v7411_v24  ;;  %v7216_v27 = vpop.f32.mrb[139].mxu1  ;;  %7649 = vmatmul.mubr.bf16.vlgmr.msra.gmra.mrb[148].mxu1 %v7408_v39  ;;  %v7320_v26 = vmax.f32 %v7211_v9, 0.0 }
 0xfce   :  { %v7288_v2 = vadd.f32 %v7287_v43, %v13671_v59  ;;  %v7217_v23 = vadd.f32 %v7216_v27, %v13674_v0  ;;  %v7289_v37 = vpop.f32.mrb[147].mxu0  ;;  %7714 = vmatmul.mubr.bf16.vlgmr.msra.gmra.mrb[156].mxu0 %v7410_v53  ;;  %7801 = vmatpush1.bf16.msra.mxu1 %v10345_v61  ;;  %v7322_v62 = vmax.f32 %v7284_v52, 0.0  ;;  %v7321_v6 = vmax.f32 %v7213_v28, 0.0 }
 0xfcf   :  { %v7324_v22 = vmax.f32 %v7215_v4, 0.0  ;;  %v7290_v60 = vadd.f32 %v7289_v37, %v13677_v56  ;;  %7874 = vmatpush1.bf16.msra.mxu0 %v10347_v33  ;;  %v7323_v44 = vmax.f32 %v7286_v19, 0.0 }
 0xfd0   :  { %v7326_v35 = vmax.f32 %v7288_v2, 0.0  ;;  %v7325_v15 = vmax.f32 %v7217_v23, 0.0 }
 0xfd1   :  { %v7412_v32 = vpack.c.bf16 %v7324_v22, %v7320_v26  ;;  %v7327_v3 = vmax.f32 %v7290_v60, 0.0 }
 0xfd2   :  { %v7414_v45 = vpack.c.bf16 %v7326_v35, %v7322_v62  ;;  %v7413_v39 = vpack.c.bf16 %v7325_v15, %v7321_v6  ;;  %v7220_v13 = vpop.f32.mrb[140].mxu1 }
 0xfd3   :  { %v7415_v57 = vpack.c.bf16 %v7327_v3, %v7323_v44  ;;  %v7221_v10 = vadd.f32 %v7220_v13, %v13665_v58  ;;  %v7293_v61 = vpop.f32.mrb[148].mxu0  ;;  %v7222_v53 = vpop.f32.mrb[141].mxu1 }
 0xfd4   :  { %v7294_v40 = vadd.f32 %v7293_v61, %v13671_v59  ;;  %v7223_v5 = vadd.f32 %v7222_v53, %v13674_v0  ;;  %v7295_v46 = vpop.f32.mrb[149].mxu0  ;;  %v7224_v33 = vpop.f32.mrb[142].mxu1  ;;  %7656 = vmatprep.mubr.bf16.mxu1 %v7413_v39 }
 0xfd5   :  { %v7296_v16 = vadd.f32 %v7295_v46, %v13677_v56  ;;  %v7225_v24 = vadd.f32 %v7224_v33, %v13665_v58  ;;  %v7297_v9 = vpop.f32.mrb[150].mxu0  ;;  %7721 = vmatprep.mubr.bf16.mxu0 %v7415_v57  ;;  %v7226_v48 = vpop.f32.mrb[143].mxu1  ;;  %7657 = vmatmul.mubr.bf16.gmra.mrb[152].mxu1 %v7412_v32  ;;  %v7328_v8 = vmax.f32 %v7221_v10, 0.0 }
 0xfd6   :  { %v7298_v1 = vadd.f32 %v7297_v9, %v13671_v59  ;;  %v7227_v52 = vadd.f32 %v7226_v48, %v13674_v0  ;;  %v7299_v28 = vpop.f32.mrb[151].mxu0  ;;  %7722 = vmatmul.mubr.bf16.gmra.mrb[160].mxu0 %v7414_v45  ;;  %v7330_v4 = vmax.f32 %v7294_v40, 0.0  ;;  %v7329_v43 = vmax.f32 %v7223_v5, 0.0 }
 0xfd7   :  { %v7332_v29 = vmax.f32 %v7225_v24, 0.0  ;;  %v7300_v19 = vadd.f32 %v7299_v28, %v13677_v56  ;;  %v7331_v23 = vmax.f32 %v7296_v16, 0.0 }
 0xfd8   :  { %v7334_v27 = vmax.f32 %v7298_v1, 0.0  ;;  %v7333_v2 = vmax.f32 %v7227_v52, 0.0 }
 0xfd9   :  { %v7416_v37 = vpack.c.bf16 %v7332_v29, %v7328_v8  ;;  %v7335_v26 = vmax.f32 %v7300_v19, 0.0 }
 0xfda   :  { %v7418_v22 = vpack.c.bf16 %v7334_v27, %v7330_v4  ;;  %v7417_v60 = vpack.c.bf16 %v7333_v2, %v7329_v43  ;;  %v7230_v62 = vpop.f32.mrb[144].mxu1  ;;  %v11656_v4 = vld [vmem:[%s14510_s4 + $0x350] sm:$0xff]  }
 0xfdb   :  { %v7419_v6 = vpack.c.bf16 %v7335_v26, %v7331_v23  ;;  %v7231_v35 = vadd.f32 %v7230_v62, %v13665_v58  ;;  %v7303_v15 = vpop.f32.mrb[152].mxu0  ;;  %v7232_v44 = vpop.f32.mrb[145].mxu1  ;;  %v11657_v43 = vld [vmem:[%s14510_s4 + $0x3d0] sm:$0xff]   ;;  %v11660_v23 = vld [vmem:[%s14510_s4 + $0x358] sm:$0xff]   ;;  %v11665_v62 = vld [vmem:[%s14510_s4 + $0x3e0] sm:$0xff]  }
 0xfdc   :  { %v7304_v32 = vadd.f32 %v7303_v15, %v13671_v59  ;;  %v7233_v3 = vadd.f32 %v7232_v44, %v13674_v0  ;;  %v7305_v45 = vpop.f32.mrb[153].mxu0  ;;  %v7234_v39 = vpop.f32.mrb[146].mxu1  ;;  %7664 = vmatprep.mubr.bf16.mxu1 %v7417_v60  ;;  %v11658_v27 = vld [vmem:[%s14510_s4 + $0x310] sm:$0xff]   ;;  %v11662_v26 = vld [vmem:[%s14510_s4 + $0x318] sm:$0xff]   ;;  %v11664_v60 = vld [vmem:[%s14510_s4 + $0x360] sm:$0xff]  }
 0xfdd   :  { %v7306_v13 = vadd.f32 %v7305_v45, %v13677_v56  ;;  %v7235_v57 = vadd.f32 %v7234_v39, %v13665_v58  ;;  %v7307_v10 = vpop.f32.mrb[154].mxu0  ;;  %7729 = vmatprep.mubr.bf16.mxu0 %v7419_v6  ;;  %v7236_v61 = vpop.f32.mrb[147].mxu1  ;;  %7665 = vmatmul.mubr.bf16.gmra.mrb[156].mxu1 %v7416_v37  ;;  %v7336_v46 = vmax.f32 %v7231_v35, 0.0  ;;  %v11659_v2 = vld [vmem:[%s14510_s4 + $0x390] sm:$0xff]   ;;  %v11661_v37 = vld [vmem:[%s14510_s4 + $0x3d8] sm:$0xff]   ;;  %v11666_v6 = vld [vmem:[%s14510_s4 + $0x320] sm:$0xff]  }
 0xfde   :  { %v7308_v53 = vadd.f32 %v7307_v10, %v13671_v59  ;;  %v7237_v40 = vadd.f32 %v7236_v61, %v13674_v0  ;;  %v7309_v5 = vpop.f32.mrb[155].mxu0  ;;  %7730 = vmatmul.mubr.bf16.gmra.mrb[164].mxu0 %v7418_v22  ;;  %v7338_v24 = vmax.f32 %v7304_v32, 0.0  ;;  %v7337_v9 = vmax.f32 %v7233_v3, 0.0  ;;  %v11653_v59 = vld [vmem:[%s14510_s4 + $0x3c8] sm:$0xff]   ;;  %v11663_v22 = vld [vmem:[%s14510_s4 + $0x398] sm:$0xff]   ;;  %v11667_v35 = vld [vmem:[%s14510_s4 + $0x3a0] sm:$0xff]  }
 0xfdf   :  { %v7340_v33 = vmax.f32 %v7235_v57, 0.0  ;;  %v7310_v16 = vadd.f32 %v7309_v5, %v13677_v56  ;;  %v7339_v52 = vmax.f32 %v7306_v13, 0.0  ;;  %v11654_v0 = vld [vmem:[%s14510_s4 + $0x308] sm:$0xff]   ;;  %v11672_v45 = vld [vmem:[%s14510_s4 + $0x370] sm:$0xff]   ;;  %v11676_v10 = vld [vmem:[%s14510_s4 + $0x378] sm:$0xff]  }
 0xfe0   :  { %v7342_v48 = vmax.f32 %v7308_v53, 0.0  ;;  %v7341_v1 = vmax.f32 %v7237_v40, 0.0  ;;  %v11655_v56 = vld [vmem:[%s14510_s4 + $0x388] sm:$0xff]   ;;  %v11673_v39 = vld [vmem:[%s14510_s4 + $0x3f0] sm:$0xff]   ;;  %v11677_v61 = vld [vmem:[%s14510_s4 + $0x3f8] sm:$0xff]  }
 0xfe1   :  { %v7420_v58 = vpack.c.bf16 %v7340_v33, %v7336_v46  ;;  %v7343_v28 = vmax.f32 %v7310_v16, 0.0  ;;  %v11668_v15 = vld [vmem:[%s14510_s4 + $0x368] sm:$0xff]   ;;  %v11674_v13 = vld [vmem:[%s14510_s4 + $0x330] sm:$0xff]   ;;  %v11678_v53 = vld [vmem:[%s14510_s4 + $0x338] sm:$0xff]  }
 0xfe2   :  { %v7422_v8 = vpack.c.bf16 %v7342_v48, %v7338_v24  ;;  %v7421_v29 = vpack.c.bf16 %v7341_v1, %v7337_v9  ;;  %v11669_v44 = vld [vmem:[%s14510_s4 + $0x3e8] sm:$0xff]   ;;  %v11675_v57 = vld [vmem:[%s14510_s4 + $0x3b0] sm:$0xff]   ;;  %v11679_v40 = vld [vmem:[%s14510_s4 + $0x3b8] sm:$0xff]  }
 0xfe3   :  { %v7423_v19 = vpack.c.bf16 %v7343_v28, %v7339_v52  ;;  %v11670_v32 = vld [vmem:[%s14510_s4 + $0x328] sm:$0xff]  }
 0xfe4   :  { %7672 = vmatprep.mubr.bf16.mxu1 %v7421_v29  ;;  %v11671_v3 = vld [vmem:[%s14510_s4 + $0x3a8] sm:$0xff]  }
 0xfe5   :  { %7737 = vmatprep.mubr.bf16.mxu0 %v7423_v19  ;;  %7673 = vmatmul.mubr.bf16.gmra.mrb[160].mxu1 %v7420_v58 }
 0xfe6   :  { %7738 = vmatmul.mubr.bf16.gmra.mrb[168].mxu0 %v7422_v8  ;;  %7832 = vmatprep.mubr.bf16.mxu1 %v11994_v14 }
 0xfe7   :  { %7905 = vmatprep.mubr.bf16.mxu0 %v11994_v14 }
 0xfed   :  { %10349 = vmatmul.mubr.msk.bf16.vlgmr.msra.gmra.mrb[164].mxu1 %vm36_vm0, %v13049_v20 }
 0xfee   :  { %10353 = vmatmul.mubr.msk.bf16.vlgmr.msra.gmra.mrb[172].mxu0 %vm36_vm0, %v13049_v20  ;;  %7842 = vmatprep.mubr.bf16.mxu1 %v11994_v14  ;;  %v11648_v20 = vld [vmem:[%s14510_s4 + $0x340] sm:$0xff]  }
 0xfef   :  { %7915 = vmatprep.mubr.bf16.mxu0 %v11994_v14  ;;  %10817 = vmatprep.subr.bf16.mxu1 %v11648_v20 }
 0xff5   :  { %10350 = vmatmul.mubr.msk.bf16.gmra.mrb[168].mxu1 %vm36_vm0, %v13069_v36 }
 0xff6   :  { %10354 = vmatmul.mubr.msk.bf16.gmra.mrb[176].mxu0 %vm36_vm0, %v13069_v36  ;;  %7852 = vmatprep.mubr.bf16.mxu1 %v11994_v14  ;;  %v11649_v36 = vld [vmem:[%s14510_s4 + $0x3c0] sm:$0xff]  }
 0xff7   :  { %7925 = vmatprep.mubr.bf16.mxu0 %v11994_v14  ;;  %10857 = vmatprep.subr.bf16.mxu0 %v11649_v36 }
 0xffd   :  { %10351 = vmatmul.mubr.msk.bf16.gmra.mrb[172].mxu1 %vm36_vm0, %v13089_v25 }
 0xffe   :  { %10355 = vmatmul.mubr.msk.bf16.gmra.mrb[180].mxu0 %vm36_vm0, %v13089_v25  ;;  %7862 = vmatprep.mubr.bf16.mxu1 %v11994_v14  ;;  %v11650_v25 = vld [vmem:[%s14510_s4 + $0x300] sm:$0xff]  }
 0xfff   :  { %7935 = vmatprep.mubr.bf16.mxu0 %v11994_v14  ;;  %v11651_v14 = vld [vmem:[%s14510_s4 + $0x380] sm:$0xff]   ;;  %10818 = vmatpush3.bf16.msra.mxu1 %v11650_v25 }
0x1000   :  { %10858 = vmatpush3.bf16.msra.mxu0 %v11651_v14 }
0x1001   :  { %10859 = vmatprep.subr.bf16.mxu0 %v11653_v59 }
0x1004   :  { %10860 = vmatpush3.bf16.msra.mxu0 %v11655_v56 }
0x1005   :  { %10352 = vmatmul.mubr.msk.bf16.gmra.mrb[176].mxu1 %vm36_vm0, %v13109_v21  ;;  %10861 = vmatprep.subr.bf16.mxu0 %v11657_v43 }
0x1006   :  { %10356 = vmatmul.mubr.msk.bf16.gmra.mrb[184].mxu0 %vm36_vm0, %v13109_v21  ;;  %v11652_v21 = vld [vmem:[%s14510_s4 + $0x348] sm:$0xff]  }
0x1007   :  { %10819 = vmatprep.subr.bf16.mxu1 %v11652_v21 }
0x1008   :  { %10820 = vmatpush3.bf16.msra.mxu1 %v11654_v0  ;;  %10862 = vmatpush3.bf16.msra.mxu0 %v11659_v2 }
0x1009   :  { %10821 = vmatprep.subr.bf16.mxu1 %v11656_v4  ;;  %10863 = vmatprep.subr.bf16.mxu0 %v11661_v37 }
0x100c   :  { %10822 = vmatpush3.bf16.msra.mxu1 %v11658_v27  ;;  %10864 = vmatpush3.bf16.msra.mxu0 %v11663_v22 }
0x100d   :  { %10823 = vmatprep.subr.bf16.mxu1 %v11660_v23  ;;  %10865 = vmatprep.subr.bf16.mxu0 %v11665_v62 }
0x1010   :  { %10824 = vmatpush3.bf16.msra.mxu1 %v11662_v26  ;;  %10866 = vmatpush3.bf16.msra.mxu0 %v11667_v35 }
0x1011   :  { %10825 = vmatprep.subr.bf16.mxu1 %v11664_v60  ;;  %10867 = vmatprep.subr.bf16.mxu0 %v11669_v44 }
0x1014   :  { %10826 = vmatpush3.bf16.msra.mxu1 %v11666_v6  ;;  %10868 = vmatpush3.bf16.msra.mxu0 %v11671_v3 }
0x1015   :  { %10827 = vmatprep.subr.bf16.mxu1 %v11668_v15  ;;  %10869 = vmatprep.subr.bf16.mxu0 %v11673_v39 }
0x1018   :  { %10828 = vmatpush3.bf16.msra.mxu1 %v11670_v32  ;;  %10870 = vmatpush3.bf16.msra.mxu0 %v11675_v57 }
0x1019   :  { %10829 = vmatprep.subr.bf16.mxu1 %v11672_v45  ;;  %10871 = vmatprep.subr.bf16.mxu0 %v11677_v61 }
0x101c   :  { %10830 = vmatpush3.bf16.msra.mxu1 %v11674_v13  ;;  %10872 = vmatpush3.bf16.msra.mxu0 %v11679_v40 }
0x101d   :  { %10831 = vmatprep.subr.bf16.mxu1 %v11676_v10  ;;  %11338 = vmatprep.subr.bf16.mxu0 %v11978_v11 }
0x1020   :  { %10832 = vmatpush3.bf16.msra.mxu1 %v11678_v53  ;;  %v7759_v53 = vld [vmem:[%s14509_s3 + $0xb8] sm:$0x11] }
0x1021   :  { %11324 = vmatprep.subr.bf16.mxu1 %v11978_v11 }
0x10a0   :  { %v10753_v5 = vpop.f32.mrb[148].mxu1 }
0x10a1   :  { %v10793_v46 = vpop.f32.mrb[156].mxu0  ;;  %v10754_v33 = vpop.f32.mrb[149].mxu1 }
0x10a2   :  { %v10755_v16 = vadd.f32 %v10754_v33, %v10753_v5  ;;  %v10794_v24 = vpop.f32.mrb[157].mxu0  ;;  %v10756_v9 = vpop.f32.mrb[150].mxu1 }
0x10a3   :  { %v10795_v48 = vadd.f32 %v10794_v24, %v10793_v46  ;;  %v10796_v1 = vpop.f32.mrb[158].mxu0  ;;  %v10757_v52 = vpop.f32.mrb[151].mxu1 }
0x10a4   :  { %v10758_v58 = vadd.f32 %v10757_v52, %v10756_v9  ;;  %v10797_v28 = vpop.f32.mrb[159].mxu0 }
0x10a5   :  { %v7716_v8 = vadd.f32 %v10795_v48, %v10755_v16  ;;  %v10798_v29 = vadd.f32 %v10797_v28, %v10796_v1  ;;  %v7762_v1 = vunpack.c.l.bf16 %v7759_v53 }
0x10a7   :  { %v13842_v19 = vadd.f32 %v7716_v8, %v13645_v7  ;;  %v7719_v20 = vadd.f32 %v10798_v29, %v10758_v58  ;;  %v7763_v8 = vunpack.c.h.bf16 %v7759_v53 }
0x10a8   :  { %v10759_v36 = vpop.f32.mrb[152].mxu1 }
0x10a9   :  { %v13845_v25 = vadd.f32 %v7719_v20, %v13647_v31  ;;  %v10799_v14 = vpop.f32.mrb[160].mxu0  ;;  %v10760_v21 = vpop.f32.mrb[153].mxu1 }
0x10aa   :  { %v10761_v59 = vadd.f32 %v10760_v21, %v10759_v36  ;;  %v10800_v0 = vpop.f32.mrb[161].mxu0  ;;  %v10762_v56 = vpop.f32.mrb[154].mxu1 }
0x10ab   :  { %v10801_v4 = vadd.f32 %v10800_v0, %v10799_v14  ;;  %v10802_v43 = vpop.f32.mrb[162].mxu0  ;;  %v10763_v27 = vpop.f32.mrb[155].mxu1 }
0x10ac   :  { %v10764_v2 = vadd.f32 %v10763_v27, %v10762_v56  ;;  %v10803_v23 = vpop.f32.mrb[163].mxu0 }
0x10ad   :  { %v7724_v37 = vadd.f32 %v10801_v4, %v10761_v59  ;;  %v10804_v26 = vadd.f32 %v10803_v23, %v10802_v43  ;;  %v13878_v4 = vrot.slane %v7763_v8, %v13241_v49 }
0x10af   :  { %v13848_v7 = vadd.f32 %v7724_v37, %v13649_v50  ;;  %v7727_v22 = vadd.f32 %v10804_v26, %v10764_v2  ;;  %v7758_v50 = vld [vmem:[%s14509_s3 + $0xb0] sm:$0x11] }
0x10b0   :  { %v10765_v60 = vpop.f32.mrb[156].mxu1  ;;  %v7760_v16 = vunpack.c.l.bf16 %v7758_v50  ;;  %v7761_v52 = vunpack.c.h.bf16 %v7758_v50 }
0x10b1   :  { %v13851_v31 = vadd.f32 %v7727_v22, %v13651_v54  ;;  %v10805_v62 = vpop.f32.mrb[164].mxu0  ;;  %v10766_v6 = vpop.f32.mrb[157].mxu1 }
0x10b2   :  { %v10767_v35 = vadd.f32 %v10766_v6, %v10765_v60  ;;  %v10806_v15 = vpop.f32.mrb[165].mxu0  ;;  %v10768_v44 = vpop.f32.mrb[158].mxu1  ;;  %v13866_v21 = vrot.slane %v7760_v16, %v13241_v49  ;;  %v13872_v59 = vrot.slane %v7761_v52, %v13241_v49 }
0x10b3   :  { %v10807_v32 = vadd.f32 %v10806_v15, %v10805_v62  ;;  %v10808_v3 = vpop.f32.mrb[166].mxu0  ;;  %v10769_v45 = vpop.f32.mrb[159].mxu1 }
0x10b4   :  { %v10770_v39 = vadd.f32 %v10769_v45, %v10768_v44  ;;  %v10809_v13 = vpop.f32.mrb[167].mxu0 }
0x10b5   :  { %v7732_v57 = vadd.f32 %v10807_v32, %v10767_v35  ;;  %v10810_v10 = vadd.f32 %v10809_v13, %v10808_v3 }
0x10b7   :  { %v13857_v61 = vadd.f32 %v7732_v57, %v13653_v42  ;;  %v7735_v54 = vadd.f32 %v10810_v10, %v10770_v39 }
0x10b8   :  { %v10771_v40 = vpop.f32.mrb[160].mxu1 }
0x10b9   :  { %v13863_v5 = vadd.f32 %v7735_v54, %v13661_v17  ;;  %v10811_v46 = vpop.f32.mrb[168].mxu0  ;;  %v10772_v33 = vpop.f32.mrb[161].mxu1  ;;  %v13869_v17 = vrot.slane %v7762_v1, %v13241_v49 }
0x10ba   :  { %v10773_v24 = vadd.f32 %v10772_v33, %v10771_v40  ;;  %v10812_v9 = vpop.f32.mrb[169].mxu0  ;;  %v10774_v48 = vpop.f32.mrb[162].mxu1 }
0x10bb   :  { %v10813_v58 = vadd.f32 %v10812_v9, %v10811_v46  ;;  %v10814_v42 = vpop.f32.mrb[170].mxu0  ;;  %v10775_v28 = vpop.f32.mrb[163].mxu1 }
0x10bc   :  { %v10776_v29 = vadd.f32 %v10775_v28, %v10774_v48  ;;  %v10815_v20 = vpop.f32.mrb[171].mxu0 }
0x10bd   :  { %v7740_v36 = vadd.f32 %v10813_v58, %v10773_v24  ;;  %v10816_v14 = vadd.f32 %v10815_v20, %v10814_v42  ;;  %v8557_v20 = vld [vmem:[%s14511_s1 + $0x1f] sm:$0x1] }
0x10bf   :  { %v13875_v0 = vadd.f32 %v7740_v36, %v13667_v41  ;;  %v7743_v56 = vadd.f32 %v10816_v14, %v10776_v29  ;;  %v8599_v41 = vld [vmem:[%s14507_s2 + $0x27] sm:$0xff] }
0x10c0   :  { %v7834_v43 = vpop.f32.mrb[164].mxu1  ;;  %v8600_v13 = vpack.c.bf16 %v8599_v41, %v8599_v41  ;;  %v8565_v41 = vrot.slane %v8557_v20, 7 }
0x10c1   :  { %v13881_v27 = vadd.f32 %v7743_v56, %v13679_v18  ;;  %v7835_v2 = vadd.f32 %v7834_v43, %v13866_v21  ;;  %v7907_v23 = vpop.f32.mrb[172].mxu0  ;;  %v7836_v37 = vpop.f32.mrb[165].mxu1 }
0x10c2   :  { %v7908_v26 = vadd.f32 %v7907_v23, %v13869_v17  ;;  %v7837_v22 = vadd.f32 %v7836_v37, %v13872_v59  ;;  %v7909_v60 = vpop.f32.mrb[173].mxu0  ;;  %v7838_v62 = vpop.f32.mrb[166].mxu1  ;;  %v8630_v58 = vsel %vm8591_vm5, %v8600_v13, 0 }
0x10c3   :  { %v7910_v49 = vadd.f32 %v7909_v60, %v13878_v4  ;;  %v7839_v6 = vadd.f32 %v7838_v62, %v13866_v21  ;;  %v7911_v18 = vpop.f32.mrb[174].mxu0  ;;  %v7840_v35 = vpop.f32.mrb[167].mxu1  ;;  %v7946_v3 = vmax.f32 %v7835_v2, 0.0  ;;  %v8558_v62 = vld [vmem:[%s14511_s1 + $0x2f] sm:$0x1] }
0x10c4   :  { %v7912_v15 = vadd.f32 %v7911_v18, %v13869_v17  ;;  %v7841_v44 = vadd.f32 %v7840_v35, %v13872_v59  ;;  %v7913_v32 = vpop.f32.mrb[175].mxu0  ;;  %v7948_v57 = vmax.f32 %v7908_v26, 0.0  ;;  %v7947_v10 = vmax.f32 %v7837_v22, 0.0 }
0x10c5   :  { %v7950_v45 = vmax.f32 %v7839_v6, 0.0  ;;  %v7914_v39 = vadd.f32 %v7913_v32, %v13878_v4  ;;  %v7949_v53 = vmax.f32 %v7910_v49, 0.0 }
0x10c6   :  { %v7952_v50 = vmax.f32 %v7912_v15, 0.0  ;;  %v7951_v54 = vmax.f32 %v7841_v44, 0.0  ;;  %v8556_v15 = vld [vmem:[%s14511_s1 + $0xf] sm:$0x1] }
0x10c7   :  { %v8042_v40 = vpack.c.bf16 %v7950_v45, %v7946_v3  ;;  %v7953_v46 = vmax.f32 %v7914_v39, 0.0 }
0x10c8   :  { %v8044_v33 = vpack.c.bf16 %v7952_v50, %v7948_v57  ;;  %v8043_v16 = vpack.c.bf16 %v7951_v54, %v7947_v10  ;;  %v7844_v24 = vpop.f32.mrb[168].mxu1  ;;  %v8559_v57 = vld [vmem:[%s14511_s1 + $0x3f] sm:$0x1]  ;;  %v8568_v10 = vrot.slane %v8558_v62, 6 }
0x10c9   :  { %v8045_v9 = vpack.c.bf16 %v7953_v46, %v7949_v53  ;;  %v7845_v48 = vadd.f32 %v7844_v24, %v13866_v21  ;;  %v7917_v1 = vpop.f32.mrb[176].mxu0  ;;  %v7846_v52 = vpop.f32.mrb[169].mxu1  ;;  %v8586_v46 = vsel %vm8585_vm6, %v8556_v15, %v8565_v41 }
0x10ca   :  { %v7918_v42 = vadd.f32 %v7917_v1, %v13869_v17  ;;  %v7847_v28 = vadd.f32 %v7846_v52, %v13872_v59  ;;  %v7919_v8 = vpop.f32.mrb[177].mxu0  ;;  %v7848_v29 = vpop.f32.mrb[170].mxu1  ;;  %8282 = vmatprep.mubr.bf16.mxu1 %v8043_v16 }
0x10cb   :  { %v7920_v36 = vadd.f32 %v7919_v8, %v13878_v4  ;;  %v7849_v14 = vadd.f32 %v7848_v29, %v13866_v21  ;;  %v7921_v56 = vpop.f32.mrb[178].mxu0  ;;  %8347 = vmatprep.mubr.bf16.mxu0 %v8045_v9  ;;  %v7850_v43 = vpop.f32.mrb[171].mxu1  ;;  %8283 = vmatmul.mubr.bf16.vlgmr.msra.gmra.mrb[180].mxu1 %v8042_v40  ;;  %v7954_v26 = vmax.f32 %v7845_v48, 0.0  ;;  %v8560_v48 = vld [vmem:[%s14511_s1 + $0x4f] sm:$0x1] }
0x10cc   :  { %v7922_v2 = vadd.f32 %v7921_v56, %v13869_v17  ;;  %v7851_v23 = vadd.f32 %v7850_v43, %v13872_v59  ;;  %v7923_v37 = vpop.f32.mrb[179].mxu0  ;;  %8348 = vmatmul.mubr.bf16.vlgmr.msra.gmra.mrb[188].mxu0 %v8044_v33  ;;  %11325 = vmatpush3.bf16.msra.mxu1 %v8630_v58  ;;  %v7956_v49 = vmax.f32 %v7918_v42, 0.0  ;;  %v7955_v6 = vmax.f32 %v7847_v28, 0.0 }
0x10cd   :  { %v7958_v22 = vmax.f32 %v7849_v14, 0.0  ;;  %v7924_v60 = vadd.f32 %v7923_v37, %v13878_v4  ;;  %11330 = vmatprep.subr.bf16.mxu1 %v11978_v11  ;;  %v7957_v44 = vmax.f32 %v7920_v36, 0.0  ;;  %v8571_v28 = vrot.slane %v8559_v57, 5 }
0x10ce   :  { %v7960_v18 = vmax.f32 %v7922_v2, 0.0  ;;  %v7959_v35 = vmax.f32 %v7851_v23, 0.0  ;;  %v8588_v36 = vsel %vm8587_vm7, %v8586_v46, %v8568_v10  ;;  %v8574_v2 = vrot.slane %v8560_v48, 4 }
0x10cf   :  { %v8046_v32 = vpack.c.bf16 %v7958_v22, %v7954_v26  ;;  %v7961_v3 = vmax.f32 %v7924_v60, 0.0  ;;  %v8561_v60 = vld [vmem:[%s14511_s1 + $0x5f] sm:$0x1] }
0x10d0   :  { %v8048_v45 = vpack.c.bf16 %v7960_v18, %v7956_v49  ;;  %v8047_v39 = vpack.c.bf16 %v7959_v35, %v7955_v6  ;;  %v7854_v13 = vpop.f32.mrb[172].mxu1  ;;  %v8590_v6 = vsel %vm8589_vm8, %v8588_v36, %v8571_v28 }
0x10d1   :  { %v8049_v50 = vpack.c.bf16 %v7961_v3, %v7957_v44  ;;  %v7855_v54 = vadd.f32 %v7854_v13, %v13866_v21  ;;  %v7927_v53 = vpop.f32.mrb[180].mxu0  ;;  %v7856_v40 = vpop.f32.mrb[173].mxu1  ;;  %v8577_v3 = vrot.slane %v8561_v60, 3  ;;  %v8592_v57 = vsel %vm8591_vm5, %v8590_v6, %v8574_v2 }
0x10d2   :  { %v7928_v33 = vadd.f32 %v7927_v53, %v13869_v17  ;;  %v7857_v16 = vadd.f32 %v7856_v40, %v13872_v59  ;;  %v7929_v24 = vpop.f32.mrb[181].mxu0  ;;  %v7858_v9 = vpop.f32.mrb[174].mxu1  ;;  %8290 = vmatprep.mubr.bf16.mxu1 %v8047_v39 }
0x10d3   :  { %v7930_v1 = vadd.f32 %v7929_v24, %v13878_v4  ;;  %v7859_v52 = vadd.f32 %v7858_v9, %v13866_v21  ;;  %v7931_v58 = vpop.f32.mrb[182].mxu0  ;;  %8355 = vmatprep.mubr.bf16.mxu0 %v8049_v50  ;;  %v7860_v42 = vpop.f32.mrb[175].mxu1  ;;  %8291 = vmatmul.mubr.bf16.gmra.mrb[184].mxu1 %v8046_v32  ;;  %v7962_v14 = vmax.f32 %v7855_v54, 0.0  ;;  %v8562_v32 = vld [vmem:[%s14511_s1 + $0x6f] sm:$0x1] }
0x10d4   :  { %v7932_v8 = vadd.f32 %v7931_v58, %v13869_v17  ;;  %v7861_v29 = vadd.f32 %v7860_v42, %v13872_v59  ;;  %v7933_v20 = vpop.f32.mrb[183].mxu0  ;;  %8356 = vmatmul.mubr.bf16.gmra.mrb[192].mxu0 %v8048_v45  ;;  %v7964_v23 = vmax.f32 %v7928_v33, 0.0  ;;  %v7963_v37 = vmax.f32 %v7857_v16, 0.0 }
0x10d5   :  { %v7966_v56 = vmax.f32 %v7859_v52, 0.0  ;;  %v7934_v43 = vadd.f32 %v7933_v20, %v13878_v4  ;;  %v7965_v62 = vmax.f32 %v7930_v1, 0.0  ;;  %v8580_v24 = vrot.slane %v8562_v32, 2  ;;  %v8563_v52 = vld [vmem:[%s14511_s1 + $0x7f] sm:$0x1] }
0x10d6   :  { %v7968_v26 = vmax.f32 %v7932_v8, 0.0  ;;  %v7967_v22 = vmax.f32 %v7861_v29, 0.0  ;;  %v8594_v58 = vsel %vm8593_vm9, %v8592_v57, %v8577_v3 }
0x10d7   :  { %v8050_v41 = vpack.c.bf16 %v7966_v56, %v7962_v14  ;;  %v7969_v49 = vmax.f32 %v7934_v43, 0.0 }
0x10d8   :  { %v8052_v18 = vpack.c.bf16 %v7968_v26, %v7964_v23  ;;  %v8051_v35 = vpack.c.bf16 %v7967_v22, %v7963_v37  ;;  %v7864_v15 = vpop.f32.mrb[176].mxu1  ;;  %v8596_v23 = vsel %vm8595_vm10, %v8594_v58, %v8580_v24 }
0x10d9   :  { %v8053_v44 = vpack.c.bf16 %v7969_v49, %v7965_v62  ;;  %v7865_v45 = vadd.f32 %v7864_v15, %v13866_v21  ;;  %v7937_v39 = vpop.f32.mrb[184].mxu0  ;;  %v7866_v13 = vpop.f32.mrb[177].mxu1 }
0x10da   :  { %v7938_v10 = vadd.f32 %v7937_v39, %v13869_v17  ;;  %v7867_v50 = vadd.f32 %v7866_v13, %v13872_v59  ;;  %v7939_v54 = vpop.f32.mrb[185].mxu0  ;;  %v7868_v53 = vpop.f32.mrb[178].mxu1  ;;  %8298 = vmatprep.mubr.bf16.mxu1 %v8051_v35  ;;  %v13961_v39 = vld [vmem:[%s14507_s2 + $0x26] ss:$0 sm:$0xff] }
0x10db   :  { %v7940_v40 = vadd.f32 %v7939_v54, %v13878_v4  ;;  %v7869_v46 = vadd.f32 %v7868_v53, %v13866_v21  ;;  %v7941_v33 = vpop.f32.mrb[186].mxu0  ;;  %8363 = vmatprep.mubr.bf16.mxu0 %v8053_v44  ;;  %v7870_v16 = vpop.f32.mrb[179].mxu1  ;;  %8299 = vmatmul.mubr.bf16.gmra.mrb[188].mxu1 %v8050_v41  ;;  %v7970_v42 = vmax.f32 %v7865_v45, 0.0 }
0x10dc   :  { %v7942_v9 = vadd.f32 %v7941_v33, %v13869_v17  ;;  %v7871_v48 = vadd.f32 %v7870_v16, %v13872_v59  ;;  %v7943_v1 = vpop.f32.mrb[187].mxu0  ;;  %8364 = vmatmul.mubr.bf16.gmra.mrb[196].mxu0 %v8052_v18  ;;  %v7972_v8 = vmax.f32 %v7938_v10, 0.0  ;;  %v7971_v29 = vmax.f32 %v7867_v50, 0.0 }
0x10dd   :  { %v7974_v21 = vmax.f32 %v7869_v46, 0.0  ;;  %v7944_v28 = vadd.f32 %v7943_v1, %v13878_v4  ;;  %v7973_v14 = vmax.f32 %v7940_v40, 0.0  ;;  %v8583_v59 = vrot.slane %v8563_v52, 1 }
0x10de   :  { %v7976_v20 = vmax.f32 %v7942_v9, 0.0  ;;  %v7975_v36 = vmax.f32 %v7871_v48, 0.0 }
0x10df   :  { %v8054_v17 = vpack.c.bf16 %v7974_v21, %v7970_v42  ;;  %v7977_v56 = vmax.f32 %v7944_v28, 0.0  ;;  %v8598_v26 = vsel %vm8597_vm11, %v8596_v23, %v8583_v59 }
0x10e0   :  { %v8056_v43 = vpack.c.bf16 %v7976_v20, %v7972_v8  ;;  %v8055_v2 = vpack.c.bf16 %v7975_v36, %v7971_v29  ;;  %v8621_v4 = vpack.c.bf16 %v8598_v26, %v8598_v26 }
0x10e1   :  { %v8057_v37 = vpack.c.bf16 %v7977_v56, %v7973_v14 }
0x10e2   :  { %8306 = vmatprep.mubr.bf16.mxu1 %v8055_v2 }
0x10e3   :  { %8371 = vmatprep.mubr.bf16.mxu0 %v8057_v37  ;;  %8307 = vmatmul.mubr.bf16.gmra.mrb[192].mxu1 %v8054_v17 }
0x10e4   :  { %8372 = vmatmul.mubr.bf16.gmra.mrb[200].mxu0 %v8056_v43  ;;  %11326 = vmatprep.mubr.msk.bf16.mxu1 %vm11979_vm1, %v11978_v11 }
0x10e5   :  { %11346 = vmatprep.mubr.msk.bf16.mxu0 %vm11979_vm1, %v11978_v11 }
0x10eb   :  { %11327 = vmatmul.mubr.msk.bf16.vlgmr.msra.gmra.mrb[196].mxu1 %vm799_vm3, %v8621_v4 }
0x10ec   :  { %11334 = vmatprep.mubr.msk.bf16.mxu1 %vm11979_vm1, %v11978_v11 }
0x119e   :  { %v10833_v22 = vpop.f32.mrb[180].mxu1 }
0x119f   :  { %v10873_v60 = vpop.f32.mrb[188].mxu0  ;;  %v10834_v62 = vpop.f32.mrb[181].mxu1 }
0x11a0   :  { %v10835_v41 = vadd.f32 %v10834_v62, %v10833_v22  ;;  %v10874_v49 = vpop.f32.mrb[189].mxu0  ;;  %v10836_v6 = vpop.f32.mrb[182].mxu1 }
0x11a1   :  { %v10875_v18 = vadd.f32 %v10874_v49, %v10873_v60  ;;  %v10876_v35 = vpop.f32.mrb[190].mxu0  ;;  %v10837_v15 = vpop.f32.mrb[183].mxu1 }
0x11a2   :  { %v10838_v44 = vadd.f32 %v10837_v15, %v10836_v6  ;;  %v10877_v32 = vpop.f32.mrb[191].mxu0 }
0x11a3   :  { %v8350_v3 = vadd.f32 %v10875_v18, %v10835_v41  ;;  %v10878_v45 = vadd.f32 %v10877_v32, %v10876_v35 }
0x11a5   :  { %v8380_v13 = vadd.f32 %v8350_v3, %v13842_v19  ;;  %v8353_v57 = vadd.f32 %v10878_v45, %v10838_v44 }
0x11a6   :  { %v10839_v10 = vpop.f32.mrb[184].mxu1 }
0x11a7   :  { %v13965_v50 = vadd.f32 %v8353_v57, %v13845_v25  ;;  %v10879_v54 = vpop.f32.mrb[192].mxu0  ;;  %v10840_v53 = vpop.f32.mrb[185].mxu1  ;;  %v13968_v40 = vadd.f32 %v13961_v39, %v8380_v13  ;;  %v10392_v13 = vld [vmem:[%s14507_s2 + $0x4f] ss:$0 sm:$0xff] }
0x11a8   :  { %v10841_v46 = vadd.f32 %v10840_v53, %v10839_v10  ;;  %v10880_v33 = vpop.f32.mrb[193].mxu0  ;;  %v10842_v16 = vpop.f32.mrb[186].mxu1 }
0x11a9   :  { %v10881_v24 = vadd.f32 %v10880_v33, %v10879_v54  ;;  %v10882_v9 = vpop.f32.mrb[194].mxu0  ;;  %v10843_v48 = vpop.f32.mrb[187].mxu1 }
0x11aa   :  { %v10844_v1 = vadd.f32 %v10843_v48, %v10842_v16  ;;  %v10883_v52 = vpop.f32.mrb[195].mxu0 }
0x11ab   :  { %v8358_v58 = vadd.f32 %v10881_v24, %v10841_v46  ;;  %v10884_v19 = vadd.f32 %v10883_v52, %v10882_v9 }
0x11ad   :  { %v13971_v42 = vadd.f32 %v8358_v58, %v13848_v7  ;;  %v8361_v25 = vadd.f32 %v10884_v19, %v10844_v1 }
0x11ae   :  { %v10845_v21 = vpop.f32.mrb[188].mxu1 }
0x11af   :  { %v8383_v28 = vadd.f32 %v8361_v25, %v13851_v31  ;;  %v10885_v8 = vpop.f32.mrb[196].mxu0  ;;  %v10846_v29 = vpop.f32.mrb[189].mxu1 }
0x11b0   :  { %v10847_v20 = vadd.f32 %v10846_v29, %v10845_v21  ;;  %v10886_v36 = vpop.f32.mrb[197].mxu0  ;;  %v10848_v14 = vpop.f32.mrb[190].mxu1  ;;  %v8610_v29 = vld [vmem:[%s14507_s2 + $0x60] sm:$0xff] }
0x11b1   :  { %v10887_v17 = vadd.f32 %v10886_v36, %v10885_v8  ;;  %v10888_v56 = vpop.f32.mrb[198].mxu0  ;;  %v10849_v59 = vpop.f32.mrb[191].mxu1  ;;  %v13975_v43 = vadd.f32 %v13961_v39, %v8383_v28  ;;  %v8608_v28 = vld [vmem:[%s14507_s2 + $0x50] sm:$0xff]  ;;  %v8609_v8 = vld [vmem:[%s14507_s2 + $0x58] sm:$0xff]  ;;  %v8611_v36 = vld [vmem:[%s14507_s2 + $0x68] sm:$0xff] }
0x11b2   :  { %v10850_v2 = vadd.f32 %v10849_v59, %v10848_v14  ;;  %v10889_v23 = vpop.f32.mrb[199].mxu0  ;;  %v8601_v14 = vld [vmem:[%s14507_s2 + $0x2f] sm:$0xff]  ;;  %v8603_v59 = vld [vmem:[%s14507_s2 + $0x3f] sm:$0xff] }
0x11b3   :  { %v8366_v37 = vadd.f32 %v10887_v17, %v10847_v20  ;;  %v10890_v7 = vadd.f32 %v10889_v23, %v10888_v56  ;;  %v14013_v20 = vpack.c.bf16 %v8609_v8, %v8608_v28  ;;  %v8602_v17 = vld [vmem:[%s14507_s2 + $0x37] sm:$0xff]  ;;  %v8604_v23 = vld [vmem:[%s14507_s2 + $0x47] sm:$0xff] }
0x11b4   :  { %v14024_v56 = vpack.c.bf16 %v8602_v17, %v8601_v14 }
0x11b5   :  { %v13978_v26 = vadd.f32 %v8366_v37, %v13857_v61  ;;  %v8369_v4 = vadd.f32 %v10890_v7, %v10850_v2  ;;  %11339 = vmatpush3.bf16.msra.mxu0 %v14013_v20  ;;  %v14030_v2 = vpack.c.bf16 %v8611_v36, %v8610_v29  ;;  %v8612_v37 = vld [vmem:[%s14507_s2 + $0x70] sm:$0xff]  ;;  %v8613_v7 = vld [vmem:[%s14507_s2 + $0x78] sm:$0xff] }
0x11b6   :  { %v10851_v31 = vpop.f32.mrb[192].mxu1  ;;  %11340 = vmatprep.subr.bf16.mxu0 %v11978_v11  ;;  %11331 = vmatpush3.bf16.msra.mxu1 %v14024_v56 }
0x11b7   :  { %v8385_v22 = vadd.f32 %v8369_v4, %v13863_v5  ;;  %v10891_v60 = vpop.f32.mrb[200].mxu0  ;;  %v10852_v62 = vpop.f32.mrb[193].mxu1  ;;  %v14043_v4 = vpack.c.bf16 %v8604_v23, %v8603_v59  ;;  %11332 = vmatprep.subr.bf16.mxu1 %v11978_v11 }
0x11b8   :  { %v10853_v41 = vadd.f32 %v10852_v62, %v10851_v31  ;;  %v10892_v49 = vpop.f32.mrb[201].mxu0  ;;  %v10854_v6 = vpop.f32.mrb[194].mxu1  ;;  %v14047_v31 = vpack.c.bf16 %v8613_v7, %v8612_v37  ;;  %v8615_v62 = vld [vmem:[%s14507_s2 + $0x88] sm:$0xff] }
0x11b9   :  { %v10893_v18 = vadd.f32 %v10892_v49, %v10891_v60  ;;  %v10894_v35 = vpop.f32.mrb[202].mxu0  ;;  %v10855_v15 = vpop.f32.mrb[195].mxu1  ;;  %v13982_v44 = vadd.f32 %v13961_v39, %v8385_v22  ;;  %11341 = vmatpush3.bf16.msra.mxu0 %v14030_v2  ;;  %v8614_v60 = vld [vmem:[%s14507_s2 + $0x80] sm:$0xff] }
0x11ba   :  { %v10856_v32 = vadd.f32 %v10855_v15, %v10854_v6  ;;  %v10895_v3 = vpop.f32.mrb[203].mxu0  ;;  %11342 = vmatprep.subr.bf16.mxu0 %v11978_v11  ;;  %11333 = vmatpush3.bf16.msra.mxu1 %v14043_v4 }
0x11bb   :  { %v8374_v45 = vadd.f32 %v10893_v18, %v10853_v41  ;;  %v10896_v61 = vadd.f32 %v10895_v3, %v10894_v35  ;;  %11350 = vmatprep.subr.bf16.mxu1 %v11978_v11  ;;  %v14061_v41 = vpack.c.bf16 %v8615_v62, %v8614_v60 }
0x11bd   :  { %v8386_v5 = vadd.f32 %v8374_v45, %v13875_v0  ;;  %v8377_v57 = vadd.f32 %v10896_v61, %v10856_v32  ;;  %11343 = vmatpush3.bf16.msra.mxu0 %v14047_v31  ;;  %v14089_v45 = vld [vmem:[%s14507_s2 + $0x90] sm:$0x1] }
0x11be   :  { %v8666_v10 = vpop.f32.mrb[196].mxu1  ;;  %11344 = vmatprep.subr.bf16.mxu0 %v11978_v11 }
0x11bf   :  { %v8387_v54 = vadd.f32 %v8377_v57, %v13881_v27  ;;  %v13989_v53 = vadd.f32 %v10392_v13, %v8666_v10  ;;  %v11328_v46 = vpop.f32.mrb[197].mxu1  ;;  %v13992_v33 = vadd.f32 %v13961_v39, %v8386_v5 }
0x11c0   :  { %v8669_v16 = vpop.f32.mrb[198].mxu1 }
0x11c1   :  { %11824 = vtanh.f32 %v13989_v53  ;;  %v11329_v24 = vpop.f32.mrb[199].mxu1  ;;  %v13996_v9 = vadd.f32 %v13961_v39, %v8387_v54  ;;  %v10394_v0 = vmul.f32 -1.442695, %v13989_v53  ;;  %11345 = vmatpush3.bf16.msra.mxu0 %v14061_v41 }
0x11c2   :  { %11358 = vmatprep.subr.bf16.mxu0 %v11978_v11 }
0x11c3   :  { %11826 = vpow2.f32 %v10394_v0 }
0x11cb   :  { %v11825_v48 = vpop.eup %11824 }
0x11cc   :  { %8681 = vrot.lane.b32.xlu1 %v11825_v48, %s11995_s15 }
0x11cd   :  { %v11827_v27 = vpop.eup %11826 }
0x11ce   :  { %v8675_v1 = vadd.f32 1.0, %v11827_v27 }
0x11d0   :  { %11828 = vrcp.f32 %v8675_v1 }
0x11da   :  { %v11829_v52 = vpop.eup %11828 }
0x11db   :  { %v8679_v25 = vmul.f32 0.0, %v11829_v52 }
0x123e   :  { %v8682_v58 = vpop.permute.xlu1 %8681 }
0x123f   :  { %v8684_v19 = vmul.f32 %v11829_v52, %v8682_v58 }
0x1241   :  { %8686 = vrot.lane.b32.xlu0 %v8684_v19, %s11996_s16 }
0x12b3   :  { %v8687_v21 = vpop.permute.xlu0 %8686 }
0x12b4   :  { %v14001_v39 = vadd.f32 %v8687_v21, %v8679_v25 }
0x12b6   :  { %11830 = vtanh.f32 %v14001_v39  ;;  %v8756_v23 = vrot.slane %v14001_v39, 7 }
0x12c0   :  { %v11831_v22 = vpop.eup %11830 }
0x12c1   :  { %8692 = vrot.lane.b32.xlu1 %v11831_v22, %s11995_s15 }
0x1333   :  { %v8693_v49 = vpop.permute.xlu1 %8692 }
0x1334   :  { %v8695_v6 = vmul.f32 %v11829_v52, %v8693_v49 }
0x1336   :  { %v8696_v18 = vpack.c.bf16 %v8695_v6, %v8695_v6  ;;  %8776 = vrot.lane.b32.xlu0 %v8695_v6, %s11996_s16 }
0x1338   :  { %8698 = vrot.lane.b32.xlu1 %v8696_v18, %s11996_s16 }
0x13a8   :  { %v8777_v35 = vpop.permute.xlu0 %8776 }
0x13a9   :  { %v8779_v15 = vsel %vm8700_vm12, %v8777_v35, 0.0 }
0x13aa   :  { %v8780_v32 = vpack.c.bf16 %v8779_v15, %v8779_v15  ;;  %v8699_v3 = vpop.permute.xlu1 %8698 }
0x13ab   :  { %11335 = vmatmul.mubr.msk.bf16.vlgmr.msra.gmra.mrb[200].mxu1 %vm8700_vm12, %v8699_v3 }
0x13ac   :  { %11347 = vmatmul.mubr.msk.bf16.vlgmr.msra.gmra.mrb[204].mxu0 %vm8781_vm13, %v8780_v32  ;;  %11351 = vmatpush3.bf16.msra.mxu1 %v14024_v56 }
0x13ad   :  { %11359 = vmatpush3.bf16.msra.mxu0 %v14013_v20  ;;  %11352 = vmatprep.subr.bf16.mxu1 %v11978_v11 }
0x13ae   :  { %11360 = vmatprep.subr.bf16.mxu0 %v11978_v11  ;;  %11354 = vmatprep.mubr.msk.bf16.mxu1 %vm11979_vm1, %v11978_v11 }
0x13af   :  { %11366 = vmatprep.mubr.msk.bf16.mxu0 %vm11979_vm1, %v11978_v11 }
0x13b0   :  { %11353 = vmatpush3.bf16.msra.mxu1 %v14043_v4 }
0x13b1   :  { %11361 = vmatpush3.bf16.msra.mxu0 %v14030_v2  ;;  %11370 = vmatprep.subr.bf16.mxu1 %v11978_v11 }
0x13b2   :  { %11362 = vmatprep.subr.bf16.mxu0 %v11978_v11 }
0x13b5   :  { %11363 = vmatpush3.bf16.msra.mxu0 %v14047_v31 }
0x13b6   :  { %11364 = vmatprep.subr.bf16.mxu0 %v11978_v11 }
0x13b9   :  { %11365 = vmatpush3.bf16.msra.mxu0 %v14061_v41 }
0x13ba   :  { %11390 = vmatprep.subr.bf16.mxu0 %v11978_v11 }
0x147e   :  { %v8738_v61 = vpop.f32.mrb[200].mxu1 }
0x147f   :  { %v8745_v13 = vrot.slane %v8738_v61, 7  ;;  %v11336_v5 = vpop.f32.mrb[201].mxu1  ;;  %v8819_v57 = vpop.f32.mrb[204].mxu0 }
0x1480   :  { %v8820_v10 = vadd.f32 %v8819_v57, %v14089_v45  ;;  %v8741_v54 = vpop.f32.mrb[202].mxu1  ;;  %v11348_v46 = vpop.f32.mrb[205].mxu0 }
0x1481   :  { %v8747_v16 = vadd.f32 %v8745_v13, %v13989_v53  ;;  %v11337_v24 = vpop.f32.mrb[203].mxu1  ;;  %v8822_v48 = vpop.f32.mrb[206].mxu0 }
0x1482   :  { %11832 = vtanh.f32 %v8820_v10  ;;  %v11349_v0 = vpop.f32.mrb[207].mxu0  ;;  %v10398_v52 = vmul.f32 -1.442695, %v8820_v10 }
0x1483   :  { %11834 = vtanh.f32 %v8747_v16  ;;  %v10396_v58 = vmul.f32 -1.442695, %v8747_v16 }
0x1484   :  { %11836 = vpow2.f32 %v10398_v52 }
0x1485   :  { %11838 = vpow2.f32 %v10396_v58 }
0x148c   :  { %v11833_v27 = vpop.eup %11832 }
0x148d   :  { %v11835_v1 = vpop.eup %11834  ;;  %8834 = vrot.lane.b32.xlu0 %v11833_v27, %s11995_s15 }
0x148e   :  { %8760 = vrot.lane.b32.xlu1 %v11835_v1, %s11995_s15  ;;  %v11837_v19 = vpop.eup %11836 }
0x148f   :  { %v11839_v25 = vpop.eup %11838  ;;  %v8828_v21 = vadd.f32 1.0, %v11837_v19 }
0x1490   :  { %v8751_v28 = vadd.f32 1.0, %v11839_v25 }
0x1491   :  { %11840 = vrcp.f32 %v8828_v21 }
0x1492   :  { %11842 = vrcp.f32 %v8751_v28 }
0x149b   :  { %v11841_v8 = vpop.eup %11840 }
0x149c   :  { %v11843_v36 = vpop.eup %11842  ;;  %v8832_v37 = vmul.f32 0.0, %v11841_v8 }
0x149d   :  { %v8758_v22 = vmul.f32 %v11843_v36, %v8756_v23 }
0x14ff   :  { %v8835_v29 = vpop.permute.xlu0 %8834 }
0x1500   :  { %v8837_v14 = vmul.f32 %v11841_v8, %v8835_v29  ;;  %v8761_v17 = vpop.permute.xlu1 %8760 }
0x1501   :  { %v8763_v59 = vmul.f32 %v11843_v36, %v8761_v17 }
0x1502   :  { %8839 = vrot.lane.b32.xlu0 %v8837_v14, %s11996_s16 }
0x1503   :  { %8765 = vrot.lane.b32.xlu1 %v8763_v59, %s11996_s16 }
0x1574   :  { %v8840_v7 = vpop.permute.xlu0 %8839 }
0x1575   :  { %v14098_v60 = vadd.f32 %v8840_v7, %v8832_v37  ;;  %v8766_v62 = vpop.permute.xlu1 %8765 }
0x1576   :  { %v14100_v49 = vadd.f32 %v8766_v62, %v8758_v22 }
0x1577   :  { %11844 = vtanh.f32 %v14098_v60 }
0x1578   :  { %11846 = vtanh.f32 %v14100_v49 }
0x1581   :  { %v11845_v6 = vpop.eup %11844 }
0x1582   :  { %v11847_v18 = vpop.eup %11846  ;;  %8845 = vrot.lane.b32.xlu0 %v11845_v6, %s11995_s15 }
0x1583   :  { %8771 = vrot.lane.b32.xlu1 %v11847_v18, %s11995_s15 }
0x15f4   :  { %v8846_v15 = vpop.permute.xlu0 %8845 }
0x15f5   :  { %v8772_v35 = vpop.permute.xlu1 %8771  ;;  %v14107_v3 = vmul.f32 %v11841_v8, %v8846_v15 }
0x15f6   :  { %v8774_v39 = vmul.f32 %v11843_v36, %v8772_v35 }
0x15f7   :  { %v8934_v13 = vrot.slane %v14107_v3, 7 }
0x15f8   :  { %v8849_v32 = vpack.c.bf16 %v8774_v39, %v8774_v39  ;;  %8930 = vrot.lane.b32.xlu0 %v8774_v39, %s11996_s16  ;;  %v8910_v39 = vrot.slane %v14100_v49, 7 }
0x15fa   :  { %v8851_v61 = vshrl.u32 %v8849_v32, 16 }
0x15fc   :  { %8853 = vrot.lane.b32.xlu1 %v8851_v61, %s11996_s16 }
0x1600   :  { %8935 = vrot.lane.b32.xlu1 %v8934_v13, %s11995_s15 }
0x166a   :  { %v8931_v57 = vpop.permute.xlu0 %8930 }
0x166e   :  { %v8854_v5 = vpop.permute.xlu1 %8853 }
0x166f   :  { %11355 = vmatmul.mubr.msk.bf16.vlgmr.msra.gmra.mrb[204].mxu1 %vm8700_vm12, %v8854_v5 }
0x1670   :  { %11371 = vmatpush3.bf16.msra.mxu1 %v14024_v56  ;;  %11374 = vmatprep.mubr.msk.bf16.mxu1 %vm11979_vm1, %v11978_v11 }
0x1671   :  { %11372 = vmatprep.subr.bf16.mxu1 %v11978_v11 }
0x1672   :  { %v8936_v10 = vpop.permute.xlu1 %8935 }
0x1673   :  { %v8938_v54 = vsel %vm8700_vm12, %v8931_v57, %v8936_v10 }
0x1674   :  { %v8939_v46 = vpack.c.bf16 %v8938_v54, %v8938_v54  ;;  %11373 = vmatpush3.bf16.msra.mxu1 %v14043_v4 }
0x1675   :  { %11378 = vmatprep.subr.bf16.mxu1 %v11978_v11 }
0x1676   :  { %v8941_v16 = vshrl.u32 %v8939_v46, 16 }
0x1678   :  { %11367 = vmatmul.mubr.msk.bf16.vlgmr.msra.gmra.mrb[208].mxu0 %vm8781_vm13, %v8941_v16 }
0x1679   :  { %11391 = vmatpush3.bf16.msra.mxu0 %v14024_v56  ;;  %11394 = vmatprep.mubr.msk.bf16.mxu0 %vm11979_vm1, %v11978_v11 }
0x167a   :  { %11392 = vmatprep.subr.bf16.mxu0 %v11978_v11 }
0x167d   :  { %11393 = vmatpush3.bf16.msra.mxu0 %v14043_v4 }
0x167e   :  { %11398 = vmatprep.subr.bf16.mxu0 %v11978_v11 }
0x1742   :  { %v8892_v24 = vpop.f32.mrb[204].mxu1 }
0x1743   :  { %v8899_v48 = vrot.slane %v8892_v24, 6  ;;  %v11356_v0 = vpop.f32.mrb[205].mxu1 }
0x1744   :  { %v8895_v27 = vpop.f32.mrb[206].mxu1 }
0x1745   :  { %v8901_v1 = vadd.f32 %v8899_v48, %v13989_v53  ;;  %v11357_v52 = vpop.f32.mrb[207].mxu1 }
0x1747   :  { %11848 = vtanh.f32 %v8901_v1  ;;  %v10400_v36 = vmul.f32 -1.442695, %v8901_v1 }
0x174b   :  { %v8980_v58 = vpop.f32.mrb[208].mxu0 }
0x174c   :  { %v8981_v19 = vadd.f32 %v8980_v58, %v14089_v45  ;;  %v11368_v25 = vpop.f32.mrb[209].mxu0 }
0x174d   :  { %v8983_v21 = vpop.f32.mrb[210].mxu0 }
0x174e   :  { %11850 = vtanh.f32 %v8981_v19  ;;  %v11369_v28 = vpop.f32.mrb[211].mxu0  ;;  %v10402_v14 = vmul.f32 -1.442695, %v8981_v19 }
0x174f   :  { %11852 = vpow2.f32 %v10400_v36 }
0x1750   :  { %11854 = vpow2.f32 %v10402_v14 }
0x1751   :  { %v11849_v8 = vpop.eup %11848 }
0x1752   :  { %8914 = vrot.lane.b32.xlu0 %v11849_v8, %s11995_s15 }
0x1758   :  { %v11851_v29 = vpop.eup %11850 }
0x1759   :  { %8995 = vrot.lane.b32.xlu1 %v11851_v29, %s11995_s15  ;;  %v11853_v17 = vpop.eup %11852 }
0x175a   :  { %v8905_v59 = vadd.f32 1.0, %v11853_v17  ;;  %v11855_v23 = vpop.eup %11854 }
0x175b   :  { %v8989_v37 = vadd.f32 1.0, %v11855_v23 }
0x175c   :  { %11856 = vrcp.f32 %v8905_v59 }
0x175d   :  { %11858 = vrcp.f32 %v8989_v37 }
0x1766   :  { %v11857_v7 = vpop.eup %11856 }
0x1767   :  { %v11859_v6 = vpop.eup %11858  ;;  %v8912_v15 = vmul.f32 %v11857_v7, %v8910_v39 }
0x1768   :  { %v8993_v13 = vmul.f32 %v11859_v6, %v14098_v60 }
0x17c4   :  { %v8915_v22 = vpop.permute.xlu0 %8914 }
0x17c5   :  { %v8917_v62 = vmul.f32 %v11857_v7, %v8915_v22 }
0x17c7   :  { %8919 = vrot.lane.b32.xlu0 %v8917_v62, %s11996_s16 }
0x17cb   :  { %v8996_v18 = vpop.permute.xlu1 %8995 }
0x17cc   :  { %v8998_v35 = vmul.f32 %v11859_v6, %v8996_v18 }
0x17ce   :  { %9000 = vrot.lane.b32.xlu1 %v8998_v35, %s11996_s16 }
0x1839   :  { %v8920_v32 = vpop.permute.xlu0 %8919 }
0x183a   :  { %v14134_v61 = vadd.f32 %v8920_v32, %v8912_v15 }
0x183c   :  { %11860 = vtanh.f32 %v14134_v61 }
0x1840   :  { %v9001_v5 = vpop.permute.xlu1 %9000 }
0x1841   :  { %v14138_v57 = vadd.f32 %v9001_v5, %v8993_v13 }
0x1843   :  { %11862 = vtanh.f32 %v14138_v57 }
0x1846   :  { %v11861_v10 = vpop.eup %11860 }
0x1847   :  { %8925 = vrot.lane.b32.xlu0 %v11861_v10, %s11995_s15 }
0x184d   :  { %v11863_v54 = vpop.eup %11862 }
0x184e   :  { %9006 = vrot.lane.b32.xlu1 %v11863_v54, %s11995_s15 }
0x18b9   :  { %v8926_v49 = vpop.permute.xlu0 %8925 }
0x18ba   :  { %v8928_v46 = vmul.f32 %v11857_v7, %v8926_v49 }
0x18bc   :  { %v9010_v16 = vpack.c.bf16 %v8928_v46, %v8928_v46  ;;  %9090 = vrot.lane.b32.xlu1 %v8928_v46, %s11996_s16 }
0x18be   :  { %v9012_v24 = vrot.slane %v9010_v16, 1  ;;  %v9070_v16 = vrot.slane %v14134_v61, 7 }
0x18c0   :  { %v9007_v48 = vpop.permute.xlu1 %9006  ;;  %9013 = vrot.lane.b32.xlu0 %v9012_v24, %s11996_s16 }
0x18c1   :  { %v14145_v60 = vmul.f32 %v11859_v6, %v9007_v48 }
0x18c3   :  { %v9094_v0 = vrot.slane %v14145_v60, 6 }
0x18c5   :  { %9095 = vrot.lane.b32.xlu0 %v9094_v0, %s11995_s15 }
0x192e   :  { %v9091_v52 = vpop.permute.xlu1 %9090 }
0x1932   :  { %v9014_v27 = vpop.permute.xlu0 %9013 }
0x1933   :  { %11375 = vmatmul.mubr.msk.bf16.vlgmr.msra.gmra.mrb[208].mxu1 %vm8700_vm12, %v9014_v27 }
0x1934   :  { %11379 = vmatpush3.bf16.msra.mxu1 %v14013_v20  ;;  %11386 = vmatprep.mubr.msk.bf16.mxu1 %vm11979_vm1, %v11978_v11 }
0x1935   :  { %11380 = vmatprep.subr.bf16.mxu1 %v11978_v11 }
0x1937   :  { %v9096_v1 = vpop.permute.xlu0 %9095 }
0x1938   :  { %11381 = vmatpush3.bf16.msra.mxu1 %v14030_v2  ;;  %v9098_v58 = vsel %vm8700_vm12, %v9091_v52, %v9096_v1 }
0x1939   :  { %11382 = vmatprep.subr.bf16.mxu1 %v11978_v11  ;;  %v9099_v19 = vpack.c.bf16 %v9098_v58, %v9098_v58 }
0x193b   :  { %v9101_v25 = vrot.slane %v9099_v19, 1 }
0x193c   :  { %11383 = vmatpush3.bf16.msra.mxu1 %v14047_v31 }
0x193d   :  { %11384 = vmatprep.subr.bf16.mxu1 %v11978_v11 }
0x1940   :  { %11385 = vmatpush3.bf16.msra.mxu1 %v14061_v41 }
0x1941   :  { %11410 = vmatprep.subr.bf16.mxu1 %v11978_v11 }
0x1943   :  { %11387 = vmatmul.mubr.msk.bf16.vlgmr.msra.gmra.mrb[212].mxu1 %vm8781_vm13, %v9101_v25 }
0x1944   :  { %11411 = vmatpush3.bf16.msra.mxu1 %v14024_v56  ;;  %11414 = vmatprep.mubr.msk.bf16.mxu1 %vm11979_vm1, %v11978_v11 }
0x1945   :  { %11412 = vmatprep.subr.bf16.mxu1 %v11978_v11 }
0x1948   :  { %11413 = vmatpush3.bf16.msra.mxu1 %v14043_v4 }
0x1949   :  { %11418 = vmatprep.subr.bf16.mxu1 %v11978_v11 }
0x1a06   :  { %v9052_v21 = vpop.f32.mrb[208].mxu1 }
0x1a07   :  { %v9059_v28 = vrot.slane %v9052_v21, 5  ;;  %v11376_v8 = vpop.f32.mrb[209].mxu1 }
0x1a08   :  { %v9055_v29 = vpop.f32.mrb[210].mxu1 }
0x1a09   :  { %v9061_v36 = vadd.f32 %v9059_v28, %v13989_v53  ;;  %v11377_v14 = vpop.f32.mrb[211].mxu1 }
0x1a0b   :  { %11864 = vtanh.f32 %v9061_v36  ;;  %v10404_v6 = vmul.f32 -1.442695, %v9061_v36 }
0x1a15   :  { %v11865_v17 = vpop.eup %11864 }
0x1a16   :  { %v9139_v59 = vpop.f32.mrb[212].mxu1  ;;  %9074 = vrot.lane.b32.xlu1 %v11865_v17, %s11995_s15 }
0x1a17   :  { %v9140_v23 = vadd.f32 %v9139_v59, %v14089_v45  ;;  %v11388_v37 = vpop.f32.mrb[213].mxu1 }
0x1a18   :  { %v9142_v7 = vpop.f32.mrb[214].mxu1 }
0x1a19   :  { %11866 = vtanh.f32 %v9140_v23  ;;  %v11389_v22 = vpop.f32.mrb[215].mxu1  ;;  %v10406_v35 = vmul.f32 -1.442695, %v9140_v23 }
0x1a1a   :  { %11868 = vpow2.f32 %v10404_v6 }
0x1a1b   :  { %11870 = vpow2.f32 %v10406_v35 }
0x1a23   :  { %v11867_v62 = vpop.eup %11866 }
0x1a24   :  { %9154 = vrot.lane.b32.xlu0 %v11867_v62, %s11995_s15  ;;  %v11869_v18 = vpop.eup %11868 }
0x1a25   :  { %v9065_v39 = vadd.f32 1.0, %v11869_v18  ;;  %v11871_v15 = vpop.eup %11870 }
0x1a26   :  { %v9148_v13 = vadd.f32 1.0, %v11871_v15 }
0x1a27   :  { %11872 = vrcp.f32 %v9065_v39 }
0x1a28   :  { %11874 = vrcp.f32 %v9148_v13 }
0x1a31   :  { %v11873_v32 = vpop.eup %11872 }
0x1a32   :  { %v11875_v54 = vpop.eup %11874  ;;  %v9072_v24 = vmul.f32 %v11873_v32, %v9070_v16 }
0x1a33   :  { %v9152_v1 = vmul.f32 %v11875_v54, %v14138_v57  ;;  %v9895_v57 = vrot.slane %v14145_v60, 7 }
0x1a35   :  { %v9910_v59 = vsel %vm8585_vm6, %v14107_v3, %v9895_v57 }
0x1a88   :  { %v9075_v5 = vpop.permute.xlu1 %9074 }
0x1a89   :  { %v9077_v10 = vmul.f32 %v11873_v32, %v9075_v5 }
0x1a8b   :  { %9079 = vrot.lane.b32.xlu1 %v9077_v10, %s11996_s16 }
0x1a96   :  { %v9155_v49 = vpop.permute.xlu0 %9154 }
0x1a97   :  { %v9157_v46 = vmul.f32 %v11875_v54, %v9155_v49 }
0x1a99   :  { %9159 = vrot.lane.b32.xlu0 %v9157_v46, %s11996_s16 }
0x1afd   :  { %v9080_v48 = vpop.permute.xlu1 %9079 }
0x1afe   :  { %v14175_v0 = vadd.f32 %v9080_v48, %v9072_v24 }
0x1b00   :  { %11876 = vtanh.f32 %v14175_v0 }
0x1b0a   :  { %v11877_v27 = vpop.eup %11876 }
0x1b0b   :  { %v9160_v52 = vpop.permute.xlu0 %9159  ;;  %9085 = vrot.lane.b32.xlu1 %v11877_v27, %s11995_s15 }
0x1b0c   :  { %v14180_v58 = vadd.f32 %v9160_v52, %v9152_v1 }
0x1b0e   :  { %11878 = vtanh.f32 %v14180_v58 }
0x1b18   :  { %v11879_v19 = vpop.eup %11878 }
0x1b19   :  { %9165 = vrot.lane.b32.xlu0 %v11879_v19, %s11995_s15 }
0x1b7d   :  { %v9086_v61 = vpop.permute.xlu1 %9085 }
0x1b7e   :  { %v9088_v25 = vmul.f32 %v11873_v32, %v9086_v61 }
0x1b80   :  { %v9169_v21 = vpack.c.bf16 %v9088_v25, %v9088_v25  ;;  %9251 = vrot.lane.b32.xlu0 %v9088_v25, %s11996_s16 }
0x1b82   :  { %v9171_v28 = vshrl.u32 %v9169_v21, 16 }
0x1b84   :  { %v9173_v8 = vrot.slane %v9171_v28, 1 }
0x1b86   :  { %9174 = vrot.lane.b32.xlu1 %v9173_v8, %s11996_s16 }
0x1b8b   :  { %v9166_v29 = vpop.permute.xlu0 %9165 }
0x1b8c   :  { %v9168_v36 = vmul.f32 %v11875_v54, %v9166_v29 }
0x1b8e   :  { %v9255_v14 = vrot.slane %v9168_v36, 5  ;;  %v9897_v17 = vrot.slane %v9168_v36, 6  ;;  %v9231_v36 = vrot.slane %v14175_v0, 7 }
0x1b90   :  { %v14190_v23 = vsel %vm8587_vm7, %v9910_v59, %v9897_v17  ;;  %9256 = vrot.lane.b32.xlu1 %v9255_v14, %s11995_s15 }
0x1bf2   :  { %v9252_v3 = vpop.permute.xlu0 %9251 }
0x1bf8   :  { %v9175_v37 = vpop.permute.xlu1 %9174 }
0x1bf9   :  { %11395 = vmatmul.mubr.msk.bf16.vlgmr.msra.gmra.mrb[212].mxu0 %vm8700_vm12, %v9175_v37 }
0x1bfa   :  { %11399 = vmatpush3.bf16.msra.mxu0 %v14013_v20  ;;  %11406 = vmatprep.mubr.msk.bf16.mxu0 %vm11979_vm1, %v11978_v11 }
0x1bfb   :  { %11400 = vmatprep.subr.bf16.mxu0 %v11978_v11 }
0x1bfe   :  { %11401 = vmatpush3.bf16.msra.mxu0 %v14030_v2 }
0x1bff   :  { %11402 = vmatprep.subr.bf16.mxu0 %v11978_v11 }
0x1c02   :  { %v9257_v60 = vpop.permute.xlu1 %9256  ;;  %11403 = vmatpush3.bf16.msra.mxu0 %v14047_v31 }
0x1c03   :  { %v9259_v7 = vsel %vm8700_vm12, %v9252_v3, %v9257_v60  ;;  %11404 = vmatprep.subr.bf16.mxu0 %v11978_v11 }
0x1c04   :  { %v9260_v22 = vpack.c.bf16 %v9259_v7, %v9259_v7 }
0x1c06   :  { %v9262_v62 = vshrl.u32 %v9260_v22, 16  ;;  %11405 = vmatpush3.bf16.msra.mxu0 %v14061_v41 }
0x1c07   :  { %11430 = vmatprep.subr.bf16.mxu0 %v11978_v11 }
0x1c08   :  { %v9264_v6 = vrot.slane %v9262_v62, 1 }
0x1c0a   :  { %11407 = vmatmul.mubr.msk.bf16.vlgmr.msra.gmra.mrb[216].mxu0 %vm8781_vm13, %v9264_v6 }
0x1c0b   :  { %11431 = vmatpush3.bf16.msra.mxu0 %v14024_v56  ;;  %11434 = vmatprep.mubr.msk.bf16.mxu0 %vm11979_vm1, %v11978_v11 }
0x1c0c   :  { %11432 = vmatprep.subr.bf16.mxu0 %v11978_v11 }
0x1c0f   :  { %11433 = vmatpush3.bf16.msra.mxu0 %v14043_v4 }
0x1c10   :  { %11438 = vmatprep.subr.bf16.mxu0 %v11978_v11 }
0x1ccc   :  { %v9213_v18 = vpop.f32.mrb[212].mxu0 }
0x1ccd   :  { %v9220_v35 = vrot.slane %v9213_v18, 4  ;;  %v11396_v39 = vpop.f32.mrb[213].mxu0 }
0x1cce   :  { %v9216_v15 = vpop.f32.mrb[214].mxu0 }
0x1ccf   :  { %v9222_v32 = vadd.f32 %v9220_v35, %v13989_v53  ;;  %v11397_v13 = vpop.f32.mrb[215].mxu0 }
0x1cd1   :  { %11880 = vtanh.f32 %v9222_v32  ;;  %v10408_v48 = vmul.f32 -1.442695, %v9222_v32 }
0x1cdb   :  { %v11881_v5 = vpop.eup %11880 }
0x1cdc   :  { %9235 = vrot.lane.b32.xlu0 %v11881_v5, %s11995_s15 }
0x1cdd   :  { %v9302_v10 = vpop.f32.mrb[216].mxu0 }
0x1cde   :  { %v9303_v54 = vadd.f32 %v9302_v10, %v14089_v45  ;;  %v11408_v49 = vpop.f32.mrb[217].mxu0 }
0x1cdf   :  { %v9305_v46 = vpop.f32.mrb[218].mxu0 }
0x1ce0   :  { %v11409_v16 = vpop.f32.mrb[219].mxu0  ;;  %11882 = vtanh.f32 %v9303_v54  ;;  %v10410_v1 = vmul.f32 -1.442695, %v9303_v54 }
0x1ce1   :  { %11884 = vpow2.f32 %v10408_v48 }
0x1ce2   :  { %11886 = vpow2.f32 %v10410_v1 }
0x1cea   :  { %v11883_v24 = vpop.eup %11882 }
0x1ceb   :  { %9317 = vrot.lane.b32.xlu1 %v11883_v24, %s11995_s15  ;;  %v11885_v27 = vpop.eup %11884 }
0x1cec   :  { %v9226_v52 = vadd.f32 1.0, %v11885_v27  ;;  %v11887_v19 = vpop.eup %11886 }
0x1ced   :  { %v9311_v28 = vadd.f32 1.0, %v11887_v19 }
0x1cee   :  { %11888 = vrcp.f32 %v9226_v52 }
0x1cef   :  { %11890 = vrcp.f32 %v9311_v28 }
0x1cf8   :  { %v11889_v61 = vpop.eup %11888 }
0x1cf9   :  { %v11891_v8 = vpop.eup %11890  ;;  %v9233_v14 = vmul.f32 %v11889_v61, %v9231_v36 }
0x1cfa   :  { %v9315_v3 = vmul.f32 %v11891_v8, %v14180_v58 }
0x1d4e   :  { %v9236_v25 = vpop.permute.xlu0 %9235 }
0x1d4f   :  { %v9238_v21 = vmul.f32 %v11889_v61, %v9236_v25 }
0x1d51   :  { %9240 = vrot.lane.b32.xlu0 %v9238_v21, %s11996_s16 }
0x1d5d   :  { %v9318_v57 = vpop.permute.xlu1 %9317 }
0x1d5e   :  { %v9320_v29 = vmul.f32 %v11891_v8, %v9318_v57 }
0x1d60   :  { %9322 = vrot.lane.b32.xlu1 %v9320_v29, %s11996_s16 }
0x1dc3   :  { %v9241_v17 = vpop.permute.xlu0 %9240 }
0x1dc4   :  { %v14219_v59 = vadd.f32 %v9241_v17, %v9233_v14 }
0x1dc6   :  { %11892 = vtanh.f32 %v14219_v59 }
0x1dd0   :  { %v11893_v37 = vpop.eup %11892 }
0x1dd1   :  { %9246 = vrot.lane.b32.xlu0 %v11893_v37, %s11995_s15 }
0x1dd2   :  { %v9323_v60 = vpop.permute.xlu1 %9322 }
0x1dd3   :  { %v14224_v7 = vadd.f32 %v9323_v60, %v9315_v3 }
0x1dd5   :  { %11894 = vtanh.f32 %v14224_v7 }
0x1ddf   :  { %v11895_v22 = vpop.eup %11894 }
0x1de0   :  { %9328 = vrot.lane.b32.xlu1 %v11895_v22, %s11995_s15 }
0x1e43   :  { %v9247_v0 = vpop.permute.xlu0 %9246 }
0x1e44   :  { %v9249_v62 = vmul.f32 %v11889_v61, %v9247_v0 }
0x1e46   :  { %v9332_v6 = vpack.c.bf16 %v9249_v62, %v9249_v62  ;;  %9412 = vrot.lane.b32.xlu1 %v9249_v62, %s11996_s16  ;;  %v9392_v62 = vrot.slane %v14219_v59, 7 }
0x1e48   :  { %v9334_v18 = vrot.slane %v9332_v6, 2 }
0x1e4a   :  { %9335 = vrot.lane.b32.xlu0 %v9334_v18, %s11996_s16 }
0x1e52   :  { %v9329_v35 = vpop.permute.xlu1 %9328 }
0x1e53   :  { %v9331_v39 = vmul.f32 %v11891_v8, %v9329_v35 }
0x1e55   :  { %v9416_v15 = vrot.slane %v9331_v39, 4  ;;  %v9899_v58 = vrot.slane %v9331_v39, 5 }
0x1e57   :  { %v14232_v32 = vsel %vm8589_vm8, %v14190_v23, %v9899_v58  ;;  %9417 = vrot.lane.b32.xlu0 %v9416_v15, %s11995_s15 }
0x1eb8   :  { %v9413_v23 = vpop.permute.xlu1 %9412 }
0x1ebc   :  { %v9336_v13 = vpop.permute.xlu0 %9335 }
0x1ebd   :  { %11415 = vmatmul.mubr.msk.bf16.vlgmr.msra.gmra.mrb[216].mxu1 %vm8700_vm12, %v9336_v13 }
0x1ebe   :  { %11419 = vmatpush3.bf16.msra.mxu1 %v14013_v20  ;;  %11426 = vmatprep.mubr.msk.bf16.mxu1 %vm11979_vm1, %v11978_v11 }
0x1ebf   :  { %11420 = vmatprep.subr.bf16.mxu1 %v11978_v11 }
0x1ec2   :  { %11421 = vmatpush3.bf16.msra.mxu1 %v14030_v2 }
0x1ec3   :  { %11422 = vmatprep.subr.bf16.mxu1 %v11978_v11 }
0x1ec6   :  { %11423 = vmatpush3.bf16.msra.mxu1 %v14047_v31 }
0x1ec7   :  { %11424 = vmatprep.subr.bf16.mxu1 %v11978_v11 }
0x1ec9   :  { %v9418_v5 = vpop.permute.xlu0 %9417 }
0x1eca   :  { %11425 = vmatpush3.bf16.msra.mxu1 %v14061_v41  ;;  %v9420_v10 = vsel %vm8700_vm12, %v9413_v23, %v9418_v5 }
0x1ecb   :  { %11450 = vmatprep.subr.bf16.mxu1 %v11978_v11  ;;  %v9421_v54 = vpack.c.bf16 %v9420_v10, %v9420_v10 }
0x1ecd   :  { %v9423_v49 = vrot.slane %v9421_v54, 2 }
0x1ecf   :  { %11427 = vmatmul.mubr.msk.bf16.vlgmr.msra.gmra.mrb[220].mxu1 %vm8781_vm13, %v9423_v49 }
0x1ed0   :  { %11451 = vmatpush3.bf16.msra.mxu1 %v14024_v56  ;;  %11454 = vmatprep.mubr.msk.bf16.mxu1 %vm11979_vm1, %v11978_v11 }
0x1ed1   :  { %11452 = vmatprep.subr.bf16.mxu1 %v11978_v11 }
0x1ed4   :  { %11453 = vmatpush3.bf16.msra.mxu1 %v14043_v4 }
0x1ed5   :  { %11458 = vmatprep.subr.bf16.mxu1 %v11978_v11 }
0x1f90   :  { %v9374_v46 = vpop.f32.mrb[216].mxu1 }
0x1f91   :  { %v9381_v16 = vrot.slane %v9374_v46, 3  ;;  %v11416_v24 = vpop.f32.mrb[217].mxu1 }
0x1f92   :  { %v9377_v48 = vpop.f32.mrb[218].mxu1 }
0x1f93   :  { %v9383_v27 = vadd.f32 %v9381_v16, %v13989_v53  ;;  %v11417_v1 = vpop.f32.mrb[219].mxu1 }
0x1f95   :  { %11896 = vtanh.f32 %v9383_v27  ;;  %v10412_v28 = vmul.f32 -1.442695, %v9383_v27 }
0x1f9f   :  { %v11897_v52 = vpop.eup %11896 }
0x1fa0   :  { %9396 = vrot.lane.b32.xlu1 %v11897_v52, %s11995_s15 }
0x1fa2   :  { %v9461_v56 = vpop.f32.mrb[220].mxu1 }
0x1fa3   :  { %v9462_v19 = vadd.f32 %v9461_v56, %v14089_v45  ;;  %v11428_v61 = vpop.f32.mrb[221].mxu1 }
0x1fa4   :  { %v9464_v25 = vpop.f32.mrb[222].mxu1 }
0x1fa5   :  { %11898 = vtanh.f32 %v9462_v19  ;;  %v11429_v4 = vpop.f32.mrb[223].mxu1  ;;  %v10414_v29 = vmul.f32 -1.442695, %v9462_v19 }
0x1fa6   :  { %11900 = vpow2.f32 %v10412_v28 }
0x1faf   :  { %v11899_v21 = vpop.eup %11898 }
0x1fb0   :  { %9476 = vrot.lane.b32.xlu0 %v11899_v21, %s11995_s15  ;;  %v11901_v8 = vpop.eup %11900 }
0x1fb1   :  { %v9387_v57 = vadd.f32 1.0, %v11901_v8 }
0x1fb3   :  { %11902 = vrcp.f32 %v9387_v57 }
0x1fb4   :  { %11904 = vpow2.f32 %v10414_v29 }
0x1fbd   :  { %v11903_v36 = vpop.eup %11902 }
0x1fbe   :  { %v11905_v14 = vpop.eup %11904  ;;  %v9394_v6 = vmul.f32 %v11903_v36, %v9392_v62 }
0x1fbf   :  { %v9470_v3 = vadd.f32 1.0, %v11905_v14 }
0x1fc1   :  { %11906 = vrcp.f32 %v9470_v3 }
0x1fcb   :  { %v11907_v60 = vpop.eup %11906 }
0x1fcc   :  { %v9474_v15 = vmul.f32 %v11907_v60, %v14224_v7 }
0x2012   :  { %v9397_v17 = vpop.permute.xlu1 %9396 }
0x2013   :  { %v9399_v37 = vmul.f32 %v11903_v36, %v9397_v17 }
0x2015   :  { %9401 = vrot.lane.b32.xlu1 %v9399_v37, %s11996_s16 }
0x2022   :  { %v9477_v22 = vpop.permute.xlu0 %9476 }
0x2023   :  { %v9479_v0 = vmul.f32 %v11907_v60, %v9477_v22 }
0x2025   :  { %9481 = vrot.lane.b32.xlu0 %v9479_v0, %s11996_s16 }
0x2087   :  { %v9402_v18 = vpop.permute.xlu1 %9401 }
0x2088   :  { %v14261_v35 = vadd.f32 %v9402_v18, %v9394_v6 }
0x208a   :  { %11908 = vtanh.f32 %v14261_v35 }
0x2094   :  { %v11909_v39 = vpop.eup %11908 }
0x2095   :  { %9407 = vrot.lane.b32.xlu1 %v11909_v39, %s11995_s15 }
0x2097   :  { %v9482_v58 = vpop.permute.xlu0 %9481 }
0x2098   :  { %v14266_v13 = vadd.f32 %v9482_v58, %v9474_v15 }
0x209a   :  { %11910 = vtanh.f32 %v14266_v13 }
0x20a4   :  { %v11911_v23 = vpop.eup %11910 }
0x20a5   :  { %9487 = vrot.lane.b32.xlu0 %v11911_v23, %s11995_s15 }
0x2107   :  { %v9408_v59 = vpop.permute.xlu1 %9407 }
0x2108   :  { %v9410_v5 = vmul.f32 %v11903_v36, %v9408_v59 }
0x210a   :  { %v9491_v10 = vpack.c.bf16 %v9410_v5, %v9410_v5  ;;  %9573 = vrot.lane.b32.xlu0 %v9410_v5, %s11996_s16 }
0x210c   :  { %v9493_v54 = vshrl.u32 %v9491_v10, 16 }
0x210e   :  { %v9495_v49 = vrot.slane %v9493_v54, 2  ;;  %v9553_v54 = vrot.slane %v14261_v35, 7 }
0x2110   :  { %9496 = vrot.lane.b32.xlu1 %v9495_v49, %s11996_s16 }
0x2117   :  { %v9488_v46 = vpop.permute.xlu0 %9487 }
0x2118   :  { %v9490_v16 = vmul.f32 %v11907_v60, %v9488_v46 }
0x211a   :  { %v9577_v7 = vrot.slane %v9490_v16, 3  ;;  %v9901_v24 = vrot.slane %v9490_v16, 4 }
0x211c   :  { %v14274_v48 = vsel %vm8591_vm5, %v14232_v32, %v9901_v24  ;;  %9578 = vrot.lane.b32.xlu1 %v9577_v7, %s11995_s15 }
0x217c   :  { %v9574_v32 = vpop.permute.xlu0 %9573 }
0x2182   :  { %v9497_v27 = vpop.permute.xlu1 %9496 }
0x2183   :  { %11435 = vmatmul.mubr.msk.bf16.vlgmr.msra.gmra.mrb[220].mxu0 %vm8700_vm12, %v9497_v27 }
0x2184   :  { %11439 = vmatpush3.bf16.msra.mxu0 %v14013_v20  ;;  %11446 = vmatprep.mubr.msk.bf16.mxu0 %vm11979_vm1, %v11978_v11 }
0x2185   :  { %11440 = vmatprep.subr.bf16.mxu0 %v11978_v11 }
0x2188   :  { %11441 = vmatpush3.bf16.msra.mxu0 %v14030_v2 }
0x2189   :  { %11442 = vmatprep.subr.bf16.mxu0 %v11978_v11 }
0x218c   :  { %11443 = vmatpush3.bf16.msra.mxu0 %v14047_v31 }
0x218d   :  { %11444 = vmatprep.subr.bf16.mxu0 %v11978_v11 }
0x218e   :  { %v9579_v1 = vpop.permute.xlu1 %9578 }
0x218f   :  { %v9581_v52 = vsel %vm8700_vm12, %v9574_v32, %v9579_v1 }
0x2190   :  { %11445 = vmatpush3.bf16.msra.mxu0 %v14061_v41  ;;  %v9582_v56 = vpack.c.bf16 %v9581_v52, %v9581_v52 }
0x2191   :  { %11470 = vmatprep.subr.bf16.mxu0 %v11978_v11 }
0x2192   :  { %v9584_v19 = vshrl.u32 %v9582_v56, 16 }
0x2194   :  { %v9586_v61 = vrot.slane %v9584_v19, 2 }
0x2196   :  { %11447 = vmatmul.mubr.msk.bf16.vlgmr.msra.gmra.mrb[224].mxu0 %vm8781_vm13, %v9586_v61 }
0x2197   :  { %11471 = vmatpush3.bf16.msra.mxu0 %v14013_v20  ;;  %11478 = vmatprep.mubr.msk.bf16.mxu0 %vm11979_vm1, %v11978_v11 }
0x2198   :  { %11472 = vmatprep.subr.bf16.mxu0 %v11978_v11 }
0x219b   :  { %11473 = vmatpush3.bf16.msra.mxu0 %v14030_v2 }
0x219c   :  { %11474 = vmatprep.subr.bf16.mxu0 %v11978_v11 }
0x219f   :  { %11475 = vmatpush3.bf16.msra.mxu0 %v14047_v31 }
0x21a0   :  { %11476 = vmatprep.subr.bf16.mxu0 %v11978_v11 }
0x21a3   :  { %11477 = vmatpush3.bf16.msra.mxu0 %v14061_v41 }
0x2256   :  { %v9535_v25 = vpop.f32.mrb[220].mxu0 }
0x2257   :  { %v9542_v4 = vrot.slane %v9535_v25, 2  ;;  %v11436_v21 = vpop.f32.mrb[221].mxu0 }
0x2258   :  { %v9538_v28 = vpop.f32.mrb[222].mxu0 }
0x2259   :  { %v9544_v8 = vadd.f32 %v9542_v4, %v13989_v53  ;;  %v11437_v57 = vpop.f32.mrb[223].mxu0 }
0x225b   :  { %11912 = vtanh.f32 %v9544_v8  ;;  %v10416_v22 = vmul.f32 -1.442695, %v9544_v8 }
0x2265   :  { %v11913_v29 = vpop.eup %11912 }
0x2266   :  { %9557 = vrot.lane.b32.xlu0 %v11913_v29, %s11995_s15 }
0x2269   :  { %v9624_v36 = vpop.f32.mrb[224].mxu0 }
0x226a   :  { %v9625_v14 = vadd.f32 %v9624_v36, %v14089_v45  ;;  %v11448_v17 = vpop.f32.mrb[225].mxu0 }
0x226b   :  { %v9627_v37 = vpop.f32.mrb[226].mxu0 }
0x226c   :  { %11914 = vtanh.f32 %v9625_v14  ;;  %v11449_v3 = vpop.f32.mrb[227].mxu0  ;;  %v10418_v6 = vmul.f32 -1.442695, %v9625_v14 }
0x226d   :  { %11916 = vpow2.f32 %v10416_v22 }
0x2276   :  { %v11915_v60 = vpop.eup %11914 }
0x2277   :  { %9639 = vrot.lane.b32.xlu1 %v11915_v60, %s11995_s15  ;;  %v11917_v0 = vpop.eup %11916 }
0x2278   :  { %v9548_v62 = vadd.f32 1.0, %v11917_v0 }
0x227a   :  { %11918 = vrcp.f32 %v9548_v62 }
0x227b   :  { %11920 = vpow2.f32 %v10418_v6 }
0x2284   :  { %v11919_v18 = vpop.eup %11918 }
0x2285   :  { %v11921_v15 = vpop.eup %11920  ;;  %v9555_v49 = vmul.f32 %v11919_v18, %v9553_v54 }
0x2286   :  { %v9633_v23 = vadd.f32 1.0, %v11921_v15 }
0x2288   :  { %11922 = vrcp.f32 %v9633_v23 }
0x2292   :  { %v11923_v59 = vpop.eup %11922 }
0x2293   :  { %v9637_v24 = vmul.f32 %v11923_v59, %v14266_v13 }
0x22d8   :  { %v9558_v39 = vpop.permute.xlu0 %9557 }
0x22d9   :  { %v9560_v58 = vmul.f32 %v11919_v18, %v9558_v39 }
0x22db   :  { %9562 = vrot.lane.b32.xlu0 %v9560_v58, %s11996_s16 }
0x22e9   :  { %v9640_v5 = vpop.permute.xlu1 %9639 }
0x22ea   :  { %v9642_v10 = vmul.f32 %v11923_v59, %v9640_v5 }
0x22ec   :  { %9644 = vrot.lane.b32.xlu1 %v9642_v10, %s11996_s16 }
0x234d   :  { %v9563_v46 = vpop.permute.xlu0 %9562 }
0x234e   :  { %v14306_v16 = vadd.f32 %v9563_v46, %v9555_v49 }
0x2350   :  { %11924 = vtanh.f32 %v14306_v16  ;;  %v9714_v46 = vrot.slane %v14306_v16, 7 }
0x235a   :  { %v11925_v7 = vpop.eup %11924 }
0x235b   :  { %9568 = vrot.lane.b32.xlu0 %v11925_v7, %s11995_s15 }
0x235e   :  { %v9645_v27 = vpop.permute.xlu1 %9644 }
0x235f   :  { %v14311_v32 = vadd.f32 %v9645_v27, %v9637_v24 }
0x2361   :  { %11926 = vtanh.f32 %v14311_v32 }
0x236b   :  { %v11927_v1 = vpop.eup %11926 }
0x236c   :  { %9650 = vrot.lane.b32.xlu1 %v11927_v1, %s11995_s15 }
0x23cd   :  { %v9569_v35 = vpop.permute.xlu0 %9568 }
0x23ce   :  { %v9571_v52 = vmul.f32 %v11919_v18, %v9569_v35 }
0x23d0   :  { %v9654_v56 = vpack.c.bf16 %v9571_v52, %v9571_v52  ;;  %9734 = vrot.lane.b32.xlu1 %v9571_v52, %s11996_s16 }
0x23d2   :  { %v9656_v19 = vrot.slane %v9654_v56, 3 }
0x23d4   :  { %9657 = vrot.lane.b32.xlu0 %v9656_v19, %s11996_s16 }
0x23de   :  { %v9651_v61 = vpop.permute.xlu1 %9650 }
0x23df   :  { %v9653_v25 = vmul.f32 %v11923_v59, %v9651_v61 }
0x23e1   :  { %v9738_v4 = vrot.slane %v9653_v25, 2  ;;  %v9903_v13 = vrot.slane %v9653_v25, 3 }
0x23e3   :  { %v14319_v21 = vsel %vm8593_vm9, %v14274_v48, %v9903_v13  ;;  %9739 = vrot.lane.b32.xlu0 %v9738_v4, %s11995_s15 }
0x2442   :  { %v9735_v48 = vpop.permute.xlu1 %9734 }
0x2446   :  { %v9658_v28 = vpop.permute.xlu0 %9657 }
0x2447   :  { %11455 = vmatmul.mubr.msk.bf16.vlgmr.msra.gmra.mrb[224].mxu1 %vm8700_vm12, %v9658_v28 }
0x2448   :  { %11459 = vmatpush3.bf16.msra.mxu1 %v14013_v20  ;;  %11466 = vmatprep.mubr.msk.bf16.mxu1 %vm11979_vm1, %v11978_v11 }
0x2449   :  { %11460 = vmatprep.subr.bf16.mxu1 %v11978_v11 }
0x244c   :  { %11461 = vmatpush3.bf16.msra.mxu1 %v14030_v2 }
0x244d   :  { %11462 = vmatprep.subr.bf16.mxu1 %v11978_v11 }
0x2450   :  { %11463 = vmatpush3.bf16.msra.mxu1 %v14047_v31 }
0x2451   :  { %11464 = vmatprep.subr.bf16.mxu1 %v11978_v11 }
0x2454   :  { %11465 = vmatpush3.bf16.msra.mxu1 %v14061_v41 }
0x2455   :  { %v9740_v8 = vpop.permute.xlu0 %9739 }
0x2456   :  { %v9742_v57 = vsel %vm8700_vm12, %v9735_v48, %v9740_v8  ;;  %v11976_v48 = vld [vmem:[%s14507_s2 + $0x26] ss:$0 sm:$0xff] }
0x2457   :  { %v9743_v20 = vpack.c.bf16 %v9742_v57, %v9742_v57  ;;  %v8394_v8 = vadd.f32 %v11976_v48, %v13965_v50 }
0x2459   :  { %v9745_v29 = vrot.slane %v9743_v20, 3  ;;  %v8402_v57 = vadd.f32 %v8394_v8, %v13042_v51  ;;  %v8395_v20 = vadd.f32 %v11976_v48, %v13971_v42 }
0x245b   :  { %11467 = vmatmul.mubr.msk.bf16.vlgmr.msra.gmra.mrb[228].mxu1 %vm8781_vm13, %v9745_v29  ;;  %v8414_v29 = vsel %vm36_vm0, %v8402_v57, 0.0 }
0x245c   :  { %11494 = vmatprep.mubr.msk.f32.mxu1 %vm11979_vm1, %v11978_v11 }
0x251a   :  { %v9696_v2 = vpop.f32.mrb[224].mxu1 }
0x251b   :  { %v9703_v36 = vrot.slane %v9696_v2, 1  ;;  %v11456_v14 = vpop.f32.mrb[225].mxu1  ;;  %v8403_v2 = vadd.f32 %v8395_v20, %v13062_v55 }
0x251c   :  { %v9699_v17 = vpop.f32.mrb[226].mxu1 }
0x251d   :  { %v9705_v31 = vadd.f32 %v9703_v36, %v13989_v53  ;;  %v11457_v37 = vpop.f32.mrb[227].mxu1  ;;  %v8397_v36 = vadd.f32 %v11976_v48, %v13978_v26 }
0x251f   :  { %11928 = vtanh.f32 %v9705_v31  ;;  %v10420_v18 = vmul.f32 -1.442695, %v9705_v31  ;;  %v14366_v14 = vadd.f32 %v8397_v36, %v13085_v34  ;;  %v11977_v34 = vld [vmem:[%s14507_s2 + $0x90] sm:$0x1] }
0x2521   :  { %v8423_v50 = vsel %vm36_vm0, %v14366_v14, 0.0 }
0x2529   :  { %v11929_v41 = vpop.eup %11928 }
0x252a   :  { %9718 = vrot.lane.b32.xlu0 %v11929_v41, %s11995_s15 }
0x252e   :  { %v9783_v3 = vpop.f32.mrb[228].mxu1 }
0x252f   :  { %v9784_v60 = vadd.f32 %v9783_v3, %v14089_v45  ;;  %v11468_v22 = vpop.f32.mrb[229].mxu1 }
0x2530   :  { %v9786_v0 = vpop.f32.mrb[230].mxu1 }
0x2531   :  { %11930 = vtanh.f32 %v9784_v60  ;;  %v11469_v62 = vpop.f32.mrb[231].mxu1  ;;  %v10422_v53 = vmul.f32 -1.442695, %v9784_v60 }
0x2532   :  { %11932 = vpow2.f32 %v10420_v18  ;;  %v8401_v62 = vadd.f32 %v13968_v40, %v13045_v47 }
0x253b   :  { %v11931_v6 = vpop.eup %11930 }
0x253c   :  { %9798 = vrot.lane.b32.xlu1 %v11931_v6, %s11995_s15  ;;  %v11933_v39 = vpop.eup %11932  ;;  %v8411_v6 = vsel %vm36_vm0, %v8401_v62, 0.0 }
0x253d   :  { %v9709_v15 = vadd.f32 1.0, %v11933_v39  ;;  %v8406_v39 = vadd.f32 %v13982_v44, %v13082_v38  ;;  %v8407_v44 = vadd.f32 %v13992_v33, %v13105_v12 }
0x253f   :  { %11934 = vrcp.f32 %v9709_v15  ;;  %v8426_v15 = vsel %vm36_vm0, %v8406_v39, 0.0 }
0x2540   :  { %11936 = vpow2.f32 %v10422_v53  ;;  %v8408_v53 = vadd.f32 %v13996_v9, %v13102_v63  ;;  %v8429_v63 = vsel %vm36_vm0, %v8407_v44, 0.0 }
0x2542   :  { %v8432_v47 = vsel %vm36_vm0, %v8408_v53, 0.0 }
0x2549   :  { %v11935_v58 = vpop.eup %11934 }
0x254a   :  { %v11937_v5 = vpop.eup %11936  ;;  %v9716_v7 = vmul.f32 %v11935_v58, %v9714_v46 }
0x254b   :  { %v9792_v45 = vadd.f32 1.0, %v11937_v5 }
0x254d   :  { %11938 = vrcp.f32 %v9792_v45 }
0x2557   :  { %v11939_v10 = vpop.eup %11938 }
0x2558   :  { %v9796_v35 = vmul.f32 %v11939_v10, %v14311_v32 }
0x259c   :  { %v9719_v23 = vpop.permute.xlu0 %9718 }
0x259d   :  { %v9721_v59 = vmul.f32 %v11935_v58, %v9719_v23 }
0x259f   :  { %9723 = vrot.lane.b32.xlu0 %v9721_v59, %s11996_s16 }
0x25ae   :  { %v9799_v54 = vpop.permute.xlu1 %9798 }
0x25af   :  { %v9801_v49 = vmul.f32 %v11939_v10, %v9799_v54 }
0x25b1   :  { %9803 = vrot.lane.b32.xlu1 %v9801_v49, %s11996_s16 }
0x2611   :  { %v9724_v24 = vpop.permute.xlu0 %9723 }
0x2612   :  { %v9726_v27 = vadd.f32 %v9724_v24, %v9716_v7 }
0x2614   :  { %11940 = vtanh.f32 %v9726_v27 }
0x261e   :  { %v11941_v1 = vpop.eup %11940 }
0x261f   :  { %9729 = vrot.lane.b32.xlu0 %v11941_v1, %s11995_s15 }
0x2623   :  { %v9804_v52 = vpop.permute.xlu1 %9803 }
0x2624   :  { %v14345_v56 = vadd.f32 %v9804_v52, %v9796_v35 }
0x2626   :  { %11942 = vtanh.f32 %v14345_v56 }
0x2630   :  { %v11943_v19 = vpop.eup %11942 }
0x2631   :  { %9809 = vrot.lane.b32.xlu1 %v11943_v19, %s11995_s15 }
0x2691   :  { %v9730_v61 = vpop.permute.xlu0 %9729 }
0x2692   :  { %v9732_v25 = vmul.f32 %v11935_v58, %v9730_v61 }
0x2694   :  { %9814 = vrot.lane.b32.xlu1 %v9732_v25, %s11996_s16 }
0x26a3   :  { %v9810_v16 = vpop.permute.xlu1 %9809 }
0x26a4   :  { %v9812_v4 = vmul.f32 %v11939_v10, %v9810_v16 }
0x26a6   :  { %v9818_v13 = vrot.slane %v9812_v4, 1  ;;  %v9905_v28 = vrot.slane %v9812_v4, 2 }
0x26a8   :  { %9819 = vrot.lane.b32.xlu0 %v9818_v13, %s11995_s15  ;;  %v14353_v32 = vsel %vm8595_vm10, %v14319_v21, %v9905_v28  ;;  %v8417_v21 = vsel %vm36_vm0, %v8403_v2, 0.0 }
0x26c7   :  { %8415 = vadd.xlane.f32.xlu0 %v8414_v29 }
0x26cb   :  { %8418 = vadd.xlane.f32.xlu0 %v8417_v21 }
0x26cf   :  { %8424 = vadd.xlane.f32.xlu0 %v8423_v50 }
0x2706   :  { %v9815_v51 = vpop.permute.xlu1 %9814 }
0x271a   :  { %v9820_v17 = vpop.permute.xlu0 %9819 }
0x271b   :  { %v9822_v42 = vsel %vm8700_vm12, %v9815_v51, %v9820_v17 }
0x271c   :  { %v9823_v31 = vpack.c.bf16 %v9822_v42, %v9822_v42 }
0x271e   :  { %v9825_v37 = vshrl.u32 %v9823_v31, 16 }
0x2720   :  { %v9827_v55 = vrot.slane %v9825_v37, 3 }
0x2722   :  { %11479 = vmatmul.mubr.msk.bf16.vlgmr.msra.gmra.mrb[228].mxu0 %vm8781_vm13, %v9827_v55 }
0x2723   :  { %11505 = vmatprep.mubr.msk.f32.mxu0 %vm11979_vm1, %v11978_v11  ;;  %v8404_v11 = vadd.f32 %v13975_v43, %v13065_v30 }
0x2725   :  { %v8420_v18 = vsel %vm36_vm0, %v8404_v11, 0.0 }
0x2754   :  { %v8416_v9 = vpop.xlane.xlu0 %8415 }
0x2755   :  { %v8436_v59 = vmul.f32 0.0625, %v8416_v9 }
0x2757   :  { %v14397_v54 = vsub.f32 %v8402_v57, %v8436_v59 }
0x2758   :  { %v8419_v5 = vpop.xlane.xlu0 %8418 }
0x2759   :  { %v8437_v49 = vmul.f32 0.0625, %v8419_v5  ;;  %v8452_v1 = vmul.f32 %v14397_v54, %v14397_v54 }
0x275b   :  { %v14403_v27 = vsub.f32 %v8403_v2, %v8437_v49  ;;  %v8462_v25 = vsel %vm36_vm0, %v8452_v1, 0.0 }
0x275c   :  { %v8425_v35 = vpop.xlane.xlu0 %8424 }
0x275d   :  { %v8439_v19 = vmul.f32 0.0625, %v8425_v35  ;;  %v8453_v16 = vmul.f32 %v14403_v27, %v14403_v27 }
0x275f   :  { %v14414_v4 = vsub.f32 %v14366_v14, %v8439_v19  ;;  %v8465_v28 = vsel %vm36_vm0, %v8453_v16, 0.0 }
0x2761   :  { %v8455_v2 = vmul.f32 %v14414_v4, %v14414_v4 }
0x2763   :  { %v8471_v21 = vsel %vm36_vm0, %v8455_v2, 0.0 }
0x27f5   :  { %v9865_v26 = vpop.f32.mrb[228].mxu0 }
0x27f6   :  { %v9866_v41 = vadd.f32 %v11977_v34, %v9865_v26  ;;  %v11480_v3 = vpop.f32.mrb[229].mxu0 }
0x27f7   :  { %v9868_v60 = vpop.f32.mrb[230].mxu0 }
0x27f8   :  { %11944 = vtanh.f32 %v9866_v41  ;;  %v11481_v22 = vpop.f32.mrb[231].mxu0  ;;  %v10424_v40 = vmul.f32 -1.442695, %v9866_v41 }
0x27f9   :  { %v9923_v22 = vld [vmem:[%s14507_s2 + $0x99] sm:$0xff] }
0x27fa   :  { %11946 = vpow2.f32 %v10424_v40  ;;  %v10009_v40 = vld [vmem:[%s14507_s2 + $0xca] sm:$0xff] }
0x2802   :  { %v11945_v0 = vpop.eup %11944 }
0x2803   :  { %9880 = vrot.lane.b32.xlu1 %v11945_v0, %s11995_s15  ;;  %v9924_v0 = vld [vmem:[%s14507_s2 + $0xa1] sm:$0xff] }
0x2804   :  { %v11947_v58 = vpop.eup %11946 }
0x2805   :  { %v9874_v30 = vadd.f32 1.0, %v11947_v58 }
0x2807   :  { %11948 = vrcp.f32 %v9874_v30 }
0x2811   :  { %v14390_v43 = vpop.eup %11948 }
0x2812   :  { %v9878_v42 = vmul.f32 %v14390_v43, %v14345_v56  ;;  %v9922_v56 = vld [vmem:[%s14507_s2 + $0x91] sm:$0xff] }
0x2827   :  { %8412 = vadd.xlane.f32.xlu1 %v8411_v6  ;;  %v11517_v6 = vpack.c.bf16 %v9923_v22, %v9922_v56 }
0x282b   :  { %8421 = vadd.xlane.f32.xlu1 %v8420_v18 }
0x282f   :  { %8427 = vadd.xlane.f32.xlu1 %v8426_v15  ;;  %v9927_v15 = vld [vmem:[%s14507_s2 + $0xb9] sm:$0xff] }
0x2833   :  { %8433 = vadd.xlane.f32.xlu1 %v8432_v47  ;;  %v10008_v47 = vld [vmem:[%s14507_s2 + $0xc2] sm:$0xff] }
0x2834   :  { %v11526_v58 = vpack.c.bf16 %v10009_v40, %v10008_v47 }
0x2875   :  { %v9881_v23 = vpop.permute.xlu1 %9880 }
0x2876   :  { %v9883_v38 = vmul.f32 %v14390_v43, %v9881_v23 }
0x2878   :  { %9885 = vrot.lane.b32.xlu0 %v9883_v38, %s11996_s16 }
0x2897   :  { %8430 = vadd.xlane.f32.xlu0 %v8429_v63 }
0x28b4   :  { %v8413_v45 = vpop.xlane.xlu1 %8412 }
0x28b5   :  { %v8435_v10 = vmul.f32 0.0625, %v8413_v45 }
0x28b7   :  { %v14399_v46 = vsub.f32 %v8401_v62, %v8435_v10  ;;  %v11997_v62 = vmov 0.0|0.0  }
0x28b8   :  { %v8422_v7 = vpop.xlane.xlu1 %8421  ;;  %11516 = vmatprep.subr.bf16.mxu1 %v11997_v62  ;;  %11525 = vmatprep.subr.bf16.mxu0 %v11997_v62 }
0x28b9   :  { %v8451_v24 = vmul.f32 %v14399_v46, %v14399_v46  ;;  %v8438_v12 = vmul.f32 0.0625, %v8422_v7  ;;  %11518 = vmatpush3.bf16.msra.mxu1 %v11517_v6  ;;  %11527 = vmatpush3.bf16.msra.mxu0 %v11526_v58 }
0x28ba   :  { %11519 = vmatprep.subr.bf16.mxu1 %v11997_v62  ;;  %11528 = vmatprep.subr.bf16.mxu0 %v11997_v62 }
0x28bb   :  { %v8459_v33 = vsel %vm36_vm0, %v8451_v24, 0.0  ;;  %v14408_v61 = vsub.f32 %v8404_v11, %v8438_v12  ;;  %v9925_v11 = vld [vmem:[%s14507_s2 + $0xa9] sm:$0xff] }
0x28bc   :  { %8460 = vadd.xlane.f32.xlu1 %v8459_v33  ;;  %v8428_v52 = vpop.xlane.xlu1 %8427  ;;  %v11520_v18 = vpack.c.bf16 %v9925_v11, %v9924_v0 }
0x28bd   :  { %v8440_v13 = vmul.f32 0.0625, %v8428_v52  ;;  %v8454_v48 = vmul.f32 %v14408_v61, %v14408_v61 }
0x28be   :  { %11521 = vmatpush3.bf16.msra.mxu1 %v11520_v18 }
0x28bf   :  { %v14419_v57 = vsub.f32 %v8406_v39, %v8440_v13  ;;  %v8468_v29 = vsel %vm36_vm0, %v8454_v48, 0.0  ;;  %v9926_v39 = vld [vmem:[%s14507_s2 + $0xb1] sm:$0xff]  ;;  %11522 = vmatprep.subr.bf16.mxu1 %v11997_v62 }
0x28c0   :  { %8463 = vadd.xlane.f32.xlu1 %v8462_v25  ;;  %v8434_v8 = vpop.xlane.xlu1 %8433 }
0x28c1   :  { %v8442_v20 = vmul.f32 0.0625, %v8434_v8  ;;  %v8456_v14 = vmul.f32 %v14419_v57, %v14419_v57 }
0x28c3   :  { %v14424_v36 = vsub.f32 %v8408_v53, %v8442_v20  ;;  %v8474_v50 = vsel %vm36_vm0, %v8456_v14, 0.0  ;;  %v11523_v53 = vpack.c.bf16 %v9927_v15, %v9926_v39 }
0x28c4   :  { %8466 = vadd.xlane.f32.xlu1 %v8465_v28 }
0x28c5   :  { %v8458_v51 = vmul.f32 %v14424_v36, %v14424_v36  ;;  %11524 = vmatpush3.bf16.msra.mxu1 %v11523_v53 }
0x28c7   :  { %v8480_v17 = vsel %vm36_vm0, %v8458_v51, 0.0 }
0x28c8   :  { %8469 = vadd.xlane.f32.xlu1 %v8468_v29 }
0x28cc   :  { %8472 = vadd.xlane.f32.xlu1 %v8471_v21 }
0x28d0   :  { %8475 = vadd.xlane.f32.xlu1 %v8474_v50 }
0x28d4   :  { %8481 = vadd.xlane.f32.xlu1 %v8480_v17 }
0x28ea   :  { %v9886_v31 = vpop.permute.xlu0 %9885 }
0x28eb   :  { %v9888_v37 = vadd.f32 %v9886_v31, %v9878_v42  ;;  %v10390_v31 = vld [vmem:[%s14507_s2 + $0x24] ss:$0 sm:$0xff] }
0x28ed   :  { %11950 = vtanh.f32 %v9888_v37 }
0x28f7   :  { %v11951_v55 = vpop.eup %11950 }
0x28f8   :  { %9891 = vrot.lane.b32.xlu0 %v11951_v55, %s11995_s15 }
0x2924   :  { %v8431_v26 = vpop.xlane.xlu0 %8430 }
0x2925   :  { %v8441_v34 = vmul.f32 0.0625, %v8431_v26 }
0x2927   :  { %v14436_v41 = vsub.f32 %v8407_v44, %v8441_v34 }
0x2929   :  { %v8457_v3 = vmul.f32 %v14436_v41, %v14436_v41 }
0x292b   :  { %v8477_v60 = vsel %vm36_vm0, %v8457_v3, 0.0 }
0x292c   :  { %8478 = vadd.xlane.f32.xlu0 %v8477_v60 }
0x2949   :  { %v8461_v63 = vpop.xlane.xlu1 %8460 }
0x294a   :  { %v8483_v49 = vmul.f32 0.0625, %v8461_v63 }
0x294c   :  { %v8491_v33 = vadd.f32 1e-05, %v8483_v49 }
0x294d   :  { %v8464_v9 = vpop.xlane.xlu1 %8463 }
0x294e   :  { %v8484_v10 = vmul.f32 0.0625, %v8464_v9 }
0x2950   :  { %v8492_v24 = vadd.f32 1e-05, %v8484_v10 }
0x2951   :  { %v8467_v59 = vpop.xlane.xlu1 %8466 }
0x2952   :  { %v8485_v7 = vmul.f32 0.0625, %v8467_v59  ;;  %11952 = vrsqrt.f32 %v8492_v24 }
0x2953   :  { %11954 = vrsqrt.f32 %v8491_v33 }
0x2954   :  { %v8493_v35 = vadd.f32 1e-05, %v8485_v7 }
0x2955   :  { %v8470_v5 = vpop.xlane.xlu1 %8469 }
0x2956   :  { %v8486_v12 = vmul.f32 0.0625, %v8470_v5  ;;  %11956 = vrsqrt.f32 %v8493_v35  ;;  %v10010_v35 = vld [vmem:[%s14507_s2 + $0xd2] sm:$0xff] }
0x2958   :  { %v8494_v52 = vadd.f32 1e-05, %v8486_v12 }
0x2959   :  { %v8473_v45 = vpop.xlane.xlu1 %8472 }
0x295a   :  { %11958 = vrsqrt.f32 %v8494_v52 }
0x295c   :  { %v11953_v20 = vpop.eup %11952 }
0x295d   :  { %v8476_v1 = vpop.xlane.xlu1 %8475  ;;  %v11955_v29 = vpop.eup %11954  ;;  %v8508_v14 = vmul.f32 %v11953_v20, %v14397_v54  ;;  %v10391_v54 = vld [vmem:[%s14507_s2 + $0x25] ss:$0 sm:$0xff] }
0x295e   :  { %v8488_v19 = vmul.f32 0.0625, %v8476_v1  ;;  %v8507_v51 = vmul.f32 %v11955_v29, %v14399_v46 }
0x295f   :  { %v8520_v37 = vmul.f32 %v10390_v31, %v8508_v14 }
0x2960   :  { %v8496_v25 = vadd.f32 1e-05, %v8488_v19  ;;  %v11957_v2 = vpop.eup %11956  ;;  %v8519_v34 = vmul.f32 %v10390_v31, %v8507_v51  ;;  %v10425_v19 = vld [vmem:[%s14507_s2 + $0xc1] ss:$0 sm:$0xff] }
0x2961   :  { %v8482_v16 = vpop.xlane.xlu1 %8481  ;;  %v8509_v17 = vmul.f32 %v11957_v2, %v14403_v27  ;;  %v8532_v27 = vadd.f32 %v10391_v54, %v8520_v37 }
0x2962   :  { %v8490_v48 = vmul.f32 0.0625, %v8482_v16  ;;  %v8531_v0 = vadd.f32 %v10391_v54, %v8519_v34 }
0x2963   :  { %v8521_v3 = vmul.f32 %v10390_v31, %v8509_v17 }
0x2964   :  { %v8498_v21 = vadd.f32 1e-05, %v8490_v48  ;;  %v11959_v50 = vpop.eup %11958 }
0x2965   :  { %v8510_v55 = vmul.f32 %v11959_v50, %v14408_v61  ;;  %v8533_v62 = vadd.f32 %v10391_v54, %v8521_v3  ;;  %v8540_v61 = vsel %vm36_vm0, %v8532_v27, 0.0 }
0x2967   :  { %v8522_v56 = vmul.f32 %v10390_v31, %v8510_v55  ;;  %v8542_v40 = vsel %vm36_vm0, %v8533_v62, 0.0 }
0x2969   :  { %v8534_v18 = vadd.f32 %v10391_v54, %v8522_v56 }
0x296a   :  { %v9892_v30 = vpop.permute.xlu0 %9891 }
0x296b   :  { %v9894_v23 = vmul.f32 %v14390_v43, %v9892_v30  ;;  %v8487_v43 = vmul.f32 0.0625, %v8473_v45 }
0x296d   :  { %v9908_v38 = vrot.slane %v9894_v23, 1  ;;  %v8544_v23 = vsel %vm36_vm0, %v8534_v18, 0.0 }
0x296f   :  { %v9916_v44 = vsel %vm8597_vm11, %v14353_v32, %v9908_v38  ;;  %v8495_v32 = vadd.f32 1e-05, %v8487_v43  ;;  %v10011_v43 = vld [vmem:[%s14507_s2 + $0xda] sm:$0xff] }
0x2970   :  { %9918 = vrot.lane.b32.xlu1 %v9916_v44, %s11998_s6  ;;  %v11529_v52 = vpack.c.bf16 %v10011_v43, %v10010_v35 }
0x2971   :  { %11960 = vrsqrt.f32 %v8495_v32 }
0x2972   :  { %11962 = vrsqrt.f32 %v8496_v25  ;;  %11530 = vmatpush3.bf16.msra.mxu0 %v11529_v52 }
0x297b   :  { %v11961_v42 = vpop.eup %11960 }
0x297c   :  { %v11963_v26 = vpop.eup %11962  ;;  %v8511_v60 = vmul.f32 %v11961_v42, %v14414_v4  ;;  %v8539_v4 = vsel %vm36_vm0, %v8531_v0, 0.0 }
0x297d   :  { %v8512_v22 = vmul.f32 %v11963_v26, %v14419_v57  ;;  %v8541_v58 = vadd.f32 %v8540_v61, %v8539_v4 }
0x297e   :  { %v8523_v6 = vmul.f32 %v10390_v31, %v8511_v60 }
0x297f   :  { %v8524_v39 = vmul.f32 %v10390_v31, %v8512_v22  ;;  %v8543_v38 = vadd.f32 %v8542_v40, %v8541_v58 }
0x2980   :  { %v8535_v47 = vadd.f32 %v10391_v54, %v8523_v6 }
0x2981   :  { %v8536_v57 = vadd.f32 %v10391_v54, %v8524_v39  ;;  %v8545_v63 = vadd.f32 %v8544_v23, %v8543_v38 }
0x2983   :  { %v8548_v59 = vsel %vm36_vm0, %v8536_v57, 0.0 }
0x29b9   :  { %v8479_v13 = vpop.xlane.xlu0 %8478 }
0x29ba   :  { %v8489_v28 = vmul.f32 0.0625, %v8479_v13 }
0x29bc   :  { %v8497_v8 = vadd.f32 1e-05, %v8489_v28  ;;  %v10427_v28 = vld [vmem:[%s14507_s2 + $0xe2] ss:$0 sm:$0xff] }
0x29be   :  { %11964 = vrsqrt.f32 %v8497_v8 }
0x29bf   :  { %11966 = vrsqrt.f32 %v8498_v21 }
0x29c8   :  { %v11965_v46 = vpop.eup %11964 }
0x29c9   :  { %v8513_v11 = vmul.f32 %v11965_v46, %v14436_v41  ;;  %v11967_v15 = vpop.eup %11966  ;;  %v8546_v41 = vsel %vm36_vm0, %v8535_v47, 0.0 }
0x29ca   :  { %v8514_v30 = vmul.f32 %v11967_v15, %v14424_v36  ;;  %v8547_v5 = vadd.f32 %v8546_v41, %v8545_v63 }
0x29cb   :  { %v8525_v53 = vmul.f32 %v10390_v31, %v8513_v11 }
0x29cc   :  { %v8526_v9 = vmul.f32 %v10390_v31, %v8514_v30  ;;  %v8549_v10 = vadd.f32 %v8548_v59, %v8547_v5 }
0x29cd   :  { %v8537_v44 = vadd.f32 %v10391_v54, %v8525_v53 }
0x29ce   :  { %v8538_v49 = vadd.f32 %v10391_v54, %v8526_v9 }
0x29cf   :  { %v8550_v45 = vsel %vm36_vm0, %v8537_v44, 0.0 }
0x29d0   :  { %v8551_v7 = vadd.f32 %v8550_v45, %v8549_v10  ;;  %v8552_v24 = vsel %vm36_vm0, %v8538_v49, 0.0 }
0x29d2   :  { %v8553_v36 = vadd.f32 %v8552_v24, %v8551_v7 }
0x29d4   :  { %v8555_v12 = vmul.f32 0.125, %v8553_v36 }
0x29e2   :  { %v9919_v33 = vpop.permute.xlu1 %9918 }
0x29e3   :  { %v9921_v1 = vsel %vm36_vm0, %v8555_v12, %v9919_v33 }
0x29e4   :  { %11495 = vmatmul.mubr.msk.f32.vlgmr.msra.gmra.mrb[232].mxu1 %vm9933_vm14, %v9921_v1 }
0x2ab7   :  { %v10003_v32 = vpop.f32.mrb[232].mxu1 }
0x2ab8   :  { %v10004_v25 = vadd.f32 %v10425_v19, %v10003_v32  ;;  %v11496_v16 = vpop.f32.mrb[233].mxu1 }
0x2aba   :  { %v10007_v13 = vmax.f32 %v10004_v25, 0.0 }
0x2abc   :  { %11506 = vmatmul.mubr.msk.f32.vlgmr.msra.gmra.mrb[232].mxu0 %vm8700_vm12, %v10007_v13 }
0x2b8f   :  { %v10086_v48 = vpop.f32.mrb[232].mxu0 }
0x2b90   :  { %v10087_v8 = vadd.f32 %v10427_v28, %v10086_v48  ;;  %v11507_v20 = vpop.f32.mrb[233].mxu0 }
0x2b92   :  { %v10090_v29 = vmax.f32 %v10087_v8, 0.0 }
0x2b94   :  { %10092 = vst.msk [vmem:[%s14512_s5] sm:$0xff] %vm10091_vm15, %v10090_v29 }

</bundles_post_ra>
